<compile_context>
chip_gen: v6e
topology: v6e:2x2x1
jax: 0.10.0
libtpu: 0.0.40
codegen_flags: <defaults>
</compile_context>

<pallas_src>
import functools
import math

import jax
import jax.numpy as jnp
from jax.experimental import pallas as pl
from jax.experimental.pallas import tpu as pltpu


# ----------------------------------------------------------------------------
# Pallas kernels
# ----------------------------------------------------------------------------
def _matmul_bias_act_kernel(a_ref, w_ref, b_ref, o_ref, *, apply_relu):
    # Single jnp.dot over the full K extent (no reduction grid axis needed for
    # this network: K <= 1728). bf16 operands, f32 accumulation on the MXU.
    out = jnp.dot(a_ref[...], w_ref[...], preferred_element_type=jnp.float32)
    out = out + b_ref[...]
    if apply_relu:
        out = jnp.maximum(out, 0.0)
    o_ref[...] = out.astype(o_ref.dtype)


def _pick_tm(m):
    """Row-tile: prefer >=2 blocks (megacore), cap rows per block at 512."""
    if m <= 8:
        return m
    for tm in (512, 256, 128, 64, 32, 16, 8):
        if m % tm == 0 and m // tm >= 2:
            return tm
    for tm in (512, 256, 128, 64, 32, 16, 8):
        if m % tm == 0:
            return tm
    return m  # full-dim block fallback


def matmul_bias_act(a, w, b, *, apply_relu, out_dtype):
    """out = act(a @ w + b); a: [M,K] bf16, w: [K,N] bf16, b: [1,N] f32.

    Full-K / full-N blocks (full-extent blocks waive the (8,128) rule), grid
    only over M. W and b index_maps are constant so they stay VMEM-resident.
    """
    m, k = a.shape
    _, n = w.shape
    tm = _pick_tm(m)

    return pl.pallas_call(
        functools.partial(_matmul_bias_act_kernel, apply_relu=apply_relu),
        out_shape=jax.ShapeDtypeStruct((m, n), out_dtype),
        grid_spec=pltpu.PrefetchScalarGridSpec(
            num_scalar_prefetch=0,
            grid=(m // tm,),
            in_specs=[
                pl.BlockSpec((tm, k), lambda i: (i, 0)),
                pl.BlockSpec((k, n), lambda i: (0, 0)),
                pl.BlockSpec((1, n), lambda i: (0, 0)),
            ],
            out_specs=pl.BlockSpec((tm, n), lambda i: (i, 0)),
        ),
        compiler_params=pltpu.CompilerParams(
            dimension_semantics=("parallel",)),
    )(a, w, b)


def _pool_fc_kernel(x_ref, w_ref, b_ref, o_ref):
    # Global average pool over the flattened 8x8 spatial axis, then the
    # Linear(512, 100) classifier — fused in one launch, no row padding.
    feats = jnp.mean(x_ref[...].astype(jnp.float32), axis=1)           # [B, C]
    out = jnp.dot(feats, w_ref[...], preferred_element_type=jnp.float32)
    o_ref[...] = out + b_ref[...]


def pool_fc(x_nlc, w, b):
    n = x_nlc.shape[0]
    return pl.pallas_call(
        _pool_fc_kernel,
        out_shape=jax.ShapeDtypeStruct((n, w.shape[1]), jnp.float32),
    )(x_nlc, w, b)


# ----------------------------------------------------------------------------
# Conv = im2col (XLA glue, bf16) + fused Pallas matmul+bias+ReLU
# ----------------------------------------------------------------------------
def _im2col(x_nhwc, ksize, padding, stride):
    kh, kw = ksize
    ph, pw = padding
    n, h, w, c = x_nhwc.shape
    xp = jnp.pad(x_nhwc, ((0, 0), (ph, ph), (pw, pw), (0, 0)))
    hout = (h + 2 * ph - kh) // stride + 1
    wout = (w + 2 * pw - kw) // stride + 1
    cols = []
    for dy in range(kh):
        for dx in range(kw):
            cols.append(xp[:, dy:dy + stride * hout:stride,
                           dx:dx + stride * wout:stride, :])
    patches = jnp.concatenate(cols, axis=-1)      # [N, Hout, Wout, kh*kw*C]
    return patches.reshape(n * hout * wout, kh * kw * c), (n, hout, wout)


def conv_relu(x_nhwc, w_mat, bias, ksize, padding, stride):
    cout = w_mat.shape[1]
    a, (n, hout, wout) = _im2col(x_nhwc, ksize, padding, stride)
    out = matmul_bias_act(a, w_mat, bias, apply_relu=True,
                          out_dtype=jnp.bfloat16)
    return out.reshape(n, hout, wout, cout)


# ----------------------------------------------------------------------------
# Network definition (mirrors convBlock / conv_BN_relu in the PyTorch module)
# ----------------------------------------------------------------------------
def _convblock_cfg(cin, cout):
    cinter = int(math.sqrt(cout / cin)) * cin   # matches PyTorch int() truncation
    return [
        (cin, cinter, (1, 3), (0, 1), 1),
        (cinter, cout, (3, 1), (1, 0), 1),
        (cout, cout, (1, 3), (0, 1), 1),
        (cout, cout, (3, 1), (1, 0), 1),
    ]


def net_config():
    cfg = []
    cfg += _convblock_cfg(3, 96)
    cfg += _convblock_cfg(96, 96)
    cfg += [(96, 96, (3, 3), (1, 1), 2)]
    cfg += _convblock_cfg(96, 192)
    cfg += _convblock_cfg(192, 192)
    cfg += [(192, 192, (3, 3), (1, 1), 2)]
    cfg += [(192, 512, (1, 1), (0, 0), 1)]
    cfg += [(512, 512, (1, 1), (0, 0), 1)]
    cfg += [(512, 512, (1, 1), (0, 0), 1)]
    return cfg


def init_params(key):
    """kaiming_normal(relu) init, zero biases (matches Net.init()).

    Weights are stored already in matmul layout: [K = kh*kw*cin, N = cout],
    cast to bf16 once here so the forward pass does no per-step weight prep.
    """
    params = {"convs": []}
    for (cin, cout, (kh, kw), _pad, _stride) in net_config():
        key, sub = jax.random.split(key)
        std = math.sqrt(2.0 / (cin * kh * kw))
        w = jax.random.normal(sub, (cout, cin, kh, kw), jnp.float32) * std
        # reorder matches im2col patch order (dy, dx, cin)
        w_mat = jnp.transpose(w, (2, 3, 1, 0)).reshape(kh * kw * cin, cout)
        params["convs"].append((w_mat.astype(jnp.bfloat16),
                                jnp.zeros((1, cout), jnp.float32)))
    key, sub = jax.random.split(key)
    fc_w = jax.random.normal(sub, (100, 512), jnp.float32) * math.sqrt(2.0 / 512)
    params["fc_w"] = fc_w.T                       # [512, 100], f32 (tiny)
    params["fc_b"] = jnp.zeros((1, 100), jnp.float32)
    return params


def net_forward(params, x_nchw):
    x = jnp.transpose(x_nchw, (0, 2, 3, 1)).astype(jnp.bfloat16)  # NCHW->NHWC
    for (w_mat, b), (_cin, _cout, k, pad, stride) in zip(params["convs"],
                                                         net_config()):
        x = conv_relu(x, w_mat, b, k, pad, stride)
    n, h, w, c = x.shape                                          # [N, 8, 8, 512]
    logits = pool_fc(x.reshape(n, h * w, c), params["fc_w"], params["fc_b"])
    return logits                                                 # [N, 100] f32


if __name__ == "__main__":
    key = jax.random.PRNGKey(0)
    pkey, xkey = jax.random.split(key)
    params = init_params(pkey)
    # CIFAR-style input: the architecture (two stride-2 convs + AvgPool2d(8))
    # requires 32x32 spatial and 3 input channels; batch kept small.
    x = jax.random.normal(xkey, (2, 3, 32, 32), jnp.float32)
    out = jax.jit(net_forward)(params, x)
    out = jax.block_until_ready(out)
    assert out.shape == (2, 100) and out.dtype == jnp.float32
    print("KERNEL_OK")
</pallas_src>

<mosaic_0001>
module attributes {stable_mosaic.version = 11 : i64} {
  func.func @_matmul_bias_act_kernel(%arg0: i32, %arg1: memref<512x9xbf16, #tpu.memory_space<vmem>>, %arg2: memref<9x15xbf16, #tpu.memory_space<vmem>>, %arg3: memref<1x15xf32, #tpu.memory_space<vmem>>, %arg4: memref<512x15xbf16, #tpu.memory_space<vmem>>) attributes {dimension_semantics = [#tpu.dimension_semantics<parallel>], iteration_bounds = array<i64: 4>, scalar_prefetch = 0 : i64, scratch_operands = 0 : i64, tpu.core_type = #tpu.core_type<tc>, window_params = [{transform_indices = @transform_0, window_bounds = array<i64: 512, 9>}, {pipeline_mode = #tpu.pipeline_mode<synchronous>, transform_indices = @transform_1, window_bounds = array<i64: 9, 15>}, {pipeline_mode = #tpu.pipeline_mode<synchronous>, transform_indices = @transform_2, window_bounds = array<i64: 1, 15>}, {transform_indices = @transform_3, window_bounds = array<i64: 512, 15>}]} {
    %c0 = arith.constant 0 : index
    %c0_0 = arith.constant 0 : index
    %0 = vector.load %arg1[%c0, %c0_0] : memref<512x9xbf16, #tpu.memory_space<vmem>>, vector<512x9xbf16>
    %c0_1 = arith.constant 0 : index
    %c0_2 = arith.constant 0 : index
    %1 = vector.load %arg2[%c0_1, %c0_2] : memref<9x15xbf16, #tpu.memory_space<vmem>>, vector<9x15xbf16>
    %cst = arith.constant dense<0.000000e+00> : vector<512x15xf32>
    %2 = tpu.matmul %0, %1, %cst {dimension_numbers = #tpu.dot_dimension_numbers<[1], [0], [0], [1], [0, 0, 1, 1], [], []>} : vector<512x9xbf16>, vector<9x15xbf16>, vector<512x15xf32> -> vector<512x15xf32>
    %c0_3 = arith.constant 0 : index
    %c0_4 = arith.constant 0 : index
    %3 = vector.load %arg3[%c0_3, %c0_4] : memref<1x15xf32, #tpu.memory_space<vmem>>, vector<1x15xf32>
    %4 = vector.broadcast %3 : vector<1x15xf32> to vector<512x15xf32>
    %5 = arith.addf %2, %4 : vector<512x15xf32>
    %cst_5 = arith.constant 0.000000e+00 : f32
    %6 = vector.broadcast %cst_5 : f32 to vector<512x15xf32>
    %7 = arith.maximumf %5, %6 : vector<512x15xf32>
    %8 = arith.truncf %7 : vector<512x15xf32> to vector<512x15xbf16>
    %c0_6 = arith.constant 0 : index
    %c0_7 = arith.constant 0 : index
    %9 = vector.load %arg4[%c0_6, %c0_7] : memref<512x15xbf16, #tpu.memory_space<vmem>>, vector<512x15xbf16>
    tpu.vector_store %arg4[%c0_6, %c0_7], %8 {strides = array<i32>} : memref<512x15xbf16, #tpu.memory_space<vmem>>, vector<512x15xbf16>,
    return
  }
  func.func @transform_0(%arg0: i32) -> (i32, i32) {
    %c0_i32 = arith.constant 0 : i32
    %c0_i32_0 = arith.constant 0 : i32
    return %arg0, %c0_i32 : i32, i32
  }
  func.func @transform_1(%arg0: i32) -> (i32, i32) {
    %c0_i32 = arith.constant 0 : i32
    %c0_i32_0 = arith.constant 0 : i32
    %c0_i32_1 = arith.constant 0 : i32
    return %c0_i32, %c0_i32_0 : i32, i32
  }
  func.func @transform_2(%arg0: i32) -> (i32, i32) {
    %c0_i32 = arith.constant 0 : i32
    %c0_i32_0 = arith.constant 0 : i32
    %c0_i32_1 = arith.constant 0 : i32
    return %c0_i32, %c0_i32_0 : i32, i32
  }
  func.func @transform_3(%arg0: i32) -> (i32, i32) {
    %c0_i32 = arith.constant 0 : i32
    %c0_i32_0 = arith.constant 0 : i32
    return %arg0, %c0_i32 : i32, i32
  }
}

module attributes {stable_mosaic.version = 11 : i64} {
  func.func @_matmul_bias_act_kernel(%arg0: i32, %arg1: memref<512x45xbf16, #tpu.memory_space<vmem>>, %arg2: memref<45x96xbf16, #tpu.memory_space<vmem>>, %arg3: memref<1x96xf32, #tpu.memory_space<vmem>>, %arg4: memref<512x96xbf16, #tpu.memory_space<vmem>>) attributes {dimension_semantics = [#tpu.dimension_semantics<parallel>], iteration_bounds = array<i64: 4>, scalar_prefetch = 0 : i64, scratch_operands = 0 : i64, tpu.core_type = #tpu.core_type<tc>, window_params = [{transform_indices = @transform_0, window_bounds = array<i64: 512, 45>}, {pipeline_mode = #tpu.pipeline_mode<synchronous>, transform_indices = @transform_1, window_bounds = array<i64: 45, 96>}, {pipeline_mode = #tpu.pipeline_mode<synchronous>, transform_indices = @transform_2, window_bounds = array<i64: 1, 96>}, {transform_indices = @transform_3, window_bounds = array<i64: 512, 96>}]} {
    %c0 = arith.constant 0 : index
    %c0_0 = arith.constant 0 : index
    %0 = vector.load %arg1[%c0, %c0_0] : memref<512x45xbf16, #tpu.memory_space<vmem>>, vector<512x45xbf16>
    %c0_1 = arith.constant 0 : index
    %c0_2 = arith.constant 0 : index
    %1 = vector.load %arg2[%c0_1, %c0_2] : memref<45x96xbf16, #tpu.memory_space<vmem>>, vector<45x96xbf16>
    %cst = arith.constant dense<0.000000e+00> : vector<512x96xf32>
    %2 = tpu.matmul %0, %1, %cst {dimension_numbers = #tpu.dot_dimension_numbers<[1], [0], [0], [1], [0, 0, 1, 1], [], []>} : vector<512x45xbf16>, vector<45x96xbf16>, vector<512x96xf32> -> vector<512x96xf32>
    %c0_3 = arith.constant 0 : index
    %c0_4 = arith.constant 0 : index
    %3 = vector.load %arg3[%c0_3, %c0_4] : memref<1x96xf32, #tpu.memory_space<vmem>>, vector<1x96xf32>
    %4 = vector.broadcast %3 : vector<1x96xf32> to vector<512x96xf32>
    %5 = arith.addf %2, %4 : vector<512x96xf32>
    %cst_5 = arith.constant 0.000000e+00 : f32
    %6 = vector.broadcast %cst_5 : f32 to vector<512x96xf32>
    %7 = arith.maximumf %5, %6 : vector<512x96xf32>
    %8 = arith.truncf %7 : vector<512x96xf32> to vector<512x96xbf16>
    %c0_6 = arith.constant 0 : index
    %c0_7 = arith.constant 0 : index
    %9 = vector.load %arg4[%c0_6, %c0_7] : memref<512x96xbf16, #tpu.memory_space<vmem>>, vector<512x96xbf16>
    tpu.vector_store %arg4[%c0_6, %c0_7], %8 {strides = array<i32>} : memref<512x96xbf16, #tpu.memory_space<vmem>>, vector<512x96xbf16>,
    return
  }
  func.func @transform_0(%arg0: i32) -> (i32, i32) {
    %c0_i32 = arith.constant 0 : i32
    %c0_i32_0 = arith.constant 0 : i32
    return %arg0, %c0_i32 : i32, i32
  }
  func.func @transform_1(%arg0: i32) -> (i32, i32) {
    %c0_i32 = arith.constant 0 : i32
    %c0_i32_0 = arith.constant 0 : i32
    %c0_i32_1 = arith.constant 0 : i32
    return %c0_i32, %c0_i32_0 : i32, i32
  }
  func.func @transform_2(%arg0: i32) -> (i32, i32) {
    %c0_i32 = arith.constant 0 : i32
    %c0_i32_0 = arith.constant 0 : i32
    %c0_i32_1 = arith.constant 0 : i32
    return %c0_i32, %c0_i32_0 : i32, i32
  }
  func.func @transform_3(%arg0: i32) -> (i32, i32) {
    %c0_i32 = arith.constant 0 : i32
    %c0_i32_0 = arith.constant 0 : i32
    return %arg0, %c0_i32 : i32, i32
  }
}

module attributes {stable_mosaic.version = 11 : i64} {
  func.func @_matmul_bias_act_kernel(%arg0: i32, %arg1: memref<512x288xbf16, #tpu.memory_space<vmem>>, %arg2: memref<288x96xbf16, #tpu.memory_space<vmem>>, %arg3: memref<1x96xf32, #tpu.memory_space<vmem>>, %arg4: memref<512x96xbf16, #tpu.memory_space<vmem>>) attributes {dimension_semantics = [#tpu.dimension_semantics<parallel>], iteration_bounds = array<i64: 4>, scalar_prefetch = 0 : i64, scratch_operands = 0 : i64, tpu.core_type = #tpu.core_type<tc>, window_params = [{transform_indices = @transform_0, window_bounds = array<i64: 512, 288>}, {pipeline_mode = #tpu.pipeline_mode<synchronous>, transform_indices = @transform_1, window_bounds = array<i64: 288, 96>}, {pipeline_mode = #tpu.pipeline_mode<synchronous>, transform_indices = @transform_2, window_bounds = array<i64: 1, 96>}, {transform_indices = @transform_3, window_bounds = array<i64: 512, 96>}]} {
    %c0 = arith.constant 0 : index
    %c0_0 = arith.constant 0 : index
    %0 = vector.load %arg1[%c0, %c0_0] : memref<512x288xbf16, #tpu.memory_space<vmem>>, vector<512x288xbf16>
    %c0_1 = arith.constant 0 : index
    %c0_2 = arith.constant 0 : index
    %1 = vector.load %arg2[%c0_1, %c0_2] : memref<288x96xbf16, #tpu.memory_space<vmem>>, vector<288x96xbf16>
    %cst = arith.constant dense<0.000000e+00> : vector<512x96xf32>
    %2 = tpu.matmul %0, %1, %cst {dimension_numbers = #tpu.dot_dimension_numbers<[1], [0], [0], [1], [0, 0, 1, 1], [], []>} : vector<512x288xbf16>, vector<288x96xbf16>, vector<512x96xf32> -> vector<512x96xf32>
    %c0_3 = arith.constant 0 : index
    %c0_4 = arith.constant 0 : index
    %3 = vector.load %arg3[%c0_3, %c0_4] : memref<1x96xf32, #tpu.memory_space<vmem>>, vector<1x96xf32>
    %4 = vector.broadcast %3 : vector<1x96xf32> to vector<512x96xf32>
    %5 = arith.addf %2, %4 : vector<512x96xf32>
    %cst_5 = arith.constant 0.000000e+00 : f32
    %6 = vector.broadcast %cst_5 : f32 to vector<512x96xf32>
    %7 = arith.maximumf %5, %6 : vector<512x96xf32>
    %8 = arith.truncf %7 : vector<512x96xf32> to vector<512x96xbf16>
    %c0_6 = arith.constant 0 : index
    %c0_7 = arith.constant 0 : index
    %9 = vector.load %arg4[%c0_6, %c0_7] : memref<512x96xbf16, #tpu.memory_space<vmem>>, vector<512x96xbf16>
    tpu.vector_store %arg4[%c0_6, %c0_7], %8 {strides = array<i32>} : memref<512x96xbf16, #tpu.memory_space<vmem>>, vector<512x96xbf16>,
    return
  }
  func.func @transform_0(%arg0: i32) -> (i32, i32) {
    %c0_i32 = arith.constant 0 : i32
    %c0_i32_0 = arith.constant 0 : i32
    return %arg0, %c0_i32 : i32, i32
  }
  func.func @transform_1(%arg0: i32) -> (i32, i32) {
    %c0_i32 = arith.constant 0 : i32
    %c0_i32_0 = arith.constant 0 : i32
    %c0_i32_1 = arith.constant 0 : i32
    return %c0_i32, %c0_i32_0 : i32, i32
  }
  func.func @transform_2(%arg0: i32) -> (i32, i32) {
    %c0_i32 = arith.constant 0 : i32
    %c0_i32_0 = arith.constant 0 : i32
    %c0_i32_1 = arith.constant 0 : i32
    return %c0_i32, %c0_i32_0 : i32, i32
  }
  func.func @transform_3(%arg0: i32) -> (i32, i32) {
    %c0_i32 = arith.constant 0 : i32
    %c0_i32_0 = arith.constant 0 : i32
    return %arg0, %c0_i32 : i32, i32
  }
}

module attributes {stable_mosaic.version = 11 : i64} {
  func.func @_matmul_bias_act_kernel(%arg0: i32, %arg1: memref<256x864xbf16, #tpu.memory_space<vmem>>, %arg2: memref<864x96xbf16, #tpu.memory_space<vmem>>, %arg3: memref<1x96xf32, #tpu.memory_space<vmem>>, %arg4: memref<256x96xbf16, #tpu.memory_space<vmem>>) attributes {dimension_semantics = [#tpu.dimension_semantics<parallel>], iteration_bounds = array<i64: 2>, scalar_prefetch = 0 : i64, scratch_operands = 0 : i64, tpu.core_type = #tpu.core_type<tc>, window_params = [{transform_indices = @transform_0, window_bounds = array<i64: 256, 864>}, {pipeline_mode = #tpu.pipeline_mode<synchronous>, transform_indices = @transform_1, window_bounds = array<i64: 864, 96>}, {pipeline_mode = #tpu.pipeline_mode<synchronous>, transform_indices = @transform_2, window_bounds = array<i64: 1, 96>}, {transform_indices = @transform_3, window_bounds = array<i64: 256, 96>}]} {
    %c0 = arith.constant 0 : index
    %c0_0 = arith.constant 0 : index
    %0 = vector.load %arg1[%c0, %c0_0] : memref<256x864xbf16, #tpu.memory_space<vmem>>, vector<256x864xbf16>
    %c0_1 = arith.constant 0 : index
    %c0_2 = arith.constant 0 : index
    %1 = vector.load %arg2[%c0_1, %c0_2] : memref<864x96xbf16, #tpu.memory_space<vmem>>, vector<864x96xbf16>
    %cst = arith.constant dense<0.000000e+00> : vector<256x96xf32>
    %2 = tpu.matmul %0, %1, %cst {dimension_numbers = #tpu.dot_dimension_numbers<[1], [0], [0], [1], [0, 0, 1, 1], [], []>} : vector<256x864xbf16>, vector<864x96xbf16>, vector<256x96xf32> -> vector<256x96xf32>
    %c0_3 = arith.constant 0 : index
    %c0_4 = arith.constant 0 : index
    %3 = vector.load %arg3[%c0_3, %c0_4] : memref<1x96xf32, #tpu.memory_space<vmem>>, vector<1x96xf32>
    %4 = vector.broadcast %3 : vector<1x96xf32> to vector<256x96xf32>
    %5 = arith.addf %2, %4 : vector<256x96xf32>
    %cst_5 = arith.constant 0.000000e+00 : f32
    %6 = vector.broadcast %cst_5 : f32 to vector<256x96xf32>
    %7 = arith.maximumf %5, %6 : vector<256x96xf32>
    %8 = arith.truncf %7 : vector<256x96xf32> to vector<256x96xbf16>
    %c0_6 = arith.constant 0 : index
    %c0_7 = arith.constant 0 : index
    %9 = vector.load %arg4[%c0_6, %c0_7] : memref<256x96xbf16, #tpu.memory_space<vmem>>, vector<256x96xbf16>
    tpu.vector_store %arg4[%c0_6, %c0_7], %8 {strides = array<i32>} : memref<256x96xbf16, #tpu.memory_space<vmem>>, vector<256x96xbf16>,
    return
  }
  func.func @transform_0(%arg0: i32) -> (i32, i32) {
    %c0_i32 = arith.constant 0 : i32
    %c0_i32_0 = arith.constant 0 : i32
    return %arg0, %c0_i32 : i32, i32
  }
  func.func @transform_1(%arg0: i32) -> (i32, i32) {
    %c0_i32 = arith.constant 0 : i32
    %c0_i32_0 = arith.constant 0 : i32
    %c0_i32_1 = arith.constant 0 : i32
    return %c0_i32, %c0_i32_0 : i32, i32
  }
  func.func @transform_2(%arg0: i32) -> (i32, i32) {
    %c0_i32 = arith.constant 0 : i32
    %c0_i32_0 = arith.constant 0 : i32
    %c0_i32_1 = arith.constant 0 : i32
    return %c0_i32, %c0_i32_0 : i32, i32
  }
  func.func @transform_3(%arg0: i32) -> (i32, i32) {
    %c0_i32 = arith.constant 0 : i32
    %c0_i32_0 = arith.constant 0 : i32
    return %arg0, %c0_i32 : i32, i32
  }
}

module attributes {stable_mosaic.version = 11 : i64} {
  func.func @_matmul_bias_act_kernel(%arg0: i32, %arg1: memref<256x288xbf16, #tpu.memory_space<vmem>>, %arg2: memref<288x96xbf16, #tpu.memory_space<vmem>>, %arg3: memref<1x96xf32, #tpu.memory_space<vmem>>, %arg4: memref<256x96xbf16, #tpu.memory_space<vmem>>) attributes {dimension_semantics = [#tpu.dimension_semantics<parallel>], iteration_bounds = array<i64: 2>, scalar_prefetch = 0 : i64, scratch_operands = 0 : i64, tpu.core_type = #tpu.core_type<tc>, window_params = [{transform_indices = @transform_0, window_bounds = array<i64: 256, 288>}, {pipeline_mode = #tpu.pipeline_mode<synchronous>, transform_indices = @transform_1, window_bounds = array<i64: 288, 96>}, {pipeline_mode = #tpu.pipeline_mode<synchronous>, transform_indices = @transform_2, window_bounds = array<i64: 1, 96>}, {transform_indices = @transform_3, window_bounds = array<i64: 256, 96>}]} {
    %c0 = arith.constant 0 : index
    %c0_0 = arith.constant 0 : index
    %0 = vector.load %arg1[%c0, %c0_0] : memref<256x288xbf16, #tpu.memory_space<vmem>>, vector<256x288xbf16>
    %c0_1 = arith.constant 0 : index
    %c0_2 = arith.constant 0 : index
    %1 = vector.load %arg2[%c0_1, %c0_2] : memref<288x96xbf16, #tpu.memory_space<vmem>>, vector<288x96xbf16>
    %cst = arith.constant dense<0.000000e+00> : vector<256x96xf32>
    %2 = tpu.matmul %0, %1, %cst {dimension_numbers = #tpu.dot_dimension_numbers<[1], [0], [0], [1], [0, 0, 1, 1], [], []>} : vector<256x288xbf16>, vector<288x96xbf16>, vector<256x96xf32> -> vector<256x96xf32>
    %c0_3 = arith.constant 0 : index
    %c0_4 = arith.constant 0 : index
    %3 = vector.load %arg3[%c0_3, %c0_4] : memref<1x96xf32, #tpu.memory_space<vmem>>, vector<1x96xf32>
    %4 = vector.broadcast %3 : vector<1x96xf32> to vector<256x96xf32>
    %5 = arith.addf %2, %4 : vector<256x96xf32>
    %cst_5 = arith.constant 0.000000e+00 : f32
    %6 = vector.broadcast %cst_5 : f32 to vector<256x96xf32>
    %7 = arith.maximumf %5, %6 : vector<256x96xf32>
    %8 = arith.truncf %7 : vector<256x96xf32> to vector<256x96xbf16>
    %c0_6 = arith.constant 0 : index
    %c0_7 = arith.constant 0 : index
    %9 = vector.load %arg4[%c0_6, %c0_7] : memref<256x96xbf16, #tpu.memory_space<vmem>>, vector<256x96xbf16>
    tpu.vector_store %arg4[%c0_6, %c0_7], %8 {strides = array<i32>} : memref<256x96xbf16, #tpu.memory_space<vmem>>, vector<256x96xbf16>,
    return
  }
  func.func @transform_0(%arg0: i32) -> (i32, i32) {
    %c0_i32 = arith.constant 0 : i32
    %c0_i32_0 = arith.constant 0 : i32
    return %arg0, %c0_i32 : i32, i32
  }
  func.func @transform_1(%arg0: i32) -> (i32, i32) {
    %c0_i32 = arith.constant 0 : i32
    %c0_i32_0 = arith.constant 0 : i32
    %c0_i32_1 = arith.constant 0 : i32
    return %c0_i32, %c0_i32_0 : i32, i32
  }
  func.func @transform_2(%arg0: i32) -> (i32, i32) {
    %c0_i32 = arith.constant 0 : i32
    %c0_i32_0 = arith.constant 0 : i32
    %c0_i32_1 = arith.constant 0 : i32
    return %c0_i32, %c0_i32_0 : i32, i32
  }
  func.func @transform_3(%arg0: i32) -> (i32, i32) {
    %c0_i32 = arith.constant 0 : i32
    %c0_i32_0 = arith.constant 0 : i32
    return %arg0, %c0_i32 : i32, i32
  }
}

module attributes {stable_mosaic.version = 11 : i64} {
  func.func @_matmul_bias_act_kernel(%arg0: i32, %arg1: memref<256x288xbf16, #tpu.memory_space<vmem>>, %arg2: memref<288x192xbf16, #tpu.memory_space<vmem>>, %arg3: memref<1x192xf32, #tpu.memory_space<vmem>>, %arg4: memref<256x192xbf16, #tpu.memory_space<vmem>>) attributes {dimension_semantics = [#tpu.dimension_semantics<parallel>], iteration_bounds = array<i64: 2>, scalar_prefetch = 0 : i64, scratch_operands = 0 : i64, tpu.core_type = #tpu.core_type<tc>, window_params = [{transform_indices = @transform_0, window_bounds = array<i64: 256, 288>}, {pipeline_mode = #tpu.pipeline_mode<synchronous>, transform_indices = @transform_1, window_bounds = array<i64: 288, 192>}, {pipeline_mode = #tpu.pipeline_mode<synchronous>, transform_indices = @transform_2, window_bounds = array<i64: 1, 192>}, {transform_indices = @transform_3, window_bounds = array<i64: 256, 192>}]} {
    %c0 = arith.constant 0 : index
    %c0_0 = arith.constant 0 : index
    %0 = vector.load %arg1[%c0, %c0_0] : memref<256x288xbf16, #tpu.memory_space<vmem>>, vector<256x288xbf16>
    %c0_1 = arith.constant 0 : index
    %c0_2 = arith.constant 0 : index
    %1 = vector.load %arg2[%c0_1, %c0_2] : memref<288x192xbf16, #tpu.memory_space<vmem>>, vector<288x192xbf16>
    %cst = arith.constant dense<0.000000e+00> : vector<256x192xf32>
    %2 = tpu.matmul %0, %1, %cst {dimension_numbers = #tpu.dot_dimension_numbers<[1], [0], [0], [1], [0, 0, 1, 1], [], []>} : vector<256x288xbf16>, vector<288x192xbf16>, vector<256x192xf32> -> vector<256x192xf32>
    %c0_3 = arith.constant 0 : index
    %c0_4 = arith.constant 0 : index
    %3 = vector.load %arg3[%c0_3, %c0_4] : memref<1x192xf32, #tpu.memory_space<vmem>>, vector<1x192xf32>
    %4 = vector.broadcast %3 : vector<1x192xf32> to vector<256x192xf32>
    %5 = arith.addf %2, %4 : vector<256x192xf32>
    %cst_5 = arith.constant 0.000000e+00 : f32
    %6 = vector.broadcast %cst_5 : f32 to vector<256x192xf32>
    %7 = arith.maximumf %5, %6 : vector<256x192xf32>
    %8 = arith.truncf %7 : vector<256x192xf32> to vector<256x192xbf16>
    %c0_6 = arith.constant 0 : index
    %c0_7 = arith.constant 0 : index
    %9 = vector.load %arg4[%c0_6, %c0_7] : memref<256x192xbf16, #tpu.memory_space<vmem>>, vector<256x192xbf16>
    tpu.vector_store %arg4[%c0_6, %c0_7], %8 {strides = array<i32>} : memref<256x192xbf16, #tpu.memory_space<vmem>>, vector<256x192xbf16>,
    return
  }
  func.func @transform_0(%arg0: i32) -> (i32, i32) {
    %c0_i32 = arith.constant 0 : i32
    %c0_i32_0 = arith.constant 0 : i32
    return %arg0, %c0_i32 : i32, i32
  }
  func.func @transform_1(%arg0: i32) -> (i32, i32) {
    %c0_i32 = arith.constant 0 : i32
    %c0_i32_0 = arith.constant 0 : i32
    %c0_i32_1 = arith.constant 0 : i32
    return %c0_i32, %c0_i32_0 : i32, i32
  }
  func.func @transform_2(%arg0: i32) -> (i32, i32) {
    %c0_i32 = arith.constant 0 : i32
    %c0_i32_0 = arith.constant 0 : i32
    %c0_i32_1 = arith.constant 0 : i32
    return %c0_i32, %c0_i32_0 : i32, i32
  }
  func.func @transform_3(%arg0: i32) -> (i32, i32) {
    %c0_i32 = arith.constant 0 : i32
    %c0_i32_0 = arith.constant 0 : i32
    return %arg0, %c0_i32 : i32, i32
  }
}

module attributes {stable_mosaic.version = 11 : i64} {
  func.func @_matmul_bias_act_kernel(%arg0: i32, %arg1: memref<256x576xbf16, #tpu.memory_space<vmem>>, %arg2: memref<576x192xbf16, #tpu.memory_space<vmem>>, %arg3: memref<1x192xf32, #tpu.memory_space<vmem>>, %arg4: memref<256x192xbf16, #tpu.memory_space<vmem>>) attributes {dimension_semantics = [#tpu.dimension_semantics<parallel>], iteration_bounds = array<i64: 2>, scalar_prefetch = 0 : i64, scratch_operands = 0 : i64, tpu.core_type = #tpu.core_type<tc>, window_params = [{transform_indices = @transform_0, window_bounds = array<i64: 256, 576>}, {pipeline_mode = #tpu.pipeline_mode<synchronous>, transform_indices = @transform_1, window_bounds = array<i64: 576, 192>}, {pipeline_mode = #tpu.pipeline_mode<synchronous>, transform_indices = @transform_2, window_bounds = array<i64: 1, 192>}, {transform_indices = @transform_3, window_bounds = array<i64: 256, 192>}]} {
    %c0 = arith.constant 0 : index
    %c0_0 = arith.constant 0 : index
    %0 = vector.load %arg1[%c0, %c0_0] : memref<256x576xbf16, #tpu.memory_space<vmem>>, vector<256x576xbf16>
    %c0_1 = arith.constant 0 : index
    %c0_2 = arith.constant 0 : index
    %1 = vector.load %arg2[%c0_1, %c0_2] : memref<576x192xbf16, #tpu.memory_space<vmem>>, vector<576x192xbf16>
    %cst = arith.constant dense<0.000000e+00> : vector<256x192xf32>
    %2 = tpu.matmul %0, %1, %cst {dimension_numbers = #tpu.dot_dimension_numbers<[1], [0], [0], [1], [0, 0, 1, 1], [], []>} : vector<256x576xbf16>, vector<576x192xbf16>, vector<256x192xf32> -> vector<256x192xf32>
    %c0_3 = arith.constant 0 : index
    %c0_4 = arith.constant 0 : index
    %3 = vector.load %arg3[%c0_3, %c0_4] : memref<1x192xf32, #tpu.memory_space<vmem>>, vector<1x192xf32>
    %4 = vector.broadcast %3 : vector<1x192xf32> to vector<256x192xf32>
    %5 = arith.addf %2, %4 : vector<256x192xf32>
    %cst_5 = arith.constant 0.000000e+00 : f32
    %6 = vector.broadcast %cst_5 : f32 to vector<256x192xf32>
    %7 = arith.maximumf %5, %6 : vector<256x192xf32>
    %8 = arith.truncf %7 : vector<256x192xf32> to vector<256x192xbf16>
    %c0_6 = arith.constant 0 : index
    %c0_7 = arith.constant 0 : index
    %9 = vector.load %arg4[%c0_6, %c0_7] : memref<256x192xbf16, #tpu.memory_space<vmem>>, vector<256x192xbf16>
    tpu.vector_store %arg4[%c0_6, %c0_7], %8 {strides = array<i32>} : memref<256x192xbf16, #tpu.memory_space<vmem>>, vector<256x192xbf16>,
    return
  }
  func.func @transform_0(%arg0: i32) -> (i32, i32) {
    %c0_i32 = arith.constant 0 : i32
    %c0_i32_0 = arith.constant 0 : i32
    return %arg0, %c0_i32 : i32, i32
  }
  func.func @transform_1(%arg0: i32) -> (i32, i32) {
    %c0_i32 = arith.constant 0 : i32
    %c0_i32_0 = arith.constant 0 : i32
    %c0_i32_1 = arith.constant 0 : i32
    return %c0_i32, %c0_i32_0 : i32, i32
  }
  func.func @transform_2(%arg0: i32) -> (i32, i32) {
    %c0_i32 = arith.constant 0 : i32
    %c0_i32_0 = arith.constant 0 : i32
    %c0_i32_1 = arith.constant 0 : i32
    return %c0_i32, %c0_i32_0 : i32, i32
  }
  func.func @transform_3(%arg0: i32) -> (i32, i32) {
    %c0_i32 = arith.constant 0 : i32
    %c0_i32_0 = arith.constant 0 : i32
    return %arg0, %c0_i32 : i32, i32
  }
}

module attributes {stable_mosaic.version = 11 : i64} {
  func.func @_matmul_bias_act_kernel(%arg0: i32, %arg1: memref<64x1728xbf16, #tpu.memory_space<vmem>>, %arg2: memref<1728x192xbf16, #tpu.memory_space<vmem>>, %arg3: memref<1x192xf32, #tpu.memory_space<vmem>>, %arg4: memref<64x192xbf16, #tpu.memory_space<vmem>>) attributes {dimension_semantics = [#tpu.dimension_semantics<parallel>], iteration_bounds = array<i64: 2>, scalar_prefetch = 0 : i64, scratch_operands = 0 : i64, tpu.core_type = #tpu.core_type<tc>, window_params = [{transform_indices = @transform_0, window_bounds = array<i64: 64, 1728>}, {pipeline_mode = #tpu.pipeline_mode<synchronous>, transform_indices = @transform_1, window_bounds = array<i64: 1728, 192>}, {pipeline_mode = #tpu.pipeline_mode<synchronous>, transform_indices = @transform_2, window_bounds = array<i64: 1, 192>}, {transform_indices = @transform_3, window_bounds = array<i64: 64, 192>}]} {
    %c0 = arith.constant 0 : index
    %c0_0 = arith.constant 0 : index
    %0 = vector.load %arg1[%c0, %c0_0] : memref<64x1728xbf16, #tpu.memory_space<vmem>>, vector<64x1728xbf16>
    %c0_1 = arith.constant 0 : index
    %c0_2 = arith.constant 0 : index
    %1 = vector.load %arg2[%c0_1, %c0_2] : memref<1728x192xbf16, #tpu.memory_space<vmem>>, vector<1728x192xbf16>
    %cst = arith.constant dense<0.000000e+00> : vector<64x192xf32>
    %2 = tpu.matmul %0, %1, %cst {dimension_numbers = #tpu.dot_dimension_numbers<[1], [0], [0], [1], [0, 0, 1, 1], [], []>} : vector<64x1728xbf16>, vector<1728x192xbf16>, vector<64x192xf32> -> vector<64x192xf32>
    %c0_3 = arith.constant 0 : index
    %c0_4 = arith.constant 0 : index
    %3 = vector.load %arg3[%c0_3, %c0_4] : memref<1x192xf32, #tpu.memory_space<vmem>>, vector<1x192xf32>
    %4 = vector.broadcast %3 : vector<1x192xf32> to vector<64x192xf32>
    %5 = arith.addf %2, %4 : vector<64x192xf32>
    %cst_5 = arith.constant 0.000000e+00 : f32
    %6 = vector.broadcast %cst_5 : f32 to vector<64x192xf32>
    %7 = arith.maximumf %5, %6 : vector<64x192xf32>
    %8 = arith.truncf %7 : vector<64x192xf32> to vector<64x192xbf16>
    %c0_6 = arith.constant 0 : index
    %c0_7 = arith.constant 0 : index
    %9 = vector.load %arg4[%c0_6, %c0_7] : memref<64x192xbf16, #tpu.memory_space<vmem>>, vector<64x192xbf16>
    tpu.vector_store %arg4[%c0_6, %c0_7], %8 {strides = array<i32>} : memref<64x192xbf16, #tpu.memory_space<vmem>>, vector<64x192xbf16>,
    return
  }
  func.func @transform_0(%arg0: i32) -> (i32, i32) {
    %c0_i32 = arith.constant 0 : i32
    %c0_i32_0 = arith.constant 0 : i32
    return %arg0, %c0_i32 : i32, i32
  }
  func.func @transform_1(%arg0: i32) -> (i32, i32) {
    %c0_i32 = arith.constant 0 : i32
    %c0_i32_0 = arith.constant 0 : i32
    %c0_i32_1 = arith.constant 0 : i32
    return %c0_i32, %c0_i32_0 : i32, i32
  }
  func.func @transform_2(%arg0: i32) -> (i32, i32) {
    %c0_i32 = arith.constant 0 : i32
    %c0_i32_0 = arith.constant 0 : i32
    %c0_i32_1 = arith.constant 0 : i32
    return %c0_i32, %c0_i32_0 : i32, i32
  }
  func.func @transform_3(%arg0: i32) -> (i32, i32) {
    %c0_i32 = arith.constant 0 : i32
    %c0_i32_0 = arith.constant 0 : i32
    return %arg0, %c0_i32 : i32, i32
  }
}

module attributes {stable_mosaic.version = 11 : i64} {
  func.func @_matmul_bias_act_kernel(%arg0: i32, %arg1: memref<64x192xbf16, #tpu.memory_space<vmem>>, %arg2: memref<192x512xbf16, #tpu.memory_space<vmem>>, %arg3: memref<1x512xf32, #tpu.memory_space<vmem>>, %arg4: memref<64x512xbf16, #tpu.memory_space<vmem>>) attributes {dimension_semantics = [#tpu.dimension_semantics<parallel>], iteration_bounds = array<i64: 2>, scalar_prefetch = 0 : i64, scratch_operands = 0 : i64, tpu.core_type = #tpu.core_type<tc>, window_params = [{transform_indices = @transform_0, window_bounds = array<i64: 64, 192>}, {pipeline_mode = #tpu.pipeline_mode<synchronous>, transform_indices = @transform_1, window_bounds = array<i64: 192, 512>}, {pipeline_mode = #tpu.pipeline_mode<synchronous>, transform_indices = @transform_2, window_bounds = array<i64: 1, 512>}, {transform_indices = @transform_3, window_bounds = array<i64: 64, 512>}]} {
    %c0 = arith.constant 0 : index
    %c0_0 = arith.constant 0 : index
    %0 = vector.load %arg1[%c0, %c0_0] : memref<64x192xbf16, #tpu.memory_space<vmem>>, vector<64x192xbf16>
    %c0_1 = arith.constant 0 : index
    %c0_2 = arith.constant 0 : index
    %1 = vector.load %arg2[%c0_1, %c0_2] : memref<192x512xbf16, #tpu.memory_space<vmem>>, vector<192x512xbf16>
    %cst = arith.constant dense<0.000000e+00> : vector<64x512xf32>
    %2 = tpu.matmul %0, %1, %cst {dimension_numbers = #tpu.dot_dimension_numbers<[1], [0], [0], [1], [0, 0, 1, 1], [], []>} : vector<64x192xbf16>, vector<192x512xbf16>, vector<64x512xf32> -> vector<64x512xf32>
    %c0_3 = arith.constant 0 : index
    %c0_4 = arith.constant 0 : index
    %3 = vector.load %arg3[%c0_3, %c0_4] : memref<1x512xf32, #tpu.memory_space<vmem>>, vector<1x512xf32>
    %4 = vector.broadcast %3 : vector<1x512xf32> to vector<64x512xf32>
    %5 = arith.addf %2, %4 : vector<64x512xf32>
    %cst_5 = arith.constant 0.000000e+00 : f32
    %6 = vector.broadcast %cst_5 : f32 to vector<64x512xf32>
    %7 = arith.maximumf %5, %6 : vector<64x512xf32>
    %8 = arith.truncf %7 : vector<64x512xf32> to vector<64x512xbf16>
    %c0_6 = arith.constant 0 : index
    %c0_7 = arith.constant 0 : index
    %9 = vector.load %arg4[%c0_6, %c0_7] : memref<64x512xbf16, #tpu.memory_space<vmem>>, vector<64x512xbf16>
    tpu.vector_store %arg4[%c0_6, %c0_7], %8 {strides = array<i32>} : memref<64x512xbf16, #tpu.memory_space<vmem>>, vector<64x512xbf16>,
    return
  }
  func.func @transform_0(%arg0: i32) -> (i32, i32) {
    %c0_i32 = arith.constant 0 : i32
    %c0_i32_0 = arith.constant 0 : i32
    return %arg0, %c0_i32 : i32, i32
  }
  func.func @transform_1(%arg0: i32) -> (i32, i32) {
    %c0_i32 = arith.constant 0 : i32
    %c0_i32_0 = arith.constant 0 : i32
    %c0_i32_1 = arith.constant 0 : i32
    return %c0_i32, %c0_i32_0 : i32, i32
  }
  func.func @transform_2(%arg0: i32) -> (i32, i32) {
    %c0_i32 = arith.constant 0 : i32
    %c0_i32_0 = arith.constant 0 : i32
    %c0_i32_1 = arith.constant 0 : i32
    return %c0_i32, %c0_i32_0 : i32, i32
  }
  func.func @transform_3(%arg0: i32) -> (i32, i32) {
    %c0_i32 = arith.constant 0 : i32
    %c0_i32_0 = arith.constant 0 : i32
    return %arg0, %c0_i32 : i32, i32
  }
}

module attributes {stable_mosaic.version = 11 : i64} {
  func.func @_matmul_bias_act_kernel(%arg0: i32, %arg1: memref<64x512xbf16, #tpu.memory_space<vmem>>, %arg2: memref<512x512xbf16, #tpu.memory_space<vmem>>, %arg3: memref<1x512xf32, #tpu.memory_space<vmem>>, %arg4: memref<64x512xbf16, #tpu.memory_space<vmem>>) attributes {dimension_semantics = [#tpu.dimension_semantics<parallel>], iteration_bounds = array<i64: 2>, scalar_prefetch = 0 : i64, scratch_operands = 0 : i64, tpu.core_type = #tpu.core_type<tc>, window_params = [{transform_indices = @transform_0, window_bounds = array<i64: 64, 512>}, {pipeline_mode = #tpu.pipeline_mode<synchronous>, transform_indices = @transform_1, window_bounds = array<i64: 512, 512>}, {pipeline_mode = #tpu.pipeline_mode<synchronous>, transform_indices = @transform_2, window_bounds = array<i64: 1, 512>}, {transform_indices = @transform_3, window_bounds = array<i64: 64, 512>}]} {
    %c0 = arith.constant 0 : index
    %c0_0 = arith.constant 0 : index
    %0 = vector.load %arg1[%c0, %c0_0] : memref<64x512xbf16, #tpu.memory_space<vmem>>, vector<64x512xbf16>
    %c0_1 = arith.constant 0 : index
    %c0_2 = arith.constant 0 : index
    %1 = vector.load %arg2[%c0_1, %c0_2] : memref<512x512xbf16, #tpu.memory_space<vmem>>, vector<512x512xbf16>
    %cst = arith.constant dense<0.000000e+00> : vector<64x512xf32>
    %2 = tpu.matmul %0, %1, %cst {dimension_numbers = #tpu.dot_dimension_numbers<[1], [0], [0], [1], [0, 0, 1, 1], [], []>} : vector<64x512xbf16>, vector<512x512xbf16>, vector<64x512xf32> -> vector<64x512xf32>
    %c0_3 = arith.constant 0 : index
    %c0_4 = arith.constant 0 : index
    %3 = vector.load %arg3[%c0_3, %c0_4] : memref<1x512xf32, #tpu.memory_space<vmem>>, vector<1x512xf32>
    %4 = vector.broadcast %3 : vector<1x512xf32> to vector<64x512xf32>
    %5 = arith.addf %2, %4 : vector<64x512xf32>
    %cst_5 = arith.constant 0.000000e+00 : f32
    %6 = vector.broadcast %cst_5 : f32 to vector<64x512xf32>
    %7 = arith.maximumf %5, %6 : vector<64x512xf32>
    %8 = arith.truncf %7 : vector<64x512xf32> to vector<64x512xbf16>
    %c0_6 = arith.constant 0 : index
    %c0_7 = arith.constant 0 : index
    %9 = vector.load %arg4[%c0_6, %c0_7] : memref<64x512xbf16, #tpu.memory_space<vmem>>, vector<64x512xbf16>
    tpu.vector_store %arg4[%c0_6, %c0_7], %8 {strides = array<i32>} : memref<64x512xbf16, #tpu.memory_space<vmem>>, vector<64x512xbf16>,
    return
  }
  func.func @transform_0(%arg0: i32) -> (i32, i32) {
    %c0_i32 = arith.constant 0 : i32
    %c0_i32_0 = arith.constant 0 : i32
    return %arg0, %c0_i32 : i32, i32
  }
  func.func @transform_1(%arg0: i32) -> (i32, i32) {
    %c0_i32 = arith.constant 0 : i32
    %c0_i32_0 = arith.constant 0 : i32
    %c0_i32_1 = arith.constant 0 : i32
    return %c0_i32, %c0_i32_0 : i32, i32
  }
  func.func @transform_2(%arg0: i32) -> (i32, i32) {
    %c0_i32 = arith.constant 0 : i32
    %c0_i32_0 = arith.constant 0 : i32
    %c0_i32_1 = arith.constant 0 : i32
    return %c0_i32, %c0_i32_0 : i32, i32
  }
  func.func @transform_3(%arg0: i32) -> (i32, i32) {
    %c0_i32 = arith.constant 0 : i32
    %c0_i32_0 = arith.constant 0 : i32
    return %arg0, %c0_i32 : i32, i32
  }
}

module attributes {stable_mosaic.version = 11 : i64} {
  func.func @_pool_fc_kernel(%arg0: memref<2x64x512xbf16, #tpu.memory_space<vmem>>, %arg1: memref<512x100xf32, #tpu.memory_space<vmem>>, %arg2: memref<1x100xf32, #tpu.memory_space<vmem>>, %arg3: memref<2x100xf32, #tpu.memory_space<vmem>>) attributes {dimension_semantics = [], scalar_prefetch = 0 : i64, scratch_operands = 0 : i64, tpu.core_type = #tpu.core_type<tc>} {
    %c0 = arith.constant 0 : index
    %c0_0 = arith.constant 0 : index
    %c0_1 = arith.constant 0 : index
    %0 = vector.load %arg0[%c0, %c0_0, %c0_1] : memref<2x64x512xbf16, #tpu.memory_space<vmem>>, vector<2x64x512xbf16>
    %1 = arith.extf %0 : vector<2x64x512xbf16> to vector<2x64x512xf32>
    %cst = arith.constant dense<0.000000e+00> : vector<2x512xf32>
    %2 = vector.multi_reduction <add>, %1, %cst [1] : vector<2x64x512xf32> to vector<2x512xf32>
    %cst_2 = arith.constant 6.400000e+01 : f32
    %3 = vector.broadcast %cst_2 : f32 to vector<2x512xf32>
    %4 = arith.divf %2, %3 : vector<2x512xf32>
    %c0_3 = arith.constant 0 : index
    %c0_4 = arith.constant 0 : index
    %5 = vector.load %arg1[%c0_3, %c0_4] : memref<512x100xf32, #tpu.memory_space<vmem>>, vector<512x100xf32>
    %cst_5 = arith.constant dense<0.000000e+00> : vector<2x100xf32>
    %6 = tpu.matmul %4, %5, %cst_5 {dimension_numbers = #tpu.dot_dimension_numbers<[1], [0], [0], [1], [0, 0, 1, 1], [], []>} : vector<2x512xf32>, vector<512x100xf32>, vector<2x100xf32> -> vector<2x100xf32>
    %c0_6 = arith.constant 0 : index
    %c0_7 = arith.constant 0 : index
    %7 = vector.load %arg2[%c0_6, %c0_7] : memref<1x100xf32, #tpu.memory_space<vmem>>, vector<1x100xf32>
    %8 = vector.broadcast %7 : vector<1x100xf32> to vector<2x100xf32>
    %9 = arith.addf %6, %8 : vector<2x100xf32>
    %c0_8 = arith.constant 0 : index
    %c0_9 = arith.constant 0 : index
    %10 = vector.load %arg3[%c0_8, %c0_9] : memref<2x100xf32, #tpu.memory_space<vmem>>, vector<2x100xf32>
    tpu.vector_store %arg3[%c0_8, %c0_9], %9 {strides = array<i32>} : memref<2x100xf32, #tpu.memory_space<vmem>>, vector<2x100xf32>,
    return
  }
}

</mosaic_0001>

<bundles_post_ra>
// kernel: net_forward.22
= control target key start
LH: loop header
LB: loop body
LE: loop exit
PB: predicated region body
PF: predicated region fallthrough
CT: control target
= control target key end

     0   :  { %8 = vsyncpa [#allocation3], 0  ;;  %s2099_s0 = inlined_call_operand.vmem [shape: bf16[2048,9], index: 0, kind: input, shape index: {}]   ;;  %s2100_s1 = inlined_call_operand.hbm [shape: bf16[9,15], index: 1, kind: input, shape index: {}]   ;;  %s2101_s2 = inlined_call_operand.hbm [shape: f32[1,15], index: 2, kind: input, shape index: {}]   ;;  %s2102_s3 = inlined_call_operand.vmem [shape: bf16[2048,15], index: 3, kind: output, shape index: {}]  }
   0x1   :  { %9 = vsyncpa [#allocation5], 0  ;;  %s1765_s12 = smov 0  }
   0x2 LB: > { %s1297_s13 = sadd.s32 4294967295, %s1738_s12   ;;  %p1299_p0 = scmp.ge.s32.totalorder %s1738_s12, 1  ;;  %s1738_s12 = sphi %s1765_s12, %s15_s12  }
   0x3   : > { %p114_p1 = scmp.lt.s32.totalorder %s1738_s12, 5  ;;  %s1740_s14 = smov [#allocation2]  }
   0x4   : > { %s126_s15 = sshll.u32 %s1740_s14, 4  ;;  %p1779_p3 = scmp.eq.s32.totalorder %s1297_s13, 0  ;;  %s127_s15 = int_to_ptr.vmem [resolvable:$true] %s126_s15 }
   0x5   : > { %p1773_p2 = pnand %p1299_p0, %p114_p1  ;;  %s1741_s18 = smov [#allocation4]  }
   0x6   : > { %s140_s19 = sshll.u32 %s1741_s18, 4  ;;  %s1683_s21 = scalar_lea.vmem %s127_s15, 128  ;;  %s141_s19 = int_to_ptr.vmem [resolvable:$true] %s140_s19 }
   0x7   : > { %p1615_p4 = pneg %p1773_p2  ;;  %p1684_p7 = scmp.ne.s32.totalorder %s127_s15, %s1683_s21 }
   0x8   : > { %p1691_p10 = scmp.lt.s32.totalorder %s127_s15, %s127_s15  ;;  %p1692_p11 = scmp.lt.s32.totalorder %s1683_s21, %s1683_s21 }
   0x9   : > { %p1787_p5 = pnand %p1779_p3, %p1615_p4 }
   0xa   : > { %p1693_p12 = por %p1692_p11, %p1691_p10 }
   0xb   : > { %p1674_p6 = pneg %p1787_p5 }
   0xd   : > { %p1686_p8 = pnand %p1684_p7, %p1674_p6 }
   0xf   : > { %p1687_p9 = pneg %p1686_p8 }
  0x11   : > { %p1694_p13 = pnand %p1693_p12, %p1687_p9 }
  0x13   : > { %1697 = shalt.err (!%p1694_p13)
}
  0x14   : > { %s1742_s22 = smov 64   ;;  %s1743_s23 = smov 4  }
  0x15   : > { %1618 = dma.hbm_to_vmem [thread:$0]  (!%p1787_p5), %s2100_s1, 128, %s127_s15, [#allocation3], %s1742_s22, %s1742_s22, %s1743_s23  }
  0x16   : > { %s1709_s26 = scalar_lea.vmem %s141_s19, 16  ;;  %s1716_s27 = scalar_lea.vmem %s141_s19, 32 }
  0x17   : > { %p1710_p0 = scmp.ne.s32.totalorder %s141_s19, %s1709_s26  ;;  %p1717_p7 = scmp.lt.s32.totalorder %s141_s19, %s141_s19 }
  0x18   : > { %p1718_p8 = scmp.lt.s32.totalorder %s1716_s27, %s1709_s26 }
  0x19   : > { %p1712_p1 = pnand %p1710_p0, %p1674_p6 }
  0x1a   : > { %p1719_p9 = por %p1718_p8, %p1717_p7 }
  0x1b   : > { %p1713_p4 = pneg %p1712_p1 }
  0x1d   : > { %p1720_p10 = pnand %p1719_p9, %p1713_p4 }
  0x1f   : > { %1723 = shalt.err (!%p1720_p10)
}
  0x20   : > { %1621 = dma.hbm_to_vmem [thread:$0]  (!%p1787_p5), %s2101_s2, 16, %s141_s19, [#allocation5]  }
  0x21   : > { %162 = sbr.rel (%p1773_p2) target bundleno = 312 (0x138), region = 32 }
  0x26   : > { %1729 = dma.done.wait (%p1779_p3), [#allocation3], 128  }
  0x27   : > { %1731 = vsyncadd (%p1779_p3), [#allocation3], 4294967168 }
  0x28   : > { %1733 = dma.done.wait (%p1779_p3), [#allocation5], 16  }
  0x29   : > { %1735 = vsyncadd (%p1779_p3), [#allocation5], 4294967280  ;;  %vm538_vm0 = vcmask 1043456   ;;  %s1306_s30 = sshll.u32 %s1297_s13, 6  ;;  %vm539_vm1 = vcmask 1044480   ;;  %v1744_v0 = vmov 65535  }
  0x2a   : > { %p191_p5 = scmp.lt.s32.totalorder %s1306_s30, 255  ;;  %v540_v1 = vsel %vm538_vm0, 4294967295, %v1744_v0  ;;  %vm441_vm2 = vcmask 72704   ;;  %v1639_v3 = vld [vmem:[#allocation2] sm:$0x1f]   ;;  %vm1154_vm3 = vcmask 117760  }
  0x2b   : > { %v541_v2 = vsel %vm539_vm1, %v540_v1, 0  ;;  %v1895_v37 = vld [vmem:[#allocation4] ss:$0 sm:$0xff] }
  0x2c   : > { %s2107_s30 = smov (!%p191_p5, %s1306_s30), 255  ;;  %v543_v5 = vand.u32 %v1639_v3, %v541_v2 }
  0x2d   : > { %s1307_s4 = sshll.u32 %s2107_s30, 2 }
  0x2e   : > { %s1829_s7 = scalar_lea.vmem %s2099_s0, %s1307_s4  ;;  %1539 = vmatprep.subr.bf16.mxu0 %v543_v5  ;;  %1605 = vmatprep.subr.bf16.mxu1 %v543_v5  ;;  %s1906_s10 = scalar_lea.vmem %s2102_s3, %s1307_s4 }
  0x2f   : > { %v1640_v4 = vld [vmem:[%s1829_s7] sm:$0xff]   ;;  %v1642_v7 = vld [vmem:[%s1829_s7 + $0x8] sm:$0xff]   ;;  %1540 = vmatpush3.bf16.msra.mxu0 %v543_v5  ;;  %1606 = vmatpush3.bf16.msra.mxu1 %v543_v5  ;;  %v1644_v9 = vld [vmem:[%s1829_s7 + $0x10] sm:$0xff]  }
  0x30   : > { %v1641_v6 = vld [vmem:[%s1829_s7 + $0x80] sm:$0xff]   ;;  %1541 = vmatprep.mubr.msk.bf16.mxu0 %vm441_vm2, %v1640_v4  ;;  %v1643_v8 = vld [vmem:[%s1829_s7 + $0x88] sm:$0xff]   ;;  %v1645_v10 = vld [vmem:[%s1829_s7 + $0x90] sm:$0xff]  }
  0x31   : > { %1573 = vmatprep.mubr.msk.bf16.mxu1 %vm441_vm2, %v1641_v6  ;;  %v1646_v11 = vld [vmem:[%s1829_s7 + $0x18] sm:$0xff]   ;;  %v1648_v13 = vld [vmem:[%s1829_s7 + $0x20] sm:$0xff]   ;;  %v1650_v15 = vld [vmem:[%s1829_s7 + $0x28] sm:$0xff]  }
  0x32   : > { %1542 = vmatmul.mubr.msk.bf16.vlgmr.msra.gmra.mxu0 %vm441_vm2, %v1642_v7  ;;  %1574 = vmatmul.mubr.msk.bf16.vlgmr.msra.gmra.mxu1 %vm441_vm2, %v1643_v8  ;;  %v1647_v12 = vld [vmem:[%s1829_s7 + $0x98] sm:$0xff]   ;;  %v1649_v14 = vld [vmem:[%s1829_s7 + $0xa0] sm:$0xff]   ;;  %v1651_v16 = vld [vmem:[%s1829_s7 + $0xa8] sm:$0xff]  }
  0x33   : > { %1545 = vmatprep.mubr.msk.bf16.mxu0 %vm441_vm2, %v1644_v9  ;;  %1577 = vmatprep.mubr.msk.bf16.mxu1 %vm441_vm2, %v1645_v10  ;;  %v1652_v17 = vld [vmem:[%s1829_s7 + $0x30] sm:$0xff]   ;;  %v1654_v19 = vld [vmem:[%s1829_s7 + $0x38] sm:$0xff]   ;;  %v1656_v21 = vld [vmem:[%s1829_s7 + $0x40] sm:$0xff]  }
  0x34   : > { %v1653_v18 = vld [vmem:[%s1829_s7 + $0xb0] sm:$0xff]   ;;  %v1655_v20 = vld [vmem:[%s1829_s7 + $0xb8] sm:$0xff]   ;;  %v1657_v22 = vld [vmem:[%s1829_s7 + $0xc0] sm:$0xff]  }
  0x35   : > { %v1658_v23 = vld [vmem:[%s1829_s7 + $0x48] sm:$0xff]   ;;  %v1660_v25 = vld [vmem:[%s1829_s7 + $0x50] sm:$0xff]   ;;  %v1662_v27 = vld [vmem:[%s1829_s7 + $0x58] sm:$0xff]  }
  0x36   : > { %v1659_v24 = vld [vmem:[%s1829_s7 + $0xc8] sm:$0xff]   ;;  %v1661_v26 = vld [vmem:[%s1829_s7 + $0xd0] sm:$0xff]   ;;  %v1663_v28 = vld [vmem:[%s1829_s7 + $0xd8] sm:$0xff]  }
  0x37   : > { %v1664_v29 = vld [vmem:[%s1829_s7 + $0x60] sm:$0xff]   ;;  %v1666_v31 = vld [vmem:[%s1829_s7 + $0x68] sm:$0xff]   ;;  %v1668_v33 = vld [vmem:[%s1829_s7 + $0x70] sm:$0xff]  }
  0x38   : > { %v1665_v30 = vld [vmem:[%s1829_s7 + $0xe0] sm:$0xff]   ;;  %v1667_v32 = vld [vmem:[%s1829_s7 + $0xe8] sm:$0xff]   ;;  %v1669_v34 = vld [vmem:[%s1829_s7 + $0xf0] sm:$0xff]  }
  0x39   : > { %v1670_v35 = vld [vmem:[%s1829_s7 + $0x78] sm:$0xff]  }
  0x3a   : > { %1546 = vmatmul.mubr.msk.bf16.gmra.mxu0 %vm441_vm2, %v1646_v11  ;;  %1578 = vmatmul.mubr.msk.bf16.gmra.mxu1 %vm441_vm2, %v1647_v12  ;;  %v1671_v36 = vld [vmem:[%s1829_s7 + $0xf8] sm:$0xff]  }
  0x3b   : > { %1549 = vmatprep.mubr.msk.bf16.mxu0 %vm441_vm2, %v1648_v13  ;;  %1581 = vmatprep.mubr.msk.bf16.mxu1 %vm441_vm2, %v1649_v14 }
  0x42   : > { %1550 = vmatmul.mubr.msk.bf16.gmra.mxu0 %vm441_vm2, %v1650_v15  ;;  %1582 = vmatmul.mubr.msk.bf16.gmra.mxu1 %vm441_vm2, %v1651_v16 }
  0x43   : > { %1553 = vmatprep.mubr.msk.bf16.mxu0 %vm441_vm2, %v1652_v17  ;;  %1585 = vmatprep.mubr.msk.bf16.mxu1 %vm441_vm2, %v1653_v18 }
  0x4a   : > { %1554 = vmatmul.mubr.msk.bf16.gmra.mxu0 %vm441_vm2, %v1654_v19  ;;  %1586 = vmatmul.mubr.msk.bf16.gmra.mxu1 %vm441_vm2, %v1655_v20 }
  0x4b   : > { %1557 = vmatprep.mubr.msk.bf16.mxu0 %vm441_vm2, %v1656_v21  ;;  %1589 = vmatprep.mubr.msk.bf16.mxu1 %vm441_vm2, %v1657_v22 }
  0x52   : > { %1558 = vmatmul.mubr.msk.bf16.gmra.mxu0 %vm441_vm2, %v1658_v23  ;;  %1590 = vmatmul.mubr.msk.bf16.gmra.mxu1 %vm441_vm2, %v1659_v24 }
  0x53   : > { %1561 = vmatprep.mubr.msk.bf16.mxu0 %vm441_vm2, %v1660_v25  ;;  %1593 = vmatprep.mubr.msk.bf16.mxu1 %vm441_vm2, %v1661_v26 }
  0x5a   : > { %1562 = vmatmul.mubr.msk.bf16.gmra.mxu0 %vm441_vm2, %v1662_v27  ;;  %1594 = vmatmul.mubr.msk.bf16.gmra.mxu1 %vm441_vm2, %v1663_v28 }
  0x5b   : > { %1565 = vmatprep.mubr.msk.bf16.mxu0 %vm441_vm2, %v1664_v29  ;;  %1597 = vmatprep.mubr.msk.bf16.mxu1 %vm441_vm2, %v1665_v30 }
  0x62   : > { %1566 = vmatmul.mubr.msk.bf16.gmra.mxu0 %vm441_vm2, %v1666_v31  ;;  %1598 = vmatmul.mubr.msk.bf16.gmra.mxu1 %vm441_vm2, %v1667_v32 }
  0x63   : > { %1569 = vmatprep.mubr.msk.bf16.mxu0 %vm441_vm2, %v1668_v33  ;;  %1601 = vmatprep.mubr.msk.bf16.mxu1 %vm441_vm2, %v1669_v34 }
  0x6a   : > { %1570 = vmatmul.mubr.msk.bf16.gmra.mxu0 %vm441_vm2, %v1670_v35  ;;  %1602 = vmatmul.mubr.msk.bf16.gmra.mxu1 %vm441_vm2, %v1671_v36 }
  0xf2   : > { %v1543_v38 = vpop.f32.mrf.mxu0  ;;  %v1575_v39 = vpop.f32.mrf.mxu1 }
  0xf3   : > { %v588_v40 = vadd.f32 %v1543_v38, %v1895_v37  ;;  %v716_v41 = vadd.f32 %v1575_v39, %v1895_v37 }
  0xf4   : > { %v579_v42 = vpop.f32.mrf.mxu0  ;;  %v707_v43 = vpop.f32.mrf.mxu1 }
  0xf5   : > { %v836_v44 = vmax.f32 %v588_v40, 0.0  ;;  %v868_v45 = vmax.f32 %v716_v41, 0.0  ;;  %v580_v46 = vadd.f32 %v1895_v37, %v579_v42  ;;  %v708_v47 = vadd.f32 %v1895_v37, %v707_v43 }
  0xf6   : > { %v1544_v48 = vpop.f32.mrf.mxu0  ;;  %v1576_v49 = vpop.f32.mrf.mxu1 }
  0xf7   : > { %v1444_v50 = vpack.c.bf16 %v836_v44, %v836_v44  ;;  %v1476_v51 = vpack.c.bf16 %v868_v45, %v868_v45  ;;  %v834_v52 = vmax.f32 %v580_v46, 0.0  ;;  %v866_v53 = vmax.f32 %v708_v47, 0.0 }
  0xf8   : > { %v591_v54 = vadd.f32 %v1544_v48, %v1895_v37  ;;  %v719_v55 = vadd.f32 %v1576_v49, %v1895_v37  ;;  %v582_v56 = vpop.f32.mrf.mxu0  ;;  %v710_v57 = vpop.f32.mrf.mxu1 }
  0xf9   : > { %1157 = vst.msk [vmem:[%s1906_s10 + $0x8] sm:$0xf] %vm1154_vm3, %v1444_v50  ;;  %1189 = vst.msk [vmem:[%s1906_s10 + $0x88] sm:$0xf] %vm1154_vm3, %v1476_v51  ;;  %v1442_v58 = vpack.c.bf16 %v834_v52, %v834_v52  ;;  %v1474_v59 = vpack.c.bf16 %v866_v53, %v866_v53  ;;  %v583_v60 = vadd.f32 %v1895_v37, %v582_v56 }
  0xfa   : > { %v711_v61 = vadd.f32 %v1895_v37, %v710_v57  ;;  %v837_v62 = vmax.f32 %v591_v54, 0.0  ;;  %v869_v63 = vmax.f32 %v719_v55, 0.0  ;;  %v1547_v0 = vpop.f32.mrf.mxu0  ;;  %v1579_v1 = vpop.f32.mrf.mxu1 }
  0xfb   : > { %1155 = vst.msk [vmem:[%s1906_s10] sm:$0xf] %vm1154_vm3, %v1442_v58  ;;  %1187 = vst.msk [vmem:[%s1906_s10 + $0x80] sm:$0xf] %vm1154_vm3, %v1474_v59  ;;  %v835_v2 = vmax.f32 %v583_v60, 0.0  ;;  %v604_v4 = vadd.f32 %v1547_v0, %v1895_v37  ;;  %v732_v5 = vadd.f32 %v1579_v1, %v1895_v37 }
  0xfc   : > { %v867_v3 = vmax.f32 %v711_v61, 0.0  ;;  %v1445_v6 = vpack.c.bf16 %v837_v62, %v837_v62  ;;  %v1477_v7 = vpack.c.bf16 %v869_v63, %v869_v63  ;;  %v595_v8 = vpop.f32.mrf.mxu0  ;;  %v723_v9 = vpop.f32.mrf.mxu1 }
  0xfd   : > { %v1443_v10 = vpack.c.bf16 %v835_v2, %v835_v2  ;;  %v840_v12 = vmax.f32 %v604_v4, 0.0  ;;  %v872_v13 = vmax.f32 %v732_v5, 0.0  ;;  %v596_v14 = vadd.f32 %v1895_v37, %v595_v8 }
  0xfe   : > { %v1475_v11 = vpack.c.bf16 %v867_v3, %v867_v3  ;;  %1158 = vst.msk [vmem:[%s1906_s10 + $0xc] sm:$0xf] %vm1154_vm3, %v1445_v6  ;;  %1190 = vst.msk [vmem:[%s1906_s10 + $0x8c] sm:$0xf] %vm1154_vm3, %v1477_v7  ;;  %v724_v15 = vadd.f32 %v1895_v37, %v723_v9  ;;  %v1548_v16 = vpop.f32.mrf.mxu0  ;;  %v1580_v17 = vpop.f32.mrf.mxu1 }
  0xff   : > { %1156 = vst.msk [vmem:[%s1906_s10 + $0x4] sm:$0xf] %vm1154_vm3, %v1443_v10  ;;  %v1448_v18 = vpack.c.bf16 %v840_v12, %v840_v12  ;;  %v1480_v19 = vpack.c.bf16 %v872_v13, %v872_v13  ;;  %v607_v20 = vadd.f32 %v1548_v16, %v1895_v37  ;;  %v735_v21 = vadd.f32 %v1580_v17, %v1895_v37 }
 0x100   : > { %1188 = vst.msk [vmem:[%s1906_s10 + $0x84] sm:$0xf] %vm1154_vm3, %v1475_v11  ;;  %v838_v22 = vmax.f32 %v596_v14, 0.0  ;;  %v870_v23 = vmax.f32 %v724_v15, 0.0  ;;  %v598_v24 = vpop.f32.mrf.mxu0  ;;  %v726_v25 = vpop.f32.mrf.mxu1 }
 0x101   : > { %1161 = vst.msk [vmem:[%s1906_s10 + $0x18] sm:$0xf] %vm1154_vm3, %v1448_v18  ;;  %1193 = vst.msk [vmem:[%s1906_s10 + $0x98] sm:$0xf] %vm1154_vm3, %v1480_v19  ;;  %v841_v26 = vmax.f32 %v607_v20, 0.0  ;;  %v873_v27 = vmax.f32 %v735_v21, 0.0  ;;  %v599_v28 = vadd.f32 %v1895_v37, %v598_v24  ;;  %v727_v29 = vadd.f32 %v1895_v37, %v726_v25 }
 0x102   : > { %v1446_v30 = vpack.c.bf16 %v838_v22, %v838_v22  ;;  %v1478_v31 = vpack.c.bf16 %v870_v23, %v870_v23  ;;  %v1551_v32 = vpop.f32.mrf.mxu0  ;;  %v1583_v33 = vpop.f32.mrf.mxu1 }
 0x103   : > { %v1449_v34 = vpack.c.bf16 %v841_v26, %v841_v26  ;;  %v1481_v35 = vpack.c.bf16 %v873_v27, %v873_v27  ;;  %v839_v36 = vmax.f32 %v599_v28, 0.0  ;;  %v871_v38 = vmax.f32 %v727_v29, 0.0 }
 0x104   : > { %1159 = vst.msk [vmem:[%s1906_s10 + $0x10] sm:$0xf] %vm1154_vm3, %v1446_v30  ;;  %1191 = vst.msk [vmem:[%s1906_s10 + $0x90] sm:$0xf] %vm1154_vm3, %v1478_v31  ;;  %v620_v39 = vadd.f32 %v1551_v32, %v1895_v37  ;;  %v748_v40 = vadd.f32 %v1583_v33, %v1895_v37  ;;  %v611_v41 = vpop.f32.mrf.mxu0  ;;  %v739_v42 = vpop.f32.mrf.mxu1 }
 0x105   : > { %1162 = vst.msk [vmem:[%s1906_s10 + $0x1c] sm:$0xf] %vm1154_vm3, %v1449_v34  ;;  %1194 = vst.msk [vmem:[%s1906_s10 + $0x9c] sm:$0xf] %vm1154_vm3, %v1481_v35  ;;  %v1447_v43 = vpack.c.bf16 %v839_v36, %v839_v36  ;;  %v1479_v44 = vpack.c.bf16 %v871_v38, %v871_v38  ;;  %v612_v45 = vadd.f32 %v1895_v37, %v611_v41 }
 0x106   : > { %v740_v46 = vadd.f32 %v1895_v37, %v739_v42  ;;  %v844_v47 = vmax.f32 %v620_v39, 0.0  ;;  %v876_v48 = vmax.f32 %v748_v40, 0.0  ;;  %v1552_v49 = vpop.f32.mrf.mxu0  ;;  %v1584_v50 = vpop.f32.mrf.mxu1 }
 0x107   : > { %1160 = vst.msk [vmem:[%s1906_s10 + $0x14] sm:$0xf] %vm1154_vm3, %v1447_v43  ;;  %1192 = vst.msk [vmem:[%s1906_s10 + $0x94] sm:$0xf] %vm1154_vm3, %v1479_v44  ;;  %v842_v51 = vmax.f32 %v612_v45, 0.0  ;;  %v623_v53 = vadd.f32 %v1552_v49, %v1895_v37  ;;  %v751_v54 = vadd.f32 %v1584_v50, %v1895_v37 }
 0x108   : > { %v874_v52 = vmax.f32 %v740_v46, 0.0  ;;  %v1452_v55 = vpack.c.bf16 %v844_v47, %v844_v47  ;;  %v1484_v56 = vpack.c.bf16 %v876_v48, %v876_v48  ;;  %v614_v57 = vpop.f32.mrf.mxu0  ;;  %v742_v58 = vpop.f32.mrf.mxu1 }
 0x109   : > { %v1450_v59 = vpack.c.bf16 %v842_v51, %v842_v51  ;;  %v845_v61 = vmax.f32 %v623_v53, 0.0  ;;  %v877_v62 = vmax.f32 %v751_v54, 0.0  ;;  %v615_v63 = vadd.f32 %v1895_v37, %v614_v57 }
 0x10a   : > { %v1482_v60 = vpack.c.bf16 %v874_v52, %v874_v52  ;;  %1165 = vst.msk [vmem:[%s1906_s10 + $0x28] sm:$0xf] %vm1154_vm3, %v1452_v55  ;;  %1197 = vst.msk [vmem:[%s1906_s10 + $0xa8] sm:$0xf] %vm1154_vm3, %v1484_v56  ;;  %v743_v0 = vadd.f32 %v1895_v37, %v742_v58  ;;  %v1555_v1 = vpop.f32.mrf.mxu0  ;;  %v1587_v2 = vpop.f32.mrf.mxu1 }
 0x10b   : > { %1163 = vst.msk [vmem:[%s1906_s10 + $0x20] sm:$0xf] %vm1154_vm3, %v1450_v59  ;;  %v1453_v3 = vpack.c.bf16 %v845_v61, %v845_v61  ;;  %v1485_v4 = vpack.c.bf16 %v877_v62, %v877_v62  ;;  %v636_v5 = vadd.f32 %v1555_v1, %v1895_v37  ;;  %v764_v6 = vadd.f32 %v1587_v2, %v1895_v37 }
 0x10c   : > { %1195 = vst.msk [vmem:[%s1906_s10 + $0xa0] sm:$0xf] %vm1154_vm3, %v1482_v60  ;;  %v843_v7 = vmax.f32 %v615_v63, 0.0  ;;  %v875_v8 = vmax.f32 %v743_v0, 0.0  ;;  %v627_v9 = vpop.f32.mrf.mxu0  ;;  %v755_v10 = vpop.f32.mrf.mxu1 }
 0x10d   : > { %1166 = vst.msk [vmem:[%s1906_s10 + $0x2c] sm:$0xf] %vm1154_vm3, %v1453_v3  ;;  %1198 = vst.msk [vmem:[%s1906_s10 + $0xac] sm:$0xf] %vm1154_vm3, %v1485_v4  ;;  %v848_v11 = vmax.f32 %v636_v5, 0.0  ;;  %v880_v12 = vmax.f32 %v764_v6, 0.0  ;;  %v628_v13 = vadd.f32 %v1895_v37, %v627_v9  ;;  %v756_v14 = vadd.f32 %v1895_v37, %v755_v10 }
 0x10e   : > { %v1451_v15 = vpack.c.bf16 %v843_v7, %v843_v7  ;;  %v1483_v16 = vpack.c.bf16 %v875_v8, %v875_v8  ;;  %v1556_v17 = vpop.f32.mrf.mxu0  ;;  %v1588_v18 = vpop.f32.mrf.mxu1 }
 0x10f   : > { %v1456_v19 = vpack.c.bf16 %v848_v11, %v848_v11  ;;  %v1488_v20 = vpack.c.bf16 %v880_v12, %v880_v12  ;;  %v846_v21 = vmax.f32 %v628_v13, 0.0  ;;  %v878_v22 = vmax.f32 %v756_v14, 0.0 }
 0x110   : > { %1164 = vst.msk [vmem:[%s1906_s10 + $0x24] sm:$0xf] %vm1154_vm3, %v1451_v15  ;;  %1196 = vst.msk [vmem:[%s1906_s10 + $0xa4] sm:$0xf] %vm1154_vm3, %v1483_v16  ;;  %v639_v23 = vadd.f32 %v1556_v17, %v1895_v37  ;;  %v767_v24 = vadd.f32 %v1588_v18, %v1895_v37  ;;  %v630_v25 = vpop.f32.mrf.mxu0  ;;  %v758_v26 = vpop.f32.mrf.mxu1 }
 0x111   : > { %1169 = vst.msk [vmem:[%s1906_s10 + $0x38] sm:$0xf] %vm1154_vm3, %v1456_v19  ;;  %1201 = vst.msk [vmem:[%s1906_s10 + $0xb8] sm:$0xf] %vm1154_vm3, %v1488_v20  ;;  %v1454_v27 = vpack.c.bf16 %v846_v21, %v846_v21  ;;  %v1486_v28 = vpack.c.bf16 %v878_v22, %v878_v22  ;;  %v631_v29 = vadd.f32 %v1895_v37, %v630_v25 }
 0x112   : > { %v759_v30 = vadd.f32 %v1895_v37, %v758_v26  ;;  %v849_v31 = vmax.f32 %v639_v23, 0.0  ;;  %v881_v32 = vmax.f32 %v767_v24, 0.0  ;;  %v1559_v33 = vpop.f32.mrf.mxu0  ;;  %v1591_v34 = vpop.f32.mrf.mxu1 }
 0x113   : > { %1167 = vst.msk [vmem:[%s1906_s10 + $0x30] sm:$0xf] %vm1154_vm3, %v1454_v27  ;;  %1199 = vst.msk [vmem:[%s1906_s10 + $0xb0] sm:$0xf] %vm1154_vm3, %v1486_v28  ;;  %v847_v35 = vmax.f32 %v631_v29, 0.0  ;;  %v652_v38 = vadd.f32 %v1559_v33, %v1895_v37  ;;  %v780_v39 = vadd.f32 %v1591_v34, %v1895_v37 }
 0x114   : > { %v879_v36 = vmax.f32 %v759_v30, 0.0  ;;  %v1457_v40 = vpack.c.bf16 %v849_v31, %v849_v31  ;;  %v1489_v41 = vpack.c.bf16 %v881_v32, %v881_v32  ;;  %v643_v42 = vpop.f32.mrf.mxu0  ;;  %v771_v43 = vpop.f32.mrf.mxu1 }
 0x115   : > { %v1455_v44 = vpack.c.bf16 %v847_v35, %v847_v35  ;;  %v852_v46 = vmax.f32 %v652_v38, 0.0  ;;  %v884_v47 = vmax.f32 %v780_v39, 0.0  ;;  %v644_v48 = vadd.f32 %v1895_v37, %v643_v42 }
 0x116   : > { %v1487_v45 = vpack.c.bf16 %v879_v36, %v879_v36  ;;  %1170 = vst.msk [vmem:[%s1906_s10 + $0x3c] sm:$0xf] %vm1154_vm3, %v1457_v40  ;;  %1202 = vst.msk [vmem:[%s1906_s10 + $0xbc] sm:$0xf] %vm1154_vm3, %v1489_v41  ;;  %v772_v49 = vadd.f32 %v1895_v37, %v771_v43  ;;  %v1560_v50 = vpop.f32.mrf.mxu0  ;;  %v1592_v51 = vpop.f32.mrf.mxu1 }
 0x117   : > { %1168 = vst.msk [vmem:[%s1906_s10 + $0x34] sm:$0xf] %vm1154_vm3, %v1455_v44  ;;  %v1460_v52 = vpack.c.bf16 %v852_v46, %v852_v46  ;;  %v1492_v53 = vpack.c.bf16 %v884_v47, %v884_v47  ;;  %v655_v54 = vadd.f32 %v1560_v50, %v1895_v37  ;;  %v783_v55 = vadd.f32 %v1592_v51, %v1895_v37 }
 0x118   : > { %1200 = vst.msk [vmem:[%s1906_s10 + $0xb4] sm:$0xf] %vm1154_vm3, %v1487_v45  ;;  %v850_v56 = vmax.f32 %v644_v48, 0.0  ;;  %v882_v57 = vmax.f32 %v772_v49, 0.0  ;;  %v646_v58 = vpop.f32.mrf.mxu0  ;;  %v774_v59 = vpop.f32.mrf.mxu1 }
 0x119   : > { %1173 = vst.msk [vmem:[%s1906_s10 + $0x48] sm:$0xf] %vm1154_vm3, %v1460_v52  ;;  %1205 = vst.msk [vmem:[%s1906_s10 + $0xc8] sm:$0xf] %vm1154_vm3, %v1492_v53  ;;  %v853_v60 = vmax.f32 %v655_v54, 0.0  ;;  %v885_v61 = vmax.f32 %v783_v55, 0.0  ;;  %v647_v62 = vadd.f32 %v1895_v37, %v646_v58  ;;  %v775_v63 = vadd.f32 %v1895_v37, %v774_v59 }
 0x11a   : > { %v1458_v0 = vpack.c.bf16 %v850_v56, %v850_v56  ;;  %v1490_v1 = vpack.c.bf16 %v882_v57, %v882_v57  ;;  %v1563_v2 = vpop.f32.mrf.mxu0  ;;  %v1595_v3 = vpop.f32.mrf.mxu1 }
 0x11b   : > { %v1461_v4 = vpack.c.bf16 %v853_v60, %v853_v60  ;;  %v1493_v5 = vpack.c.bf16 %v885_v61, %v885_v61  ;;  %v851_v6 = vmax.f32 %v647_v62, 0.0  ;;  %v883_v7 = vmax.f32 %v775_v63, 0.0 }
 0x11c   : > { %1171 = vst.msk [vmem:[%s1906_s10 + $0x40] sm:$0xf] %vm1154_vm3, %v1458_v0  ;;  %1203 = vst.msk [vmem:[%s1906_s10 + $0xc0] sm:$0xf] %vm1154_vm3, %v1490_v1  ;;  %v668_v8 = vadd.f32 %v1563_v2, %v1895_v37  ;;  %v796_v9 = vadd.f32 %v1595_v3, %v1895_v37  ;;  %v659_v10 = vpop.f32.mrf.mxu0  ;;  %v787_v11 = vpop.f32.mrf.mxu1 }
 0x11d   : > { %1174 = vst.msk [vmem:[%s1906_s10 + $0x4c] sm:$0xf] %vm1154_vm3, %v1461_v4  ;;  %1206 = vst.msk [vmem:[%s1906_s10 + $0xcc] sm:$0xf] %vm1154_vm3, %v1493_v5  ;;  %v1459_v12 = vpack.c.bf16 %v851_v6, %v851_v6  ;;  %v1491_v13 = vpack.c.bf16 %v883_v7, %v883_v7  ;;  %v660_v14 = vadd.f32 %v1895_v37, %v659_v10 }
 0x11e   : > { %v788_v15 = vadd.f32 %v1895_v37, %v787_v11  ;;  %v856_v16 = vmax.f32 %v668_v8, 0.0  ;;  %v888_v17 = vmax.f32 %v796_v9, 0.0  ;;  %v1564_v18 = vpop.f32.mrf.mxu0  ;;  %v1596_v19 = vpop.f32.mrf.mxu1 }
 0x11f   : > { %1172 = vst.msk [vmem:[%s1906_s10 + $0x44] sm:$0xf] %vm1154_vm3, %v1459_v12  ;;  %1204 = vst.msk [vmem:[%s1906_s10 + $0xc4] sm:$0xf] %vm1154_vm3, %v1491_v13  ;;  %v854_v20 = vmax.f32 %v660_v14, 0.0  ;;  %v671_v22 = vadd.f32 %v1564_v18, %v1895_v37  ;;  %v799_v23 = vadd.f32 %v1596_v19, %v1895_v37 }
 0x120   : > { %v886_v21 = vmax.f32 %v788_v15, 0.0  ;;  %v1464_v24 = vpack.c.bf16 %v856_v16, %v856_v16  ;;  %v1496_v25 = vpack.c.bf16 %v888_v17, %v888_v17  ;;  %v662_v26 = vpop.f32.mrf.mxu0  ;;  %v790_v27 = vpop.f32.mrf.mxu1 }
 0x121   : > { %v1462_v28 = vpack.c.bf16 %v854_v20, %v854_v20  ;;  %v857_v30 = vmax.f32 %v671_v22, 0.0  ;;  %v889_v31 = vmax.f32 %v799_v23, 0.0  ;;  %v663_v32 = vadd.f32 %v1895_v37, %v662_v26 }
 0x122   : > { %v1494_v29 = vpack.c.bf16 %v886_v21, %v886_v21  ;;  %1177 = vst.msk [vmem:[%s1906_s10 + $0x58] sm:$0xf] %vm1154_vm3, %v1464_v24  ;;  %1209 = vst.msk [vmem:[%s1906_s10 + $0xd8] sm:$0xf] %vm1154_vm3, %v1496_v25  ;;  %v791_v33 = vadd.f32 %v1895_v37, %v790_v27  ;;  %v1567_v34 = vpop.f32.mrf.mxu0  ;;  %v1599_v35 = vpop.f32.mrf.mxu1 }
 0x123   : > { %1175 = vst.msk [vmem:[%s1906_s10 + $0x50] sm:$0xf] %vm1154_vm3, %v1462_v28  ;;  %v1465_v36 = vpack.c.bf16 %v857_v30, %v857_v30  ;;  %v1497_v38 = vpack.c.bf16 %v889_v31, %v889_v31  ;;  %v684_v39 = vadd.f32 %v1567_v34, %v1895_v37  ;;  %v812_v40 = vadd.f32 %v1599_v35, %v1895_v37 }
 0x124   : > { %1207 = vst.msk [vmem:[%s1906_s10 + $0xd0] sm:$0xf] %vm1154_vm3, %v1494_v29  ;;  %v855_v41 = vmax.f32 %v663_v32, 0.0  ;;  %v887_v42 = vmax.f32 %v791_v33, 0.0  ;;  %v675_v43 = vpop.f32.mrf.mxu0  ;;  %v803_v44 = vpop.f32.mrf.mxu1 }
 0x125   : > { %1178 = vst.msk [vmem:[%s1906_s10 + $0x5c] sm:$0xf] %vm1154_vm3, %v1465_v36  ;;  %1210 = vst.msk [vmem:[%s1906_s10 + $0xdc] sm:$0xf] %vm1154_vm3, %v1497_v38  ;;  %v860_v45 = vmax.f32 %v684_v39, 0.0  ;;  %v892_v46 = vmax.f32 %v812_v40, 0.0  ;;  %v676_v47 = vadd.f32 %v1895_v37, %v675_v43  ;;  %v804_v48 = vadd.f32 %v1895_v37, %v803_v44 }
 0x126   : > { %v1463_v49 = vpack.c.bf16 %v855_v41, %v855_v41  ;;  %v1495_v50 = vpack.c.bf16 %v887_v42, %v887_v42  ;;  %v1568_v51 = vpop.f32.mrf.mxu0  ;;  %v1600_v52 = vpop.f32.mrf.mxu1 }
 0x127   : > { %v1468_v53 = vpack.c.bf16 %v860_v45, %v860_v45  ;;  %v1500_v54 = vpack.c.bf16 %v892_v46, %v892_v46  ;;  %v858_v55 = vmax.f32 %v676_v47, 0.0  ;;  %v890_v56 = vmax.f32 %v804_v48, 0.0 }
 0x128   : > { %1176 = vst.msk [vmem:[%s1906_s10 + $0x54] sm:$0xf] %vm1154_vm3, %v1463_v49  ;;  %1208 = vst.msk [vmem:[%s1906_s10 + $0xd4] sm:$0xf] %vm1154_vm3, %v1495_v50  ;;  %v687_v57 = vadd.f32 %v1568_v51, %v1895_v37  ;;  %v815_v58 = vadd.f32 %v1600_v52, %v1895_v37  ;;  %v678_v59 = vpop.f32.mrf.mxu0  ;;  %v806_v60 = vpop.f32.mrf.mxu1 }
 0x129   : > { %1181 = vst.msk [vmem:[%s1906_s10 + $0x68] sm:$0xf] %vm1154_vm3, %v1468_v53  ;;  %1213 = vst.msk [vmem:[%s1906_s10 + $0xe8] sm:$0xf] %vm1154_vm3, %v1500_v54  ;;  %v1466_v61 = vpack.c.bf16 %v858_v55, %v858_v55  ;;  %v1498_v62 = vpack.c.bf16 %v890_v56, %v890_v56  ;;  %v679_v63 = vadd.f32 %v1895_v37, %v678_v59 }
 0x12a   : > { %v807_v0 = vadd.f32 %v1895_v37, %v806_v60  ;;  %v861_v1 = vmax.f32 %v687_v57, 0.0  ;;  %v893_v2 = vmax.f32 %v815_v58, 0.0  ;;  %v1571_v3 = vpop.f32.mrf.mxu0  ;;  %v1603_v4 = vpop.f32.mrf.mxu1 }
 0x12b   : > { %1179 = vst.msk [vmem:[%s1906_s10 + $0x60] sm:$0xf] %vm1154_vm3, %v1466_v61  ;;  %1211 = vst.msk [vmem:[%s1906_s10 + $0xe0] sm:$0xf] %vm1154_vm3, %v1498_v62  ;;  %v859_v5 = vmax.f32 %v679_v63, 0.0  ;;  %v700_v7 = vadd.f32 %v1571_v3, %v1895_v37  ;;  %v828_v8 = vadd.f32 %v1603_v4, %v1895_v37 }
 0x12c   : > { %v891_v6 = vmax.f32 %v807_v0, 0.0  ;;  %v1469_v9 = vpack.c.bf16 %v861_v1, %v861_v1  ;;  %v1501_v10 = vpack.c.bf16 %v893_v2, %v893_v2  ;;  %v691_v11 = vpop.f32.mrf.mxu0  ;;  %v819_v12 = vpop.f32.mrf.mxu1 }
 0x12d   : > { %v1467_v13 = vpack.c.bf16 %v859_v5, %v859_v5  ;;  %v864_v15 = vmax.f32 %v700_v7, 0.0  ;;  %v896_v16 = vmax.f32 %v828_v8, 0.0  ;;  %v692_v17 = vadd.f32 %v1895_v37, %v691_v11 }
 0x12e   : > { %v1499_v14 = vpack.c.bf16 %v891_v6, %v891_v6  ;;  %1182 = vst.msk [vmem:[%s1906_s10 + $0x6c] sm:$0xf] %vm1154_vm3, %v1469_v9  ;;  %1214 = vst.msk [vmem:[%s1906_s10 + $0xec] sm:$0xf] %vm1154_vm3, %v1501_v10  ;;  %v820_v18 = vadd.f32 %v1895_v37, %v819_v12  ;;  %v1572_v19 = vpop.f32.mrf.mxu0  ;;  %v1604_v20 = vpop.f32.mrf.mxu1 }
 0x12f   : > { %1180 = vst.msk [vmem:[%s1906_s10 + $0x64] sm:$0xf] %vm1154_vm3, %v1467_v13  ;;  %v1472_v21 = vpack.c.bf16 %v864_v15, %v864_v15  ;;  %v1504_v22 = vpack.c.bf16 %v896_v16, %v896_v16  ;;  %v703_v23 = vadd.f32 %v1572_v19, %v1895_v37  ;;  %v831_v24 = vadd.f32 %v1604_v20, %v1895_v37 }
 0x130   : > { %1212 = vst.msk [vmem:[%s1906_s10 + $0xe4] sm:$0xf] %vm1154_vm3, %v1499_v14  ;;  %v862_v25 = vmax.f32 %v692_v17, 0.0  ;;  %v894_v26 = vmax.f32 %v820_v18, 0.0  ;;  %v694_v27 = vpop.f32.mrf.mxu0  ;;  %v822_v28 = vpop.f32.mrf.mxu1 }
 0x131   : > { %1185 = vst.msk [vmem:[%s1906_s10 + $0x78] sm:$0xf] %vm1154_vm3, %v1472_v21  ;;  %1217 = vst.msk [vmem:[%s1906_s10 + $0xf8] sm:$0xf] %vm1154_vm3, %v1504_v22  ;;  %v865_v29 = vmax.f32 %v703_v23, 0.0  ;;  %v897_v30 = vmax.f32 %v831_v24, 0.0  ;;  %v695_v31 = vadd.f32 %v1895_v37, %v694_v27  ;;  %v823_v32 = vadd.f32 %v1895_v37, %v822_v28 }
 0x132   : > { %v1470_v33 = vpack.c.bf16 %v862_v25, %v862_v25  ;;  %v1502_v34 = vpack.c.bf16 %v894_v26, %v894_v26 }
 0x133   : > { %v1473_v35 = vpack.c.bf16 %v865_v29, %v865_v29  ;;  %v1505_v36 = vpack.c.bf16 %v897_v30, %v897_v30  ;;  %v863_v38 = vmax.f32 %v695_v31, 0.0  ;;  %v895_v39 = vmax.f32 %v823_v32, 0.0 }
 0x134   : > { %1183 = vst.msk [vmem:[%s1906_s10 + $0x70] sm:$0xf] %vm1154_vm3, %v1470_v33  ;;  %1215 = vst.msk [vmem:[%s1906_s10 + $0xf0] sm:$0xf] %vm1154_vm3, %v1502_v34 }
 0x135   : > { %1186 = vst.msk [vmem:[%s1906_s10 + $0x7c] sm:$0xf] %vm1154_vm3, %v1473_v35  ;;  %1218 = vst.msk [vmem:[%s1906_s10 + $0xfc] sm:$0xf] %vm1154_vm3, %v1505_v36  ;;  %v1471_v40 = vpack.c.bf16 %v863_v38, %v863_v38  ;;  %v1503_v41 = vpack.c.bf16 %v895_v39, %v895_v39 }
 0x137   : > { %1184 = vst.msk [vmem:[%s1906_s10 + $0x74] sm:$0xf] %vm1154_vm3, %v1471_v40  ;;  %1216 = vst.msk [vmem:[%s1906_s10 + $0xf4] sm:$0xf] %vm1154_vm3, %v1503_v41 }
 0x138 PF: > { %s15_s12 = sadd.s32 1, %s1738_s12  }
 0x139   : > { %p12_p2 = scmp.ge.s32.totalorder %s15_s12, 6  }
 0x13b   :  { %14 = sbr.rel (!%p12_p2) target bundleno = 2 (0x2), region = 71 }
 0x140   :  { %1241 = vsyncpa [#allocation3], 1 }
 0x141   :  { %1243 = vsyncpa [#allocation3 + $0x1], 1 }
 0x142   :  { %1244 = vsyncpa [#allocation5], 1 }

// kernel: net_forward.23
= control target key start
LH: loop header
LB: loop body
LE: loop exit
PB: predicated region body
PF: predicated region fallthrough
CT: control target
= control target key end

     0   :  { %s1654_s12 = smov 0   ;;  %s1952_s0 = inlined_call_operand.vmem [shape: bf16[2048,45], index: 0, kind: input, shape index: {}]   ;;  %s1953_s1 = inlined_call_operand.vmem [shape: bf16[45,96], index: 1, kind: input, shape index: {}]   ;;  %s1954_s2 = inlined_call_operand.vmem [shape: f32[1,96], index: 2, kind: input, shape index: {}]   ;;  %s1955_s3 = inlined_call_operand.vmem [shape: bf16[2048,96], index: 3, kind: output, shape index: {}]  }
   0x1 LB: > { %s1263_s13 = sadd.s32 4294967295, %s1631_s12   ;;  %p1267_p0 = scmp.ge.s32.totalorder %s1631_s12, 1  ;;  %s1631_s12 = sphi %s1654_s12, %s13_s12  }
   0x2   : > { %p138_p1 = scmp.lt.s32.totalorder %s1631_s12, 5 }
   0x4   : > { %p139_p2 = pnand %p1267_p0, %p138_p1 }
   0x5   : > { %s1268_s16 = sshll.u32 (!%p139_p2), %s1263_s13, 6 }
   0x6   : > { %142 = sbr.rel (%p139_p2) target bundleno = 290 (0x122), region = 32  ;;  %p163_p3 = scmp.lt.s32.totalorder (!%p139_p2), %s1268_s16, 255 }
   0xb   : > { %v1590_v0 = vld [vmem:[%s1953_s1 + $0x10] sm:$0x7f]   ;;  %vm526_vm0 = vcmask 1045504   ;;  %vm527_vm1 = vcmask 1046528   ;;  %v1633_v1 = vmov 65535   ;;  %v1591_v5 = vld [vmem:[%s1953_s1 + $0x8] sm:$0xff]  }
   0xc   : > { %v528_v2 = vsel %vm526_vm0, 4294967295, %v1633_v1  ;;  %s1957_s16 = smov (!%p163_p3, %s1268_s16), 255  ;;  %v1592_v6 = vld [vmem:[%s1953_s1] sm:$0xff]   ;;  %vm429_vm2 = vcmask 367616   ;;  %vm1142_vm3 = vcmask 781312  }
   0xd   : > { %v529_v3 = vsel %vm527_vm1, %v528_v2, 0  ;;  %s1269_s21 = sshll.u32 %s1957_s16, 2  ;;  %v1748_v39 = vld [vmem:[%s1954_s2] ss:$0 sm:$0xff] }
   0xe   : > { %v531_v4 = vand.u32 %v1590_v0, %v529_v3  ;;  %s1679_s24 = scalar_lea.vmem %s1952_s0, %s1269_s21  ;;  %s1759_s29 = scalar_lea.vmem %s1955_s3, %s1269_s21 }
   0xf   : > { %v1593_v7 = vld [vmem:[%s1679_s24] sm:$0xff]   ;;  %v1595_v9 = vld [vmem:[%s1679_s24 + $0x8] sm:$0xff]   ;;  %v1597_v11 = vld [vmem:[%s1679_s24 + $0x10] sm:$0xff]  }
  0x10   : > { %1505 = vmatprep.subr.bf16.mxu0 %v531_v4  ;;  %1575 = vmatprep.subr.bf16.mxu1 %v531_v4  ;;  %v1594_v8 = vld [vmem:[%s1679_s24 + $0x80] sm:$0xff]   ;;  %v1596_v10 = vld [vmem:[%s1679_s24 + $0x88] sm:$0xff]   ;;  %v1598_v12 = vld [vmem:[%s1679_s24 + $0x90] sm:$0xff]  }
  0x11   : > { %1506 = vmatpush3.bf16.msra.mxu0 %v531_v4  ;;  %1578 = vmatpush3.bf16.msra.mxu1 %v531_v4  ;;  %v1599_v13 = vld [vmem:[%s1679_s24 + $0x18] sm:$0xff]   ;;  %v1601_v15 = vld [vmem:[%s1679_s24 + $0x20] sm:$0xff]   ;;  %v1603_v17 = vld [vmem:[%s1679_s24 + $0x28] sm:$0xff]  }
  0x12   : > { %1507 = vmatprep.subr.bf16.mxu0 %v1591_v5  ;;  %1576 = vmatprep.subr.bf16.mxu1 %v1591_v5  ;;  %v1600_v14 = vld [vmem:[%s1679_s24 + $0x98] sm:$0xff]   ;;  %v1602_v16 = vld [vmem:[%s1679_s24 + $0xa0] sm:$0xff]   ;;  %v1604_v18 = vld [vmem:[%s1679_s24 + $0xa8] sm:$0xff]  }
  0x13   : > { %1511 = vmatprep.mubr.msk.bf16.mxu0 %vm429_vm2, %v1593_v7  ;;  %1543 = vmatprep.mubr.msk.bf16.mxu1 %vm429_vm2, %v1594_v8  ;;  %v1605_v19 = vld [vmem:[%s1679_s24 + $0x30] sm:$0xff]   ;;  %v1607_v21 = vld [vmem:[%s1679_s24 + $0x38] sm:$0xff]   ;;  %v1609_v23 = vld [vmem:[%s1679_s24 + $0x40] sm:$0xff]  }
  0x14   : > { %v1606_v20 = vld [vmem:[%s1679_s24 + $0xb0] sm:$0xff]   ;;  %v1608_v22 = vld [vmem:[%s1679_s24 + $0xb8] sm:$0xff]   ;;  %v1610_v24 = vld [vmem:[%s1679_s24 + $0xc0] sm:$0xff]  }
  0x15   : > { %1508 = vmatpush3.bf16.msra.mxu0 %v1591_v5  ;;  %1579 = vmatpush3.bf16.msra.mxu1 %v1591_v5  ;;  %v1611_v25 = vld [vmem:[%s1679_s24 + $0x48] sm:$0xff]   ;;  %v1613_v27 = vld [vmem:[%s1679_s24 + $0x50] sm:$0xff]   ;;  %v1615_v29 = vld [vmem:[%s1679_s24 + $0x58] sm:$0xff]  }
  0x16   : > { %1509 = vmatprep.subr.bf16.mxu0 %v1592_v6  ;;  %1577 = vmatprep.subr.bf16.mxu1 %v1592_v6  ;;  %v1612_v26 = vld [vmem:[%s1679_s24 + $0xc8] sm:$0xff]   ;;  %v1614_v28 = vld [vmem:[%s1679_s24 + $0xd0] sm:$0xff]   ;;  %v1616_v30 = vld [vmem:[%s1679_s24 + $0xd8] sm:$0xff]  }
  0x17   : > { %v1617_v31 = vld [vmem:[%s1679_s24 + $0x60] sm:$0xff]   ;;  %v1619_v33 = vld [vmem:[%s1679_s24 + $0x68] sm:$0xff]   ;;  %v1621_v35 = vld [vmem:[%s1679_s24 + $0x70] sm:$0xff]  }
  0x18   : > { %v1618_v32 = vld [vmem:[%s1679_s24 + $0xe0] sm:$0xff]   ;;  %v1620_v34 = vld [vmem:[%s1679_s24 + $0xe8] sm:$0xff]   ;;  %v1622_v36 = vld [vmem:[%s1679_s24 + $0xf0] sm:$0xff]  }
  0x19   : > { %1510 = vmatpush3.bf16.msra.mxu0 %v1592_v6  ;;  %1580 = vmatpush3.bf16.msra.mxu1 %v1592_v6  ;;  %v1623_v37 = vld [vmem:[%s1679_s24 + $0x78] sm:$0xff]  }
  0x1a   : > { %v1624_v38 = vld [vmem:[%s1679_s24 + $0xf8] sm:$0xff]  }
  0x1c   : > { %1512 = vmatmul.mubr.msk.bf16.vlgmr.msra.gmra.mxu0 %vm429_vm2, %v1595_v9  ;;  %1544 = vmatmul.mubr.msk.bf16.vlgmr.msra.gmra.mxu1 %vm429_vm2, %v1596_v10 }
  0x1d   : > { %1515 = vmatprep.mubr.msk.bf16.mxu0 %vm429_vm2, %v1597_v11  ;;  %1547 = vmatprep.mubr.msk.bf16.mxu1 %vm429_vm2, %v1598_v12 }
  0x24   : > { %1516 = vmatmul.mubr.msk.bf16.gmra.mxu0 %vm429_vm2, %v1599_v13  ;;  %1548 = vmatmul.mubr.msk.bf16.gmra.mxu1 %vm429_vm2, %v1600_v14 }
  0x25   : > { %1519 = vmatprep.mubr.msk.bf16.mxu0 %vm429_vm2, %v1601_v15  ;;  %1551 = vmatprep.mubr.msk.bf16.mxu1 %vm429_vm2, %v1602_v16 }
  0x2c   : > { %1520 = vmatmul.mubr.msk.bf16.gmra.mxu0 %vm429_vm2, %v1603_v17  ;;  %1552 = vmatmul.mubr.msk.bf16.gmra.mxu1 %vm429_vm2, %v1604_v18 }
  0x2d   : > { %1523 = vmatprep.mubr.msk.bf16.mxu0 %vm429_vm2, %v1605_v19  ;;  %1555 = vmatprep.mubr.msk.bf16.mxu1 %vm429_vm2, %v1606_v20 }
  0x34   : > { %1524 = vmatmul.mubr.msk.bf16.gmra.mxu0 %vm429_vm2, %v1607_v21  ;;  %1556 = vmatmul.mubr.msk.bf16.gmra.mxu1 %vm429_vm2, %v1608_v22 }
  0x35   : > { %1527 = vmatprep.mubr.msk.bf16.mxu0 %vm429_vm2, %v1609_v23  ;;  %1559 = vmatprep.mubr.msk.bf16.mxu1 %vm429_vm2, %v1610_v24 }
  0x3c   : > { %1528 = vmatmul.mubr.msk.bf16.gmra.mxu0 %vm429_vm2, %v1611_v25  ;;  %1560 = vmatmul.mubr.msk.bf16.gmra.mxu1 %vm429_vm2, %v1612_v26 }
  0x3d   : > { %1531 = vmatprep.mubr.msk.bf16.mxu0 %vm429_vm2, %v1613_v27  ;;  %1563 = vmatprep.mubr.msk.bf16.mxu1 %vm429_vm2, %v1614_v28 }
  0x44   : > { %1532 = vmatmul.mubr.msk.bf16.gmra.mxu0 %vm429_vm2, %v1615_v29  ;;  %1564 = vmatmul.mubr.msk.bf16.gmra.mxu1 %vm429_vm2, %v1616_v30 }
  0x45   : > { %1535 = vmatprep.mubr.msk.bf16.mxu0 %vm429_vm2, %v1617_v31  ;;  %1567 = vmatprep.mubr.msk.bf16.mxu1 %vm429_vm2, %v1618_v32 }
  0x4c   : > { %1536 = vmatmul.mubr.msk.bf16.gmra.mxu0 %vm429_vm2, %v1619_v33  ;;  %1568 = vmatmul.mubr.msk.bf16.gmra.mxu1 %vm429_vm2, %v1620_v34 }
  0x4d   : > { %1539 = vmatprep.mubr.msk.bf16.mxu0 %vm429_vm2, %v1621_v35  ;;  %1571 = vmatprep.mubr.msk.bf16.mxu1 %vm429_vm2, %v1622_v36 }
  0x54   : > { %1540 = vmatmul.mubr.msk.bf16.gmra.mxu0 %vm429_vm2, %v1623_v37  ;;  %1572 = vmatmul.mubr.msk.bf16.gmra.mxu1 %vm429_vm2, %v1624_v38 }
  0xdc   : > { %v1513_v40 = vpop.f32.mrf.mxu0  ;;  %v1545_v41 = vpop.f32.mrf.mxu1 }
  0xdd   : > { %v576_v42 = vadd.f32 %v1513_v40, %v1748_v39  ;;  %v704_v43 = vadd.f32 %v1545_v41, %v1748_v39 }
  0xde   : > { %v567_v44 = vpop.f32.mrf.mxu0  ;;  %v695_v45 = vpop.f32.mrf.mxu1 }
  0xdf   : > { %v824_v46 = vmax.f32 %v576_v42, 0.0  ;;  %v856_v47 = vmax.f32 %v704_v43, 0.0  ;;  %v568_v48 = vadd.f32 %v1748_v39, %v567_v44  ;;  %v696_v49 = vadd.f32 %v1748_v39, %v695_v45 }
  0xe0   : > { %v1514_v50 = vpop.f32.mrf.mxu0  ;;  %v1546_v51 = vpop.f32.mrf.mxu1 }
  0xe1   : > { %v1408_v52 = vpack.c.bf16 %v824_v46, %v824_v46  ;;  %v1440_v53 = vpack.c.bf16 %v856_v47, %v856_v47  ;;  %v822_v54 = vmax.f32 %v568_v48, 0.0  ;;  %v854_v55 = vmax.f32 %v696_v49, 0.0 }
  0xe2   : > { %v579_v56 = vadd.f32 %v1514_v50, %v1748_v39  ;;  %v707_v57 = vadd.f32 %v1546_v51, %v1748_v39  ;;  %v570_v58 = vpop.f32.mrf.mxu0  ;;  %v698_v59 = vpop.f32.mrf.mxu1 }
  0xe3   : > { %1145 = vst.msk [vmem:[%s1759_s29 + $0x8] sm:$0xf] %vm1142_vm3, %v1408_v52  ;;  %1177 = vst.msk [vmem:[%s1759_s29 + $0x88] sm:$0xf] %vm1142_vm3, %v1440_v53  ;;  %v1406_v60 = vpack.c.bf16 %v822_v54, %v822_v54  ;;  %v1438_v61 = vpack.c.bf16 %v854_v55, %v854_v55  ;;  %v571_v62 = vadd.f32 %v1748_v39, %v570_v58 }
  0xe4   : > { %v699_v63 = vadd.f32 %v1748_v39, %v698_v59  ;;  %v825_v0 = vmax.f32 %v579_v56, 0.0  ;;  %v857_v1 = vmax.f32 %v707_v57, 0.0  ;;  %v1517_v2 = vpop.f32.mrf.mxu0  ;;  %v1549_v3 = vpop.f32.mrf.mxu1 }
  0xe5   : > { %1143 = vst.msk [vmem:[%s1759_s29] sm:$0xf] %vm1142_vm3, %v1406_v60  ;;  %1175 = vst.msk [vmem:[%s1759_s29 + $0x80] sm:$0xf] %vm1142_vm3, %v1438_v61  ;;  %v823_v4 = vmax.f32 %v571_v62, 0.0  ;;  %v592_v6 = vadd.f32 %v1517_v2, %v1748_v39  ;;  %v720_v7 = vadd.f32 %v1549_v3, %v1748_v39 }
  0xe6   : > { %v855_v5 = vmax.f32 %v699_v63, 0.0  ;;  %v1409_v8 = vpack.c.bf16 %v825_v0, %v825_v0  ;;  %v1441_v9 = vpack.c.bf16 %v857_v1, %v857_v1  ;;  %v583_v10 = vpop.f32.mrf.mxu0  ;;  %v711_v11 = vpop.f32.mrf.mxu1 }
  0xe7   : > { %v1407_v12 = vpack.c.bf16 %v823_v4, %v823_v4  ;;  %v828_v14 = vmax.f32 %v592_v6, 0.0  ;;  %v860_v15 = vmax.f32 %v720_v7, 0.0  ;;  %v584_v16 = vadd.f32 %v1748_v39, %v583_v10 }
  0xe8   : > { %v1439_v13 = vpack.c.bf16 %v855_v5, %v855_v5  ;;  %1146 = vst.msk [vmem:[%s1759_s29 + $0xc] sm:$0xf] %vm1142_vm3, %v1409_v8  ;;  %1178 = vst.msk [vmem:[%s1759_s29 + $0x8c] sm:$0xf] %vm1142_vm3, %v1441_v9  ;;  %v712_v17 = vadd.f32 %v1748_v39, %v711_v11  ;;  %v1518_v18 = vpop.f32.mrf.mxu0  ;;  %v1550_v19 = vpop.f32.mrf.mxu1 }
  0xe9   : > { %1144 = vst.msk [vmem:[%s1759_s29 + $0x4] sm:$0xf] %vm1142_vm3, %v1407_v12  ;;  %v1412_v20 = vpack.c.bf16 %v828_v14, %v828_v14  ;;  %v1444_v21 = vpack.c.bf16 %v860_v15, %v860_v15  ;;  %v595_v22 = vadd.f32 %v1518_v18, %v1748_v39  ;;  %v723_v23 = vadd.f32 %v1550_v19, %v1748_v39 }
  0xea   : > { %1176 = vst.msk [vmem:[%s1759_s29 + $0x84] sm:$0xf] %vm1142_vm3, %v1439_v13  ;;  %v826_v24 = vmax.f32 %v584_v16, 0.0  ;;  %v858_v25 = vmax.f32 %v712_v17, 0.0  ;;  %v586_v26 = vpop.f32.mrf.mxu0  ;;  %v714_v27 = vpop.f32.mrf.mxu1 }
  0xeb   : > { %1149 = vst.msk [vmem:[%s1759_s29 + $0x18] sm:$0xf] %vm1142_vm3, %v1412_v20  ;;  %1181 = vst.msk [vmem:[%s1759_s29 + $0x98] sm:$0xf] %vm1142_vm3, %v1444_v21  ;;  %v829_v28 = vmax.f32 %v595_v22, 0.0  ;;  %v861_v29 = vmax.f32 %v723_v23, 0.0  ;;  %v587_v30 = vadd.f32 %v1748_v39, %v586_v26  ;;  %v715_v31 = vadd.f32 %v1748_v39, %v714_v27 }
  0xec   : > { %v1410_v32 = vpack.c.bf16 %v826_v24, %v826_v24  ;;  %v1442_v33 = vpack.c.bf16 %v858_v25, %v858_v25  ;;  %v1521_v34 = vpop.f32.mrf.mxu0  ;;  %v1553_v35 = vpop.f32.mrf.mxu1 }
  0xed   : > { %v1413_v36 = vpack.c.bf16 %v829_v28, %v829_v28  ;;  %v1445_v37 = vpack.c.bf16 %v861_v29, %v861_v29  ;;  %v827_v38 = vmax.f32 %v587_v30, 0.0  ;;  %v859_v40 = vmax.f32 %v715_v31, 0.0 }
  0xee   : > { %1147 = vst.msk [vmem:[%s1759_s29 + $0x10] sm:$0xf] %vm1142_vm3, %v1410_v32  ;;  %1179 = vst.msk [vmem:[%s1759_s29 + $0x90] sm:$0xf] %vm1142_vm3, %v1442_v33  ;;  %v608_v41 = vadd.f32 %v1521_v34, %v1748_v39  ;;  %v736_v42 = vadd.f32 %v1553_v35, %v1748_v39  ;;  %v599_v43 = vpop.f32.mrf.mxu0  ;;  %v727_v44 = vpop.f32.mrf.mxu1 }
  0xef   : > { %1150 = vst.msk [vmem:[%s1759_s29 + $0x1c] sm:$0xf] %vm1142_vm3, %v1413_v36  ;;  %1182 = vst.msk [vmem:[%s1759_s29 + $0x9c] sm:$0xf] %vm1142_vm3, %v1445_v37  ;;  %v1411_v45 = vpack.c.bf16 %v827_v38, %v827_v38  ;;  %v1443_v46 = vpack.c.bf16 %v859_v40, %v859_v40  ;;  %v600_v47 = vadd.f32 %v1748_v39, %v599_v43 }
  0xf0   : > { %v728_v48 = vadd.f32 %v1748_v39, %v727_v44  ;;  %v832_v49 = vmax.f32 %v608_v41, 0.0  ;;  %v864_v50 = vmax.f32 %v736_v42, 0.0  ;;  %v1522_v51 = vpop.f32.mrf.mxu0  ;;  %v1554_v52 = vpop.f32.mrf.mxu1 }
  0xf1   : > { %1148 = vst.msk [vmem:[%s1759_s29 + $0x14] sm:$0xf] %vm1142_vm3, %v1411_v45  ;;  %1180 = vst.msk [vmem:[%s1759_s29 + $0x94] sm:$0xf] %vm1142_vm3, %v1443_v46  ;;  %v830_v53 = vmax.f32 %v600_v47, 0.0  ;;  %v611_v55 = vadd.f32 %v1522_v51, %v1748_v39  ;;  %v739_v56 = vadd.f32 %v1554_v52, %v1748_v39 }
  0xf2   : > { %v862_v54 = vmax.f32 %v728_v48, 0.0  ;;  %v1416_v57 = vpack.c.bf16 %v832_v49, %v832_v49  ;;  %v1448_v58 = vpack.c.bf16 %v864_v50, %v864_v50  ;;  %v602_v59 = vpop.f32.mrf.mxu0  ;;  %v730_v60 = vpop.f32.mrf.mxu1 }
  0xf3   : > { %v1414_v61 = vpack.c.bf16 %v830_v53, %v830_v53  ;;  %v833_v63 = vmax.f32 %v611_v55, 0.0  ;;  %v865_v0 = vmax.f32 %v739_v56, 0.0  ;;  %v603_v1 = vadd.f32 %v1748_v39, %v602_v59 }
  0xf4   : > { %v1446_v62 = vpack.c.bf16 %v862_v54, %v862_v54  ;;  %1153 = vst.msk [vmem:[%s1759_s29 + $0x28] sm:$0xf] %vm1142_vm3, %v1416_v57  ;;  %1185 = vst.msk [vmem:[%s1759_s29 + $0xa8] sm:$0xf] %vm1142_vm3, %v1448_v58  ;;  %v731_v2 = vadd.f32 %v1748_v39, %v730_v60  ;;  %v1525_v3 = vpop.f32.mrf.mxu0  ;;  %v1557_v4 = vpop.f32.mrf.mxu1 }
  0xf5   : > { %1151 = vst.msk [vmem:[%s1759_s29 + $0x20] sm:$0xf] %vm1142_vm3, %v1414_v61  ;;  %v1417_v5 = vpack.c.bf16 %v833_v63, %v833_v63  ;;  %v1449_v6 = vpack.c.bf16 %v865_v0, %v865_v0  ;;  %v624_v7 = vadd.f32 %v1525_v3, %v1748_v39  ;;  %v752_v8 = vadd.f32 %v1557_v4, %v1748_v39 }
  0xf6   : > { %1183 = vst.msk [vmem:[%s1759_s29 + $0xa0] sm:$0xf] %vm1142_vm3, %v1446_v62  ;;  %v831_v9 = vmax.f32 %v603_v1, 0.0  ;;  %v863_v10 = vmax.f32 %v731_v2, 0.0  ;;  %v615_v11 = vpop.f32.mrf.mxu0  ;;  %v743_v12 = vpop.f32.mrf.mxu1 }
  0xf7   : > { %1154 = vst.msk [vmem:[%s1759_s29 + $0x2c] sm:$0xf] %vm1142_vm3, %v1417_v5  ;;  %1186 = vst.msk [vmem:[%s1759_s29 + $0xac] sm:$0xf] %vm1142_vm3, %v1449_v6  ;;  %v836_v13 = vmax.f32 %v624_v7, 0.0  ;;  %v868_v14 = vmax.f32 %v752_v8, 0.0  ;;  %v616_v15 = vadd.f32 %v1748_v39, %v615_v11  ;;  %v744_v16 = vadd.f32 %v1748_v39, %v743_v12 }
  0xf8   : > { %v1415_v17 = vpack.c.bf16 %v831_v9, %v831_v9  ;;  %v1447_v18 = vpack.c.bf16 %v863_v10, %v863_v10  ;;  %v1526_v19 = vpop.f32.mrf.mxu0  ;;  %v1558_v20 = vpop.f32.mrf.mxu1 }
  0xf9   : > { %v1420_v21 = vpack.c.bf16 %v836_v13, %v836_v13  ;;  %v1452_v22 = vpack.c.bf16 %v868_v14, %v868_v14  ;;  %v834_v23 = vmax.f32 %v616_v15, 0.0  ;;  %v866_v24 = vmax.f32 %v744_v16, 0.0 }
  0xfa   : > { %1152 = vst.msk [vmem:[%s1759_s29 + $0x24] sm:$0xf] %vm1142_vm3, %v1415_v17  ;;  %1184 = vst.msk [vmem:[%s1759_s29 + $0xa4] sm:$0xf] %vm1142_vm3, %v1447_v18  ;;  %v627_v25 = vadd.f32 %v1526_v19, %v1748_v39  ;;  %v755_v26 = vadd.f32 %v1558_v20, %v1748_v39  ;;  %v618_v27 = vpop.f32.mrf.mxu0  ;;  %v746_v28 = vpop.f32.mrf.mxu1 }
  0xfb   : > { %1157 = vst.msk [vmem:[%s1759_s29 + $0x38] sm:$0xf] %vm1142_vm3, %v1420_v21  ;;  %1189 = vst.msk [vmem:[%s1759_s29 + $0xb8] sm:$0xf] %vm1142_vm3, %v1452_v22  ;;  %v1418_v29 = vpack.c.bf16 %v834_v23, %v834_v23  ;;  %v1450_v30 = vpack.c.bf16 %v866_v24, %v866_v24  ;;  %v619_v31 = vadd.f32 %v1748_v39, %v618_v27 }
  0xfc   : > { %v747_v32 = vadd.f32 %v1748_v39, %v746_v28  ;;  %v837_v33 = vmax.f32 %v627_v25, 0.0  ;;  %v869_v34 = vmax.f32 %v755_v26, 0.0  ;;  %v1529_v35 = vpop.f32.mrf.mxu0  ;;  %v1561_v36 = vpop.f32.mrf.mxu1 }
  0xfd   : > { %1155 = vst.msk [vmem:[%s1759_s29 + $0x30] sm:$0xf] %vm1142_vm3, %v1418_v29  ;;  %1187 = vst.msk [vmem:[%s1759_s29 + $0xb0] sm:$0xf] %vm1142_vm3, %v1450_v30  ;;  %v835_v37 = vmax.f32 %v619_v31, 0.0  ;;  %v640_v40 = vadd.f32 %v1529_v35, %v1748_v39  ;;  %v768_v41 = vadd.f32 %v1561_v36, %v1748_v39 }
  0xfe   : > { %v867_v38 = vmax.f32 %v747_v32, 0.0  ;;  %v1421_v42 = vpack.c.bf16 %v837_v33, %v837_v33  ;;  %v1453_v43 = vpack.c.bf16 %v869_v34, %v869_v34  ;;  %v631_v44 = vpop.f32.mrf.mxu0  ;;  %v759_v45 = vpop.f32.mrf.mxu1 }
  0xff   : > { %v1419_v46 = vpack.c.bf16 %v835_v37, %v835_v37  ;;  %v840_v48 = vmax.f32 %v640_v40, 0.0  ;;  %v872_v49 = vmax.f32 %v768_v41, 0.0  ;;  %v632_v50 = vadd.f32 %v1748_v39, %v631_v44 }
 0x100   : > { %v1451_v47 = vpack.c.bf16 %v867_v38, %v867_v38  ;;  %1158 = vst.msk [vmem:[%s1759_s29 + $0x3c] sm:$0xf] %vm1142_vm3, %v1421_v42  ;;  %1190 = vst.msk [vmem:[%s1759_s29 + $0xbc] sm:$0xf] %vm1142_vm3, %v1453_v43  ;;  %v760_v51 = vadd.f32 %v1748_v39, %v759_v45  ;;  %v1530_v52 = vpop.f32.mrf.mxu0  ;;  %v1562_v53 = vpop.f32.mrf.mxu1 }
 0x101   : > { %1156 = vst.msk [vmem:[%s1759_s29 + $0x34] sm:$0xf] %vm1142_vm3, %v1419_v46  ;;  %v1424_v54 = vpack.c.bf16 %v840_v48, %v840_v48  ;;  %v1456_v55 = vpack.c.bf16 %v872_v49, %v872_v49  ;;  %v643_v56 = vadd.f32 %v1530_v52, %v1748_v39  ;;  %v771_v57 = vadd.f32 %v1562_v53, %v1748_v39 }
 0x102   : > { %1188 = vst.msk [vmem:[%s1759_s29 + $0xb4] sm:$0xf] %vm1142_vm3, %v1451_v47  ;;  %v838_v58 = vmax.f32 %v632_v50, 0.0  ;;  %v870_v59 = vmax.f32 %v760_v51, 0.0  ;;  %v634_v60 = vpop.f32.mrf.mxu0  ;;  %v762_v61 = vpop.f32.mrf.mxu1 }
 0x103   : > { %1161 = vst.msk [vmem:[%s1759_s29 + $0x48] sm:$0xf] %vm1142_vm3, %v1424_v54  ;;  %1193 = vst.msk [vmem:[%s1759_s29 + $0xc8] sm:$0xf] %vm1142_vm3, %v1456_v55  ;;  %v841_v62 = vmax.f32 %v643_v56, 0.0  ;;  %v873_v63 = vmax.f32 %v771_v57, 0.0  ;;  %v635_v0 = vadd.f32 %v1748_v39, %v634_v60  ;;  %v763_v1 = vadd.f32 %v1748_v39, %v762_v61 }
 0x104   : > { %v1422_v2 = vpack.c.bf16 %v838_v58, %v838_v58  ;;  %v1454_v3 = vpack.c.bf16 %v870_v59, %v870_v59  ;;  %v1533_v4 = vpop.f32.mrf.mxu0  ;;  %v1565_v5 = vpop.f32.mrf.mxu1 }
 0x105   : > { %v1425_v6 = vpack.c.bf16 %v841_v62, %v841_v62  ;;  %v1457_v7 = vpack.c.bf16 %v873_v63, %v873_v63  ;;  %v839_v8 = vmax.f32 %v635_v0, 0.0  ;;  %v871_v9 = vmax.f32 %v763_v1, 0.0 }
 0x106   : > { %1159 = vst.msk [vmem:[%s1759_s29 + $0x40] sm:$0xf] %vm1142_vm3, %v1422_v2  ;;  %1191 = vst.msk [vmem:[%s1759_s29 + $0xc0] sm:$0xf] %vm1142_vm3, %v1454_v3  ;;  %v656_v10 = vadd.f32 %v1533_v4, %v1748_v39  ;;  %v784_v11 = vadd.f32 %v1565_v5, %v1748_v39  ;;  %v647_v12 = vpop.f32.mrf.mxu0  ;;  %v775_v13 = vpop.f32.mrf.mxu1 }
 0x107   : > { %1162 = vst.msk [vmem:[%s1759_s29 + $0x4c] sm:$0xf] %vm1142_vm3, %v1425_v6  ;;  %1194 = vst.msk [vmem:[%s1759_s29 + $0xcc] sm:$0xf] %vm1142_vm3, %v1457_v7  ;;  %v1423_v14 = vpack.c.bf16 %v839_v8, %v839_v8  ;;  %v1455_v15 = vpack.c.bf16 %v871_v9, %v871_v9  ;;  %v648_v16 = vadd.f32 %v1748_v39, %v647_v12 }
 0x108   : > { %v776_v17 = vadd.f32 %v1748_v39, %v775_v13  ;;  %v844_v18 = vmax.f32 %v656_v10, 0.0  ;;  %v876_v19 = vmax.f32 %v784_v11, 0.0  ;;  %v1534_v20 = vpop.f32.mrf.mxu0  ;;  %v1566_v21 = vpop.f32.mrf.mxu1 }
 0x109   : > { %1160 = vst.msk [vmem:[%s1759_s29 + $0x44] sm:$0xf] %vm1142_vm3, %v1423_v14  ;;  %1192 = vst.msk [vmem:[%s1759_s29 + $0xc4] sm:$0xf] %vm1142_vm3, %v1455_v15  ;;  %v842_v22 = vmax.f32 %v648_v16, 0.0  ;;  %v659_v24 = vadd.f32 %v1534_v20, %v1748_v39  ;;  %v787_v25 = vadd.f32 %v1566_v21, %v1748_v39 }
 0x10a   : > { %v874_v23 = vmax.f32 %v776_v17, 0.0  ;;  %v1428_v26 = vpack.c.bf16 %v844_v18, %v844_v18  ;;  %v1460_v27 = vpack.c.bf16 %v876_v19, %v876_v19  ;;  %v650_v28 = vpop.f32.mrf.mxu0  ;;  %v778_v29 = vpop.f32.mrf.mxu1 }
 0x10b   : > { %v1426_v30 = vpack.c.bf16 %v842_v22, %v842_v22  ;;  %v845_v32 = vmax.f32 %v659_v24, 0.0  ;;  %v877_v33 = vmax.f32 %v787_v25, 0.0  ;;  %v651_v34 = vadd.f32 %v1748_v39, %v650_v28 }
 0x10c   : > { %v1458_v31 = vpack.c.bf16 %v874_v23, %v874_v23  ;;  %1165 = vst.msk [vmem:[%s1759_s29 + $0x58] sm:$0xf] %vm1142_vm3, %v1428_v26  ;;  %1197 = vst.msk [vmem:[%s1759_s29 + $0xd8] sm:$0xf] %vm1142_vm3, %v1460_v27  ;;  %v779_v35 = vadd.f32 %v1748_v39, %v778_v29  ;;  %v1537_v36 = vpop.f32.mrf.mxu0  ;;  %v1569_v37 = vpop.f32.mrf.mxu1 }
 0x10d   : > { %1163 = vst.msk [vmem:[%s1759_s29 + $0x50] sm:$0xf] %vm1142_vm3, %v1426_v30  ;;  %v1429_v38 = vpack.c.bf16 %v845_v32, %v845_v32  ;;  %v1461_v40 = vpack.c.bf16 %v877_v33, %v877_v33  ;;  %v672_v41 = vadd.f32 %v1537_v36, %v1748_v39  ;;  %v800_v42 = vadd.f32 %v1569_v37, %v1748_v39 }
 0x10e   : > { %1195 = vst.msk [vmem:[%s1759_s29 + $0xd0] sm:$0xf] %vm1142_vm3, %v1458_v31  ;;  %v843_v43 = vmax.f32 %v651_v34, 0.0  ;;  %v875_v44 = vmax.f32 %v779_v35, 0.0  ;;  %v663_v45 = vpop.f32.mrf.mxu0  ;;  %v791_v46 = vpop.f32.mrf.mxu1 }
 0x10f   : > { %1166 = vst.msk [vmem:[%s1759_s29 + $0x5c] sm:$0xf] %vm1142_vm3, %v1429_v38  ;;  %1198 = vst.msk [vmem:[%s1759_s29 + $0xdc] sm:$0xf] %vm1142_vm3, %v1461_v40  ;;  %v848_v47 = vmax.f32 %v672_v41, 0.0  ;;  %v880_v48 = vmax.f32 %v800_v42, 0.0  ;;  %v664_v49 = vadd.f32 %v1748_v39, %v663_v45  ;;  %v792_v50 = vadd.f32 %v1748_v39, %v791_v46 }
 0x110   : > { %v1427_v51 = vpack.c.bf16 %v843_v43, %v843_v43  ;;  %v1459_v52 = vpack.c.bf16 %v875_v44, %v875_v44  ;;  %v1538_v53 = vpop.f32.mrf.mxu0  ;;  %v1570_v54 = vpop.f32.mrf.mxu1 }
 0x111   : > { %v1432_v55 = vpack.c.bf16 %v848_v47, %v848_v47  ;;  %v1464_v56 = vpack.c.bf16 %v880_v48, %v880_v48  ;;  %v846_v57 = vmax.f32 %v664_v49, 0.0  ;;  %v878_v58 = vmax.f32 %v792_v50, 0.0 }
 0x112   : > { %1164 = vst.msk [vmem:[%s1759_s29 + $0x54] sm:$0xf] %vm1142_vm3, %v1427_v51  ;;  %1196 = vst.msk [vmem:[%s1759_s29 + $0xd4] sm:$0xf] %vm1142_vm3, %v1459_v52  ;;  %v675_v59 = vadd.f32 %v1538_v53, %v1748_v39  ;;  %v803_v60 = vadd.f32 %v1570_v54, %v1748_v39  ;;  %v666_v61 = vpop.f32.mrf.mxu0  ;;  %v794_v62 = vpop.f32.mrf.mxu1 }
 0x113   : > { %1169 = vst.msk [vmem:[%s1759_s29 + $0x68] sm:$0xf] %vm1142_vm3, %v1432_v55  ;;  %1201 = vst.msk [vmem:[%s1759_s29 + $0xe8] sm:$0xf] %vm1142_vm3, %v1464_v56  ;;  %v1430_v63 = vpack.c.bf16 %v846_v57, %v846_v57  ;;  %v1462_v0 = vpack.c.bf16 %v878_v58, %v878_v58  ;;  %v667_v1 = vadd.f32 %v1748_v39, %v666_v61 }
 0x114   : > { %v795_v2 = vadd.f32 %v1748_v39, %v794_v62  ;;  %v849_v3 = vmax.f32 %v675_v59, 0.0  ;;  %v881_v4 = vmax.f32 %v803_v60, 0.0  ;;  %v1541_v5 = vpop.f32.mrf.mxu0  ;;  %v1573_v6 = vpop.f32.mrf.mxu1 }
 0x115   : > { %1167 = vst.msk [vmem:[%s1759_s29 + $0x60] sm:$0xf] %vm1142_vm3, %v1430_v63  ;;  %1199 = vst.msk [vmem:[%s1759_s29 + $0xe0] sm:$0xf] %vm1142_vm3, %v1462_v0  ;;  %v847_v7 = vmax.f32 %v667_v1, 0.0  ;;  %v688_v9 = vadd.f32 %v1541_v5, %v1748_v39  ;;  %v816_v10 = vadd.f32 %v1573_v6, %v1748_v39 }
 0x116   : > { %v879_v8 = vmax.f32 %v795_v2, 0.0  ;;  %v1433_v11 = vpack.c.bf16 %v849_v3, %v849_v3  ;;  %v1465_v12 = vpack.c.bf16 %v881_v4, %v881_v4  ;;  %v679_v13 = vpop.f32.mrf.mxu0  ;;  %v807_v14 = vpop.f32.mrf.mxu1 }
 0x117   : > { %v1431_v15 = vpack.c.bf16 %v847_v7, %v847_v7  ;;  %v852_v17 = vmax.f32 %v688_v9, 0.0  ;;  %v884_v18 = vmax.f32 %v816_v10, 0.0  ;;  %v680_v19 = vadd.f32 %v1748_v39, %v679_v13 }
 0x118   : > { %v1463_v16 = vpack.c.bf16 %v879_v8, %v879_v8  ;;  %1170 = vst.msk [vmem:[%s1759_s29 + $0x6c] sm:$0xf] %vm1142_vm3, %v1433_v11  ;;  %1202 = vst.msk [vmem:[%s1759_s29 + $0xec] sm:$0xf] %vm1142_vm3, %v1465_v12  ;;  %v808_v20 = vadd.f32 %v1748_v39, %v807_v14  ;;  %v1542_v21 = vpop.f32.mrf.mxu0  ;;  %v1574_v22 = vpop.f32.mrf.mxu1 }
 0x119   : > { %1168 = vst.msk [vmem:[%s1759_s29 + $0x64] sm:$0xf] %vm1142_vm3, %v1431_v15  ;;  %v1436_v23 = vpack.c.bf16 %v852_v17, %v852_v17  ;;  %v1468_v24 = vpack.c.bf16 %v884_v18, %v884_v18  ;;  %v691_v25 = vadd.f32 %v1542_v21, %v1748_v39  ;;  %v819_v26 = vadd.f32 %v1574_v22, %v1748_v39 }
 0x11a   : > { %1200 = vst.msk [vmem:[%s1759_s29 + $0xe4] sm:$0xf] %vm1142_vm3, %v1463_v16  ;;  %v850_v27 = vmax.f32 %v680_v19, 0.0  ;;  %v882_v28 = vmax.f32 %v808_v20, 0.0  ;;  %v682_v29 = vpop.f32.mrf.mxu0  ;;  %v810_v30 = vpop.f32.mrf.mxu1 }
 0x11b   : > { %1173 = vst.msk [vmem:[%s1759_s29 + $0x78] sm:$0xf] %vm1142_vm3, %v1436_v23  ;;  %1205 = vst.msk [vmem:[%s1759_s29 + $0xf8] sm:$0xf] %vm1142_vm3, %v1468_v24  ;;  %v853_v31 = vmax.f32 %v691_v25, 0.0  ;;  %v885_v32 = vmax.f32 %v819_v26, 0.0  ;;  %v683_v33 = vadd.f32 %v1748_v39, %v682_v29  ;;  %v811_v34 = vadd.f32 %v1748_v39, %v810_v30 }
 0x11c   : > { %v1434_v35 = vpack.c.bf16 %v850_v27, %v850_v27  ;;  %v1466_v36 = vpack.c.bf16 %v882_v28, %v882_v28 }
 0x11d   : > { %v1437_v37 = vpack.c.bf16 %v853_v31, %v853_v31  ;;  %v1469_v38 = vpack.c.bf16 %v885_v32, %v885_v32  ;;  %v851_v40 = vmax.f32 %v683_v33, 0.0  ;;  %v883_v41 = vmax.f32 %v811_v34, 0.0 }
 0x11e   : > { %1171 = vst.msk [vmem:[%s1759_s29 + $0x70] sm:$0xf] %vm1142_vm3, %v1434_v35  ;;  %1203 = vst.msk [vmem:[%s1759_s29 + $0xf0] sm:$0xf] %vm1142_vm3, %v1466_v36 }
 0x11f   : > { %1174 = vst.msk [vmem:[%s1759_s29 + $0x7c] sm:$0xf] %vm1142_vm3, %v1437_v37  ;;  %1206 = vst.msk [vmem:[%s1759_s29 + $0xfc] sm:$0xf] %vm1142_vm3, %v1469_v38  ;;  %v1435_v42 = vpack.c.bf16 %v851_v40, %v851_v40  ;;  %v1467_v43 = vpack.c.bf16 %v883_v41, %v883_v41 }
 0x121   : > { %1172 = vst.msk [vmem:[%s1759_s29 + $0x74] sm:$0xf] %vm1142_vm3, %v1435_v42  ;;  %1204 = vst.msk [vmem:[%s1759_s29 + $0xf4] sm:$0xf] %vm1142_vm3, %v1467_v43 }
 0x122 PF: > { %s13_s12 = sadd.s32 1, %s1631_s12  }
 0x123   : > { %p10_p4 = scmp.ge.s32.totalorder %s13_s12, 6  }
 0x125   :  { %12 = sbr.rel (!%p10_p4) target bundleno = 1 (0x1), region = 62 }

// kernel: net_forward.24
= control target key start
LH: loop header
LB: loop body
LE: loop exit
PB: predicated region body
PF: predicated region fallthrough
CT: control target
= control target key end

     0   :  { %s2658_s12 = smov 0   ;;  %s3217_s0 = inlined_call_operand.vmem [shape: bf16[2048,288], index: 0, kind: input, shape index: {}]   ;;  %s3218_s1 = inlined_call_operand.vmem [shape: bf16[288,96], index: 1, kind: input, shape index: {}]   ;;  %s3219_s2 = inlined_call_operand.vmem [shape: f32[1,96], index: 2, kind: input, shape index: {}]   ;;  %s3220_s3 = inlined_call_operand.vmem [shape: bf16[2048,96], index: 3, kind: output, shape index: {}]  }
   0x1 LB: > { %s2053_s13 = sadd.s32 4294967295, %s2635_s12   ;;  %p2057_p0 = scmp.ge.s32.totalorder %s2635_s12, 1  ;;  %s2635_s12 = sphi %s2658_s12, %s13_s12  }
   0x2   : > { %p139_p1 = scmp.lt.s32.totalorder %s2635_s12, 5 }
   0x4   : > { %p140_p2 = pnand %p2057_p0, %p139_p1 }
   0x5   : > { %s2058_s16 = sshll.u32 (!%p140_p2), %s2053_s13, 6 }
   0x6   : > { %143 = sbr.rel (%p140_p2) target bundleno = 466 (0x1d2), region = 32  ;;  %p165_p3 = scmp.lt.s32.totalorder (!%p140_p2), %s2058_s16, 255 }
   0xb   : > { %v2483_v0 = vld [vmem:[%s3218_s1 + $0x38] sm:$0xff]   ;;  %v2637_v1 = vmov 0   ;;  %v2484_v2 = vld [vmem:[%s3218_s1 + $0x30] sm:$0xff]   ;;  %v2485_v3 = vld [vmem:[%s3218_s1 + $0x28] sm:$0xff]   ;;  %s3222_s16 = smov (!%p165_p3, %s2058_s16), 255  ;;  %vm937_vm0 = vcmask 261120  }
   0xc   : > { %1034 = vmatprep.subr.bf16.mxu0 %v2637_v1  ;;  %2441 = vmatprep.subr.bf16.mxu1 %v2637_v1  ;;  %v2486_v4 = vld [vmem:[%s3218_s1 + $0x20] sm:$0xff]   ;;  %s2473_s23 = smul.u32 12, %s3222_s16  ;;  %v2487_v5 = vld [vmem:[%s3218_s1 + $0x18] sm:$0xff]   ;;  %v2488_v7 = vld [vmem:[%s3218_s1 + $0x10] sm:$0xff]   ;;  %s2061_s5 = sshll.u32 %s3222_s16, 2  ;;  %vm1932_vm1 = vcmask 781312  }
   0xd   : > { %1035 = vmatpush1.bf16.msra.mxu0 %v2483_v0  ;;  %2457 = vmatpush1.bf16.msra.mxu1 %v2483_v0  ;;  %v2489_v9 = vld [vmem:[%s3218_s1 + $0x8] sm:$0xff]   ;;  %v2490_v10 = vld [vmem:[%s3218_s1] sm:$0xff]   ;;  %v2491_v11 = vld [vmem:[%s3218_s1 + $0x78] sm:$0xff]   ;;  %s2961_s8 = scalar_lea.vmem %s3220_s3, %s2061_s5 }
   0xe   : > { %1036 = vmatprep.subr.bf16.mxu0 %v2637_v1  ;;  %2442 = vmatprep.subr.bf16.mxu1 %v2637_v1  ;;  %s2695_s28 = scalar_lea.vmem %s3217_s0, %s2473_s23  ;;  %v2492_v12 = vld [vmem:[%s3218_s1 + $0x70] sm:$0xff]   ;;  %v2493_v13 = vld [vmem:[%s3218_s1 + $0x68] sm:$0xff]   ;;  %v2494_v14 = vld [vmem:[%s3218_s1 + $0x60] sm:$0xff]  }
   0xf   : > { %v2501_v6 = vld [vmem:[%s2695_s28 + $0x4] ss:$12 sps:$4 sm:$0xff]   ;;  %v2495_v15 = vld [vmem:[%s3218_s1 + $0x58] sm:$0xff]   ;;  %v2497_v17 = vld [vmem:[%s3218_s1 + $0x48] sm:$0xff]  }
  0x10   : > { %v2504_v8 = vld [vmem:[%s2695_s28 + $0x244] ss:$12 sps:$4 sm:$0xff]   ;;  %1066 = vmatprep.mubr.bf16.mxu0 %v2501_v6  ;;  %v2505_v19 = vld [vmem:[%s3218_s1 + $0x88] sm:$0xff]   ;;  %v2512_v27 = vld [vmem:[%s2695_s28 + $0x34] ss:$12 sps:$4 sm:$0xff]  }
  0x11   : > { %1037 = vmatpush1.bf16.msra.mxu0 %v2484_v2  ;;  %2458 = vmatpush1.bf16.msra.mxu1 %v2484_v2  ;;  %v2496_v16 = vld [vmem:[%s3218_s1 + $0x50] sm:$0xff]   ;;  %v2498_v18 = vld [vmem:[%s3218_s1 + $0x40] sm:$0xff]   ;;  %v2506_v22 = vld [vmem:[%s2695_s28 + $0x1c] ss:$12 sps:$4 sm:$0xff]  }
  0x12   : > { %1038 = vmatprep.subr.bf16.mxu0 %v2637_v1  ;;  %2443 = vmatprep.subr.bf16.mxu1 %v2637_v1  ;;  %v2499_v20 = vld [vmem:[%s2695_s28] ss:$12 sps:$4 sm:$0xff]   ;;  %v2508_v23 = vld [vmem:[%s2695_s28 + $0x25c] ss:$12 sps:$4 sm:$0xff]   ;;  %v2510_v25 = vld [vmem:[%s2695_s28 + $0x18] ss:$12 sps:$4 sm:$0xff]  }
  0x13   : > { %1258 = vmatprep.mubr.bf16.mxu1 %v2504_v8  ;;  %v2502_v21 = vld [vmem:[%s2695_s28 + $0x240] ss:$12 sps:$4 sm:$0xff]   ;;  %v2511_v26 = vld [vmem:[%s2695_s28 + $0x258] ss:$12 sps:$4 sm:$0xff]   ;;  %v2516_v29 = vld [vmem:[%s2695_s28 + $0x30] ss:$12 sps:$4 sm:$0xff]  }
  0x14   : > { %v2530_v24 = vld [vmem:[%s3218_s1 + $0x80] sm:$0xff]   ;;  %v2517_v30 = vld [vmem:[%s2695_s28 + $0x270] ss:$12 sps:$4 sm:$0xff]   ;;  %v2518_v31 = vld [vmem:[%s2695_s28 + $0x4c] ss:$12 sps:$4 sm:$0xff]  }
  0x15   : > { %1039 = vmatpush1.bf16.msra.mxu0 %v2485_v3  ;;  %2459 = vmatpush1.bf16.msra.mxu1 %v2485_v3  ;;  %v2514_v28 = vld [vmem:[%s2695_s28 + $0x274] ss:$12 sps:$4 sm:$0xff]   ;;  %v2520_v32 = vld [vmem:[%s2695_s28 + $0x28c] ss:$12 sps:$4 sm:$0xff]   ;;  %v2524_v35 = vld [vmem:[%s2695_s28 + $0x64] ss:$12 sps:$4 sm:$0xff]  }
  0x16   : > { %1040 = vmatprep.subr.bf16.mxu0 %v2637_v1  ;;  %2444 = vmatprep.subr.bf16.mxu1 %v2637_v1  ;;  %v2522_v33 = vld [vmem:[%s2695_s28 + $0x48] ss:$12 sps:$4 sm:$0xff]   ;;  %v2526_v36 = vld [vmem:[%s2695_s28 + $0x2a4] ss:$12 sps:$4 sm:$0xff]   ;;  %v2528_v37 = vld [vmem:[%s2695_s28 + $0x60] ss:$12 sps:$4 sm:$0xff]  }
  0x17   : > { %v2523_v34 = vld [vmem:[%s2695_s28 + $0x288] ss:$12 sps:$4 sm:$0xff]   ;;  %v2529_v38 = vld [vmem:[%s2695_s28 + $0x2a0] ss:$12 sps:$4 sm:$0xff]   ;;  %v2535_v41 = vld [vmem:[%s2695_s28 + $0x78] ss:$12 sps:$4 sm:$0xff]  }
  0x18   : > { %v2531_v39 = vld [vmem:[%s2695_s28 + $0x7c] ss:$12 sps:$4 sm:$0xff]   ;;  %v2536_v42 = vld [vmem:[%s2695_s28 + $0x2b8] ss:$12 sps:$4 sm:$0xff]   ;;  %v2537_v43 = vld [vmem:[%s2695_s28 + $0x94] ss:$12 sps:$4 sm:$0xff]  }
  0x19   : > { %1041 = vmatpush1.bf16.msra.mxu0 %v2486_v4  ;;  %2460 = vmatpush1.bf16.msra.mxu1 %v2486_v4  ;;  %v2533_v40 = vld [vmem:[%s2695_s28 + $0x2bc] ss:$12 sps:$4 sm:$0xff]   ;;  %v2539_v44 = vld [vmem:[%s2695_s28 + $0x2d4] ss:$12 sps:$4 sm:$0xff]   ;;  %v2543_v47 = vld [vmem:[%s2695_s28 + $0xac] ss:$12 sps:$4 sm:$0xff]  }
  0x1a   : > { %1042 = vmatprep.subr.bf16.mxu0 %v2637_v1  ;;  %2445 = vmatprep.subr.bf16.mxu1 %v2637_v1  ;;  %v2541_v45 = vld [vmem:[%s2695_s28 + $0x90] ss:$12 sps:$4 sm:$0xff]   ;;  %v2545_v48 = vld [vmem:[%s2695_s28 + $0x2ec] ss:$12 sps:$4 sm:$0xff]   ;;  %v2547_v49 = vld [vmem:[%s2695_s28 + $0xa8] ss:$12 sps:$4 sm:$0xff]  }
  0x1b   : > { %v2542_v46 = vld [vmem:[%s2695_s28 + $0x2d0] ss:$12 sps:$4 sm:$0xff]   ;;  %v2548_v50 = vld [vmem:[%s2695_s28 + $0x2e8] ss:$12 sps:$4 sm:$0xff]   ;;  %v2552_v53 = vld [vmem:[%s2695_s28 + $0xc0] ss:$12 sps:$4 sm:$0xff]  }
  0x1c   : > { %v2549_v51 = vld [vmem:[%s2695_s28 + $0xc4] ss:$12 sps:$4 sm:$0xff]   ;;  %v2551_v52 = vld [vmem:[%s2695_s28 + $0x8] ss:$12 sps:$4 sm:$0xff]   ;;  %v2553_v54 = vld [vmem:[%s2695_s28 + $0x20] ss:$12 sps:$4 sm:$0xff]  }
  0x1d   : > { %1043 = vmatpush1.bf16.msra.mxu0 %v2487_v5  ;;  %2461 = vmatpush1.bf16.msra.mxu1 %v2487_v5  ;;  %v2554_v55 = vld [vmem:[%s2695_s28 + $0xdc] ss:$12 sps:$4 sm:$0xff]   ;;  %v2556_v56 = vld [vmem:[%s2695_s28 + $0x38] ss:$12 sps:$4 sm:$0xff]   ;;  %v2559_v59 = vld [vmem:[%s2695_s28 + $0xf4] ss:$12 sps:$4 sm:$0xff]  }
  0x1e   : > { %1044 = vmatprep.subr.bf16.mxu0 %v2637_v1  ;;  %2446 = vmatprep.subr.bf16.mxu1 %v2637_v1  ;;  %v2557_v57 = vld [vmem:[%s2695_s28 + $0xd8] ss:$12 sps:$4 sm:$0xff]   ;;  %v2558_v58 = vld [vmem:[%s2695_s28 + $0x50] ss:$12 sps:$4 sm:$0xff]   ;;  %v2561_v60 = vld [vmem:[%s2695_s28 + $0x68] ss:$12 sps:$4 sm:$0xff]  }
  0x1f   : > { %v2562_v61 = vld [vmem:[%s2695_s28 + $0xf0] ss:$12 sps:$4 sm:$0xff]   ;;  %v2563_v62 = vld [vmem:[%s2695_s28 + $0x80] ss:$12 sps:$4 sm:$0xff]   ;;  %v2566_v0 = vld [vmem:[%s2695_s28 + $0x98] ss:$12 sps:$4 sm:$0xff]  }
  0x20   : > { %v2564_v63 = vld [vmem:[%s2695_s28 + $0x10c] ss:$12 sps:$4 sm:$0xff]   ;;  %v2568_v2 = vld [vmem:[%s2695_s28 + $0xb0] ss:$12 sps:$4 sm:$0xff]   ;;  %v2571_v4 = vld [vmem:[%s2695_s28 + $0xc8] ss:$12 sps:$4 sm:$0xff]  }
  0x21   : > { %1045 = vmatpush1.bf16.msra.mxu0 %v2488_v7  ;;  %2462 = vmatpush1.bf16.msra.mxu1 %v2488_v7  ;;  %v2569_v3 = vld [vmem:[%s2695_s28 + $0x124] ss:$12 sps:$4 sm:$0xff]   ;;  %v2572_v5 = vld [vmem:[%s2695_s28 + $0x120] ss:$12 sps:$4 sm:$0xff]   ;;  %v2574_v7 = vld [vmem:[%s2695_s28 + $0x13c] ss:$12 sps:$4 sm:$0xff]  }
  0x22   : > { %1046 = vmatprep.subr.bf16.mxu0 %v2637_v1  ;;  %2447 = vmatprep.subr.bf16.mxu1 %v2637_v1  ;;  %v2573_v6 = vld [vmem:[%s2695_s28 + $0xe0] ss:$12 sps:$4 sm:$0xff]   ;;  %v2576_v8 = vld [vmem:[%s2695_s28 + $0xf8] ss:$12 sps:$4 sm:$0xff]  }
  0x25   : > { %1047 = vmatpush1.bf16.msra.mxu0 %v2489_v9  ;;  %2463 = vmatpush1.bf16.msra.mxu1 %v2489_v9  ;;  %v2577_v9 = vld [vmem:[%s2695_s28 + $0x138] ss:$12 sps:$4 sm:$0xff]  }
  0x26   : > { %1048 = vmatprep.subr.bf16.mxu0 %v2637_v1  ;;  %2448 = vmatprep.subr.bf16.mxu1 %v2637_v1 }
  0x29   : > { %1049 = vmatpush1.bf16.msra.mxu0 %v2490_v10  ;;  %2464 = vmatpush1.bf16.msra.mxu1 %v2490_v10  ;;  %v2578_v10 = vld [vmem:[%s2695_s28 + $0x110] ss:$12 sps:$4 sm:$0xff]  }
  0x2a   : > { %1050 = vmatprep.subr.bf16.mxu0 %v2637_v1  ;;  %2449 = vmatprep.subr.bf16.mxu1 %v2637_v1 }
  0x2d   : > { %1051 = vmatpush2.bf16.msra.mxu0 %v2491_v11  ;;  %2465 = vmatpush2.bf16.msra.mxu1 %v2491_v11  ;;  %v2579_v11 = vld [vmem:[%s2695_s28 + $0x154] ss:$12 sps:$4 sm:$0xff]  }
  0x2e   : > { %1052 = vmatprep.subr.bf16.mxu0 %v2637_v1  ;;  %2450 = vmatprep.subr.bf16.mxu1 %v2637_v1 }
  0x31   : > { %1053 = vmatpush2.bf16.msra.mxu0 %v2492_v12  ;;  %2466 = vmatpush2.bf16.msra.mxu1 %v2492_v12  ;;  %v2581_v12 = vld [vmem:[%s2695_s28 + $0x128] ss:$12 sps:$4 sm:$0xff]  }
  0x32   : > { %1054 = vmatprep.subr.bf16.mxu0 %v2637_v1  ;;  %2451 = vmatprep.subr.bf16.mxu1 %v2637_v1 }
  0x35   : > { %1055 = vmatpush2.bf16.msra.mxu0 %v2493_v13  ;;  %2467 = vmatpush2.bf16.msra.mxu1 %v2493_v13  ;;  %v2582_v13 = vld [vmem:[%s2695_s28 + $0x150] ss:$12 sps:$4 sm:$0xff]  }
  0x36   : > { %1056 = vmatprep.subr.bf16.mxu0 %v2637_v1  ;;  %2452 = vmatprep.subr.bf16.mxu1 %v2637_v1 }
  0x39   : > { %1057 = vmatpush2.bf16.msra.mxu0 %v2494_v14  ;;  %2468 = vmatpush2.bf16.msra.mxu1 %v2494_v14  ;;  %v2583_v14 = vld [vmem:[%s2695_s28 + $0x140] ss:$12 sps:$4 sm:$0xff]  }
  0x3a   : > { %1058 = vmatprep.subr.bf16.mxu0 %v2637_v1  ;;  %2453 = vmatprep.subr.bf16.mxu1 %v2637_v1 }
  0x3d   : > { %1059 = vmatpush2.bf16.msra.mxu0 %v2495_v15  ;;  %2469 = vmatpush2.bf16.msra.mxu1 %v2495_v15  ;;  %v2584_v15 = vld [vmem:[%s2695_s28 + $0x16c] ss:$12 sps:$4 sm:$0xff]  }
  0x3e   : > { %1060 = vmatprep.subr.bf16.mxu0 %v2637_v1  ;;  %2454 = vmatprep.subr.bf16.mxu1 %v2637_v1 }
  0x41   : > { %1061 = vmatpush2.bf16.msra.mxu0 %v2496_v16  ;;  %2470 = vmatpush2.bf16.msra.mxu1 %v2496_v16  ;;  %v2586_v16 = vld [vmem:[%s2695_s28 + $0x158] ss:$12 sps:$4 sm:$0xff]  }
  0x42   : > { %1062 = vmatprep.subr.bf16.mxu0 %v2637_v1  ;;  %2455 = vmatprep.subr.bf16.mxu1 %v2637_v1 }
  0x45   : > { %1063 = vmatpush2.bf16.msra.mxu0 %v2497_v17  ;;  %2471 = vmatpush2.bf16.msra.mxu1 %v2497_v17  ;;  %v2587_v17 = vld [vmem:[%s2695_s28 + $0x168] ss:$12 sps:$4 sm:$0xff]  }
  0x46   : > { %1064 = vmatprep.subr.bf16.mxu0 %v2637_v1  ;;  %2456 = vmatprep.subr.bf16.mxu1 %v2637_v1  ;;  %v2567_v1 = vld [vmem:[%s2695_s28 + $0x108] ss:$12 sps:$4 sm:$0xff]  }
  0x49   : > { %1065 = vmatpush2.bf16.msra.mxu0 %v2498_v18  ;;  %2472 = vmatpush2.bf16.msra.mxu1 %v2498_v18  ;;  %v2588_v18 = vld [vmem:[%s2695_s28 + $0x170] ss:$12 sps:$4 sm:$0xff]  }
  0x4a   : > { %2373 = vmatprep.subr.bf16.mxu1 %v2505_v19 }
  0x4c   : > { %1067 = vmatmul.mubr.bf16.vlgmr.msra.gmra.mxu0 %v2499_v20  ;;  %1259 = vmatmul.mubr.bf16.vlgmr.msra.gmra.mxu1 %v2502_v21  ;;  %v2591_v20 = vld [vmem:[%s2695_s28 + $0x188] ss:$12 sps:$4 sm:$0xff]   ;;  %v2592_v21 = vld [vmem:[%s2695_s28 + $0x180] ss:$12 sps:$4 sm:$0xff]  }
  0x4d   : > { %2374 = vmatpush3.bf16.msra.mxu1 %v2505_v19  ;;  %1074 = vmatprep.mubr.bf16.mxu0 %v2506_v22  ;;  %v2589_v19 = vld [vmem:[%s2695_s28 + $0x184] ss:$12 sps:$4 sm:$0xff]   ;;  %v2593_v22 = vld [vmem:[%s2695_s28 + $0x1a0] ss:$12 sps:$4 sm:$0xff]  }
  0x4e   : > { %1266 = vmatprep.mubr.bf16.mxu1 %v2508_v23  ;;  %2375 = vmatprep.subr.bf16.mxu1 %v2530_v24  ;;  %v2594_v23 = vld [vmem:[%s2695_s28 + $0x19c] ss:$12 sps:$4 sm:$0xff]  }
  0x51   : > { %2376 = vmatpush3.bf16.msra.mxu1 %v2530_v24  ;;  %v2596_v24 = vld [vmem:[%s2695_s28 + $0x1b8] ss:$12 sps:$4 sm:$0xff]  }
  0x54   : > { %1075 = vmatmul.mubr.bf16.gmra.mxu0 %v2510_v25  ;;  %1267 = vmatmul.mubr.bf16.gmra.mxu1 %v2511_v26  ;;  %v2597_v25 = vld [vmem:[%s2695_s28 + $0x198] ss:$12 sps:$4 sm:$0xff]   ;;  %v2598_v26 = vld [vmem:[%s2695_s28 + $0x1d0] ss:$12 sps:$4 sm:$0xff]  }
  0x55   : > { %1082 = vmatprep.mubr.bf16.mxu0 %v2512_v27  ;;  %1274 = vmatprep.mubr.bf16.mxu1 %v2514_v28  ;;  %v2599_v27 = vld [vmem:[%s2695_s28 + $0x1b4] ss:$12 sps:$4 sm:$0xff]  }
  0x56   : > { %v2601_v28 = vld [vmem:[%s2695_s28 + $0x1e8] ss:$12 sps:$4 sm:$0xff]  }
  0x5c   : > { %1083 = vmatmul.mubr.bf16.gmra.mxu0 %v2516_v29  ;;  %1275 = vmatmul.mubr.bf16.gmra.mxu1 %v2517_v30  ;;  %v2602_v29 = vld [vmem:[%s2695_s28 + $0x1b0] ss:$12 sps:$4 sm:$0xff]   ;;  %v2603_v30 = vld [vmem:[%s2695_s28 + $0x200] ss:$12 sps:$4 sm:$0xff]  }
  0x5d   : > { %1090 = vmatprep.mubr.bf16.mxu0 %v2518_v31  ;;  %1282 = vmatprep.mubr.bf16.mxu1 %v2520_v32  ;;  %v2604_v31 = vld [vmem:[%s2695_s28 + $0x1cc] ss:$12 sps:$4 sm:$0xff]  }
  0x5e   : > { %v2606_v32 = vld [vmem:[%s2695_s28 + $0x218] ss:$12 sps:$4 sm:$0xff]  }
  0x64   : > { %1091 = vmatmul.mubr.bf16.gmra.mxu0 %v2522_v33  ;;  %1283 = vmatmul.mubr.bf16.gmra.mxu1 %v2523_v34  ;;  %v2607_v33 = vld [vmem:[%s2695_s28 + $0x1c8] ss:$12 sps:$4 sm:$0xff]   ;;  %v2608_v34 = vld [vmem:[%s2695_s28 + $0x230] ss:$12 sps:$4 sm:$0xff]  }
  0x65   : > { %1098 = vmatprep.mubr.bf16.mxu0 %v2524_v35  ;;  %1290 = vmatprep.mubr.bf16.mxu1 %v2526_v36  ;;  %v2609_v35 = vld [vmem:[%s2695_s28 + $0x1e4] ss:$12 sps:$4 sm:$0xff]   ;;  %v2611_v36 = vld [vmem:[%s2695_s28 + $0x248] ss:$12 sps:$4 sm:$0xff]  }
  0x6c   : > { %1099 = vmatmul.mubr.bf16.gmra.mxu0 %v2528_v37  ;;  %1291 = vmatmul.mubr.bf16.gmra.mxu1 %v2529_v38  ;;  %v2612_v37 = vld [vmem:[%s2695_s28 + $0x1e0] ss:$12 sps:$4 sm:$0xff]  }
  0x6d   : > { %1106 = vmatprep.mubr.bf16.mxu0 %v2531_v39  ;;  %1298 = vmatprep.mubr.bf16.mxu1 %v2533_v40  ;;  %v2613_v38 = vld [vmem:[%s2695_s28 + $0x260] ss:$12 sps:$4 sm:$0xff]   ;;  %v2614_v39 = vld [vmem:[%s2695_s28 + $0x1fc] ss:$12 sps:$4 sm:$0xff]   ;;  %v2616_v40 = vld [vmem:[%s2695_s28 + $0x278] ss:$12 sps:$4 sm:$0xff]  }
  0x74   : > { %1107 = vmatmul.mubr.bf16.gmra.mxu0 %v2535_v41  ;;  %1299 = vmatmul.mubr.bf16.gmra.mxu1 %v2536_v42  ;;  %v2617_v41 = vld [vmem:[%s2695_s28 + $0x1f8] ss:$12 sps:$4 sm:$0xff]   ;;  %v2618_v42 = vld [vmem:[%s2695_s28 + $0x290] ss:$12 sps:$4 sm:$0xff]  }
  0x75   : > { %1114 = vmatprep.mubr.bf16.mxu0 %v2537_v43  ;;  %1306 = vmatprep.mubr.bf16.mxu1 %v2539_v44  ;;  %v2619_v43 = vld [vmem:[%s2695_s28 + $0x214] ss:$12 sps:$4 sm:$0xff]  }
  0x76   : > { %v2621_v44 = vld [vmem:[%s2695_s28 + $0x2a8] ss:$12 sps:$4 sm:$0xff]  }
  0x7c   : > { %1115 = vmatmul.mubr.bf16.gmra.mxu0 %v2541_v45  ;;  %1307 = vmatmul.mubr.bf16.gmra.mxu1 %v2542_v46  ;;  %v2622_v45 = vld [vmem:[%s2695_s28 + $0x210] ss:$12 sps:$4 sm:$0xff]   ;;  %v2623_v46 = vld [vmem:[%s2695_s28 + $0x2c0] ss:$12 sps:$4 sm:$0xff]  }
  0x7d   : > { %1122 = vmatprep.mubr.bf16.mxu0 %v2543_v47  ;;  %1314 = vmatprep.mubr.bf16.mxu1 %v2545_v48  ;;  %v2624_v47 = vld [vmem:[%s2695_s28 + $0x22c] ss:$12 sps:$4 sm:$0xff]  }
  0x7e   : > { %v2626_v48 = vld [vmem:[%s2695_s28 + $0x2d8] ss:$12 sps:$4 sm:$0xff]  }
  0x84   : > { %1123 = vmatmul.mubr.bf16.gmra.mxu0 %v2547_v49  ;;  %1315 = vmatmul.mubr.bf16.gmra.mxu1 %v2548_v50  ;;  %v2627_v49 = vld [vmem:[%s2695_s28 + $0x228] ss:$12 sps:$4 sm:$0xff]   ;;  %v2628_v50 = vld [vmem:[%s2695_s28 + $0x2f0] ss:$12 sps:$4 sm:$0xff]  }
  0x85   : > { %1130 = vmatprep.mubr.bf16.mxu0 %v2549_v51  ;;  %2377 = vmatprep.mubr.msk.bf16.mxu1 %vm937_vm0, %v2551_v52 }
  0x8c   : > { %1131 = vmatmul.mubr.bf16.gmra.mxu0 %v2552_v53  ;;  %2378 = vmatmul.mubr.msk.bf16.vlgmr.msra.gmra.mxu1 %vm937_vm0, %v2553_v54 }
  0x8d   : > { %1138 = vmatprep.mubr.bf16.mxu0 %v2554_v55  ;;  %2381 = vmatprep.mubr.msk.bf16.mxu1 %vm937_vm0, %v2556_v56 }
  0x94   : > { %1139 = vmatmul.mubr.bf16.gmra.mxu0 %v2557_v57  ;;  %2382 = vmatmul.mubr.msk.bf16.gmra.mxu1 %vm937_vm0, %v2558_v58 }
  0x95   : > { %1146 = vmatprep.mubr.bf16.mxu0 %v2559_v59  ;;  %2385 = vmatprep.mubr.msk.bf16.mxu1 %vm937_vm0, %v2561_v60 }
  0x9c   : > { %1147 = vmatmul.mubr.bf16.gmra.mxu0 %v2562_v61  ;;  %2386 = vmatmul.mubr.msk.bf16.gmra.mxu1 %vm937_vm0, %v2563_v62 }
  0x9d   : > { %1154 = vmatprep.mubr.bf16.mxu0 %v2564_v63  ;;  %2389 = vmatprep.mubr.msk.bf16.mxu1 %vm937_vm0, %v2566_v0 }
  0xa4   : > { %1155 = vmatmul.mubr.bf16.gmra.mxu0 %v2567_v1  ;;  %2390 = vmatmul.mubr.msk.bf16.gmra.mxu1 %vm937_vm0, %v2568_v2 }
  0xa5   : > { %1162 = vmatprep.mubr.bf16.mxu0 %v2569_v3  ;;  %2393 = vmatprep.mubr.msk.bf16.mxu1 %vm937_vm0, %v2571_v4 }
  0xac   : > { %1163 = vmatmul.mubr.bf16.gmra.mxu0 %v2572_v5  ;;  %2394 = vmatmul.mubr.msk.bf16.gmra.mxu1 %vm937_vm0, %v2573_v6 }
  0xad   : > { %1170 = vmatprep.mubr.bf16.mxu0 %v2574_v7  ;;  %2397 = vmatprep.mubr.msk.bf16.mxu1 %vm937_vm0, %v2576_v8 }
  0xb4   : > { %1171 = vmatmul.mubr.bf16.gmra.mxu0 %v2577_v9  ;;  %2398 = vmatmul.mubr.msk.bf16.gmra.mxu1 %vm937_vm0, %v2578_v10 }
  0xb5   : > { %1178 = vmatprep.mubr.bf16.mxu0 %v2579_v11  ;;  %2401 = vmatprep.mubr.msk.bf16.mxu1 %vm937_vm0, %v2581_v12 }
  0xbc   : > { %1179 = vmatmul.mubr.bf16.gmra.mxu0 %v2582_v13  ;;  %2402 = vmatmul.mubr.msk.bf16.gmra.mxu1 %vm937_vm0, %v2583_v14 }
  0xbd   : > { %1186 = vmatprep.mubr.bf16.mxu0 %v2584_v15  ;;  %2405 = vmatprep.mubr.msk.bf16.mxu1 %vm937_vm0, %v2586_v16 }
  0xc4   : > { %1187 = vmatmul.mubr.bf16.gmra.mxu0 %v2587_v17  ;;  %2406 = vmatmul.mubr.msk.bf16.gmra.mxu1 %vm937_vm0, %v2588_v18 }
  0xc5   : > { %1194 = vmatprep.mubr.bf16.mxu0 %v2589_v19  ;;  %2409 = vmatprep.mubr.msk.bf16.mxu1 %vm937_vm0, %v2591_v20 }
  0xcc   : > { %1195 = vmatmul.mubr.bf16.gmra.mxu0 %v2592_v21  ;;  %2410 = vmatmul.mubr.msk.bf16.gmra.mxu1 %vm937_vm0, %v2593_v22 }
  0xcd   : > { %1202 = vmatprep.mubr.bf16.mxu0 %v2594_v23  ;;  %2413 = vmatprep.mubr.msk.bf16.mxu1 %vm937_vm0, %v2596_v24 }
  0xd4   : > { %1203 = vmatmul.mubr.bf16.gmra.mxu0 %v2597_v25  ;;  %2414 = vmatmul.mubr.msk.bf16.gmra.mxu1 %vm937_vm0, %v2598_v26 }
  0xd5   : > { %1210 = vmatprep.mubr.bf16.mxu0 %v2599_v27  ;;  %2417 = vmatprep.mubr.msk.bf16.mxu1 %vm937_vm0, %v2601_v28 }
  0xdc   : > { %1211 = vmatmul.mubr.bf16.gmra.mxu0 %v2602_v29  ;;  %2418 = vmatmul.mubr.msk.bf16.gmra.mxu1 %vm937_vm0, %v2603_v30 }
  0xdd   : > { %1218 = vmatprep.mubr.bf16.mxu0 %v2604_v31  ;;  %2421 = vmatprep.mubr.msk.bf16.mxu1 %vm937_vm0, %v2606_v32 }
  0xe4   : > { %1219 = vmatmul.mubr.bf16.gmra.mxu0 %v2607_v33  ;;  %2422 = vmatmul.mubr.msk.bf16.gmra.mxu1 %vm937_vm0, %v2608_v34 }
  0xe5   : > { %1226 = vmatprep.mubr.bf16.mxu0 %v2609_v35  ;;  %2425 = vmatprep.mubr.msk.bf16.mxu1 %vm937_vm0, %v2611_v36 }
  0xec   : > { %1227 = vmatmul.mubr.bf16.gmra.mxu0 %v2612_v37  ;;  %2426 = vmatmul.mubr.msk.bf16.gmra.mxu1 %vm937_vm0, %v2613_v38 }
  0xed   : > { %1234 = vmatprep.mubr.bf16.mxu0 %v2614_v39  ;;  %2429 = vmatprep.mubr.msk.bf16.mxu1 %vm937_vm0, %v2616_v40 }
  0xf4   : > { %1235 = vmatmul.mubr.bf16.gmra.mxu0 %v2617_v41  ;;  %2430 = vmatmul.mubr.msk.bf16.gmra.mxu1 %vm937_vm0, %v2618_v42 }
  0xf5   : > { %1242 = vmatprep.mubr.bf16.mxu0 %v2619_v43  ;;  %2433 = vmatprep.mubr.msk.bf16.mxu1 %vm937_vm0, %v2621_v44 }
  0xfc   : > { %1243 = vmatmul.mubr.bf16.gmra.mxu0 %v2622_v45  ;;  %2434 = vmatmul.mubr.msk.bf16.gmra.mxu1 %vm937_vm0, %v2623_v46 }
  0xfd   : > { %1250 = vmatprep.mubr.bf16.mxu0 %v2624_v47  ;;  %2437 = vmatprep.mubr.msk.bf16.mxu1 %vm937_vm0, %v2626_v48 }
 0x104   : > { %1251 = vmatmul.mubr.bf16.gmra.mxu0 %v2627_v49  ;;  %2438 = vmatmul.mubr.msk.bf16.gmra.mxu1 %vm937_vm0, %v2628_v50  ;;  %v2949_v49 = vld [vmem:[%s3219_s2] ss:$0 sm:$0xff] }
 0x10c   : > { %v2888_v51 = vpop.f32.mrf.mxu0  ;;  %v2890_v52 = vpop.f32.mrf.mxu1 }
 0x10e   : > { %v1070_v53 = vpop.f32.mrf.mxu0  ;;  %v1262_v54 = vpop.f32.mrf.mxu1 }
 0x110   : > { %v2892_v55 = vpop.f32.mrf.mxu0  ;;  %v2894_v56 = vpop.f32.mrf.mxu1 }
 0x112   : > { %v1073_v57 = vpop.f32.mrf.mxu0  ;;  %v1265_v58 = vpop.f32.mrf.mxu1 }
 0x114   : > { %v1076_v59 = vpop.f32.mrf.mxu0  ;;  %v2896_v60 = vpop.f32.mrf.mxu1 }
 0x115   : > { %v1077_v54 = vadd.f32 %v2949_v49, %v1076_v59 }
 0x116   : > { %v1078_v61 = vpop.f32.mrf.mxu0  ;;  %v1270_v62 = vpop.f32.mrf.mxu1 }
 0x117   : > { %v1069_v61 = vadd.f32 %v2949_v49, %v2888_v51  ;;  %v1072_v51 = vadd.f32 %v2949_v49, %v2892_v55 }
 0x118   : > { %v1079_v63 = vpop.f32.mrf.mxu0  ;;  %v2898_v0 = vpop.f32.mrf.mxu1 }
 0x11a   : > { %v1081_v1 = vpop.f32.mrf.mxu0  ;;  %v1273_v2 = vpop.f32.mrf.mxu1 }
 0x11c   : > { %v2900_v3 = vpop.f32.mrf.mxu0  ;;  %v2902_v4 = vpop.f32.mrf.mxu1 }
 0x11d   : > { %v1085_v55 = vadd.f32 %v2949_v49, %v2900_v3 }
 0x11e   : > { %v1086_v5 = vpop.f32.mrf.mxu0  ;;  %v1278_v6 = vpop.f32.mrf.mxu1 }
 0x11f   : > { %v1080_v5 = vadd.f32 %v2949_v49, %v1079_v63 }
 0x120   : > { %v2904_v7 = vpop.f32.mrf.mxu0  ;;  %v2906_v8 = vpop.f32.mrf.mxu1 }
 0x121   : > { %v1088_v3 = vadd.f32 %v2949_v49, %v2904_v7 }
 0x122   : > { %v1089_v9 = vpop.f32.mrf.mxu0  ;;  %v1281_v10 = vpop.f32.mrf.mxu1 }
 0x124   : > { %v1092_v11 = vpop.f32.mrf.mxu0  ;;  %v2908_v12 = vpop.f32.mrf.mxu1 }
 0x126   : > { %v1094_v13 = vpop.f32.mrf.mxu0  ;;  %v1286_v14 = vpop.f32.mrf.mxu1 }
 0x128   : > { %v2910_v15 = vpop.f32.mrf.mxu0  ;;  %v2912_v16 = vpop.f32.mrf.mxu1 }
 0x12a   : > { %v1097_v17 = vpop.f32.mrf.mxu0  ;;  %v1289_v18 = vpop.f32.mrf.mxu1 }
 0x12c   : > { %v2914_v19 = vpop.f32.mrf.mxu0  ;;  %v2916_v20 = vpop.f32.mrf.mxu1 }
 0x12d   : > { %v1101_v7 = vadd.f32 %v2949_v49, %v2914_v19 }
 0x12e   : > { %v1102_v21 = vpop.f32.mrf.mxu0  ;;  %v1294_v22 = vpop.f32.mrf.mxu1 }
 0x12f   : > { %v1093_v21 = vadd.f32 %v2949_v49, %v1092_v11  ;;  %v1096_v11 = vadd.f32 %v2949_v49, %v2910_v15 }
 0x130   : > { %v2918_v23 = vpop.f32.mrf.mxu0  ;;  %v2920_v24 = vpop.f32.mrf.mxu1 }
 0x131   : > { %v1104_v19 = vadd.f32 %v2949_v49, %v2918_v23 }
 0x132   : > { %v1105_v25 = vpop.f32.mrf.mxu0  ;;  %v1297_v26 = vpop.f32.mrf.mxu1 }
 0x134   : > { %v2922_v27 = vpop.f32.mrf.mxu0  ;;  %v2924_v28 = vpop.f32.mrf.mxu1 }
 0x135   : > { %v1109_v15 = vadd.f32 %v2949_v49, %v2922_v27 }
 0x136   : > { %v1110_v29 = vpop.f32.mrf.mxu0  ;;  %v1302_v30 = vpop.f32.mrf.mxu1 }
 0x138   : > { %v2926_v31 = vpop.f32.mrf.mxu0  ;;  %v2928_v32 = vpop.f32.mrf.mxu1 }
 0x139   : > { %v1112_v27 = vadd.f32 %v2949_v49, %v2926_v31 }
 0x13a   : > { %v1113_v33 = vpop.f32.mrf.mxu0  ;;  %v1305_v34 = vpop.f32.mrf.mxu1 }
 0x13c   : > { %v2930_v35 = vpop.f32.mrf.mxu0  ;;  %v2932_v36 = vpop.f32.mrf.mxu1 }
 0x13d   : > { %v1117_v23 = vadd.f32 %v2949_v49, %v2930_v35 }
 0x13e   : > { %v1118_v37 = vpop.f32.mrf.mxu0  ;;  %v1310_v38 = vpop.f32.mrf.mxu1 }
 0x140   : > { %v2934_v39 = vpop.f32.mrf.mxu0  ;;  %v2936_v40 = vpop.f32.mrf.mxu1 }
 0x141   : > { %v1120_v35 = vadd.f32 %v2949_v49, %v2934_v39 }
 0x142   : > { %v1121_v41 = vpop.f32.mrf.mxu0  ;;  %v1313_v42 = vpop.f32.mrf.mxu1 }
 0x144   : > { %v2938_v43 = vpop.f32.mrf.mxu0  ;;  %v2940_v44 = vpop.f32.mrf.mxu1 }
 0x145   : > { %v1125_v31 = vadd.f32 %v2949_v49, %v2938_v43 }
 0x146   : > { %v1126_v45 = vpop.f32.mrf.mxu0  ;;  %v1318_v46 = vpop.f32.mrf.mxu1 }
 0x148   : > { %v2942_v47 = vpop.f32.mrf.mxu0  ;;  %v2944_v48 = vpop.f32.mrf.mxu1 }
 0x149   : > { %v1128_v43 = vadd.f32 %v2949_v49, %v2942_v47 }
 0x14a   : > { %v1129_v50 = vpop.f32.mrf.mxu0  ;;  %v1321_v53 = vpop.f32.mrf.mxu1 }
 0x14c   : > { %v2952_v57 = vpop.f32.mrf.mxu0  ;;  %v2379_v58 = vpop.f32.mrf.mxu1 }
 0x14d   : > { %v1366_v62 = vadd.f32 %v2379_v58, %v1077_v54  ;;  %v1133_v39 = vadd.f32 %v2949_v49, %v2952_v57 }
 0x14e   : > { %v1134_v1 = vpop.f32.mrf.mxu0  ;;  %v1357_v2 = vpop.f32.mrf.mxu1 }
 0x14f   : > { %v1614_v6 = vmax.f32 %v1366_v62, 0.0  ;;  %v1358_v9 = vadd.f32 %v1357_v2, %v1069_v61 }
 0x150   : > { %v2963_v59 = vpop.f32.mrf.mxu0  ;;  %v2380_v10 = vpop.f32.mrf.mxu1 }
 0x151   : > { %v2277_v13 = vpack.c.bf16 %v1614_v6, %v1614_v6  ;;  %v1612_v14 = vmax.f32 %v1358_v9, 0.0  ;;  %v1369_v17 = vadd.f32 %v2380_v10, %v1080_v5  ;;  %v1136_v57 = vadd.f32 %v2949_v49, %v2963_v59 }
 0x152   : > { %v1137_v63 = vpop.f32.mrf.mxu0  ;;  %v1360_v18 = vpop.f32.mrf.mxu1 }
 0x153   : > { %1935 = vst.msk [vmem:[%s2961_s8 + $0x8] sm:$0xf] %vm1932_vm1, %v2277_v13  ;;  %v2275_v22 = vpack.c.bf16 %v1612_v14, %v1612_v14  ;;  %v1615_v25 = vmax.f32 %v1369_v17, 0.0  ;;  %v1361_v26 = vadd.f32 %v1360_v18, %v1072_v51 }
 0x154   : > { %v2970_v29 = vpop.f32.mrf.mxu0  ;;  %v2383_v30 = vpop.f32.mrf.mxu1 }
 0x155   : > { %1933 = vst.msk [vmem:[%s2961_s8] sm:$0xf] %vm1932_vm1, %v2275_v22  ;;  %v2278_v33 = vpack.c.bf16 %v1615_v25, %v1615_v25  ;;  %v1613_v34 = vmax.f32 %v1361_v26, 0.0  ;;  %v1382_v37 = vadd.f32 %v2383_v30, %v1093_v21  ;;  %v1141_v47 = vadd.f32 %v2949_v49, %v2970_v29 }
 0x156   : > { %v1142_v38 = vpop.f32.mrf.mxu0  ;;  %v1373_v41 = vpop.f32.mrf.mxu1 }
 0x157   : > { %1936 = vst.msk [vmem:[%s2961_s8 + $0xc] sm:$0xf] %vm1932_vm1, %v2278_v33  ;;  %v2276_v42 = vpack.c.bf16 %v1613_v34, %v1613_v34  ;;  %v1618_v45 = vmax.f32 %v1382_v37, 0.0  ;;  %v1374_v46 = vadd.f32 %v1373_v41, %v1085_v55 }
 0x158   : > { %v2980_v50 = vpop.f32.mrf.mxu0  ;;  %v2384_v53 = vpop.f32.mrf.mxu1 }
 0x159   : > { %1934 = vst.msk [vmem:[%s2961_s8 + $0x4] sm:$0xf] %vm1932_vm1, %v2276_v42  ;;  %v2281_v54 = vpack.c.bf16 %v1618_v45, %v1618_v45  ;;  %v1616_v58 = vmax.f32 %v1374_v46, 0.0  ;;  %v1385_v61 = vadd.f32 %v2384_v53, %v1096_v11  ;;  %v1144_v29 = vadd.f32 %v2949_v49, %v2980_v50 }
 0x15a   : > { %v1145_v62 = vpop.f32.mrf.mxu0  ;;  %v1376_v1 = vpop.f32.mrf.mxu1 }
 0x15b   : > { %1939 = vst.msk [vmem:[%s2961_s8 + $0x18] sm:$0xf] %vm1932_vm1, %v2281_v54  ;;  %v2279_v2 = vpack.c.bf16 %v1616_v58, %v1616_v58  ;;  %v1619_v5 = vmax.f32 %v1385_v61, 0.0  ;;  %v1377_v6 = vadd.f32 %v1376_v1, %v1088_v3 }
 0x15c   : > { %v2990_v9 = vpop.f32.mrf.mxu0  ;;  %v2387_v10 = vpop.f32.mrf.mxu1 }
 0x15d   : > { %1937 = vst.msk [vmem:[%s2961_s8 + $0x10] sm:$0xf] %vm1932_vm1, %v2279_v2  ;;  %v2282_v51 = vpack.c.bf16 %v1619_v5, %v1619_v5  ;;  %v1617_v13 = vmax.f32 %v1377_v6, 0.0  ;;  %v1398_v14 = vadd.f32 %v2387_v10, %v1109_v15  ;;  %v1149_v59 = vadd.f32 %v2949_v49, %v2990_v9 }
 0x15e   : > { %v1150_v17 = vpop.f32.mrf.mxu0  ;;  %v1389_v63 = vpop.f32.mrf.mxu1 }
 0x15f   : > { %1940 = vst.msk [vmem:[%s2961_s8 + $0x1c] sm:$0xf] %vm1932_vm1, %v2282_v51  ;;  %v2280_v18 = vpack.c.bf16 %v1617_v13, %v1617_v13  ;;  %v1622_v21 = vmax.f32 %v1398_v14, 0.0  ;;  %v1390_v22 = vadd.f32 %v1389_v63, %v1101_v7 }
 0x160   : > { %v3000_v25 = vpop.f32.mrf.mxu0  ;;  %v2388_v26 = vpop.f32.mrf.mxu1 }
 0x161   : > { %1938 = vst.msk [vmem:[%s2961_s8 + $0x14] sm:$0xf] %vm1932_vm1, %v2280_v18  ;;  %v2285_v30 = vpack.c.bf16 %v1622_v21, %v1622_v21  ;;  %v1620_v55 = vmax.f32 %v1390_v22, 0.0  ;;  %v1401_v33 = vadd.f32 %v2388_v26, %v1112_v27  ;;  %v1152_v9 = vadd.f32 %v2949_v49, %v3000_v25 }
 0x162   : > { %v1153_v34 = vpop.f32.mrf.mxu0  ;;  %v1392_v37 = vpop.f32.mrf.mxu1 }
 0x163   : > { %1943 = vst.msk [vmem:[%s2961_s8 + $0x28] sm:$0xf] %vm1932_vm1, %v2285_v30  ;;  %v2283_v38 = vpack.c.bf16 %v1620_v55, %v1620_v55  ;;  %v1623_v41 = vmax.f32 %v1401_v33, 0.0  ;;  %v1393_v11 = vadd.f32 %v1392_v37, %v1104_v19 }
 0x164   : > { %v1156_v42 = vpop.f32.mrf.mxu0  ;;  %v2391_v45 = vpop.f32.mrf.mxu1 }
 0x165   : > { %1941 = vst.msk [vmem:[%s2961_s8 + $0x20] sm:$0xf] %vm1932_vm1, %v2283_v38  ;;  %v2286_v46 = vpack.c.bf16 %v1623_v41, %v1623_v41  ;;  %v1621_v53 = vmax.f32 %v1393_v11, 0.0  ;;  %v1414_v3 = vadd.f32 %v2391_v45, %v1125_v31  ;;  %v1157_v50 = vadd.f32 %v2949_v49, %v1156_v42 }
 0x166   : > { %v1158_v54 = vpop.f32.mrf.mxu0  ;;  %v1405_v58 = vpop.f32.mrf.mxu1 }
 0x167   : > { %1944 = vst.msk [vmem:[%s2961_s8 + $0x2c] sm:$0xf] %vm1932_vm1, %v2286_v46  ;;  %v2284_v61 = vpack.c.bf16 %v1621_v53, %v1621_v53  ;;  %v1626_v62 = vmax.f32 %v1414_v3, 0.0  ;;  %v1406_v1 = vadd.f32 %v1405_v58, %v1117_v23 }
 0x168   : > { %v1159_v15 = vpop.f32.mrf.mxu0  ;;  %v2392_v2 = vpop.f32.mrf.mxu1 }
 0x169   : > { %1942 = vst.msk [vmem:[%s2961_s8 + $0x24] sm:$0xf] %vm1932_vm1, %v2284_v61  ;;  %v2289_v5 = vpack.c.bf16 %v1626_v62, %v1626_v62  ;;  %v1624_v6 = vmax.f32 %v1406_v1, 0.0  ;;  %v1417_v10 = vadd.f32 %v2392_v2, %v1128_v43  ;;  %v1160_v42 = vadd.f32 %v2949_v49, %v1159_v15 }
 0x16a   : > { %v1161_v7 = vpop.f32.mrf.mxu0  ;;  %v1408_v51 = vpop.f32.mrf.mxu1 }
 0x16b   : > { %1947 = vst.msk [vmem:[%s2961_s8 + $0x38] sm:$0xf] %vm1932_vm1, %v2289_v5  ;;  %v2287_v13 = vpack.c.bf16 %v1624_v6, %v1624_v6  ;;  %v1627_v14 = vmax.f32 %v1417_v10, 0.0  ;;  %v1409_v17 = vadd.f32 %v1408_v51, %v1120_v35 }
 0x16c   : > { %v1164_v63 = vpop.f32.mrf.mxu0  ;;  %v2395_v27 = vpop.f32.mrf.mxu1 }
 0x16d   : > { %1945 = vst.msk [vmem:[%s2961_s8 + $0x30] sm:$0xf] %vm1932_vm1, %v2287_v13  ;;  %v2290_v18 = vpack.c.bf16 %v1627_v14, %v1627_v14  ;;  %v1625_v21 = vmax.f32 %v1409_v17, 0.0  ;;  %v1430_v22 = vadd.f32 %v2395_v27, %v1141_v47  ;;  %v1165_v25 = vadd.f32 %v2949_v49, %v1164_v63 }
 0x16e   : > { %v1166_v26 = vpop.f32.mrf.mxu0  ;;  %v1421_v19 = vpop.f32.mrf.mxu1 }
 0x16f   : > { %1948 = vst.msk [vmem:[%s2961_s8 + $0x3c] sm:$0xf] %vm1932_vm1, %v2290_v18  ;;  %v2288_v30 = vpack.c.bf16 %v1625_v21, %v1625_v21  ;;  %v1630_v55 = vmax.f32 %v1430_v22, 0.0  ;;  %v1422_v33 = vadd.f32 %v1421_v19, %v1133_v39 }
 0x170   : > { %v1167_v34 = vpop.f32.mrf.mxu0  ;;  %v2396_v37 = vpop.f32.mrf.mxu1 }
 0x171   : > { %1946 = vst.msk [vmem:[%s2961_s8 + $0x34] sm:$0xf] %vm1932_vm1, %v2288_v30  ;;  %v2293_v31 = vpack.c.bf16 %v1630_v55, %v1630_v55  ;;  %v1628_v38 = vmax.f32 %v1422_v33, 0.0  ;;  %v1433_v41 = vadd.f32 %v2396_v37, %v1144_v29  ;;  %v1168_v63 = vadd.f32 %v2949_v49, %v1167_v34 }
 0x172   : > { %v1169_v11 = vpop.f32.mrf.mxu0  ;;  %v1424_v45 = vpop.f32.mrf.mxu1 }
 0x173   : > { %1951 = vst.msk [vmem:[%s2961_s8 + $0x48] sm:$0xf] %vm1932_vm1, %v2293_v31  ;;  %v2291_v23 = vpack.c.bf16 %v1628_v38, %v1628_v38  ;;  %v1631_v46 = vmax.f32 %v1433_v41, 0.0  ;;  %v1425_v53 = vadd.f32 %v1424_v45, %v1136_v57 }
 0x174   : > { %v1172_v3 = vpop.f32.mrf.mxu0  ;;  %v2399_v54 = vpop.f32.mrf.mxu1 }
 0x175   : > { %1949 = vst.msk [vmem:[%s2961_s8 + $0x40] sm:$0xf] %vm1932_vm1, %v2291_v23  ;;  %v2294_v58 = vpack.c.bf16 %v1631_v46, %v1631_v46  ;;  %v1629_v43 = vmax.f32 %v1425_v53, 0.0  ;;  %v1446_v61 = vadd.f32 %v2399_v54, %v1157_v50  ;;  %v1173_v15 = vadd.f32 %v2949_v49, %v1172_v3 }
 0x176   : > { %v1174_v62 = vpop.f32.mrf.mxu0  ;;  %v1437_v1 = vpop.f32.mrf.mxu1 }
 0x177   : > { %1952 = vst.msk [vmem:[%s2961_s8 + $0x4c] sm:$0xf] %vm1932_vm1, %v2294_v58  ;;  %v2292_v2 = vpack.c.bf16 %v1629_v43, %v1629_v43  ;;  %v1634_v35 = vmax.f32 %v1446_v61, 0.0  ;;  %v1438_v5 = vadd.f32 %v1437_v1, %v1149_v59 }
 0x178   : > { %v1175_v6 = vpop.f32.mrf.mxu0  ;;  %v2400_v10 = vpop.f32.mrf.mxu1 }
 0x179   : > { %1950 = vst.msk [vmem:[%s2961_s8 + $0x44] sm:$0xf] %vm1932_vm1, %v2292_v2  ;;  %v2297_v7 = vpack.c.bf16 %v1634_v35, %v1634_v35  ;;  %v1632_v51 = vmax.f32 %v1438_v5, 0.0  ;;  %v1449_v47 = vadd.f32 %v2400_v10, %v1160_v42  ;;  %v1176_v55 = vadd.f32 %v2949_v49, %v1175_v6 }
 0x17a   : > { %v1177_v13 = vpop.f32.mrf.mxu0  ;;  %v1440_v14 = vpop.f32.mrf.mxu1 }
 0x17b   : > { %1955 = vst.msk [vmem:[%s2961_s8 + $0x58] sm:$0xf] %vm1932_vm1, %v2297_v7  ;;  %v2295_v17 = vpack.c.bf16 %v1632_v51, %v1632_v51  ;;  %v1635_v27 = vmax.f32 %v1449_v47, 0.0  ;;  %v1441_v39 = vadd.f32 %v1440_v14, %v1152_v9 }
 0x17c   : > { %v1180_v18 = vpop.f32.mrf.mxu0  ;;  %v2403_v21 = vpop.f32.mrf.mxu1 }
 0x17d   : > { %1953 = vst.msk [vmem:[%s2961_s8 + $0x50] sm:$0xf] %vm1932_vm1, %v2295_v17  ;;  %v2298_v22 = vpack.c.bf16 %v1635_v27, %v1635_v27  ;;  %v1633_v26 = vmax.f32 %v1441_v39, 0.0  ;;  %v1462_v19 = vadd.f32 %v2403_v21, %v1173_v15  ;;  %v1181_v58 = vadd.f32 %v2949_v49, %v1180_v18 }
 0x17e   : > { %v1182_v29 = vpop.f32.mrf.mxu0  ;;  %v1453_v30 = vpop.f32.mrf.mxu1 }
 0x17f   : > { %1956 = vst.msk [vmem:[%s2961_s8 + $0x5c] sm:$0xf] %vm1932_vm1, %v2298_v22  ;;  %v2296_v33 = vpack.c.bf16 %v1633_v26, %v1633_v26  ;;  %v1638_v37 = vmax.f32 %v1462_v19, 0.0  ;;  %v1454_v57 = vadd.f32 %v1453_v30, %v1165_v25 }
 0x180   : > { %v1183_v31 = vpop.f32.mrf.mxu0  ;;  %v2404_v38 = vpop.f32.mrf.mxu1 }
 0x181   : > { %1954 = vst.msk [vmem:[%s2961_s8 + $0x54] sm:$0xf] %vm1932_vm1, %v2296_v33  ;;  %v2301_v41 = vpack.c.bf16 %v1638_v37, %v1638_v37  ;;  %v1636_v11 = vmax.f32 %v1454_v57, 0.0  ;;  %v1465_v45 = vadd.f32 %v2404_v38, %v1176_v55  ;;  %v1184_v10 = vadd.f32 %v2949_v49, %v1183_v31 }
 0x182   : > { %v1185_v50 = vpop.f32.mrf.mxu0  ;;  %v1456_v23 = vpop.f32.mrf.mxu1 }
 0x183   : > { %1959 = vst.msk [vmem:[%s2961_s8 + $0x68] sm:$0xf] %vm1932_vm1, %v2301_v41  ;;  %v2299_v46 = vpack.c.bf16 %v1636_v11, %v1636_v11  ;;  %v1639_v53 = vmax.f32 %v1465_v45, 0.0  ;;  %v1457_v3 = vadd.f32 %v1456_v23, %v1168_v63 }
 0x184   : > { %v1188_v54 = vpop.f32.mrf.mxu0  ;;  %v2407_v59 = vpop.f32.mrf.mxu1 }
 0x185   : > { %1957 = vst.msk [vmem:[%s2961_s8 + $0x60] sm:$0xf] %vm1932_vm1, %v2299_v46  ;;  %v2302_v34 = vpack.c.bf16 %v1639_v53, %v1639_v53  ;;  %v1637_v43 = vmax.f32 %v1457_v3, 0.0  ;;  %v1189_v61 = vadd.f32 %v2949_v49, %v1188_v54 }
 0x186   : > { %v1190_v62 = vpop.f32.mrf.mxu0  ;;  %v1469_v1 = vpop.f32.mrf.mxu1 }
 0x187   : > { %1960 = vst.msk [vmem:[%s2961_s8 + $0x6c] sm:$0xf] %vm1932_vm1, %v2302_v34  ;;  %v2300_v42 = vpack.c.bf16 %v1637_v43, %v1637_v43  ;;  %v1478_v2 = vadd.f32 %v2407_v59, %v1189_v61  ;;  %v1470_v35 = vadd.f32 %v1469_v1, %v1181_v58 }
 0x188   : > { %v1191_v5 = vpop.f32.mrf.mxu0  ;;  %v2408_v6 = vpop.f32.mrf.mxu1 }
 0x189   : > { %1958 = vst.msk [vmem:[%s2961_s8 + $0x64] sm:$0xf] %vm1932_vm1, %v2300_v42  ;;  %v1642_v9 = vmax.f32 %v1478_v2, 0.0  ;;  %v1640_v7 = vmax.f32 %v1470_v35, 0.0  ;;  %v1192_v51 = vadd.f32 %v2949_v49, %v1191_v5 }
 0x18a   : > { %v1193_v47 = vpop.f32.mrf.mxu0  ;;  %v1472_v13 = vpop.f32.mrf.mxu1 }
 0x18b   : > { %v2305_v14 = vpack.c.bf16 %v1642_v9, %v1642_v9  ;;  %v2303_v15 = vpack.c.bf16 %v1640_v7, %v1640_v7  ;;  %v1481_v17 = vadd.f32 %v2408_v6, %v1192_v51  ;;  %v1473_v27 = vadd.f32 %v1472_v13, %v1184_v10 }
 0x18c   : > { %v1196_v39 = vpop.f32.mrf.mxu0  ;;  %v2411_v18 = vpop.f32.mrf.mxu1 }
 0x18d   : > { %1963 = vst.msk [vmem:[%s2961_s8 + $0x78] sm:$0xf] %vm1932_vm1, %v2305_v14  ;;  %1961 = vst.msk [vmem:[%s2961_s8 + $0x70] sm:$0xf] %vm1932_vm1, %v2303_v15  ;;  %v1643_v21 = vmax.f32 %v1481_v17, 0.0  ;;  %v1641_v25 = vmax.f32 %v1473_v27, 0.0  ;;  %v1197_v22 = vadd.f32 %v2949_v49, %v1196_v39 }
 0x18e   : > { %v1198_v26 = vpop.f32.mrf.mxu0  ;;  %v1485_v19 = vpop.f32.mrf.mxu1 }
 0x18f   : > { %v2306_v29 = vpack.c.bf16 %v1643_v21, %v1643_v21  ;;  %v2304_v30 = vpack.c.bf16 %v1641_v25, %v1641_v25  ;;  %v1486_v55 = vadd.f32 %v1485_v19, %v1197_v22 }
 0x190   : > { %v1199_v33 = vpop.f32.mrf.mxu0  ;;  %v2412_v37 = vpop.f32.mrf.mxu1 }
 0x191   : > { %1964 = vst.msk [vmem:[%s2961_s8 + $0x7c] sm:$0xf] %vm1932_vm1, %v2306_v29  ;;  %1962 = vst.msk [vmem:[%s2961_s8 + $0x74] sm:$0xf] %vm1932_vm1, %v2304_v30  ;;  %v1644_v57 = vmax.f32 %v1486_v55, 0.0  ;;  %v1200_v31 = vadd.f32 %v2949_v49, %v1199_v33 }
 0x192   : > { %v1201_v38 = vpop.f32.mrf.mxu0  ;;  %v1488_v63 = vpop.f32.mrf.mxu1 }
 0x193   : > { %v2307_v41 = vpack.c.bf16 %v1644_v57, %v1644_v57  ;;  %v1489_v11 = vadd.f32 %v1488_v63, %v1200_v31 }
 0x194   : > { %v1204_v45 = vpop.f32.mrf.mxu0  ;;  %v2415_v50 = vpop.f32.mrf.mxu1 }
 0x195   : > { %1965 = vst.msk [vmem:[%s2961_s8 + $0x80] sm:$0xf] %vm1932_vm1, %v2307_v41  ;;  %v1645_v23 = vmax.f32 %v1489_v11, 0.0  ;;  %v1205_v46 = vadd.f32 %v2949_v49, %v1204_v45  ;;  %v1269_v11 = vadd.f32 %v2949_v49, %v2896_v60 }
 0x196   : > { %v1206_v53 = vpop.f32.mrf.mxu0  ;;  %v1501_v3 = vpop.f32.mrf.mxu1 }
 0x197   : > { %v2308_v54 = vpack.c.bf16 %v1645_v23, %v1645_v23  ;;  %v1494_v59 = vadd.f32 %v2411_v18, %v1205_v46 }
 0x198   : > { %v1207_v58 = vpop.f32.mrf.mxu0  ;;  %v2416_v34 = vpop.f32.mrf.mxu1 }
 0x199   : > { %1966 = vst.msk [vmem:[%s2961_s8 + $0x84] sm:$0xf] %vm1932_vm1, %v2308_v54  ;;  %v1646_v43 = vmax.f32 %v1494_v59, 0.0  ;;  %v1208_v61 = vadd.f32 %v2949_v49, %v1207_v58 }
 0x19a   : > { %v1209_v62 = vpop.f32.mrf.mxu0  ;;  %v1504_v1 = vpop.f32.mrf.mxu1 }
 0x19b   : > { %v2309_v42 = vpack.c.bf16 %v1646_v43, %v1646_v43  ;;  %v1497_v2 = vadd.f32 %v2412_v37, %v1208_v61 }
 0x19c   : > { %v1212_v35 = vpop.f32.mrf.mxu0  ;;  %v3092_v5 = vpop.f32.mrf.mxu1 }
 0x19d   : > { %1967 = vst.msk [vmem:[%s2961_s8 + $0x88] sm:$0xf] %vm1932_vm1, %v2309_v42  ;;  %v1647_v6 = vmax.f32 %v1497_v2, 0.0  ;;  %v1213_v10 = vadd.f32 %v2949_v49, %v1212_v35  ;;  %v1272_v42 = vadd.f32 %v2949_v49, %v2898_v0 }
 0x19e   : > { %v1214_v9 = vpop.f32.mrf.mxu0  ;;  %v1517_v7 = vpop.f32.mrf.mxu1 }
 0x19f   : > { %v2310_v51 = vpack.c.bf16 %v1647_v6, %v1647_v6  ;;  %v1502_v47 = vadd.f32 %v1501_v3, %v1213_v10 }
 0x1a0   : > { %v1215_v13 = vpop.f32.mrf.mxu0  ;;  %v3097_v14 = vpop.f32.mrf.mxu1 }
 0x1a1   : > { %1968 = vst.msk [vmem:[%s2961_s8 + $0x8c] sm:$0xf] %vm1932_vm1, %v2310_v51  ;;  %v1648_v15 = vmax.f32 %v1502_v47, 0.0  ;;  %v1216_v17 = vadd.f32 %v2949_v49, %v1215_v13 }
 0x1a2   : > { %v1217_v27 = vpop.f32.mrf.mxu0  ;;  %v1520_v39 = vpop.f32.mrf.mxu1 }
 0x1a3   : > { %v2311_v18 = vpack.c.bf16 %v1648_v15, %v1648_v15  ;;  %v1505_v21 = vadd.f32 %v1504_v1, %v1216_v17 }
 0x1a4   : > { %v1220_v25 = vpop.f32.mrf.mxu0  ;;  %v3102_v22 = vpop.f32.mrf.mxu1 }
 0x1a5   : > { %1969 = vst.msk [vmem:[%s2961_s8 + $0x90] sm:$0xf] %vm1932_vm1, %v2311_v18  ;;  %v1649_v26 = vmax.f32 %v1505_v21, 0.0  ;;  %v1221_v19 = vadd.f32 %v2949_v49, %v1220_v25 }
 0x1a6   : > { %v1222_v29 = vpop.f32.mrf.mxu0  ;;  %v3107_v30 = vpop.f32.mrf.mxu1 }
 0x1a7   : > { %v2312_v55 = vpack.c.bf16 %v1649_v26, %v1649_v26  ;;  %v1510_v33 = vadd.f32 %v2415_v50, %v1221_v19  ;;  %v1261_v50 = vadd.f32 %v2949_v49, %v2890_v52  ;;  %v1277_v29 = vadd.f32 %v2949_v49, %v2902_v4 }
 0x1a8   : > { %v1223_v37 = vpop.f32.mrf.mxu0  ;;  %v3109_v57 = vpop.f32.mrf.mxu1 }
 0x1a9   : > { %1970 = vst.msk [vmem:[%s2961_s8 + $0x94] sm:$0xf] %vm1932_vm1, %v2312_v55  ;;  %v1650_v31 = vmax.f32 %v1510_v33, 0.0  ;;  %v1224_v38 = vadd.f32 %v2949_v49, %v1223_v37 }
 0x1aa   : > { %v1225_v63 = vpop.f32.mrf.mxu0  ;;  %v3114_v41 = vpop.f32.mrf.mxu1 }
 0x1ab   : > { %v2313_v45 = vpack.c.bf16 %v1650_v31, %v1650_v31  ;;  %v1513_v23 = vadd.f32 %v2416_v34, %v1224_v38  ;;  %v1264_v34 = vadd.f32 %v2949_v49, %v2894_v56 }
 0x1ac   : > { %v1228_v46 = vpop.f32.mrf.mxu0  ;;  %v2427_v53 = vpop.f32.mrf.mxu1 }
 0x1ad   : > { %1971 = vst.msk [vmem:[%s2961_s8 + $0x98] sm:$0xf] %vm1932_vm1, %v2313_v45  ;;  %v1651_v3 = vmax.f32 %v1513_v23, 0.0  ;;  %v1229_v54 = vadd.f32 %v2949_v49, %v1228_v46  ;;  %v1558_v59 = vadd.f32 %v2427_v53, %v1269_v11  ;;  %v1280_v45 = vadd.f32 %v2949_v49, %v2906_v8 }
 0x1ae   : > { %v1230_v58 = vpop.f32.mrf.mxu0  ;;  %v1549_v43 = vpop.f32.mrf.mxu1 }
 0x1af   : > { %v2314_v61 = vpack.c.bf16 %v1651_v3, %v1651_v3  ;;  %v1518_v62 = vadd.f32 %v1517_v7, %v1229_v54  ;;  %v1662_v1 = vmax.f32 %v1558_v59, 0.0  ;;  %v1550_v60 = vadd.f32 %v1549_v43, %v1261_v50 }
 0x1b0   : > { %v1231_v52 = vpop.f32.mrf.mxu0  ;;  %v2428_v2 = vpop.f32.mrf.mxu1  ;;  %v1285_v7 = vadd.f32 %v2949_v49, %v2908_v12 }
 0x1b1   : > { %1972 = vst.msk [vmem:[%s2961_s8 + $0x9c] sm:$0xf] %vm1932_vm1, %v2314_v61  ;;  %v1652_v35 = vmax.f32 %v1518_v62, 0.0  ;;  %v2325_v6 = vpack.c.bf16 %v1662_v1, %v1662_v1  ;;  %v1660_v10 = vmax.f32 %v1550_v60, 0.0  ;;  %v1232_v9 = vadd.f32 %v2949_v49, %v1231_v52 }
 0x1b2   : > { %v1561_v51 = vadd.f32 %v2428_v2, %v1272_v42  ;;  %v1233_v47 = vpop.f32.mrf.mxu0  ;;  %v1552_v56 = vpop.f32.mrf.mxu1  ;;  %v1293_v62 = vadd.f32 %v2949_v49, %v2916_v20  ;;  %v1301_v1 = vadd.f32 %v2949_v49, %v2924_v28 }
 0x1b3   : > { %v2315_v13 = vpack.c.bf16 %v1652_v35, %v1652_v35  ;;  %1983 = vst.msk [vmem:[%s2961_s8 + $0xc8] sm:$0xf] %vm1932_vm1, %v2325_v6  ;;  %v2323_v0 = vpack.c.bf16 %v1660_v10, %v1660_v10  ;;  %v1521_v15 = vadd.f32 %v1520_v39, %v1232_v9  ;;  %v1553_v17 = vadd.f32 %v1552_v56, %v1264_v34 }
 0x1b4   : > { %v1663_v27 = vmax.f32 %v1561_v51, 0.0  ;;  %v1236_v18 = vpop.f32.mrf.mxu0  ;;  %v2431_v21 = vpop.f32.mrf.mxu1  ;;  %v1288_v39 = vadd.f32 %v2949_v49, %v2912_v16  ;;  %v1304_v6 = vadd.f32 %v2949_v49, %v2928_v32 }
 0x1b5   : > { %1973 = vst.msk [vmem:[%s2961_s8 + $0xa0] sm:$0xf] %vm1932_vm1, %v2315_v13  ;;  %1981 = vst.msk [vmem:[%s2961_s8 + $0xc0] sm:$0xf] %vm1932_vm1, %v2323_v0  ;;  %v1653_v25 = vmax.f32 %v1521_v15, 0.0  ;;  %v1661_v26 = vmax.f32 %v1553_v17, 0.0  ;;  %v1237_v12 = vadd.f32 %v2949_v49, %v1236_v18  ;;  %v1574_v19 = vadd.f32 %v2431_v21, %v1285_v7 }
 0x1b6   : > { %v2326_v55 = vpack.c.bf16 %v1663_v27, %v1663_v27  ;;  %v1238_v33 = vpop.f32.mrf.mxu0  ;;  %v1565_v37 = vpop.f32.mrf.mxu1  ;;  %v1296_v18 = vadd.f32 %v2949_v49, %v2920_v24 }
 0x1b7   : > { %v2316_v31 = vpack.c.bf16 %v1653_v25, %v1653_v25  ;;  %v2324_v38 = vpack.c.bf16 %v1661_v26, %v1661_v26  ;;  %v1526_v63 = vadd.f32 %v3092_v5, %v1237_v12  ;;  %v1666_v11 = vmax.f32 %v1574_v19, 0.0 }
 0x1b8   : > { %1984 = vst.msk [vmem:[%s2961_s8 + $0xcc] sm:$0xf] %vm1932_vm1, %v2326_v55  ;;  %v1566_v23 = vadd.f32 %v1565_v37, %v1277_v29  ;;  %v1239_v46 = vpop.f32.mrf.mxu0  ;;  %v2432_v4 = vpop.f32.mrf.mxu1  ;;  %v1309_v55 = vadd.f32 %v2949_v49, %v2932_v36 }
 0x1b9   : > { %1974 = vst.msk [vmem:[%s2961_s8 + $0xa4] sm:$0xf] %vm1932_vm1, %v2316_v31  ;;  %1982 = vst.msk [vmem:[%s2961_s8 + $0xc4] sm:$0xf] %vm1932_vm1, %v2324_v38  ;;  %v1654_v16 = vmax.f32 %v1526_v63, 0.0  ;;  %v2329_v53 = vpack.c.bf16 %v1666_v11, %v1666_v11  ;;  %v1240_v50 = vadd.f32 %v2949_v49, %v1239_v46  ;;  %v1577_v5 = vadd.f32 %v2432_v4, %v1288_v39 }
 0x1ba   : > { %v1664_v3 = vmax.f32 %v1566_v23, 0.0  ;;  %v1241_v54 = vpop.f32.mrf.mxu0  ;;  %v1568_v59 = vpop.f32.mrf.mxu1 }
 0x1bb   : > { %v2317_v58 = vpack.c.bf16 %v1654_v16, %v1654_v16  ;;  %1987 = vst.msk [vmem:[%s2961_s8 + $0xd8] sm:$0xf] %vm1932_vm1, %v2329_v53  ;;  %v1529_v8 = vadd.f32 %v3097_v14, %v1240_v50  ;;  %v1667_v43 = vmax.f32 %v1577_v5, 0.0  ;;  %v1569_v61 = vadd.f32 %v1568_v59, %v1280_v45 }
 0x1bc   : > { %v2327_v60 = vpack.c.bf16 %v1664_v3, %v1664_v3  ;;  %v1244_v34 = vpop.f32.mrf.mxu0  ;;  %v2435_v42 = vpop.f32.mrf.mxu1  ;;  %v1312_v16 = vadd.f32 %v2949_v49, %v2936_v40  ;;  %v1320_v53 = vadd.f32 %v2949_v49, %v2944_v48 }
 0x1bd   : > { %1975 = vst.msk [vmem:[%s2961_s8 + $0xa8] sm:$0xf] %vm1932_vm1, %v2317_v58  ;;  %v1655_v52 = vmax.f32 %v1529_v8, 0.0  ;;  %v2330_v2 = vpack.c.bf16 %v1667_v43, %v1667_v43  ;;  %v1665_v35 = vmax.f32 %v1569_v61, 0.0  ;;  %v1245_v14 = vadd.f32 %v2949_v49, %v1244_v34 }
 0x1be   : > { %1985 = vst.msk [vmem:[%s2961_s8 + $0xd0] sm:$0xf] %vm1932_vm1, %v2327_v60  ;;  %v1590_v20 = vadd.f32 %v2435_v42, %v1301_v1  ;;  %v1246_v10 = vpop.f32.mrf.mxu0  ;;  %v1581_v28 = vpop.f32.mrf.mxu1 }
 0x1bf   : > { %v2318_v9 = vpack.c.bf16 %v1655_v52, %v1655_v52  ;;  %1988 = vst.msk [vmem:[%s2961_s8 + $0xdc] sm:$0xf] %vm1932_vm1, %v2330_v2  ;;  %v2328_v7 = vpack.c.bf16 %v1665_v35, %v1665_v35  ;;  %v1534_v51 = vadd.f32 %v3107_v30, %v1245_v14  ;;  %v1582_v47 = vadd.f32 %v1581_v28, %v1293_v62 }
 0x1c0   : > { %v1670_v56 = vmax.f32 %v1590_v20, 0.0  ;;  %v1247_v13 = vpop.f32.mrf.mxu0  ;;  %v2436_v0 = vpop.f32.mrf.mxu1  ;;  %v1317_v30 = vadd.f32 %v2949_v49, %v2940_v44 }
 0x1c1   : > { %1976 = vst.msk [vmem:[%s2961_s8 + $0xac] sm:$0xf] %vm1932_vm1, %v2318_v9  ;;  %1986 = vst.msk [vmem:[%s2961_s8 + $0xd4] sm:$0xf] %vm1932_vm1, %v2328_v7  ;;  %v1656_v32 = vmax.f32 %v1534_v51, 0.0  ;;  %v1668_v15 = vmax.f32 %v1582_v47, 0.0  ;;  %v1248_v17 = vadd.f32 %v2949_v49, %v1247_v13  ;;  %v1593_v27 = vadd.f32 %v2436_v0, %v1304_v6 }
 0x1c2   : > { %v2333_v21 = vpack.c.bf16 %v1670_v56, %v1670_v56  ;;  %v1249_v25 = vpop.f32.mrf.mxu0  ;;  %v1584_v26 = vpop.f32.mrf.mxu1 }
 0x1c3   : > { %v2319_v12 = vpack.c.bf16 %v1656_v32, %v1656_v32  ;;  %v2331_v19 = vpack.c.bf16 %v1668_v15, %v1668_v15  ;;  %v1537_v29 = vadd.f32 %v3114_v41, %v1248_v17  ;;  %v1671_v39 = vmax.f32 %v1593_v27, 0.0 }
 0x1c4   : > { %1991 = vst.msk [vmem:[%s2961_s8 + $0xe8] sm:$0xf] %vm1932_vm1, %v2333_v21  ;;  %v1585_v33 = vadd.f32 %v1584_v26, %v1296_v18  ;;  %v1252_v37 = vpop.f32.mrf.mxu0  ;;  %v2439_v24 = vpop.f32.mrf.mxu1 }
 0x1c5   : > { %1977 = vst.msk [vmem:[%s2961_s8 + $0xb0] sm:$0xf] %vm1932_vm1, %v2319_v12  ;;  %1989 = vst.msk [vmem:[%s2961_s8 + $0xe0] sm:$0xf] %vm1932_vm1, %v2331_v19  ;;  %v1657_v44 = vmax.f32 %v1537_v29, 0.0  ;;  %v2334_v31 = vpack.c.bf16 %v1671_v39, %v1671_v39  ;;  %v1253_v38 = vadd.f32 %v2949_v49, %v1252_v37  ;;  %v1606_v41 = vadd.f32 %v2439_v24, %v1317_v30 }
 0x1c6   : > { %v1669_v63 = vmax.f32 %v1585_v33, 0.0  ;;  %v1254_v11 = vpop.f32.mrf.mxu0  ;;  %v1597_v45 = vpop.f32.mrf.mxu1 }
 0x1c7   : > { %v2320_v36 = vpack.c.bf16 %v1657_v44, %v1657_v44  ;;  %1992 = vst.msk [vmem:[%s2961_s8 + $0xec] sm:$0xf] %vm1932_vm1, %v2334_v31  ;;  %v1542_v23 = vadd.f32 %v3102_v22, %v1253_v38  ;;  %v1674_v46 = vmax.f32 %v1606_v41, 0.0  ;;  %v1598_v4 = vadd.f32 %v1597_v45, %v1309_v55 }
 0x1c8   : > { %v2332_v50 = vpack.c.bf16 %v1669_v63, %v1669_v63  ;;  %v1255_v5 = vpop.f32.mrf.mxu0  ;;  %v2440_v3 = vpop.f32.mrf.mxu1 }
 0x1c9   : > { %1978 = vst.msk [vmem:[%s2961_s8 + $0xb4] sm:$0xf] %vm1932_vm1, %v2320_v36  ;;  %v1658_v54 = vmax.f32 %v1542_v23, 0.0  ;;  %v2337_v59 = vpack.c.bf16 %v1674_v46, %v1674_v46  ;;  %v1672_v58 = vmax.f32 %v1598_v4, 0.0  ;;  %v1256_v22 = vadd.f32 %v2949_v49, %v1255_v5 }
 0x1ca   : > { %1990 = vst.msk [vmem:[%s2961_s8 + $0xe4] sm:$0xf] %vm1932_vm1, %v2332_v50  ;;  %v1609_v8 = vadd.f32 %v2440_v3, %v1320_v53  ;;  %v1257_v40 = vpop.f32.mrf.mxu0  ;;  %v1600_v43 = vpop.f32.mrf.mxu1 }
 0x1cb   : > { %v2321_v48 = vpack.c.bf16 %v1658_v54, %v1658_v54  ;;  %1995 = vst.msk [vmem:[%s2961_s8 + $0xf8] sm:$0xf] %vm1932_vm1, %v2337_v59  ;;  %v2335_v61 = vpack.c.bf16 %v1672_v58, %v1672_v58  ;;  %v1545_v62 = vadd.f32 %v3109_v57, %v1256_v22  ;;  %v1601_v1 = vadd.f32 %v1600_v43, %v1312_v16 }
 0x1cc   : > { %v1675_v60 = vmax.f32 %v1609_v8, 0.0 }
 0x1cd   : > { %1979 = vst.msk [vmem:[%s2961_s8 + $0xb8] sm:$0xf] %vm1932_vm1, %v2321_v48  ;;  %1993 = vst.msk [vmem:[%s2961_s8 + $0xf0] sm:$0xf] %vm1932_vm1, %v2335_v61  ;;  %v1659_v49 = vmax.f32 %v1545_v62, 0.0  ;;  %v1673_v34 = vmax.f32 %v1601_v1, 0.0 }
 0x1ce   : > { %v2338_v42 = vpack.c.bf16 %v1675_v60, %v1675_v60 }
 0x1cf   : > { %v2322_v52 = vpack.c.bf16 %v1659_v49, %v1659_v49  ;;  %v2336_v2 = vpack.c.bf16 %v1673_v34, %v1673_v34 }
 0x1d0   : > { %1996 = vst.msk [vmem:[%s2961_s8 + $0xfc] sm:$0xf] %vm1932_vm1, %v2338_v42 }
 0x1d1   : > { %1980 = vst.msk [vmem:[%s2961_s8 + $0xbc] sm:$0xf] %vm1932_vm1, %v2322_v52  ;;  %1994 = vst.msk [vmem:[%s2961_s8 + $0xf4] sm:$0xf] %vm1932_vm1, %v2336_v2 }
 0x1d2 PF: > { %s13_s12 = sadd.s32 1, %s2635_s12  }
 0x1d3   : > { %p10_p4 = scmp.ge.s32.totalorder %s13_s12, 6  }
 0x1d5   :  { %12 = sbr.rel (!%p10_p4) target bundleno = 1 (0x1), region = 62 }

// kernel: net_forward.30
= control target key start
LH: loop header
LB: loop body
LE: loop exit
PB: predicated region body
PF: predicated region fallthrough
CT: control target
= control target key end

     0   :  { %s3174_s12 = smov 0   ;;  %s3884_s0 = inlined_call_operand.vmem [shape: bf16[512,864], index: 0, kind: input, shape index: {}]   ;;  %s3885_s1 = inlined_call_operand.vmem [shape: bf16[864,96], index: 1, kind: input, shape index: {}]   ;;  %s3886_s2 = inlined_call_operand.vmem [shape: f32[1,96], index: 2, kind: input, shape index: {}]   ;;  %s3887_s3 = inlined_call_operand.vmem [shape: bf16[512,96], index: 3, kind: output, shape index: {}]  }
   0x1 LB: > { %s2247_s13 = sadd.s32 4294967295, %s3152_s12   ;;  %p2251_p0 = scmp.ge.s32.totalorder %s3152_s12, 1  ;;  %s3152_s12 = sphi %s3174_s12, %s13_s12  }
   0x2   : > { %p139_p1 = scmp.lt.s32.totalorder %s3152_s12, 3 }
   0x4   : > { %p140_p2 = pnand %p2251_p0, %p139_p1 }
   0x6   : > { %143 = sbr.rel (%p140_p2) target bundleno = 470 (0x1d6), region = 32 }
   0xb   : > { %v2932_v0 = vld [vmem:[%s3885_s1 + $0x78] sm:$0xff]   ;;  %s2252_s16 = sshll.u32 %s2247_s13, 5  ;;  %v2934_v2 = vld [vmem:[%s3885_s1 + $0x70] sm:$0xff]   ;;  %v2936_v4 = vld [vmem:[%s3885_s1 + $0x68] sm:$0xff]   ;;  %vm1305_vm0 = vcmask 785408   ;;  %vm2158_vm1 = vcmask 781312  }
   0xc   : > { %v2933_v1 = vld [vmem:[%s3885_s1 + $0x38] sm:$0xff]   ;;  %2505 = vmatprep.subr.bf16.mxu0 %v2932_v0  ;;  %2907 = vmatprep.subr.bf16.mxu1 %v2932_v0  ;;  %p165_p3 = scmp.lt.s32.totalorder %s2252_s16, 63  ;;  %v2935_v3 = vld [vmem:[%s3885_s1 + $0x30] sm:$0xff]   ;;  %v2937_v5 = vld [vmem:[%s3885_s1 + $0x28] sm:$0xff]  }
   0xd   : > { %2506 = vmatpush3.bf16.msra.mxu0 %v2933_v1  ;;  %2915 = vmatpush3.bf16.msra.mxu1 %v2933_v1  ;;  %v2938_v6 = vld [vmem:[%s3885_s1 + $0x60] sm:$0xff]   ;;  %v2940_v8 = vld [vmem:[%s3885_s1 + $0x58] sm:$0xff]   ;;  %v2942_v10 = vld [vmem:[%s3885_s1 + $0x50] sm:$0xff]  }
   0xe   : > { %2507 = vmatprep.subr.bf16.mxu0 %v2934_v2  ;;  %2908 = vmatprep.subr.bf16.mxu1 %v2934_v2  ;;  %s3913_s16 = smov (!%p165_p3, %s2252_s16), 63  ;;  %v2939_v7 = vld [vmem:[%s3885_s1 + $0x20] sm:$0xff]   ;;  %v2941_v9 = vld [vmem:[%s3885_s1 + $0x18] sm:$0xff]   ;;  %v2943_v13 = vld [vmem:[%s3885_s1 + $0x10] sm:$0xff]  }
   0xf   : > { %s2923_s29 = smul.u32 28, %s3913_s16  ;;  %v2944_v14 = vld [vmem:[%s3885_s1 + $0x48] sm:$0xff]   ;;  %v2946_v16 = vld [vmem:[%s3885_s1 + $0x40] sm:$0xff]   ;;  %v2954_v18 = vld [vmem:[%s3885_s1 + $0xf8] sm:$0xff]   ;;  %s2255_s4 = sshll.u32 %s3913_s16, 2 }
  0x10   : > { %v2945_v15 = vld [vmem:[%s3885_s1 + $0x8] sm:$0xff]   ;;  %v2947_v17 = vld [vmem:[%s3885_s1] sm:$0xff]   ;;  %v2955_v21 = vld [vmem:[%s3885_s1 + $0x178] sm:$0xff]   ;;  %s3732_s7 = scalar_lea.vmem %s3887_s3, %s2255_s4 }
  0x11   : > { %2508 = vmatpush3.bf16.msra.mxu0 %v2935_v3  ;;  %2916 = vmatpush3.bf16.msra.mxu1 %v2935_v3  ;;  %s3215_s9 = scalar_lea.vmem %s3884_s0, %s2923_s29  ;;  %v2956_v22 = vld [vmem:[%s3885_s1 + $0xb8] sm:$0xff]   ;;  %v2958_v24 = vld [vmem:[%s3885_s1 + $0xf0] sm:$0xff]   ;;  %v2966_v32 = vld [vmem:[%s3885_s1 + $0xe8] sm:$0xff]  }
  0x12   : > { %2509 = vmatprep.subr.bf16.mxu0 %v2936_v4  ;;  %2909 = vmatprep.subr.bf16.mxu1 %v2936_v4  ;;  %v2950_v11 = vld [vmem:[%s3215_s9 + $0x4] ss:$28 sps:$4 sm:$0xff]   ;;  %v2957_v23 = vld [vmem:[%s3885_s1 + $0x138] sm:$0xff]   ;;  %v2969_v27 = vld [vmem:[%s3885_s1 + $0x170] sm:$0xff]  }
  0x13   : > { %v2953_v12 = vld [vmem:[%s3215_s9 + $0x2a4] ss:$28 sps:$4 sm:$0xff]   ;;  %1386 = vmatprep.mubr.bf16.mxu0 %v2950_v11  ;;  %v2960_v25 = vld [vmem:[%s3215_s9 + $0x3c] ss:$28 sps:$4 sm:$0xff]   ;;  %v2959_v28 = vld [vmem:[%s3885_s1 + $0xb0] sm:$0xff]  }
  0x14   : > { %1482 = vmatprep.mubr.bf16.mxu1 %v2953_v12  ;;  %v2948_v19 = vld [vmem:[%s3215_s9] ss:$28 sps:$4 sm:$0xff]   ;;  %v2971_v29 = vld [vmem:[%s3885_s1 + $0x130] sm:$0xff]   ;;  %v2967_v33 = vld [vmem:[%s3885_s1 + $0xa8] sm:$0xff]  }
  0x15   : > { %2510 = vmatpush3.bf16.msra.mxu0 %v2937_v5  ;;  %2917 = vmatpush3.bf16.msra.mxu1 %v2937_v5  ;;  %v2951_v20 = vld [vmem:[%s3215_s9 + $0x2a0] ss:$28 sps:$4 sm:$0xff]   ;;  %v2964_v30 = vld [vmem:[%s3215_s9 + $0x38] ss:$28 sps:$4 sm:$0xff]   ;;  %v2976_v39 = vld [vmem:[%s3215_s9 + $0x70] ss:$28 sps:$4 sm:$0xff]  }
  0x16   : > { %2511 = vmatprep.subr.bf16.mxu0 %v2938_v6  ;;  %2910 = vmatprep.subr.bf16.mxu1 %v2938_v6  ;;  %v2962_v26 = vld [vmem:[%s3215_s9 + $0x2dc] ss:$28 sps:$4 sm:$0xff]   ;;  %v2968_v34 = vld [vmem:[%s3885_s1 + $0xe0] sm:$0xff]   ;;  %v2972_v35 = vld [vmem:[%s3215_s9 + $0x74] ss:$28 sps:$4 sm:$0xff]  }
  0x17   : > { %v2965_v31 = vld [vmem:[%s3215_s9 + $0x2d8] ss:$28 sps:$4 sm:$0xff]   ;;  %v2970_v37 = vld [vmem:[%s3885_s1 + $0xa0] sm:$0xff]   ;;  %v2977_v40 = vld [vmem:[%s3215_s9 + $0x310] ss:$28 sps:$4 sm:$0xff]  }
  0x18   : > { %v2974_v36 = vld [vmem:[%s3215_s9 + $0x314] ss:$28 sps:$4 sm:$0xff]   ;;  %v2978_v38 = vld [vmem:[%s3885_s1 + $0xd8] sm:$0xff]   ;;  %v2989_v41 = vld [vmem:[%s3885_s1 + $0x168] sm:$0xff]  }
  0x19   : > { %2512 = vmatpush3.bf16.msra.mxu0 %v2939_v7  ;;  %2918 = vmatpush3.bf16.msra.mxu1 %v2939_v7  ;;  %v2979_v42 = vld [vmem:[%s3885_s1 + $0x98] sm:$0xff]   ;;  %v2980_v43 = vld [vmem:[%s3885_s1 + $0xd0] sm:$0xff]   ;;  %v2991_v44 = vld [vmem:[%s3885_s1 + $0x128] sm:$0xff]  }
  0x1a   : > { %2513 = vmatprep.subr.bf16.mxu0 %v2940_v8  ;;  %2911 = vmatprep.subr.bf16.mxu1 %v2940_v8  ;;  %v2982_v45 = vld [vmem:[%s3215_s9 + $0xac] ss:$28 sps:$4 sm:$0xff]   ;;  %v2981_v47 = vld [vmem:[%s3885_s1 + $0x90] sm:$0xff]   ;;  %v3000_v51 = vld [vmem:[%s3885_s1 + $0x160] sm:$0xff]  }
  0x1b   : > { %v2984_v46 = vld [vmem:[%s3215_s9 + $0x34c] ss:$28 sps:$4 sm:$0xff]   ;;  %v3002_v53 = vld [vmem:[%s3885_s1 + $0x120] sm:$0xff]   ;;  %v3015_v60 = vld [vmem:[%s3885_s1 + $0x158] sm:$0xff]  }
  0x1c   : > { %v2988_v48 = vld [vmem:[%s3885_s1 + $0xc8] sm:$0xff]   ;;  %v2994_v54 = vld [vmem:[%s3215_s9 + $0xe4] ss:$28 sps:$4 sm:$0xff]   ;;  %v3016_v61 = vld [vmem:[%s3885_s1 + $0x118] sm:$0xff]  }
  0x1d   : > { %2514 = vmatpush3.bf16.msra.mxu0 %v2941_v9  ;;  %2919 = vmatpush3.bf16.msra.mxu1 %v2941_v9  ;;  %v2986_v49 = vld [vmem:[%s3215_s9 + $0xa8] ss:$28 sps:$4 sm:$0xff]   ;;  %v2999_v62 = vld [vmem:[%s3215_s9 + $0xe0] ss:$28 sps:$4 sm:$0xff]   ;;  %v3024_v2 = vld [vmem:[%s3885_s1 + $0x150] sm:$0xff]  }
  0x1e   : > { %2515 = vmatprep.subr.bf16.mxu0 %v2942_v10  ;;  %2912 = vmatprep.subr.bf16.mxu1 %v2942_v10  ;;  %v2987_v50 = vld [vmem:[%s3215_s9 + $0x348] ss:$28 sps:$4 sm:$0xff]   ;;  %v3003_v63 = vld [vmem:[%s3215_s9 + $0x11c] ss:$28 sps:$4 sm:$0xff]   ;;  %v3025_v3 = vld [vmem:[%s3885_s1 + $0x110] sm:$0xff]  }
  0x1f   : > { %v2990_v52 = vld [vmem:[%s3885_s1 + $0x88] sm:$0xff]   ;;  %v2992_v55 = vld [vmem:[%s3885_s1 + $0xc0] sm:$0xff]   ;;  %v3007_v4 = vld [vmem:[%s3215_s9 + $0x118] ss:$28 sps:$4 sm:$0xff]  }
  0x20   : > { %v2998_v56 = vld [vmem:[%s3215_s9 + $0xc] ss:$28 sps:$4 sm:$0xff]   ;;  %v2993_v57 = vld [vmem:[%s3885_s1 + $0x80] sm:$0xff]   ;;  %v3009_v6 = vld [vmem:[%s3215_s9 + $0x154] ss:$28 sps:$4 sm:$0xff]  }
  0x21   : > { %2516 = vmatpush3.bf16.msra.mxu0 %v2943_v13  ;;  %2920 = vmatpush3.bf16.msra.mxu1 %v2943_v13  ;;  %v3001_v58 = vld [vmem:[%s3885_s1 + $0x1a8] sm:$0xff]   ;;  %v3005_v0 = vld [vmem:[%s3215_s9 + $0x44] ss:$28 sps:$4 sm:$0xff]   ;;  %v3011_v7 = vld [vmem:[%s3215_s9 + $0x7c] ss:$28 sps:$4 sm:$0xff]  }
  0x22   : > { %2517 = vmatprep.subr.bf16.mxu0 %v2944_v14  ;;  %2913 = vmatprep.subr.bf16.mxu1 %v2944_v14  ;;  %v2996_v59 = vld [vmem:[%s3215_s9 + $0x8] ss:$28 sps:$4 sm:$0xff]   ;;  %v3008_v5 = vld [vmem:[%s3215_s9 + $0x40] ss:$28 sps:$4 sm:$0xff]   ;;  %v3013_v10 = vld [vmem:[%s3215_s9 + $0x150] ss:$28 sps:$4 sm:$0xff]  }
  0x23   : > { %v3023_v1 = vld [vmem:[%s3885_s1 + $0x1a0] sm:$0xff]   ;;  %v3038_v8 = vld [vmem:[%s3885_s1 + $0x148] sm:$0xff]   ;;  %v3014_v11 = vld [vmem:[%s3215_s9 + $0x78] ss:$28 sps:$4 sm:$0xff]  }
  0x24   : > { %v3039_v9 = vld [vmem:[%s3885_s1 + $0x108] sm:$0xff]   ;;  %v3044_v13 = vld [vmem:[%s3885_s1 + $0x198] sm:$0xff]   ;;  %v3019_v14 = vld [vmem:[%s3215_s9 + $0xb4] ss:$28 sps:$4 sm:$0xff]  }
  0x25   : > { %2518 = vmatpush3.bf16.msra.mxu0 %v2945_v15  ;;  %2921 = vmatpush3.bf16.msra.mxu1 %v2945_v15  ;;  %v3017_v12 = vld [vmem:[%s3215_s9 + $0x18c] ss:$28 sps:$4 sm:$0xff]   ;;  %v3047_v15 = vld [vmem:[%s3885_s1 + $0x140] sm:$0xff]  }
  0x26   : > { %2519 = vmatprep.subr.bf16.mxu0 %v2946_v16  ;;  %2914 = vmatprep.subr.bf16.mxu1 %v2946_v16  ;;  %v3048_v16 = vld [vmem:[%s3885_s1 + $0x100] sm:$0xff]  }
  0x29   : > { %2520 = vmatpush3.bf16.msra.mxu0 %v2947_v17  ;;  %2922 = vmatpush3.bf16.msra.mxu1 %v2947_v17  ;;  %v3021_v17 = vld [vmem:[%s3215_s9 + $0x188] ss:$28 sps:$4 sm:$0xff]  }
  0x2a   : > { %2617 = vmatprep.subr.bf16.mxu1 %v2954_v18  ;;  %2729 = vmatprep.subr.bf16.mxu0 %v2955_v21  ;;  %v3022_v18 = vld [vmem:[%s3215_s9 + $0xb0] ss:$28 sps:$4 sm:$0xff]  }
  0x2b   : > { %v3028_v21 = vld [vmem:[%s3215_s9 + $0xec] ss:$28 sps:$4 sm:$0xff]  }
  0x2c   : > { %1387 = vmatmul.mubr.bf16.vlgmr.msra.gmra.mxu0 %v2948_v19  ;;  %1483 = vmatmul.mubr.bf16.vlgmr.msra.gmra.mxu1 %v2951_v20  ;;  %v3026_v19 = vld [vmem:[%s3215_s9 + $0x1c4] ss:$28 sps:$4 sm:$0xff]   ;;  %v3061_v20 = vld [vmem:[%s3885_s1 + $0x190] sm:$0xff]  }
  0x2d   : > { %2618 = vmatpush3.bf16.msra.mxu1 %v2956_v22  ;;  %2730 = vmatpush3.bf16.msra.mxu0 %v2957_v23  ;;  %v3030_v22 = vld [vmem:[%s3215_s9 + $0x1c0] ss:$28 sps:$4 sm:$0xff]   ;;  %v3031_v23 = vld [vmem:[%s3215_s9 + $0xe8] ss:$28 sps:$4 sm:$0xff]  }
  0x2e   : > { %2619 = vmatprep.subr.bf16.mxu1 %v2958_v24  ;;  %1394 = vmatprep.mubr.bf16.mxu0 %v2960_v25  ;;  %v3032_v24 = vld [vmem:[%s3215_s9 + $0x1fc] ss:$28 sps:$4 sm:$0xff]   ;;  %v3034_v25 = vld [vmem:[%s3215_s9 + $0x124] ss:$28 sps:$4 sm:$0xff]  }
  0x2f   : > { %1490 = vmatprep.mubr.bf16.mxu1 %v2962_v26  ;;  %2731 = vmatprep.subr.bf16.mxu0 %v2969_v27  ;;  %v3080_v26 = vld [vmem:[%s3885_s1 + $0x188] sm:$0xff]   ;;  %v3036_v27 = vld [vmem:[%s3215_s9 + $0x1f8] ss:$28 sps:$4 sm:$0xff]  }
  0x31   : > { %2620 = vmatpush3.bf16.msra.mxu1 %v2959_v28  ;;  %2732 = vmatpush3.bf16.msra.mxu0 %v2971_v29  ;;  %v3037_v28 = vld [vmem:[%s3215_s9 + $0x120] ss:$28 sps:$4 sm:$0xff]   ;;  %v3040_v29 = vld [vmem:[%s3215_s9 + $0x234] ss:$28 sps:$4 sm:$0xff]  }
  0x32   : > { %2621 = vmatprep.subr.bf16.mxu1 %v2966_v32  ;;  %2733 = vmatprep.subr.bf16.mxu0 %v2989_v41  ;;  %v3045_v32 = vld [vmem:[%s3215_s9 + $0x230] ss:$28 sps:$4 sm:$0xff]   ;;  %v3060_v41 = vld [vmem:[%s3215_s9 + $0x1c8] ss:$28 sps:$4 sm:$0xff]  }
  0x34   : > { %1395 = vmatmul.mubr.bf16.gmra.mxu0 %v2964_v30  ;;  %1491 = vmatmul.mubr.bf16.gmra.mxu1 %v2965_v31  ;;  %v3042_v30 = vld [vmem:[%s3215_s9 + $0x15c] ss:$28 sps:$4 sm:$0xff]   ;;  %v3097_v31 = vld [vmem:[%s3885_s1 + $0x180] sm:$0xff]  }
  0x35   : > { %2622 = vmatpush3.bf16.msra.mxu1 %v2967_v33  ;;  %1402 = vmatprep.mubr.bf16.mxu0 %v2972_v35  ;;  %v3046_v33 = vld [vmem:[%s3215_s9 + $0x158] ss:$28 sps:$4 sm:$0xff]  }
  0x36   : > { %2623 = vmatprep.subr.bf16.mxu1 %v2968_v34  ;;  %1498 = vmatprep.mubr.bf16.mxu1 %v2974_v36  ;;  %v3049_v34 = vld [vmem:[%s3215_s9 + $0x26c] ss:$28 sps:$4 sm:$0xff]   ;;  %v3051_v35 = vld [vmem:[%s3215_s9 + $0x194] ss:$28 sps:$4 sm:$0xff]  }
  0x37   : > { %2734 = vmatpush3.bf16.msra.mxu0 %v2991_v44  ;;  %v3053_v36 = vld [vmem:[%s3215_s9 + $0x268] ss:$28 sps:$4 sm:$0xff]   ;;  %v3066_v44 = vld [vmem:[%s3215_s9 + $0x200] ss:$28 sps:$4 sm:$0xff]  }
  0x38   : > { %2735 = vmatprep.subr.bf16.mxu0 %v3000_v51  ;;  %v3076_v51 = vld [vmem:[%s3215_s9 + $0xbc] ss:$28 sps:$4 sm:$0xff]  }
  0x39   : > { %2624 = vmatpush3.bf16.msra.mxu1 %v2970_v37  ;;  %v3054_v37 = vld [vmem:[%s3215_s9 + $0x190] ss:$28 sps:$4 sm:$0xff]  }
  0x3a   : > { %2625 = vmatprep.subr.bf16.mxu1 %v2978_v38  ;;  %v3055_v38 = vld [vmem:[%s3215_s9 + $0x1cc] ss:$28 sps:$4 sm:$0xff]  }
  0x3b   : > { %2736 = vmatpush3.bf16.msra.mxu0 %v3002_v53  ;;  %v3079_v53 = vld [vmem:[%s3215_s9 + $0xb8] ss:$28 sps:$4 sm:$0xff]  }
  0x3c   : > { %1403 = vmatmul.mubr.bf16.gmra.mxu0 %v2976_v39  ;;  %1499 = vmatmul.mubr.bf16.gmra.mxu1 %v2977_v40  ;;  %v3059_v39 = vld [vmem:[%s3215_s9 + $0x14] ss:$28 sps:$4 sm:$0xff]  }
  0x3d   : > { %2626 = vmatpush3.bf16.msra.mxu1 %v2979_v42  ;;  %1410 = vmatprep.mubr.bf16.mxu0 %v2982_v45  ;;  %v3057_v40 = vld [vmem:[%s3215_s9 + $0x10] ss:$28 sps:$4 sm:$0xff]   ;;  %v3062_v42 = vld [vmem:[%s3215_s9 + $0x204] ss:$28 sps:$4 sm:$0xff]  }
  0x3e   : > { %2627 = vmatprep.subr.bf16.mxu1 %v2980_v43  ;;  %1506 = vmatprep.mubr.bf16.mxu1 %v2984_v46  ;;  %v3064_v43 = vld [vmem:[%s3215_s9 + $0x4c] ss:$28 sps:$4 sm:$0xff]   ;;  %v3068_v46 = vld [vmem:[%s3215_s9 + $0x23c] ss:$28 sps:$4 sm:$0xff]  }
  0x3f   : > { %2737 = vmatprep.subr.bf16.mxu0 %v3015_v60  ;;  %v3067_v45 = vld [vmem:[%s3215_s9 + $0x48] ss:$28 sps:$4 sm:$0xff]   ;;  %v3091_v60 = vld [vmem:[%s3215_s9 + $0x2e0] ss:$28 sps:$4 sm:$0xff]  }
  0x40   : > { %2738 = vmatpush3.bf16.msra.mxu0 %v3016_v61  ;;  %v3092_v61 = vld [vmem:[%s3215_s9 + $0x128] ss:$28 sps:$4 sm:$0xff]  }
  0x41   : > { %2628 = vmatpush3.bf16.msra.mxu1 %v2981_v47  ;;  %2739 = vmatprep.subr.bf16.mxu0 %v3024_v2  ;;  %v3070_v47 = vld [vmem:[%s3215_s9 + $0x84] ss:$28 sps:$4 sm:$0xff]   ;;  %v3100_v2 = vld [vmem:[%s3215_s9 + $0x354] ss:$28 sps:$4 sm:$0xff]  }
  0x42   : > { %2629 = vmatprep.subr.bf16.mxu1 %v2988_v48  ;;  %v3072_v48 = vld [vmem:[%s3215_s9 + $0x238] ss:$28 sps:$4 sm:$0xff]  }
  0x44   : > { %1411 = vmatmul.mubr.bf16.gmra.mxu0 %v2986_v49  ;;  %1507 = vmatmul.mubr.bf16.gmra.mxu1 %v2987_v50  ;;  %v3073_v49 = vld [vmem:[%s3215_s9 + $0x80] ss:$28 sps:$4 sm:$0xff]   ;;  %v3074_v50 = vld [vmem:[%s3215_s9 + $0x274] ss:$28 sps:$4 sm:$0xff]  }
  0x45   : > { %2630 = vmatpush3.bf16.msra.mxu1 %v2990_v52  ;;  %1418 = vmatprep.mubr.bf16.mxu0 %v2994_v54  ;;  %v3078_v52 = vld [vmem:[%s3215_s9 + $0x270] ss:$28 sps:$4 sm:$0xff]  }
  0x46   : > { %2631 = vmatprep.subr.bf16.mxu1 %v2992_v55  ;;  %1547 = vmatprep.mubr.bf16.mxu1 %v2998_v56  ;;  %v3081_v54 = vld [vmem:[%s3215_s9 + $0x2ac] ss:$28 sps:$4 sm:$0xff]   ;;  %v3083_v55 = vld [vmem:[%s3215_s9 + $0xf4] ss:$28 sps:$4 sm:$0xff]  }
  0x47   : > { %2740 = vmatpush3.bf16.msra.mxu0 %v3025_v3  ;;  %v3085_v56 = vld [vmem:[%s3215_s9 + $0x2a8] ss:$28 sps:$4 sm:$0xff]   ;;  %v3102_v3 = vld [vmem:[%s3215_s9 + $0x19c] ss:$28 sps:$4 sm:$0xff]  }
  0x48   : > { %2741 = vmatprep.subr.bf16.mxu0 %v3038_v8  ;;  %v3109_v8 = vld [vmem:[%s3215_s9 + $0x1d0] ss:$28 sps:$4 sm:$0xff]  }
  0x49   : > { %2632 = vmatpush3.bf16.msra.mxu1 %v2993_v57  ;;  %v3086_v57 = vld [vmem:[%s3215_s9 + $0xf0] ss:$28 sps:$4 sm:$0xff]  }
  0x4a   : > { %2863 = vmatprep.subr.bf16.mxu1 %v3001_v58 }
  0x4b   : > { %2742 = vmatpush3.bf16.msra.mxu0 %v3039_v9  ;;  %v3110_v9 = vld [vmem:[%s3215_s9 + $0x50] ss:$28 sps:$4 sm:$0xff]  }
  0x4c   : > { %1419 = vmatmul.mubr.bf16.gmra.mxu0 %v2999_v62  ;;  %1548 = vmatmul.mubr.bf16.vlgmr.msra.gmra.mxu1 %v2996_v59  ;;  %v3089_v59 = vld [vmem:[%s3215_s9 + $0x12c] ss:$28 sps:$4 sm:$0xff]   ;;  %v3093_v62 = vld [vmem:[%s3215_s9 + $0x31c] ss:$28 sps:$4 sm:$0xff]  }
  0x4d   : > { %2864 = vmatpush3.bf16.msra.mxu1 %v3001_v58  ;;  %1426 = vmatprep.mubr.bf16.mxu0 %v3003_v63  ;;  %v3087_v58 = vld [vmem:[%s3215_s9 + $0x2e4] ss:$28 sps:$4 sm:$0xff]  }
  0x4e   : > { %1555 = vmatprep.mubr.bf16.mxu1 %v3005_v0  ;;  %2865 = vmatprep.subr.bf16.mxu1 %v3023_v1  ;;  %v3095_v63 = vld [vmem:[%s3215_s9 + $0x164] ss:$28 sps:$4 sm:$0xff]   ;;  %v3098_v0 = vld [vmem:[%s3215_s9 + $0x318] ss:$28 sps:$4 sm:$0xff]  }
  0x4f   : > { %2743 = vmatprep.subr.bf16.mxu0 %v3047_v15  ;;  %v3118_v15 = vld [vmem:[%s3215_s9 + $0xf8] ss:$28 sps:$4 sm:$0xff]  }
  0x50   : > { %2744 = vmatpush3.bf16.msra.mxu0 %v3048_v16  ;;  %v3119_v16 = vld [vmem:[%s3215_s9 + $0x240] ss:$28 sps:$4 sm:$0xff]  }
  0x51   : > { %2866 = vmatpush3.bf16.msra.mxu1 %v3023_v1  ;;  %v3099_v1 = vld [vmem:[%s3215_s9 + $0x160] ss:$28 sps:$4 sm:$0xff]  }
  0x52   : > { %2867 = vmatprep.subr.bf16.mxu1 %v3044_v13 }
  0x54   : > { %1427 = vmatmul.mubr.bf16.gmra.mxu0 %v3007_v4  ;;  %1556 = vmatmul.mubr.bf16.gmra.mxu1 %v3008_v5  ;;  %v3104_v4 = vld [vmem:[%s3215_s9 + $0x350] ss:$28 sps:$4 sm:$0xff]   ;;  %v3105_v5 = vld [vmem:[%s3215_s9 + $0x198] ss:$28 sps:$4 sm:$0xff]  }
  0x55   : > { %1434 = vmatprep.mubr.bf16.mxu0 %v3009_v6  ;;  %1563 = vmatprep.mubr.bf16.mxu1 %v3011_v7  ;;  %v3106_v6 = vld [vmem:[%s3215_s9 + $0x1d4] ss:$28 sps:$4 sm:$0xff]  }
  0x56   : > { %2868 = vmatpush3.bf16.msra.mxu1 %v3044_v13  ;;  %v3108_v7 = vld [vmem:[%s3215_s9 + $0x18] ss:$28 sps:$4 sm:$0xff]   ;;  %v3115_v13 = vld [vmem:[%s3215_s9 + $0xc0] ss:$28 sps:$4 sm:$0xff]  }
  0x57   : > { %2869 = vmatprep.subr.bf16.mxu1 %v3061_v20 }
  0x5a   : > { %2870 = vmatpush3.bf16.msra.mxu1 %v3061_v20  ;;  %v3124_v20 = vld [vmem:[%s3215_s9 + $0x278] ss:$28 sps:$4 sm:$0xff]  }
  0x5b   : > { %2871 = vmatprep.subr.bf16.mxu1 %v3080_v26 }
  0x5c   : > { %1435 = vmatmul.mubr.bf16.gmra.mxu0 %v3013_v10  ;;  %1564 = vmatmul.mubr.bf16.gmra.mxu1 %v3014_v11  ;;  %v3111_v10 = vld [vmem:[%s3215_s9 + $0x20c] ss:$28 sps:$4 sm:$0xff]  }
  0x5d   : > { %1442 = vmatprep.mubr.bf16.mxu0 %v3017_v12  ;;  %1571 = vmatprep.mubr.bf16.mxu1 %v3019_v14  ;;  %v3113_v11 = vld [vmem:[%s3215_s9 + $0x88] ss:$28 sps:$4 sm:$0xff]  }
  0x5e   : > { %2872 = vmatpush3.bf16.msra.mxu1 %v3080_v26  ;;  %v3114_v12 = vld [vmem:[%s3215_s9 + $0x208] ss:$28 sps:$4 sm:$0xff]  }
  0x5f   : > { %2873 = vmatprep.subr.bf16.mxu1 %v3097_v31  ;;  %v3116_v14 = vld [vmem:[%s3215_s9 + $0x244] ss:$28 sps:$4 sm:$0xff]   ;;  %v3131_v26 = vld [vmem:[%s3215_s9 + $0x2ec] ss:$28 sps:$4 sm:$0xff]  }
  0x62   : > { %2874 = vmatpush3.bf16.msra.mxu1 %v3097_v31 }
  0x64   : > { %1443 = vmatmul.mubr.bf16.gmra.mxu0 %v3021_v17  ;;  %1572 = vmatmul.mubr.bf16.gmra.mxu1 %v3022_v18  ;;  %v3120_v17 = vld [vmem:[%s3215_s9 + $0x130] ss:$28 sps:$4 sm:$0xff]   ;;  %v3121_v18 = vld [vmem:[%s3215_s9 + $0x27c] ss:$28 sps:$4 sm:$0xff]  }
  0x65   : > { %1450 = vmatprep.mubr.bf16.mxu0 %v3026_v19  ;;  %1579 = vmatprep.mubr.bf16.mxu1 %v3028_v21  ;;  %v3123_v19 = vld [vmem:[%s3215_s9 + $0x168] ss:$28 sps:$4 sm:$0xff]   ;;  %v3125_v21 = vld [vmem:[%s3215_s9 + $0x1a0] ss:$28 sps:$4 sm:$0xff]  }
  0x6c   : > { %1451 = vmatmul.mubr.bf16.gmra.mxu0 %v3030_v22  ;;  %1580 = vmatmul.mubr.bf16.gmra.mxu1 %v3031_v23  ;;  %v3126_v22 = vld [vmem:[%s3215_s9 + $0x2b4] ss:$28 sps:$4 sm:$0xff]  }
  0x6d   : > { %1458 = vmatprep.mubr.bf16.mxu0 %v3032_v24  ;;  %1587 = vmatprep.mubr.bf16.mxu1 %v3034_v25  ;;  %v3128_v23 = vld [vmem:[%s3215_s9 + $0x1d8] ss:$28 sps:$4 sm:$0xff]   ;;  %v3129_v24 = vld [vmem:[%s3215_s9 + $0x2b0] ss:$28 sps:$4 sm:$0xff]  }
  0x6e   : > { %v3130_v25 = vld [vmem:[%s3215_s9 + $0x210] ss:$28 sps:$4 sm:$0xff]  }
  0x74   : > { %1459 = vmatmul.mubr.bf16.gmra.mxu0 %v3036_v27  ;;  %1588 = vmatmul.mubr.bf16.gmra.mxu1 %v3037_v28  ;;  %v3133_v27 = vld [vmem:[%s3215_s9 + $0x248] ss:$28 sps:$4 sm:$0xff]  }
  0x75   : > { %1466 = vmatprep.mubr.bf16.mxu0 %v3040_v29  ;;  %1595 = vmatprep.mubr.bf16.mxu1 %v3042_v30 }
  0x7c   : > { %1467 = vmatmul.mubr.bf16.gmra.mxu0 %v3045_v32  ;;  %1596 = vmatmul.mubr.bf16.gmra.mxu1 %v3046_v33 }
  0x7d   : > { %1474 = vmatprep.mubr.bf16.mxu0 %v3049_v34  ;;  %1603 = vmatprep.mubr.bf16.mxu1 %v3051_v35 }
  0x84   : > { %1475 = vmatmul.mubr.bf16.gmra.mxu0 %v3053_v36  ;;  %1604 = vmatmul.mubr.bf16.gmra.mxu1 %v3054_v37  ;;  %v3134_v36 = vld [vmem:[%s3215_s9 + $0x2e8] ss:$28 sps:$4 sm:$0xff]   ;;  %v3135_v37 = vld [vmem:[%s3215_s9 + $0x280] ss:$28 sps:$4 sm:$0xff]  }
  0x85   : > { %1611 = vmatprep.mubr.bf16.mxu1 %v3055_v38  ;;  %1708 = vmatprep.mubr.bf16.mxu0 %v3059_v39  ;;  %v3136_v38 = vld [vmem:[%s3215_s9 + $0x324] ss:$28 sps:$4 sm:$0xff]   ;;  %v3138_v39 = vld [vmem:[%s3215_s9 + $0x2b8] ss:$28 sps:$4 sm:$0xff]  }
  0x8c   : > { %1612 = vmatmul.mubr.bf16.gmra.mxu1 %v3060_v41  ;;  %1709 = vmatmul.mubr.bf16.vlgmr.msra.gmra.mxu0 %v3057_v40 }
  0x8d   : > { %1619 = vmatprep.mubr.bf16.mxu1 %v3062_v42  ;;  %1716 = vmatprep.mubr.bf16.mxu0 %v3064_v43 }
  0x94   : > { %1620 = vmatmul.mubr.bf16.gmra.mxu1 %v3066_v44  ;;  %1717 = vmatmul.mubr.bf16.gmra.mxu0 %v3067_v45 }
  0x95   : > { %1627 = vmatprep.mubr.bf16.mxu1 %v3068_v46  ;;  %1724 = vmatprep.mubr.bf16.mxu0 %v3070_v47 }
  0x9c   : > { %1628 = vmatmul.mubr.bf16.gmra.mxu1 %v3072_v48  ;;  %1725 = vmatmul.mubr.bf16.gmra.mxu0 %v3073_v49 }
  0x9d   : > { %1635 = vmatprep.mubr.bf16.mxu1 %v3074_v50  ;;  %1732 = vmatprep.mubr.bf16.mxu0 %v3076_v51 }
  0xa4   : > { %1636 = vmatmul.mubr.bf16.gmra.mxu1 %v3078_v52  ;;  %1733 = vmatmul.mubr.bf16.gmra.mxu0 %v3079_v53  ;;  %v3139_v52 = vld [vmem:[%s3215_s9 + $0x320] ss:$28 sps:$4 sm:$0xff]   ;;  %v3140_v53 = vld [vmem:[%s3215_s9 + $0x2f0] ss:$28 sps:$4 sm:$0xff]  }
  0xa5   : > { %1643 = vmatprep.mubr.bf16.mxu1 %v3081_v54  ;;  %1740 = vmatprep.mubr.bf16.mxu0 %v3083_v55  ;;  %v3141_v54 = vld [vmem:[%s3215_s9 + $0x35c] ss:$28 sps:$4 sm:$0xff]   ;;  %v3143_v55 = vld [vmem:[%s3215_s9 + $0x328] ss:$28 sps:$4 sm:$0xff]  }
  0xac   : > { %1644 = vmatmul.mubr.bf16.gmra.mxu1 %v3085_v56  ;;  %1741 = vmatmul.mubr.bf16.gmra.mxu0 %v3086_v57 }
  0xad   : > { %1651 = vmatprep.mubr.bf16.mxu1 %v3087_v58  ;;  %1748 = vmatprep.mubr.bf16.mxu0 %v3089_v59 }
  0xb4   : > { %1652 = vmatmul.mubr.bf16.gmra.mxu1 %v3091_v60  ;;  %1749 = vmatmul.mubr.bf16.gmra.mxu0 %v3092_v61 }
  0xb5   : > { %1659 = vmatprep.mubr.bf16.mxu1 %v3093_v62  ;;  %1756 = vmatprep.mubr.bf16.mxu0 %v3095_v63 }
  0xbc   : > { %1660 = vmatmul.mubr.bf16.gmra.mxu1 %v3098_v0  ;;  %1757 = vmatmul.mubr.bf16.gmra.mxu0 %v3099_v1 }
  0xbd   : > { %1667 = vmatprep.mubr.bf16.mxu1 %v3100_v2  ;;  %1764 = vmatprep.mubr.bf16.mxu0 %v3102_v3 }
  0xc4   : > { %1668 = vmatmul.mubr.bf16.gmra.mxu1 %v3104_v4  ;;  %1765 = vmatmul.mubr.bf16.gmra.mxu0 %v3105_v5  ;;  %v3144_v4 = vld [vmem:[%s3215_s9 + $0x358] ss:$28 sps:$4 sm:$0xff]   ;;  %v3145_v5 = vld [vmem:[%s3215_s9 + $0x360] ss:$28 sps:$4 sm:$0xff]  }
  0xc5   : > { %1772 = vmatprep.mubr.bf16.mxu0 %v3106_v6  ;;  %2875 = vmatprep.mubr.msk.bf16.mxu1 %vm1305_vm0, %v3108_v7 }
  0xcc   : > { %1773 = vmatmul.mubr.bf16.gmra.mxu0 %v3109_v8  ;;  %2876 = vmatmul.mubr.msk.bf16.vlgmr.msra.gmra.mxu1 %vm1305_vm0, %v3110_v9 }
  0xcd   : > { %1780 = vmatprep.mubr.bf16.mxu0 %v3111_v10  ;;  %2879 = vmatprep.mubr.msk.bf16.mxu1 %vm1305_vm0, %v3113_v11 }
  0xd4   : > { %1781 = vmatmul.mubr.bf16.gmra.mxu0 %v3114_v12  ;;  %2880 = vmatmul.mubr.msk.bf16.gmra.mxu1 %vm1305_vm0, %v3115_v13 }
  0xd5   : > { %1788 = vmatprep.mubr.bf16.mxu0 %v3116_v14  ;;  %2883 = vmatprep.mubr.msk.bf16.mxu1 %vm1305_vm0, %v3118_v15 }
  0xdc   : > { %1789 = vmatmul.mubr.bf16.gmra.mxu0 %v3119_v16  ;;  %2884 = vmatmul.mubr.msk.bf16.gmra.mxu1 %vm1305_vm0, %v3120_v17 }
  0xdd   : > { %1796 = vmatprep.mubr.bf16.mxu0 %v3121_v18  ;;  %2887 = vmatprep.mubr.msk.bf16.mxu1 %vm1305_vm0, %v3123_v19 }
  0xe4   : > { %1797 = vmatmul.mubr.bf16.gmra.mxu0 %v3124_v20  ;;  %2888 = vmatmul.mubr.msk.bf16.gmra.mxu1 %vm1305_vm0, %v3125_v21 }
  0xe5   : > { %1804 = vmatprep.mubr.bf16.mxu0 %v3126_v22  ;;  %2891 = vmatprep.mubr.msk.bf16.mxu1 %vm1305_vm0, %v3128_v23  ;;  %v3509_v22 = vld [vmem:[%s3886_s2] ss:$0 sm:$0xff] }
  0xec   : > { %v2521_v28 = vpop.f32.mrf.mxu0  ;;  %v2593_v29 = vpop.f32.mrf.mxu1  ;;  %1805 = vmatmul.mubr.bf16.gmra.mxu0 %v3129_v24  ;;  %2892 = vmatmul.mubr.msk.bf16.gmra.mxu1 %vm1305_vm0, %v3130_v25 }
  0xed   : > { %1812 = vmatprep.mubr.bf16.mxu0 %v3131_v26  ;;  %2895 = vmatprep.mubr.msk.bf16.mxu1 %vm1305_vm0, %v3133_v27 }
  0xee   : > { %v2522_v30 = vpop.f32.mrf.mxu0  ;;  %v2594_v31 = vpop.f32.mrf.mxu1 }
  0xef   : > { %v3465_v32 = vadd.f32 %v2522_v30, %v2521_v28  ;;  %v3467_v33 = vadd.f32 %v2594_v31, %v2593_v29 }
  0xf0   : > { %v2524_v34 = vpop.f32.mrf.mxu0  ;;  %v2596_v35 = vpop.f32.mrf.mxu1 }
  0xf1   : > { %v1389_v27 = vadd.f32 %v3465_v32, %v3509_v22 }
  0xf2   : > { %v2525_v40 = vpop.f32.mrf.mxu0  ;;  %v2597_v41 = vpop.f32.mrf.mxu1 }
  0xf3   : > { %v3473_v42 = vadd.f32 %v2525_v40, %v2524_v34  ;;  %v3475_v43 = vadd.f32 %v2597_v41, %v2596_v35 }
  0xf4   : > { %v2527_v44 = vpop.f32.mrf.mxu0  ;;  %v2599_v45 = vpop.f32.mrf.mxu1  ;;  %1813 = vmatmul.mubr.bf16.gmra.mxu0 %v3134_v36  ;;  %2896 = vmatmul.mubr.msk.bf16.gmra.mxu1 %vm1305_vm0, %v3135_v37 }
  0xf5   : > { %1820 = vmatprep.mubr.bf16.mxu0 %v3136_v38  ;;  %2899 = vmatprep.mubr.msk.bf16.mxu1 %vm1305_vm0, %v3138_v39  ;;  %v1392_v37 = vadd.f32 %v3473_v42, %v3509_v22 }
  0xf6   : > { %v2528_v46 = vpop.f32.mrf.mxu0  ;;  %v2600_v47 = vpop.f32.mrf.mxu1 }
  0xf7   : > { %v3479_v48 = vadd.f32 %v2528_v46, %v2527_v44  ;;  %v3481_v49 = vadd.f32 %v2600_v47, %v2599_v45 }
  0xf8   : > { %v2530_v50 = vpop.f32.mrf.mxu0  ;;  %v2602_v51 = vpop.f32.mrf.mxu1 }
  0xf9   : > { %v1397_v46 = vadd.f32 %v3479_v48, %v3509_v22 }
  0xfa   : > { %v2531_v56 = vpop.f32.mrf.mxu0  ;;  %v2603_v57 = vpop.f32.mrf.mxu1 }
  0xfb   : > { %v3487_v58 = vadd.f32 %v2531_v56, %v2530_v50  ;;  %v3489_v59 = vadd.f32 %v2603_v57, %v2602_v51 }
  0xfc   : > { %v2533_v60 = vpop.f32.mrf.mxu0  ;;  %v2605_v61 = vpop.f32.mrf.mxu1  ;;  %1821 = vmatmul.mubr.bf16.gmra.mxu0 %v3139_v52  ;;  %2900 = vmatmul.mubr.msk.bf16.gmra.mxu1 %vm1305_vm0, %v3140_v53 }
  0xfd   : > { %1828 = vmatprep.mubr.bf16.mxu0 %v3141_v54  ;;  %2903 = vmatprep.mubr.msk.bf16.mxu1 %vm1305_vm0, %v3143_v55  ;;  %v1400_v55 = vadd.f32 %v3487_v58, %v3509_v22 }
  0xfe   : > { %v2534_v62 = vpop.f32.mrf.mxu0  ;;  %v2606_v63 = vpop.f32.mrf.mxu1 }
  0xff   : > { %v2535_v0 = vadd.f32 %v2534_v62, %v2533_v60  ;;  %v3493_v1 = vadd.f32 %v2606_v63, %v2605_v61 }
 0x100   : > { %v2536_v2 = vpop.f32.mrf.mxu0  ;;  %v2608_v3 = vpop.f32.mrf.mxu1 }
 0x102   : > { %v2537_v6 = vpop.f32.mrf.mxu0  ;;  %v2609_v7 = vpop.f32.mrf.mxu1 }
 0x103   : > { %v2538_v8 = vadd.f32 %v2537_v6, %v2536_v2  ;;  %v3497_v9 = vadd.f32 %v2609_v7, %v2608_v3  ;;  %v1405_v2 = vadd.f32 %v2535_v0, %v3509_v22 }
 0x104   : > { %v2539_v10 = vpop.f32.mrf.mxu0  ;;  %v2611_v11 = vpop.f32.mrf.mxu1  ;;  %1829 = vmatmul.mubr.bf16.gmra.mxu0 %v3144_v4  ;;  %2904 = vmatmul.mubr.msk.bf16.gmra.mxu1 %vm1305_vm0, %v3145_v5 }
 0x106   : > { %v2540_v12 = vpop.f32.mrf.mxu0  ;;  %v2612_v13 = vpop.f32.mrf.mxu1 }
 0x107   : > { %v2541_v14 = vadd.f32 %v2540_v12, %v2539_v10  ;;  %v3500_v15 = vadd.f32 %v2612_v13, %v2611_v11  ;;  %v1408_v11 = vadd.f32 %v2538_v8, %v3509_v22 }
 0x108   : > { %v2542_v16 = vpop.f32.mrf.mxu0  ;;  %v2614_v17 = vpop.f32.mrf.mxu1 }
 0x10a   : > { %v2543_v18 = vpop.f32.mrf.mxu0  ;;  %v2615_v19 = vpop.f32.mrf.mxu1 }
 0x10b   : > { %v3502_v20 = vadd.f32 %v2543_v18, %v2542_v16  ;;  %v3504_v21 = vadd.f32 %v2615_v19, %v2614_v17 }
 0x10c   : > { %v2545_v23 = vpop.f32.mrf.mxu0  ;;  %v2633_v24 = vpop.f32.mrf.mxu1 }
 0x10e   : > { %v2546_v25 = vpop.f32.mrf.mxu0  ;;  %v2634_v26 = vpop.f32.mrf.mxu1 }
 0x10f   : > { %v3513_v28 = vadd.f32 %v2546_v25, %v2545_v23  ;;  %v2635_v29 = vadd.f32 %v2634_v26, %v2633_v24  ;;  %v1413_v23 = vadd.f32 %v2541_v14, %v3509_v22 }
 0x110   : > { %v2548_v30 = vpop.f32.mrf.mxu0  ;;  %v2636_v31 = vpop.f32.mrf.mxu1 }
 0x111   : > { %v3515_v34 = vadd.f32 %v2635_v29, %v1389_v27 }
 0x112   : > { %v2549_v35 = vpop.f32.mrf.mxu0  ;;  %v2637_v36 = vpop.f32.mrf.mxu1 }
 0x113   : > { %v3519_v38 = vadd.f32 %v2549_v35, %v2548_v30  ;;  %v2638_v39 = vadd.f32 %v2637_v36, %v2636_v31  ;;  %v1416_v31 = vadd.f32 %v3502_v20, %v3509_v22 }
 0x114   : > { %v2551_v40 = vpop.f32.mrf.mxu0  ;;  %v2639_v41 = vpop.f32.mrf.mxu1 }
 0x115   : > { %v3521_v44 = vadd.f32 %v2638_v39, %v1392_v37 }
 0x116   : > { %v2552_v32 = vpop.f32.mrf.mxu0  ;;  %v2640_v45 = vpop.f32.mrf.mxu1 }
 0x117   : > { %v3525_v47 = vadd.f32 %v2552_v32, %v2551_v40  ;;  %v2641_v50 = vadd.f32 %v2640_v45, %v2639_v41  ;;  %v1421_v32 = vadd.f32 %v3513_v28, %v3509_v22 }
 0x118   : > { %v2554_v51 = vpop.f32.mrf.mxu0  ;;  %v2642_v52 = vpop.f32.mrf.mxu1 }
 0x119   : > { %v3527_v53 = vadd.f32 %v2641_v50, %v1397_v46 }
 0x11a   : > { %v2555_v42 = vpop.f32.mrf.mxu0  ;;  %v2643_v54 = vpop.f32.mrf.mxu1 }
 0x11b   : > { %v3531_v56 = vadd.f32 %v2555_v42, %v2554_v51  ;;  %v2644_v57 = vadd.f32 %v2643_v54, %v2642_v52  ;;  %v1424_v54 = vadd.f32 %v3519_v38, %v3509_v22 }
 0x11c   : > { %v2557_v60 = vpop.f32.mrf.mxu0  ;;  %v2645_v61 = vpop.f32.mrf.mxu1 }
 0x11d   : > { %v3533_v62 = vadd.f32 %v2644_v57, %v1400_v55  ;;  %v1432_v38 = vadd.f32 %v3531_v56, %v3509_v22 }
 0x11e   : > { %v2558_v48 = vpop.f32.mrf.mxu0  ;;  %v2646_v63 = vpop.f32.mrf.mxu1 }
 0x11f   : > { %v3536_v3 = vadd.f32 %v2558_v48, %v2557_v60  ;;  %v2647_v4 = vadd.f32 %v2646_v63, %v2645_v61 }
 0x120   : > { %v2560_v5 = vpop.f32.mrf.mxu0  ;;  %v2648_v6 = vpop.f32.mrf.mxu1 }
 0x121   : > { %v3538_v7 = vadd.f32 %v2647_v4, %v1405_v2  ;;  %v1429_v2 = vadd.f32 %v3525_v47, %v3509_v22  ;;  %v1437_v47 = vadd.f32 %v3536_v3, %v3509_v22 }
 0x122   : > { %v2561_v10 = vpop.f32.mrf.mxu0  ;;  %v2649_v58 = vpop.f32.mrf.mxu1 }
 0x123   : > { %v3541_v12 = vadd.f32 %v2561_v10, %v2560_v5  ;;  %v2650_v13 = vadd.f32 %v2649_v58, %v2648_v6 }
 0x124   : > { %v2563_v16 = vpop.f32.mrf.mxu0  ;;  %v2651_v17 = vpop.f32.mrf.mxu1 }
 0x125   : > { %v3543_v18 = vadd.f32 %v2650_v13, %v1408_v11  ;;  %v1440_v56 = vadd.f32 %v3541_v12, %v3509_v22 }
 0x126   : > { %v2564_v19 = vpop.f32.mrf.mxu0  ;;  %v2652_v0 = vpop.f32.mrf.mxu1 }
 0x127   : > { %v3546_v24 = vadd.f32 %v2564_v19, %v2563_v16  ;;  %v2653_v25 = vadd.f32 %v2652_v0, %v2651_v17 }
 0x128   : > { %v2566_v26 = vpop.f32.mrf.mxu0  ;;  %v2654_v27 = vpop.f32.mrf.mxu1 }
 0x129   : > { %v3548_v29 = vadd.f32 %v2653_v25, %v1413_v23  ;;  %v1445_v3 = vadd.f32 %v3546_v24, %v3509_v22 }
 0x12a   : > { %v2567_v30 = vpop.f32.mrf.mxu0  ;;  %v2655_v8 = vpop.f32.mrf.mxu1 }
 0x12b   : > { %v3552_v35 = vadd.f32 %v2567_v30, %v2566_v26  ;;  %v2656_v36 = vadd.f32 %v2655_v8, %v2654_v27 }
 0x12c   : > { %v2569_v37 = vpop.f32.mrf.mxu0  ;;  %v2657_v39 = vpop.f32.mrf.mxu1 }
 0x12d   : > { %v3554_v40 = vadd.f32 %v2656_v36, %v1416_v31  ;;  %v1448_v12 = vadd.f32 %v3552_v35, %v3509_v22 }
 0x12e   : > { %v2570_v14 = vpop.f32.mrf.mxu0  ;;  %v2658_v41 = vpop.f32.mrf.mxu1 }
 0x12f   : > { %v3558_v45 = vadd.f32 %v2570_v14, %v2569_v37  ;;  %v2659_v46 = vadd.f32 %v2658_v41, %v2657_v39 }
 0x130   : > { %v2572_v50 = vpop.f32.mrf.mxu0  ;;  %v2660_v51 = vpop.f32.mrf.mxu1 }
 0x131   : > { %v3560_v52 = vadd.f32 %v2659_v46, %v1421_v32 }
 0x132   : > { %v2573_v20 = vpop.f32.mrf.mxu0  ;;  %v2661_v42 = vpop.f32.mrf.mxu1 }
 0x133   : > { %v2574_v55 = vadd.f32 %v2573_v20, %v2572_v50  ;;  %v2662_v57 = vadd.f32 %v2661_v42, %v2660_v51 }
 0x134   : > { %v2575_v60 = vpop.f32.mrf.mxu0  ;;  %v2663_v61 = vpop.f32.mrf.mxu1 }
 0x135   : > { %v3564_v48 = vadd.f32 %v2662_v57, %v1424_v54 }
 0x136   : > { %v2576_v63 = vpop.f32.mrf.mxu0  ;;  %v2664_v28 = vpop.f32.mrf.mxu1 }
 0x137   : > { %v2577_v4 = vadd.f32 %v2576_v63, %v2575_v60  ;;  %v2665_v5 = vadd.f32 %v2664_v28, %v2663_v61 }
 0x138   : > { %v2578_v6 = vpop.f32.mrf.mxu0  ;;  %v2666_v10 = vpop.f32.mrf.mxu1 }
 0x139   : > { %v3568_v58 = vadd.f32 %v2665_v5, %v1429_v2 }
 0x13a   : > { %v2579_v11 = vpop.f32.mrf.mxu0  ;;  %v2667_v13 = vpop.f32.mrf.mxu1 }
 0x13b   : > { %v2580_v16 = vadd.f32 %v2579_v11, %v2578_v6  ;;  %v2668_v17 = vadd.f32 %v2667_v13, %v2666_v10 }
 0x13c   : > { %v2581_v19 = vpop.f32.mrf.mxu0  ;;  %v2669_v0 = vpop.f32.mrf.mxu1 }
 0x13d   : > { %v3572_v23 = vadd.f32 %v2668_v17, %v1432_v38  ;;  %v1453_v38 = vadd.f32 %v3558_v45, %v3509_v22  ;;  %v1461_v45 = vadd.f32 %v2577_v4, %v3509_v22 }
 0x13e   : > { %v2582_v25 = vpop.f32.mrf.mxu0  ;;  %v2670_v26 = vpop.f32.mrf.mxu1 }
 0x13f   : > { %v2583_v27 = vadd.f32 %v2582_v25, %v2581_v19  ;;  %v2671_v30 = vadd.f32 %v2670_v26, %v2669_v0 }
 0x140   : > { %v2584_v8 = vpop.f32.mrf.mxu0  ;;  %v2672_v31 = vpop.f32.mrf.mxu1 }
 0x141   : > { %v3576_v36 = vadd.f32 %v2671_v30, %v1437_v47  ;;  %v1456_v47 = vadd.f32 %v2574_v55, %v3509_v22  ;;  %v1464_v55 = vadd.f32 %v2580_v16, %v3509_v22  ;;  %v1469_v4 = vadd.f32 %v2583_v27, %v3509_v22 }
 0x142   : > { %v2585_v37 = vpop.f32.mrf.mxu0  ;;  %v2673_v39 = vpop.f32.mrf.mxu1 }
 0x143   : > { %v2586_v14 = vadd.f32 %v2585_v37, %v2584_v8  ;;  %v2674_v41 = vadd.f32 %v2673_v39, %v2672_v31 }
 0x144   : > { %v2587_v32 = vpop.f32.mrf.mxu0  ;;  %v2675_v46 = vpop.f32.mrf.mxu1 }
 0x145   : > { %v3580_v50 = vadd.f32 %v2674_v41, %v1440_v56  ;;  %v1472_v16 = vadd.f32 %v2586_v14, %v3509_v22 }
 0x146   : > { %v2588_v51 = vpop.f32.mrf.mxu0  ;;  %v2676_v20 = vpop.f32.mrf.mxu1 }
 0x147   : > { %v2589_v42 = vadd.f32 %v2588_v51, %v2587_v32  ;;  %v2677_v54 = vadd.f32 %v2676_v20, %v2675_v46 }
 0x148   : > { %v2590_v57 = vpop.f32.mrf.mxu0  ;;  %v2678_v60 = vpop.f32.mrf.mxu1 }
 0x149   : > { %v3584_v61 = vadd.f32 %v2677_v54, %v1445_v3  ;;  %v1477_v27 = vadd.f32 %v2589_v42, %v3509_v22  ;;  %v1485_v42 = vadd.f32 %v3467_v33, %v3509_v22 }
 0x14a   : > { %v2591_v63 = vpop.f32.mrf.mxu0  ;;  %v2679_v28 = vpop.f32.mrf.mxu1 }
 0x14b   : > { %v2592_v2 = vadd.f32 %v2591_v63, %v2590_v57  ;;  %v2680_v5 = vadd.f32 %v2679_v28, %v2678_v60 }
 0x14c   : > { %v2681_v6 = vpop.f32.mrf.mxu1  ;;  %v3588_v10 = vpop.f32.mrf.mxu0 }
 0x14d   : > { %v3590_v11 = vadd.f32 %v2680_v5, %v1448_v12  ;;  %v1480_v14 = vadd.f32 %v2592_v2, %v3509_v22 }
 0x14e   : > { %v2682_v13 = vpop.f32.mrf.mxu1  ;;  %v3592_v24 = vpop.f32.mrf.mxu0 }
 0x14f   : > { %v2683_v17 = vadd.f32 %v2682_v13, %v2681_v6 }
 0x150   : > { %v2684_v19 = vpop.f32.mrf.mxu1  ;;  %v3596_v0 = vpop.f32.mrf.mxu0 }
 0x151   : > { %v3598_v25 = vadd.f32 %v2683_v17, %v1453_v38 }
 0x152   : > { %v2685_v35 = vpop.f32.mrf.mxu1  ;;  %v3600_v26 = vpop.f32.mrf.mxu0 }
 0x153   : > { %v2686_v30 = vadd.f32 %v2685_v35, %v2684_v19 }
 0x154   : > { %v2687_v8 = vpop.f32.mrf.mxu1  ;;  %v3603_v31 = vpop.f32.mrf.mxu0 }
 0x155   : > { %v3605_v37 = vadd.f32 %v2686_v30, %v1456_v47 }
 0x156   : > { %v2688_v39 = vpop.f32.mrf.mxu1  ;;  %v3607_v56 = vpop.f32.mrf.mxu0 }
 0x157   : > { %3888 = vst [vmem:[#allocation2_spill] sm:$0xff] %v3605_v37  ;;  %v2689_v41 = vadd.f32 %v2688_v39, %v2687_v8 }
 0x158   : > { %v2690_v32 = vpop.f32.mrf.mxu1  ;;  %v3610_v46 = vpop.f32.mrf.mxu0 }
 0x159   : > { %v3612_v51 = vadd.f32 %v2689_v41, %v1461_v45 }
 0x15a   : > { %v2691_v20 = vpop.f32.mrf.mxu1  ;;  %v3614_v3 = vpop.f32.mrf.mxu0 }
 0x15b   : > { %v2692_v54 = vadd.f32 %v2691_v20, %v2690_v32 }
 0x15c   : > { %v2693_v57 = vpop.f32.mrf.mxu1  ;;  %v3617_v60 = vpop.f32.mrf.mxu0 }
 0x15d   : > { %v3619_v63 = vadd.f32 %v2692_v54, %v1464_v55 }
 0x15e   : > { %v2694_v28 = vpop.f32.mrf.mxu1  ;;  %v3621_v12 = vpop.f32.mrf.mxu0 }
 0x15f   : > { %3889 = vst [vmem:[#allocation3_spill] sm:$0xff] %v3619_v63  ;;  %v2695_v5 = vadd.f32 %v2694_v28, %v2693_v57 }
 0x160   : > { %v2696_v6 = vpop.f32.mrf.mxu1  ;;  %v3624_v13 = vpop.f32.mrf.mxu0 }
 0x161   : > { %v3626_v38 = vadd.f32 %v2695_v5, %v1469_v4 }
 0x162   : > { %v2697_v17 = vpop.f32.mrf.mxu1  ;;  %v3628_v19 = vpop.f32.mrf.mxu0 }
 0x163   : > { %3890 = vst [vmem:[#allocation4_spill] sm:$0xff] %v3626_v38  ;;  %v2698_v35 = vadd.f32 %v2697_v17, %v2696_v6 }
 0x164   : > { %v2699_v47 = vpop.f32.mrf.mxu1  ;;  %v3631_v30 = vpop.f32.mrf.mxu0 }
 0x165   : > { %v3633_v8 = vadd.f32 %v2698_v35, %v1472_v16 }
 0x166   : > { %v2700_v39 = vpop.f32.mrf.mxu1  ;;  %v3635_v45 = vpop.f32.mrf.mxu0 }
 0x167   : > { %3891 = vst [vmem:[#allocation5_spill] sm:$0xff] %v3633_v8  ;;  %v2701_v41 = vadd.f32 %v2700_v39, %v2699_v47 }
 0x168   : > { %v2702_v32 = vpop.f32.mrf.mxu1  ;;  %v3638_v20 = vpop.f32.mrf.mxu0 }
 0x169   : > { %v3640_v55 = vadd.f32 %v2701_v41, %v1477_v27 }
 0x16a   : > { %v2703_v54 = vpop.f32.mrf.mxu1  ;;  %v3642_v57 = vpop.f32.mrf.mxu0 }
 0x16b   : > { %3892 = vst [vmem:[#allocation6_spill] sm:$0xff] %v3640_v55  ;;  %v2704_v28 = vadd.f32 %v2703_v54, %v2702_v32  ;;  %v1488_v32 = vadd.f32 %v3475_v43, %v3509_v22 }
 0x16c   : > { %v2705_v4 = vpop.f32.mrf.mxu1  ;;  %v3645_v5 = vpop.f32.mrf.mxu0 }
 0x16d   : > { %v3647_v6 = vadd.f32 %v2704_v28, %v1480_v14 }
 0x16e   : > { %v2706_v17 = vpop.f32.mrf.mxu1  ;;  %v3649_v16 = vpop.f32.mrf.mxu0 }
 0x16f   : > { %3893 = vst [vmem:[#allocation7_spill] sm:$0xff] %v3647_v6  ;;  %v2707_v35 = vadd.f32 %v2706_v17, %v2705_v4  ;;  %v1493_v4 = vadd.f32 %v3481_v49, %v3509_v22 }
 0x170   : > { %v2708_v47 = vpop.f32.mrf.mxu1  ;;  %v3653_v39 = vpop.f32.mrf.mxu0 }
 0x171   : > { %v3655_v27 = vadd.f32 %v2707_v35, %v1485_v42 }
 0x172   : > { %v2709_v41 = vpop.f32.mrf.mxu1  ;;  %v3657_v2 = vpop.f32.mrf.mxu0 }
 0x173   : > { %3894 = vst [vmem:[#allocation8_spill] sm:$0xff] %v3655_v27  ;;  %v2710_v54 = vadd.f32 %v2709_v41, %v2708_v47  ;;  %v1496_v47 = vadd.f32 %v3489_v59, %v3509_v22 }
 0x174   : > { %v2711_v14 = vpop.f32.mrf.mxu1  ;;  %v3661_v28 = vpop.f32.mrf.mxu0 }
 0x175   : > { %v3663_v8 = vadd.f32 %v2710_v54, %v1488_v32 }
 0x176   : > { %v2712_v6 = vpop.f32.mrf.mxu1  ;;  %v3665_v33 = vpop.f32.mrf.mxu0 }
 0x177   : > { %3895 = vst [vmem:[#allocation9_spill] sm:$0xff] %v3663_v8  ;;  %v2713_v17 = vadd.f32 %v2712_v6, %v2711_v14  ;;  %v1501_v6 = vadd.f32 %v3493_v1, %v3509_v22 }
 0x178   : > { %v2714_v42 = vpop.f32.mrf.mxu1  ;;  %v3669_v35 = vpop.f32.mrf.mxu0 }
 0x179   : > { %v3671_v27 = vadd.f32 %v2713_v17, %v1493_v4 }
 0x17a   : > { %v2715_v38 = vpop.f32.mrf.mxu1  ;;  %v3673_v43 = vpop.f32.mrf.mxu0 }
 0x17b   : > { %3896 = vst [vmem:[#allocation10_spill] sm:$0xff] %v3671_v27  ;;  %v2716_v41 = vadd.f32 %v2715_v38, %v2714_v42  ;;  %v1504_v38 = vadd.f32 %v3497_v9, %v3509_v22  ;;  %v2747_v9 = vadd.f32 %v3592_v24, %v3588_v10 }
 0x17c   : > { %v2717_v32 = vpop.f32.mrf.mxu1  ;;  %v3677_v54 = vpop.f32.mrf.mxu0 }
 0x17d   : > { %v3679_v8 = vadd.f32 %v2716_v41, %v1496_v47 }
 0x17e   : > { %v2718_v55 = vpop.f32.mrf.mxu1  ;;  %v3681_v49 = vpop.f32.mrf.mxu0 }
 0x17f   : > { %3897 = vst [vmem:[#allocation11_spill] sm:$0xff] %v3679_v8  ;;  %v2719_v14 = vadd.f32 %v2718_v55, %v2717_v32  ;;  %v1509_v55 = vadd.f32 %v3500_v15, %v3509_v22  ;;  %v2753_v32 = vadd.f32 %v3607_v56, %v3603_v31  ;;  %v2756_v15 = vadd.f32 %v3614_v3, %v3610_v46 }
 0x180   : > { %v2720_v4 = vpop.f32.mrf.mxu1  ;;  %v3685_v17 = vpop.f32.mrf.mxu0 }
 0x181   : > { %v3687_v27 = vadd.f32 %v2719_v14, %v1501_v6  ;;  %v1719_v56 = vadd.f32 %v2753_v32, %v3527_v53  ;;  %v1722_v3 = vadd.f32 %v2756_v15, %v3533_v62  ;;  %v2768_v62 = vadd.f32 %v3642_v57, %v3638_v20 }
 0x182   : > { %v2721_v37 = vpop.f32.mrf.mxu1  ;;  %v3689_v59 = vpop.f32.mrf.mxu0 }
 0x183   : > { %3898 = vst [vmem:[#allocation12_spill] sm:$0xff] %v3687_v27  ;;  %v2722_v42 = vadd.f32 %v2721_v37, %v2720_v4 }
 0x184   : > { %v2723_v47 = vpop.f32.mrf.mxu1  ;;  %v3693_v41 = vpop.f32.mrf.mxu0 }
 0x185   : > { %v3695_v8 = vadd.f32 %v2722_v42, %v1504_v38  ;;  %v1512_v42 = vadd.f32 %v3504_v21, %v3509_v22  ;;  %v2765_v22 = vadd.f32 %v3635_v45, %v3631_v30  ;;  %v2759_v30 = vadd.f32 %v3621_v12, %v3617_v60 }
 0x186   : > { %v2724_v63 = vpop.f32.mrf.mxu1  ;;  %v3697_v1 = vpop.f32.mrf.mxu0  ;;  %v2762_v60 = vadd.f32 %v3628_v19, %v3624_v13 }
 0x187   : > { %3899 = vst [vmem:[#allocation13_spill] sm:$0xff] %v3695_v8  ;;  %v2725_v6 = vadd.f32 %v2724_v63, %v2723_v47  ;;  %v2750_v63 = vadd.f32 %v3600_v26, %v3596_v0 }
 0x188   : > { %v2726_v14 = vpop.f32.mrf.mxu1  ;;  %v3703_v27 = vpop.f32.mrf.mxu0 }
 0x189   : > { %v3707_v37 = vadd.f32 %v2725_v6, %v1509_v55  ;;  %v1711_v6 = vadd.f32 %v2747_v9, %v3515_v34  ;;  %v1714_v26 = vadd.f32 %v2750_v63, %v3521_v44  ;;  %v1735_v44 = vadd.f32 %v2765_v22, %v3548_v29 }
 0x18a   : > { %v2727_v4 = vpop.f32.mrf.mxu1  ;;  %v3709_v38 = vpop.f32.mrf.mxu0  ;;  %v2777_v29 = vadd.f32 %v3665_v33, %v3661_v28  ;;  %v2780_v33 = vadd.f32 %v3673_v43, %v3669_v35 }
 0x18b   : > { %v2728_v31 = vadd.f32 %v2727_v4, %v2726_v14 }
 0x18c   : > { %v3718_v47 = vpop.f32.mrf.mxu0  ;;  %v2877_v10 = vpop.f32.mrf.mxu1 }
 0x18d   : > { %v3720_v24 = vadd.f32 %v2728_v31, %v1512_v42  ;;  %v1880_v55 = vadd.f32 %v2877_v10, %v1719_v56  ;;  %v1727_v10 = vadd.f32 %v2759_v30, %v3538_v7  ;;  %v2771_v7 = vadd.f32 %v3649_v16, %v3645_v5 }
 0x18e   : > { %v3724_v8 = vpop.f32.mrf.mxu0  ;;  %v1871_v21 = vpop.f32.mrf.mxu1  ;;  %v1751_v5 = vadd.f32 %v2777_v29, %v3568_v58  ;;  %v2774_v16 = vadd.f32 %v3657_v2, %v3653_v39  ;;  %v2789_v58 = vadd.f32 %v3697_v1, %v3693_v41  ;;  %v2792_v1 = vadd.f32 %v3709_v38, %v3703_v27 }
 0x18f   : > { %v2000_v46 = vmax.f32 %v1880_v55, 0.0  ;;  %v1872_v53 = vadd.f32 %v1871_v21, %v1711_v6  ;;  %v1738_v21 = vadd.f32 %v2768_v62, %v3554_v40 }
 0x190   : > { %v3734_v0 = vpop.f32.mrf.mxu0  ;;  %v2878_v34 = vpop.f32.mrf.mxu1 }
 0x191   : > { %v2475_v45 = vpack.c.bf16 %v2000_v46, %v2000_v46  ;;  %v1998_v32 = vmax.f32 %v1872_v53, 0.0  ;;  %v1883_v14 = vadd.f32 %v2878_v34, %v1722_v3  ;;  %v1730_v3 = vadd.f32 %v2762_v60, %v3543_v18 }
 0x192   : > { %v3741_v9 = vpop.f32.mrf.mxu0  ;;  %v1874_v4 = vpop.f32.mrf.mxu1 }
 0x193   : > { %2161 = vst.msk [vmem:[%s3732_s7 + $0x8] sm:$0xf] %vm2158_vm1, %v2475_v45  ;;  %v2473_v42 = vpack.c.bf16 %v1998_v32, %v1998_v32  ;;  %v2001_v15 = vmax.f32 %v1883_v14, 0.0  ;;  %v1875_v31 = vadd.f32 %v1874_v4, %v1714_v26 }
 0x194   : > { %v3748_v12 = vpop.f32.mrf.mxu0  ;;  %v2881_v56 = vpop.f32.mrf.mxu1 }
 0x195   : > { %2159 = vst.msk [vmem:[%s3732_s7] sm:$0xf] %vm2158_vm1, %v2473_v42  ;;  %v2476_v20 = vpack.c.bf16 %v2001_v15, %v2001_v15  ;;  %v1999_v57 = vmax.f32 %v1875_v31, 0.0  ;;  %v1896_v63 = vadd.f32 %v2881_v56, %v1735_v44  ;;  %v1743_v42 = vadd.f32 %v2771_v7, %v3560_v52 }
 0x196   : > { %v3753_v55 = vpop.f32.mrf.mxu0  ;;  %v1887_v6 = vpop.f32.mrf.mxu1  ;;  %v1754_v44 = vadd.f32 %v2780_v33, %v3572_v23  ;;  %v2783_v52 = vadd.f32 %v3681_v49, %v3677_v54  ;;  %v1767_v54 = vadd.f32 %v2789_v58, %v3584_v61  ;;  %v2786_v49 = vadd.f32 %v3689_v59, %v3685_v17 }
 0x197   : > { %2162 = vst.msk [vmem:[%s3732_s7 + $0xc] sm:$0xf] %vm2158_vm1, %v2476_v20  ;;  %v2474_v13 = vpack.c.bf16 %v1999_v57, %v1999_v57  ;;  %v2004_v19 = vmax.f32 %v1896_v63, 0.0  ;;  %v1888_v22 = vadd.f32 %v1887_v6, %v1727_v10  ;;  %v1746_v57 = vadd.f32 %v2774_v16, %v3564_v48 }
 0x198   : > { %v3760_v46 = vpop.f32.mrf.mxu0  ;;  %v2882_v53 = vpop.f32.mrf.mxu1  ;;  %v2801_v61 = vadd.f32 %v3753_v55, %v3748_v12 }
 0x199   : > { %2160 = vst.msk [vmem:[%s3732_s7 + $0x4] sm:$0xf] %vm2158_vm1, %v2474_v13  ;;  %v2479_v40 = vpack.c.bf16 %v2004_v19, %v2004_v19  ;;  %v2002_v34 = vmax.f32 %v1888_v22, 0.0  ;;  %v1899_v28 = vadd.f32 %v2882_v53, %v1738_v21  ;;  %v1759_v53 = vadd.f32 %v2783_v52, %v3576_v36 }
 0x19a   : > { %v3769_v26 = vpop.f32.mrf.mxu0  ;;  %v1890_v30 = vpop.f32.mrf.mxu1  ;;  %v2795_v36 = vadd.f32 %v3724_v8, %v3718_v47  ;;  %v2798_v8 = vadd.f32 %v3741_v9, %v3734_v0 }
 0x19b   : > { %2165 = vst.msk [vmem:[%s3732_s7 + $0x18] sm:$0xf] %vm2158_vm1, %v2479_v40  ;;  %v2477_v45 = vpack.c.bf16 %v2002_v34, %v2002_v34  ;;  %v2005_v18 = vmax.f32 %v1899_v28, 0.0  ;;  %v1891_v32 = vadd.f32 %v1890_v30, %v1730_v3  ;;  %v1770_v40 = vadd.f32 %v2792_v1, %v3590_v11 }
 0x19c   : > { %v3776_v14 = vpop.f32.mrf.mxu0  ;;  %v2885_v62 = vpop.f32.mrf.mxu1  ;;  %v1762_v30 = vadd.f32 %v2786_v49, %v3580_v50  ;;  %v2804_v12 = vadd.f32 %v3769_v26, %v3760_v46 }
 0x19d   : > { %2163 = vst.msk [vmem:[%s3732_s7 + $0x10] sm:$0xf] %vm2158_vm1, %v2477_v45  ;;  %v2480_v35 = vpack.c.bf16 %v2005_v18, %v2005_v18  ;;  %v2003_v43 = vmax.f32 %v1891_v32, 0.0  ;;  %v1912_v4 = vadd.f32 %v2885_v62, %v1751_v5  ;;  %v1783_v62 = vadd.f32 %v2801_v61, %v3612_v51 }
 0x19e   : > { %v3781_v15 = vpop.f32.mrf.mxu0  ;;  %v1903_v31 = vpop.f32.mrf.mxu1 }
 0x19f   : > { %2166 = vst.msk [vmem:[%s3732_s7 + $0x1c] sm:$0xf] %vm2158_vm1, %v2480_v35  ;;  %v2478_v39 = vpack.c.bf16 %v2003_v43, %v2003_v43  ;;  %v2008_v2 = vmax.f32 %v1912_v4, 0.0  ;;  %v1904_v60 = vadd.f32 %v1903_v31, %v1743_v42  ;;  %v1775_v4 = vadd.f32 %v2795_v36, %v3598_v25 }
 0x1a0   : > { %v3788_v56 = vpop.f32.mrf.mxu0  ;;  %v2886_v20 = vpop.f32.mrf.mxu1  ;;  %v2807_v52 = vadd.f32 %v3781_v15, %v3776_v14 }
 0x1a1   : > { %2164 = vst.msk [vmem:[%s3732_s7 + $0x14] sm:$0xf] %vm2158_vm1, %v2478_v39  ;;  %v2483_v23 = vpack.c.bf16 %v2008_v2, %v2008_v2  ;;  %v2006_v63 = vmax.f32 %v1904_v60, 0.0  ;;  %v1915_v41 = vadd.f32 %v2886_v20, %v1754_v44  ;;  %v3900_v44 = vld [vmem:[#allocation3_spill] sm:$0xff]  ;;  %v3901_v20 = vld [vmem:[#allocation2_spill] sm:$0xff] }
 0x1a2   : > { %v3797_v10 = vpop.f32.mrf.mxu0  ;;  %v1906_v6 = vpop.f32.mrf.mxu1  ;;  %v1786_v58 = vadd.f32 %v2804_v12, %v3900_v44 }
 0x1a3   : > { %2169 = vst.msk [vmem:[%s3732_s7 + $0x28] sm:$0xf] %vm2158_vm1, %v2483_v23  ;;  %v2481_v21 = vpack.c.bf16 %v2006_v63, %v2006_v63  ;;  %v2009_v48 = vmax.f32 %v1915_v41, 0.0  ;;  %v1907_v29 = vadd.f32 %v1906_v6, %v1746_v57  ;;  %v1778_v57 = vadd.f32 %v2798_v8, %v3901_v20 }
 0x1a4   : > { %v2811_v13 = vpop.f32.mrf.mxu0  ;;  %v2889_v19 = vpop.f32.mrf.mxu1  ;;  %v2810_v14 = vadd.f32 %v3797_v10, %v3788_v56 }
 0x1a5   : > { %2167 = vst.msk [vmem:[%s3732_s7 + $0x20] sm:$0xf] %vm2158_vm1, %v2481_v21  ;;  %v2484_v22 = vpack.c.bf16 %v2009_v48, %v2009_v48  ;;  %v2007_v27 = vmax.f32 %v1907_v29, 0.0  ;;  %v1928_v38 = vadd.f32 %v2889_v19, %v1767_v54  ;;  %v3902_v54 = vld [vmem:[#allocation6_spill] sm:$0xff] }
 0x1a6   : > { %v2812_v3 = vpop.f32.mrf.mxu0  ;;  %v1919_v7 = vpop.f32.mrf.mxu1 }
 0x1a7   : > { %2170 = vst.msk [vmem:[%s3732_s7 + $0x2c] sm:$0xf] %vm2158_vm1, %v2484_v22  ;;  %v2482_v17 = vpack.c.bf16 %v2007_v27, %v2007_v27  ;;  %v2012_v59 = vmax.f32 %v1928_v38, 0.0  ;;  %v1920_v34 = vadd.f32 %v1919_v7, %v1759_v53  ;;  %v2813_v39 = vadd.f32 %v2812_v3, %v2811_v13  ;;  %v3903_v38 = vld [vmem:[#allocation4_spill] sm:$0xff] }
 0x1a8   : > { %v2814_v28 = vpop.f32.mrf.mxu0  ;;  %v2890_v33 = vpop.f32.mrf.mxu1  ;;  %v1791_v53 = vadd.f32 %v2807_v52, %v3903_v38 }
 0x1a9   : > { %2168 = vst.msk [vmem:[%s3732_s7 + $0x24] sm:$0xf] %vm2158_vm1, %v2482_v17  ;;  %v2487_v11 = vpack.c.bf16 %v2012_v59, %v2012_v59  ;;  %v2010_v45 = vmax.f32 %v1920_v34, 0.0  ;;  %v1931_v18 = vadd.f32 %v2890_v33, %v1770_v40  ;;  %v1799_v49 = vadd.f32 %v2813_v39, %v3902_v54  ;;  %v3904_v40 = vld [vmem:[#allocation7_spill] sm:$0xff]  ;;  %v3905_v33 = vld [vmem:[#allocation5_spill] sm:$0xff] }
 0x1aa   : > { %v2815_v55 = vpop.f32.mrf.mxu0  ;;  %v1922_v32 = vpop.f32.mrf.mxu1 }
 0x1ab   : > { %2173 = vst.msk [vmem:[%s3732_s7 + $0x38] sm:$0xf] %vm2158_vm1, %v2487_v11  ;;  %v2485_v5 = vpack.c.bf16 %v2010_v45, %v2010_v45  ;;  %v2013_v16 = vmax.f32 %v1931_v18, 0.0  ;;  %v1923_v50 = vadd.f32 %v1922_v32, %v1762_v30  ;;  %v2816_v41 = vadd.f32 %v2815_v55, %v2814_v28  ;;  %v3906_v32 = vld [vmem:[#allocation10_spill] sm:$0xff] }
 0x1ac   : > { %v2817_v47 = vpop.f32.mrf.mxu0  ;;  %v2893_v35 = vpop.f32.mrf.mxu1  ;;  %v1794_v30 = vadd.f32 %v2810_v14, %v3905_v33 }
 0x1ad   : > { %2171 = vst.msk [vmem:[%s3732_s7 + $0x30] sm:$0xf] %vm2158_vm1, %v2485_v5  ;;  %v2488_v43 = vpack.c.bf16 %v2013_v16, %v2013_v16  ;;  %v2011_v46 = vmax.f32 %v1923_v50, 0.0  ;;  %v1944_v26 = vadd.f32 %v2893_v35, %v1783_v62  ;;  %v1802_v61 = vadd.f32 %v2816_v41, %v3904_v40 }
 0x1ae   : > { %v2818_v42 = vpop.f32.mrf.mxu0  ;;  %v1935_v31 = vpop.f32.mrf.mxu1 }
 0x1af   : > { %2174 = vst.msk [vmem:[%s3732_s7 + $0x3c] sm:$0xf] %vm2158_vm1, %v2488_v43  ;;  %v2486_v51 = vpack.c.bf16 %v2011_v46, %v2011_v46  ;;  %v2016_v0 = vmax.f32 %v1944_v26, 0.0  ;;  %v1936_v9 = vadd.f32 %v1935_v31, %v1775_v4  ;;  %v2819_v36 = vadd.f32 %v2818_v42, %v2817_v47  ;;  %v3907_v42 = vld [vmem:[#allocation8_spill] sm:$0xff] }
 0x1b0   : > { %v2820_v2 = vpop.f32.mrf.mxu0  ;;  %v2894_v60 = vpop.f32.mrf.mxu1 }
 0x1b1   : > { %2172 = vst.msk [vmem:[%s3732_s7 + $0x34] sm:$0xf] %vm2158_vm1, %v2486_v51  ;;  %v2491_v25 = vpack.c.bf16 %v2016_v0, %v2016_v0  ;;  %v2014_v23 = vmax.f32 %v1936_v9, 0.0  ;;  %v1947_v63 = vadd.f32 %v2894_v60, %v1786_v58  ;;  %v1807_v31 = vadd.f32 %v2819_v36, %v3907_v42  ;;  %v3908_v9 = vld [vmem:[#allocation11_spill] sm:$0xff] }
 0x1b2   : > { %v2821_v1 = vpop.f32.mrf.mxu0  ;;  %v1938_v6 = vpop.f32.mrf.mxu1 }
 0x1b3   : > { %2177 = vst.msk [vmem:[%s3732_s7 + $0x48] sm:$0xf] %vm2158_vm1, %v2491_v25  ;;  %v2489_v21 = vpack.c.bf16 %v2014_v23, %v2014_v23  ;;  %v2017_v48 = vmax.f32 %v1947_v63, 0.0  ;;  %v1939_v29 = vadd.f32 %v1938_v6, %v1778_v57  ;;  %v2822_v35 = vadd.f32 %v2821_v1, %v2820_v2  ;;  %v3909_v57 = vld [vmem:[#allocation9_spill] sm:$0xff] }
 0x1b4   : > { %v2823_v15 = vpop.f32.mrf.mxu0  ;;  %v2897_v13 = vpop.f32.mrf.mxu1 }
 0x1b5   : > { %2175 = vst.msk [vmem:[%s3732_s7 + $0x40] sm:$0xf] %vm2158_vm1, %v2489_v21  ;;  %v2492_v19 = vpack.c.bf16 %v2017_v48, %v2017_v48  ;;  %v2015_v22 = vmax.f32 %v1939_v29, 0.0  ;;  %v1960_v27 = vadd.f32 %v2897_v13, %v1799_v49  ;;  %v1810_v52 = vadd.f32 %v2822_v35, %v3909_v57 }
 0x1b6   : > { %v2824_v3 = vpop.f32.mrf.mxu0  ;;  %v1951_v7 = vpop.f32.mrf.mxu1 }
 0x1b7   : > { %2178 = vst.msk [vmem:[%s3732_s7 + $0x4c] sm:$0xf] %vm2158_vm1, %v2492_v19  ;;  %v2490_v17 = vpack.c.bf16 %v2015_v22, %v2015_v22  ;;  %v2020_v59 = vmax.f32 %v1960_v27, 0.0  ;;  %v2825_v56 = vadd.f32 %v2824_v3, %v2823_v15  ;;  %v1952_v10 = vadd.f32 %v1951_v7, %v1791_v53  ;;  %v3910_v19 = vld [vmem:[#allocation12_spill] sm:$0xff] }
 0x1b8   : > { %v2826_v34 = vpop.f32.mrf.mxu0  ;;  %v2898_v28 = vpop.f32.mrf.mxu1 }
 0x1b9   : > { %2176 = vst.msk [vmem:[%s3732_s7 + $0x44] sm:$0xf] %vm2158_vm1, %v2490_v17  ;;  %v2495_v11 = vpack.c.bf16 %v2020_v59, %v2020_v59  ;;  %v2018_v45 = vmax.f32 %v1952_v10, 0.0  ;;  %v1963_v18 = vadd.f32 %v2898_v28, %v1802_v61  ;;  %v1815_v5 = vadd.f32 %v2825_v56, %v3906_v32  ;;  %v3911_v56 = vld [vmem:[#allocation13_spill] sm:$0xff] }
 0x1ba   : > { %v2827_v12 = vpop.f32.mrf.mxu0  ;;  %v1954_v55 = vpop.f32.mrf.mxu1 }
 0x1bb   : > { %2181 = vst.msk [vmem:[%s3732_s7 + $0x58] sm:$0xf] %vm2158_vm1, %v2495_v11  ;;  %v2493_v16 = vpack.c.bf16 %v2018_v45, %v2018_v45  ;;  %v2021_v50 = vmax.f32 %v1963_v18, 0.0  ;;  %v2828_v62 = vadd.f32 %v2827_v12, %v2826_v34  ;;  %v1955_v8 = vadd.f32 %v1954_v55, %v1794_v30 }
 0x1bc   : > { %v2829_v43 = vpop.f32.mrf.mxu0  ;;  %v2901_v47 = vpop.f32.mrf.mxu1 }
 0x1bd   : > { %2179 = vst.msk [vmem:[%s3732_s7 + $0x50] sm:$0xf] %vm2158_vm1, %v2493_v16  ;;  %v2496_v46 = vpack.c.bf16 %v2021_v50, %v2021_v50  ;;  %v2019_v26 = vmax.f32 %v1955_v8, 0.0  ;;  %v1976_v4 = vadd.f32 %v2901_v47, %v1815_v5  ;;  %v1818_v2 = vadd.f32 %v2828_v62, %v3908_v9 }
 0x1be   : > { %v2830_v44 = vpop.f32.mrf.mxu0  ;;  %v1967_v58 = vpop.f32.mrf.mxu1 }
 0x1bf   : > { %2182 = vst.msk [vmem:[%s3732_s7 + $0x5c] sm:$0xf] %vm2158_vm1, %v2496_v46  ;;  %v2494_v39 = vpack.c.bf16 %v2019_v26, %v2019_v26  ;;  %v2024_v51 = vmax.f32 %v1976_v4, 0.0  ;;  %v1968_v0 = vadd.f32 %v1967_v58, %v1807_v31  ;;  %v2831_v23 = vadd.f32 %v2830_v44, %v2829_v43 }
 0x1c0   : > { %v2832_v60 = vpop.f32.mrf.mxu0  ;;  %v2902_v20 = vpop.f32.mrf.mxu1 }
 0x1c1   : > { %2180 = vst.msk [vmem:[%s3732_s7 + $0x54] sm:$0xf] %vm2158_vm1, %v2494_v39  ;;  %v2499_v25 = vpack.c.bf16 %v2024_v51, %v2024_v51  ;;  %v2022_v63 = vmax.f32 %v1968_v0, 0.0  ;;  %v1979_v41 = vadd.f32 %v2902_v20, %v1818_v2  ;;  %v1823_v22 = vadd.f32 %v2831_v23, %v3910_v19 }
 0x1c2   : > { %v2833_v1 = vpop.f32.mrf.mxu0  ;;  %v1970_v6 = vpop.f32.mrf.mxu1 }
 0x1c3   : > { %2185 = vst.msk [vmem:[%s3732_s7 + $0x68] sm:$0xf] %vm2158_vm1, %v2499_v25  ;;  %v2497_v21 = vpack.c.bf16 %v2022_v63, %v2022_v63  ;;  %v2025_v48 = vmax.f32 %v1979_v41, 0.0  ;;  %v1971_v29 = vadd.f32 %v1970_v6, %v1810_v52  ;;  %v2834_v15 = vadd.f32 %v2833_v1, %v2832_v60 }
 0x1c4   : > { %v2835_v54 = vpop.f32.mrf.mxu0  ;;  %v2905_v49 = vpop.f32.mrf.mxu1 }
 0x1c5   : > { %2183 = vst.msk [vmem:[%s3732_s7 + $0x60] sm:$0xf] %vm2158_vm1, %v2497_v21  ;;  %v2500_v14 = vpack.c.bf16 %v2025_v48, %v2025_v48  ;;  %v2023_v13 = vmax.f32 %v1971_v29, 0.0  ;;  %v1826_v10 = vadd.f32 %v2834_v15, %v3911_v56 }
 0x1c6   : > { %v2836_v27 = vpop.f32.mrf.mxu0  ;;  %v1983_v38 = vpop.f32.mrf.mxu1 }
 0x1c7   : > { %2186 = vst.msk [vmem:[%s3732_s7 + $0x6c] sm:$0xf] %vm2158_vm1, %v2500_v14  ;;  %v2498_v53 = vpack.c.bf16 %v2023_v13, %v2023_v13  ;;  %v2837_v3 = vadd.f32 %v2836_v27, %v2835_v54  ;;  %v1984_v7 = vadd.f32 %v1983_v38, %v1823_v22 }
 0x1c8   : > { %v2838_v40 = vpop.f32.mrf.mxu0  ;;  %v2906_v61 = vpop.f32.mrf.mxu1 }
 0x1c9   : > { %2184 = vst.msk [vmem:[%s3732_s7 + $0x64] sm:$0xf] %vm2158_vm1, %v2498_v53  ;;  %v1831_v17 = vadd.f32 %v2837_v3, %v3707_v37  ;;  %v2026_v59 = vmax.f32 %v1984_v7, 0.0 }
 0x1ca   : > { %v2839_v34 = vpop.f32.mrf.mxu0  ;;  %v1986_v28 = vpop.f32.mrf.mxu1 }
 0x1cb   : > { %v1992_v33 = vadd.f32 %v2905_v49, %v1831_v17  ;;  %v2501_v30 = vpack.c.bf16 %v2026_v59, %v2026_v59  ;;  %v2840_v36 = vadd.f32 %v2839_v34, %v2838_v40  ;;  %v1987_v11 = vadd.f32 %v1986_v28, %v1826_v10 }
 0x1cd   : > { %v2028_v45 = vmax.f32 %v1992_v33, 0.0  ;;  %2187 = vst.msk [vmem:[%s3732_s7 + $0x70] sm:$0xf] %vm2158_vm1, %v2501_v30  ;;  %v1834_v18 = vadd.f32 %v2840_v36, %v3720_v24  ;;  %v2027_v12 = vmax.f32 %v1987_v11, 0.0 }
 0x1cf   : > { %v2503_v55 = vpack.c.bf16 %v2028_v45, %v2028_v45  ;;  %v1995_v37 = vadd.f32 %v2906_v61, %v1834_v18  ;;  %v2502_v32 = vpack.c.bf16 %v2027_v12, %v2027_v12 }
 0x1d1   : > { %2189 = vst.msk [vmem:[%s3732_s7 + $0x78] sm:$0xf] %vm2158_vm1, %v2503_v55  ;;  %v2029_v5 = vmax.f32 %v1995_v37, 0.0  ;;  %2188 = vst.msk [vmem:[%s3732_s7 + $0x74] sm:$0xf] %vm2158_vm1, %v2502_v32 }
 0x1d3   : > { %v2504_v16 = vpack.c.bf16 %v2029_v5, %v2029_v5 }
 0x1d5   : > { %2190 = vst.msk [vmem:[%s3732_s7 + $0x7c] sm:$0xf] %vm2158_vm1, %v2504_v16 }
 0x1d6 PF: > { %s13_s12 = sadd.s32 1, %s3152_s12  }
 0x1d7   : > { %p10_p4 = scmp.ge.s32.totalorder %s13_s12, 4  }
 0x1d9   :  { %12 = sbr.rel (!%p10_p4) target bundleno = 1 (0x1), region = 62 }

// kernel: net_forward.31
= control target key start
LH: loop header
LB: loop body
LE: loop exit
PB: predicated region body
PF: predicated region fallthrough
CT: control target
= control target key end

     0   :  { %s1712_s12 = smov 0   ;;  %s1992_s0 = inlined_call_operand.vmem [shape: bf16[512,288], index: 0, kind: input, shape index: {}]   ;;  %s1993_s1 = inlined_call_operand.vmem [shape: bf16[288,96], index: 1, kind: input, shape index: {}]   ;;  %s1994_s2 = inlined_call_operand.vmem [shape: f32[1,96], index: 2, kind: input, shape index: {}]   ;;  %s1995_s3 = inlined_call_operand.vmem [shape: bf16[512,96], index: 3, kind: output, shape index: {}]  }
   0x1 LB: > { %s1253_s13 = sadd.s32 4294967295, %s1690_s12   ;;  %p1257_p0 = scmp.ge.s32.totalorder %s1690_s12, 1  ;;  %s1690_s12 = sphi %s1712_s12, %s13_s12  }
   0x2   : > { %p139_p1 = scmp.lt.s32.totalorder %s1690_s12, 3 }
   0x4   : > { %p140_p2 = pnand %p1257_p0, %p139_p1 }
   0x5   : > { %s1258_s16 = sshll.u32 (!%p140_p2), %s1253_s13, 5 }
   0x6   : > { %143 = sbr.rel (%p140_p2) target bundleno = 342 (0x156), region = 32  ;;  %p165_p3 = scmp.lt.s32.totalorder (!%p140_p2), %s1258_s16, 63 }
   0xb   : > { %v1602_v0 = vld [vmem:[%s1993_s1 + $0x78] sm:$0xff]   ;;  %v1604_v2 = vld [vmem:[%s1993_s1 + $0x70] sm:$0xff]   ;;  %v1606_v4 = vld [vmem:[%s1993_s1 + $0x68] sm:$0xff]   ;;  %s1997_s16 = smov (!%p165_p3, %s1258_s16), 63  ;;  %vm633_vm0 = vcmask 261120   ;;  %vm1164_vm1 = vcmask 781312  }
   0xc   : > { %v1603_v1 = vld [vmem:[%s1993_s1 + $0x38] sm:$0xff]   ;;  %1411 = vmatprep.subr.bf16.mxu0 %v1602_v0  ;;  %1577 = vmatprep.subr.bf16.mxu1 %v1602_v0  ;;  %v1605_v3 = vld [vmem:[%s1993_s1 + $0x30] sm:$0xff]   ;;  %v1607_v5 = vld [vmem:[%s1993_s1 + $0x28] sm:$0xff]   ;;  %s1593_s29 = smul.u32 12, %s1997_s16  ;;  %s1261_s5 = sshll.u32 %s1997_s16, 2 }
   0xd   : > { %1412 = vmatpush3.bf16.msra.mxu0 %v1603_v1  ;;  %1585 = vmatpush3.bf16.msra.mxu1 %v1603_v1  ;;  %v1608_v6 = vld [vmem:[%s1993_s1 + $0x60] sm:$0xff]   ;;  %v1610_v8 = vld [vmem:[%s1993_s1 + $0x58] sm:$0xff]   ;;  %v1612_v10 = vld [vmem:[%s1993_s1 + $0x50] sm:$0xff]   ;;  %s1878_s8 = scalar_lea.vmem %s1995_s3, %s1261_s5 }
   0xe   : > { %1413 = vmatprep.subr.bf16.mxu0 %v1604_v2  ;;  %1578 = vmatprep.subr.bf16.mxu1 %v1604_v2  ;;  %v1609_v7 = vld [vmem:[%s1993_s1 + $0x20] sm:$0xff]   ;;  %s1753_s9 = scalar_lea.vmem %s1992_s0, %s1593_s29  ;;  %v1611_v9 = vld [vmem:[%s1993_s1 + $0x18] sm:$0xff]   ;;  %v1613_v13 = vld [vmem:[%s1993_s1 + $0x10] sm:$0xff]  }
   0xf   : > { %v1620_v11 = vld [vmem:[%s1753_s9 + $0x4] ss:$12 sps:$4 sm:$0xff]   ;;  %v1614_v14 = vld [vmem:[%s1993_s1 + $0x48] sm:$0xff]   ;;  %v1631_v26 = vld [vmem:[%s1753_s9 + $0x34] ss:$12 sps:$4 sm:$0xff]  }
  0x10   : > { %v1623_v12 = vld [vmem:[%s1753_s9 + $0x124] ss:$12 sps:$4 sm:$0xff]   ;;  %714 = vmatprep.mubr.bf16.mxu0 %v1620_v11  ;;  %v1615_v15 = vld [vmem:[%s1993_s1 + $0x8] sm:$0xff]   ;;  %v1633_v27 = vld [vmem:[%s1753_s9 + $0x154] ss:$12 sps:$4 sm:$0xff]  }
  0x11   : > { %1414 = vmatpush3.bf16.msra.mxu0 %v1605_v3  ;;  %1586 = vmatpush3.bf16.msra.mxu1 %v1605_v3  ;;  %v1616_v16 = vld [vmem:[%s1993_s1 + $0x40] sm:$0xff]   ;;  %v1624_v18 = vld [vmem:[%s1993_s1 + $0x88] sm:$0xff]   ;;  %v1635_v28 = vld [vmem:[%s1753_s9 + $0x30] ss:$12 sps:$4 sm:$0xff]  }
  0x12   : > { %1415 = vmatprep.subr.bf16.mxu0 %v1606_v4  ;;  %1579 = vmatprep.subr.bf16.mxu1 %v1606_v4  ;;  %v1617_v17 = vld [vmem:[%s1993_s1] sm:$0xff]   ;;  %v1625_v21 = vld [vmem:[%s1753_s9 + $0x1c] ss:$12 sps:$4 sm:$0xff]   ;;  %v1638_v30 = vld [vmem:[%s1753_s9 + $0x4c] ss:$12 sps:$4 sm:$0xff]  }
  0x13   : > { %810 = vmatprep.mubr.bf16.mxu1 %v1623_v12  ;;  %v1618_v19 = vld [vmem:[%s1753_s9] ss:$12 sps:$4 sm:$0xff]   ;;  %v1627_v22 = vld [vmem:[%s1753_s9 + $0x13c] ss:$12 sps:$4 sm:$0xff]   ;;  %v1629_v24 = vld [vmem:[%s1753_s9 + $0x18] ss:$12 sps:$4 sm:$0xff]  }
  0x14   : > { %v1621_v20 = vld [vmem:[%s1753_s9 + $0x120] ss:$12 sps:$4 sm:$0xff]   ;;  %v1630_v25 = vld [vmem:[%s1753_s9 + $0x138] ss:$12 sps:$4 sm:$0xff]   ;;  %v1636_v29 = vld [vmem:[%s1753_s9 + $0x150] ss:$12 sps:$4 sm:$0xff]  }
  0x15   : > { %1416 = vmatpush3.bf16.msra.mxu0 %v1607_v5  ;;  %1587 = vmatpush3.bf16.msra.mxu1 %v1607_v5  ;;  %v1637_v23 = vld [vmem:[%s1993_s1 + $0x80] sm:$0xff]   ;;  %v1640_v31 = vld [vmem:[%s1753_s9 + $0x16c] ss:$12 sps:$4 sm:$0xff]   ;;  %v1642_v32 = vld [vmem:[%s1753_s9 + $0x48] ss:$12 sps:$4 sm:$0xff]  }
  0x16   : > { %1417 = vmatprep.subr.bf16.mxu0 %v1608_v6  ;;  %1580 = vmatprep.subr.bf16.mxu1 %v1608_v6  ;;  %v1643_v33 = vld [vmem:[%s1753_s9 + $0x168] ss:$12 sps:$4 sm:$0xff]   ;;  %v1644_v34 = vld [vmem:[%s1753_s9 + $0x64] ss:$12 sps:$4 sm:$0xff]   ;;  %v1647_v36 = vld [vmem:[%s1753_s9 + $0x60] ss:$12 sps:$4 sm:$0xff]  }
  0x17   : > { %v1646_v35 = vld [vmem:[%s1753_s9 + $0x8] ss:$12 sps:$4 sm:$0xff]   ;;  %v1648_v37 = vld [vmem:[%s1753_s9 + $0x20] ss:$12 sps:$4 sm:$0xff]   ;;  %v1651_v39 = vld [vmem:[%s1753_s9 + $0x38] ss:$12 sps:$4 sm:$0xff]  }
  0x18   : > { %v1649_v38 = vld [vmem:[%s1753_s9 + $0x7c] ss:$12 sps:$4 sm:$0xff]   ;;  %v1652_v40 = vld [vmem:[%s1753_s9 + $0x78] ss:$12 sps:$4 sm:$0xff]   ;;  %v1654_v42 = vld [vmem:[%s1753_s9 + $0x94] ss:$12 sps:$4 sm:$0xff]  }
  0x19   : > { %1418 = vmatpush3.bf16.msra.mxu0 %v1609_v7  ;;  %1588 = vmatpush3.bf16.msra.mxu1 %v1609_v7  ;;  %v1653_v41 = vld [vmem:[%s1753_s9 + $0x50] ss:$12 sps:$4 sm:$0xff]   ;;  %v1656_v43 = vld [vmem:[%s1753_s9 + $0x68] ss:$12 sps:$4 sm:$0xff]   ;;  %v1658_v45 = vld [vmem:[%s1753_s9 + $0x80] ss:$12 sps:$4 sm:$0xff]  }
  0x1a   : > { %1419 = vmatprep.subr.bf16.mxu0 %v1610_v8  ;;  %1581 = vmatprep.subr.bf16.mxu1 %v1610_v8  ;;  %v1657_v44 = vld [vmem:[%s1753_s9 + $0x90] ss:$12 sps:$4 sm:$0xff]   ;;  %v1659_v46 = vld [vmem:[%s1753_s9 + $0xac] ss:$12 sps:$4 sm:$0xff]   ;;  %v1662_v48 = vld [vmem:[%s1753_s9 + $0xa8] ss:$12 sps:$4 sm:$0xff]  }
  0x1b   : > { %v1661_v47 = vld [vmem:[%s1753_s9 + $0x98] ss:$12 sps:$4 sm:$0xff]   ;;  %v1663_v49 = vld [vmem:[%s1753_s9 + $0xb0] ss:$12 sps:$4 sm:$0xff]   ;;  %v1666_v51 = vld [vmem:[%s1753_s9 + $0xc8] ss:$12 sps:$4 sm:$0xff]  }
  0x1c   : > { %v1664_v50 = vld [vmem:[%s1753_s9 + $0xc4] ss:$12 sps:$4 sm:$0xff]   ;;  %v1667_v52 = vld [vmem:[%s1753_s9 + $0xc0] ss:$12 sps:$4 sm:$0xff]   ;;  %v1669_v54 = vld [vmem:[%s1753_s9 + $0xdc] ss:$12 sps:$4 sm:$0xff]  }
  0x1d   : > { %1420 = vmatpush3.bf16.msra.mxu0 %v1611_v9  ;;  %1589 = vmatpush3.bf16.msra.mxu1 %v1611_v9  ;;  %v1668_v53 = vld [vmem:[%s1753_s9 + $0xe0] ss:$12 sps:$4 sm:$0xff]   ;;  %v1671_v55 = vld [vmem:[%s1753_s9 + $0xf8] ss:$12 sps:$4 sm:$0xff]   ;;  %v1673_v57 = vld [vmem:[%s1753_s9 + $0x110] ss:$12 sps:$4 sm:$0xff]  }
  0x1e   : > { %1421 = vmatprep.subr.bf16.mxu0 %v1612_v10  ;;  %1582 = vmatprep.subr.bf16.mxu1 %v1612_v10  ;;  %v1672_v56 = vld [vmem:[%s1753_s9 + $0xd8] ss:$12 sps:$4 sm:$0xff]   ;;  %v1674_v58 = vld [vmem:[%s1753_s9 + $0xf4] ss:$12 sps:$4 sm:$0xff]   ;;  %v1677_v60 = vld [vmem:[%s1753_s9 + $0xf0] ss:$12 sps:$4 sm:$0xff]  }
  0x1f   : > { %v1676_v59 = vld [vmem:[%s1753_s9 + $0x128] ss:$12 sps:$4 sm:$0xff]   ;;  %v1678_v61 = vld [vmem:[%s1753_s9 + $0x140] ss:$12 sps:$4 sm:$0xff]   ;;  %v1681_v63 = vld [vmem:[%s1753_s9 + $0x158] ss:$12 sps:$4 sm:$0xff]  }
  0x20   : > { %v1679_v62 = vld [vmem:[%s1753_s9 + $0x10c] ss:$12 sps:$4 sm:$0xff]   ;;  %v1682_v0 = vld [vmem:[%s1753_s9 + $0x108] ss:$12 sps:$4 sm:$0xff]   ;;  %v1683_v1 = vld [vmem:[%s1753_s9 + $0x170] ss:$12 sps:$4 sm:$0xff]  }
  0x21   : > { %1422 = vmatpush3.bf16.msra.mxu0 %v1613_v13  ;;  %1590 = vmatpush3.bf16.msra.mxu1 %v1613_v13 }
  0x22   : > { %1423 = vmatprep.subr.bf16.mxu0 %v1614_v14  ;;  %1583 = vmatprep.subr.bf16.mxu1 %v1614_v14 }
  0x25   : > { %1424 = vmatpush3.bf16.msra.mxu0 %v1615_v15  ;;  %1591 = vmatpush3.bf16.msra.mxu1 %v1615_v15 }
  0x26   : > { %1425 = vmatprep.subr.bf16.mxu0 %v1616_v16  ;;  %1584 = vmatprep.subr.bf16.mxu1 %v1616_v16 }
  0x29   : > { %1426 = vmatpush3.bf16.msra.mxu0 %v1617_v17  ;;  %1592 = vmatpush3.bf16.msra.mxu1 %v1617_v17 }
  0x2a   : > { %1541 = vmatprep.subr.bf16.mxu1 %v1624_v18 }
  0x2c   : > { %715 = vmatmul.mubr.bf16.vlgmr.msra.gmra.mxu0 %v1618_v19  ;;  %811 = vmatmul.mubr.bf16.vlgmr.msra.gmra.mxu1 %v1621_v20 }
  0x2d   : > { %1542 = vmatpush3.bf16.msra.mxu1 %v1624_v18  ;;  %722 = vmatprep.mubr.bf16.mxu0 %v1625_v21 }
  0x2e   : > { %818 = vmatprep.mubr.bf16.mxu1 %v1627_v22  ;;  %1543 = vmatprep.subr.bf16.mxu1 %v1637_v23 }
  0x31   : > { %1544 = vmatpush3.bf16.msra.mxu1 %v1637_v23 }
  0x34   : > { %723 = vmatmul.mubr.bf16.gmra.mxu0 %v1629_v24  ;;  %819 = vmatmul.mubr.bf16.gmra.mxu1 %v1630_v25 }
  0x35   : > { %730 = vmatprep.mubr.bf16.mxu0 %v1631_v26  ;;  %826 = vmatprep.mubr.bf16.mxu1 %v1633_v27 }
  0x3c   : > { %731 = vmatmul.mubr.bf16.gmra.mxu0 %v1635_v28  ;;  %827 = vmatmul.mubr.bf16.gmra.mxu1 %v1636_v29 }
  0x3d   : > { %738 = vmatprep.mubr.bf16.mxu0 %v1638_v30  ;;  %834 = vmatprep.mubr.bf16.mxu1 %v1640_v31 }
  0x44   : > { %739 = vmatmul.mubr.bf16.gmra.mxu0 %v1642_v32  ;;  %835 = vmatmul.mubr.bf16.gmra.mxu1 %v1643_v33 }
  0x45   : > { %746 = vmatprep.mubr.bf16.mxu0 %v1644_v34  ;;  %1545 = vmatprep.mubr.msk.bf16.mxu1 %vm633_vm0, %v1646_v35 }
  0x4c   : > { %747 = vmatmul.mubr.bf16.gmra.mxu0 %v1647_v36  ;;  %1546 = vmatmul.mubr.msk.bf16.vlgmr.msra.gmra.mxu1 %vm633_vm0, %v1648_v37 }
  0x4d   : > { %754 = vmatprep.mubr.bf16.mxu0 %v1649_v38  ;;  %1549 = vmatprep.mubr.msk.bf16.mxu1 %vm633_vm0, %v1651_v39 }
  0x54   : > { %755 = vmatmul.mubr.bf16.gmra.mxu0 %v1652_v40  ;;  %1550 = vmatmul.mubr.msk.bf16.gmra.mxu1 %vm633_vm0, %v1653_v41 }
  0x55   : > { %762 = vmatprep.mubr.bf16.mxu0 %v1654_v42  ;;  %1553 = vmatprep.mubr.msk.bf16.mxu1 %vm633_vm0, %v1656_v43  ;;  %v1869_v42 = vld [vmem:[%s1994_s2] ss:$0 sm:$0xff] }
  0x5c   : > { %763 = vmatmul.mubr.bf16.gmra.mxu0 %v1657_v44  ;;  %1554 = vmatmul.mubr.msk.bf16.gmra.mxu1 %vm633_vm0, %v1658_v45 }
  0x5d   : > { %770 = vmatprep.mubr.bf16.mxu0 %v1659_v46  ;;  %1557 = vmatprep.mubr.msk.bf16.mxu1 %vm633_vm0, %v1661_v47 }
  0x64   : > { %771 = vmatmul.mubr.bf16.gmra.mxu0 %v1662_v48  ;;  %1558 = vmatmul.mubr.msk.bf16.gmra.mxu1 %vm633_vm0, %v1663_v49 }
  0x65   : > { %778 = vmatprep.mubr.bf16.mxu0 %v1664_v50  ;;  %1561 = vmatprep.mubr.msk.bf16.mxu1 %vm633_vm0, %v1666_v51 }
  0x6c   : > { %779 = vmatmul.mubr.bf16.gmra.mxu0 %v1667_v52  ;;  %1562 = vmatmul.mubr.msk.bf16.gmra.mxu1 %vm633_vm0, %v1668_v53 }
  0x6d   : > { %786 = vmatprep.mubr.bf16.mxu0 %v1669_v54  ;;  %1565 = vmatprep.mubr.msk.bf16.mxu1 %vm633_vm0, %v1671_v55 }
  0x74   : > { %787 = vmatmul.mubr.bf16.gmra.mxu0 %v1672_v56  ;;  %1566 = vmatmul.mubr.msk.bf16.gmra.mxu1 %vm633_vm0, %v1673_v57 }
  0x75   : > { %794 = vmatprep.mubr.bf16.mxu0 %v1674_v58  ;;  %1569 = vmatprep.mubr.msk.bf16.mxu1 %vm633_vm0, %v1676_v59 }
  0x7c   : > { %795 = vmatmul.mubr.bf16.gmra.mxu0 %v1677_v60  ;;  %1570 = vmatmul.mubr.msk.bf16.gmra.mxu1 %vm633_vm0, %v1678_v61 }
  0x7d   : > { %802 = vmatprep.mubr.bf16.mxu0 %v1679_v62  ;;  %1573 = vmatprep.mubr.msk.bf16.mxu1 %vm633_vm0, %v1681_v63 }
  0x84   : > { %803 = vmatmul.mubr.bf16.gmra.mxu0 %v1682_v0  ;;  %1574 = vmatmul.mubr.msk.bf16.gmra.mxu1 %vm633_vm0, %v1683_v1 }
  0xec   : > { %v1427_v2 = vpop.f32.mrf.mxu0  ;;  %v1499_v3 = vpop.f32.mrf.mxu1 }
  0xee   : > { %v1428_v4 = vpop.f32.mrf.mxu0  ;;  %v1500_v5 = vpop.f32.mrf.mxu1 }
  0xef   : > { %v1846_v6 = vadd.f32 %v1500_v5, %v1499_v3  ;;  %v1429_v39 = vadd.f32 %v1428_v4, %v1427_v2 }
  0xf0   : > { %v1430_v7 = vpop.f32.mrf.mxu0  ;;  %v1502_v8 = vpop.f32.mrf.mxu1 }
  0xf1   : > { %v717_v49 = vadd.f32 %v1429_v39, %v1869_v42 }
  0xf2   : > { %v1431_v9 = vpop.f32.mrf.mxu0  ;;  %v1503_v10 = vpop.f32.mrf.mxu1 }
  0xf3   : > { %v1848_v11 = vadd.f32 %v1503_v10, %v1502_v8  ;;  %v1432_v45 = vadd.f32 %v1431_v9, %v1430_v7 }
  0xf4   : > { %v1433_v12 = vpop.f32.mrf.mxu0  ;;  %v1505_v13 = vpop.f32.mrf.mxu1 }
  0xf5   : > { %v720_v58 = vadd.f32 %v1432_v45, %v1869_v42 }
  0xf6   : > { %v1434_v14 = vpop.f32.mrf.mxu0  ;;  %v1506_v15 = vpop.f32.mrf.mxu1 }
  0xf7   : > { %v1850_v16 = vadd.f32 %v1506_v15, %v1505_v13  ;;  %v1435_v36 = vadd.f32 %v1434_v14, %v1433_v12 }
  0xf8   : > { %v1436_v17 = vpop.f32.mrf.mxu0  ;;  %v1508_v18 = vpop.f32.mrf.mxu1 }
  0xf9   : > { %v725_v44 = vadd.f32 %v1435_v36, %v1869_v42 }
  0xfa   : > { %v1437_v19 = vpop.f32.mrf.mxu0  ;;  %v1509_v20 = vpop.f32.mrf.mxu1 }
  0xfb   : > { %v1852_v21 = vadd.f32 %v1509_v20, %v1508_v18  ;;  %v1438_v43 = vadd.f32 %v1437_v19, %v1436_v17 }
  0xfc   : > { %v1439_v22 = vpop.f32.mrf.mxu0  ;;  %v1511_v23 = vpop.f32.mrf.mxu1 }
  0xfd   : > { %v728_v55 = vadd.f32 %v1438_v43, %v1869_v42 }
  0xfe   : > { %v1440_v24 = vpop.f32.mrf.mxu0  ;;  %v1512_v25 = vpop.f32.mrf.mxu1 }
  0xff   : > { %v1854_v26 = vadd.f32 %v1512_v25, %v1511_v23  ;;  %v1441_v59 = vadd.f32 %v1440_v24, %v1439_v22 }
 0x100   : > { %v1442_v27 = vpop.f32.mrf.mxu0  ;;  %v1514_v28 = vpop.f32.mrf.mxu1 }
 0x101   : > { %v733_v14 = vadd.f32 %v1441_v59, %v1869_v42 }
 0x102   : > { %v1443_v29 = vpop.f32.mrf.mxu0  ;;  %v1515_v30 = vpop.f32.mrf.mxu1 }
 0x103   : > { %v1856_v31 = vadd.f32 %v1515_v30, %v1514_v28  ;;  %v1444_v7 = vadd.f32 %v1443_v29, %v1442_v27 }
 0x104   : > { %v1445_v32 = vpop.f32.mrf.mxu0  ;;  %v1858_v33 = vpop.f32.mrf.mxu1 }
 0x105   : > { %v736_v27 = vadd.f32 %v1444_v7, %v1869_v42 }
 0x106   : > { %v1446_v34 = vpop.f32.mrf.mxu0  ;;  %v1860_v35 = vpop.f32.mrf.mxu1 }
 0x107   : > { %v1447_v52 = vadd.f32 %v1446_v34, %v1445_v32 }
 0x108   : > { %v1448_v37 = vpop.f32.mrf.mxu0  ;;  %v1862_v38 = vpop.f32.mrf.mxu1 }
 0x109   : > { %v741_v5 = vadd.f32 %v1447_v52, %v1869_v42 }
 0x10a   : > { %v1449_v40 = vpop.f32.mrf.mxu0  ;;  %v1864_v41 = vpop.f32.mrf.mxu1 }
 0x10b   : > { %v1450_v63 = vadd.f32 %v1449_v40, %v1448_v37 }
 0x10c   : > { %v1451_v46 = vpop.f32.mrf.mxu0  ;;  %v1547_v47 = vpop.f32.mrf.mxu1 }
 0x10d   : > { %v886_v48 = vadd.f32 %v1547_v47, %v725_v44  ;;  %v744_v18 = vadd.f32 %v1450_v63, %v1869_v42 }
 0x10e   : > { %v1452_v50 = vpop.f32.mrf.mxu0  ;;  %v877_v51 = vpop.f32.mrf.mxu1 }
 0x10f   : > { %v1006_v53 = vmax.f32 %v886_v48, 0.0  ;;  %v878_v54 = vadd.f32 %v877_v51, %v717_v49  ;;  %v1453_v28 = vadd.f32 %v1452_v50, %v1451_v46 }
 0x110   : > { %v1454_v56 = vpop.f32.mrf.mxu0  ;;  %v1548_v57 = vpop.f32.mrf.mxu1 }
 0x111   : > { %v1381_v60 = vpack.c.bf16 %v1006_v53, %v1006_v53  ;;  %v1004_v61 = vmax.f32 %v878_v54, 0.0  ;;  %v889_v62 = vadd.f32 %v1548_v57, %v728_v55  ;;  %v749_v51 = vadd.f32 %v1453_v28, %v1869_v42 }
 0x112   : > { %v1455_v0 = vpop.f32.mrf.mxu0  ;;  %v880_v1 = vpop.f32.mrf.mxu1 }
 0x113   : > { %1167 = vst.msk [vmem:[%s1878_s8 + $0x8] sm:$0xf] %vm1164_vm1, %v1381_v60  ;;  %v1379_v2 = vpack.c.bf16 %v1004_v61, %v1004_v61  ;;  %v1007_v3 = vmax.f32 %v889_v62, 0.0  ;;  %v881_v4 = vadd.f32 %v880_v1, %v720_v58  ;;  %v1456_v45 = vadd.f32 %v1455_v0, %v1454_v56 }
 0x114   : > { %v1457_v8 = vpop.f32.mrf.mxu0  ;;  %v1551_v9 = vpop.f32.mrf.mxu1 }
 0x115   : > { %1165 = vst.msk [vmem:[%s1878_s8] sm:$0xf] %vm1164_vm1, %v1379_v2  ;;  %v1382_v10 = vpack.c.bf16 %v1007_v3, %v1007_v3  ;;  %v1005_v12 = vmax.f32 %v881_v4, 0.0  ;;  %v902_v13 = vadd.f32 %v1551_v9, %v741_v5  ;;  %v752_v60 = vadd.f32 %v1456_v45, %v1869_v42 }
 0x116   : > { %v1458_v15 = vpop.f32.mrf.mxu0  ;;  %v893_v17 = vpop.f32.mrf.mxu1 }
 0x117   : > { %1168 = vst.msk [vmem:[%s1878_s8 + $0xc] sm:$0xf] %vm1164_vm1, %v1382_v10  ;;  %v1380_v19 = vpack.c.bf16 %v1005_v12, %v1005_v12  ;;  %v1010_v20 = vmax.f32 %v902_v13, 0.0  ;;  %v1459_v22 = vadd.f32 %v1458_v15, %v1457_v8  ;;  %v894_v23 = vadd.f32 %v893_v17, %v733_v14 }
 0x118   : > { %v1460_v24 = vpop.f32.mrf.mxu0  ;;  %v1552_v25 = vpop.f32.mrf.mxu1 }
 0x119   : > { %1166 = vst.msk [vmem:[%s1878_s8 + $0x4] sm:$0xf] %vm1164_vm1, %v1380_v19  ;;  %v1385_v29 = vpack.c.bf16 %v1010_v20, %v1010_v20  ;;  %v1008_v30 = vmax.f32 %v894_v23, 0.0  ;;  %v905_v32 = vadd.f32 %v1552_v25, %v744_v18  ;;  %v757_v37 = vadd.f32 %v1459_v22, %v1869_v42 }
 0x11a   : > { %v1461_v34 = vpop.f32.mrf.mxu0  ;;  %v896_v36 = vpop.f32.mrf.mxu1 }
 0x11b   : > { %1171 = vst.msk [vmem:[%s1878_s8 + $0x18] sm:$0xf] %vm1164_vm1, %v1385_v29  ;;  %v1383_v39 = vpack.c.bf16 %v1008_v30, %v1008_v30  ;;  %v1011_v40 = vmax.f32 %v905_v32, 0.0  ;;  %v1462_v43 = vadd.f32 %v1461_v34, %v1460_v24  ;;  %v897_v44 = vadd.f32 %v896_v36, %v736_v27 }
 0x11c   : > { %v1463_v47 = vpop.f32.mrf.mxu0  ;;  %v1555_v46 = vpop.f32.mrf.mxu1 }
 0x11d   : > { %1169 = vst.msk [vmem:[%s1878_s8 + $0x10] sm:$0xf] %vm1164_vm1, %v1383_v39  ;;  %v1386_v48 = vpack.c.bf16 %v1011_v40, %v1011_v40  ;;  %v1009_v49 = vmax.f32 %v897_v44, 0.0  ;;  %v918_v50 = vadd.f32 %v1555_v46, %v757_v37  ;;  %v760_v56 = vadd.f32 %v1462_v43, %v1869_v42 }
 0x11e   : > { %v1464_v52 = vpop.f32.mrf.mxu0  ;;  %v909_v53 = vpop.f32.mrf.mxu1 }
 0x11f   : > { %1172 = vst.msk [vmem:[%s1878_s8 + $0x1c] sm:$0xf] %vm1164_vm1, %v1386_v48  ;;  %v1384_v54 = vpack.c.bf16 %v1009_v49, %v1009_v49  ;;  %v1014_v55 = vmax.f32 %v918_v50, 0.0  ;;  %v910_v57 = vadd.f32 %v909_v53, %v749_v51  ;;  %v1465_v62 = vadd.f32 %v1464_v52, %v1463_v47 }
 0x120   : > { %v1466_v58 = vpop.f32.mrf.mxu0  ;;  %v1556_v59 = vpop.f32.mrf.mxu1 }
 0x121   : > { %1170 = vst.msk [vmem:[%s1878_s8 + $0x14] sm:$0xf] %vm1164_vm1, %v1384_v54  ;;  %v1389_v61 = vpack.c.bf16 %v1014_v55, %v1014_v55  ;;  %v1012_v63 = vmax.f32 %v910_v57, 0.0  ;;  %v921_v0 = vadd.f32 %v1556_v59, %v760_v56  ;;  %v765_v13 = vadd.f32 %v1465_v62, %v1869_v42 }
 0x122   : > { %v1467_v1 = vpop.f32.mrf.mxu0  ;;  %v912_v2 = vpop.f32.mrf.mxu1 }
 0x123   : > { %1175 = vst.msk [vmem:[%s1878_s8 + $0x28] sm:$0xf] %vm1164_vm1, %v1389_v61  ;;  %v1387_v3 = vpack.c.bf16 %v1012_v63, %v1012_v63  ;;  %v1015_v4 = vmax.f32 %v921_v0, 0.0  ;;  %v913_v5 = vadd.f32 %v912_v2, %v752_v60  ;;  %v1468_v10 = vadd.f32 %v1467_v1, %v1466_v58 }
 0x124   : > { %v1469_v7 = vpop.f32.mrf.mxu0  ;;  %v1559_v8 = vpop.f32.mrf.mxu1 }
 0x125   : > { %1173 = vst.msk [vmem:[%s1878_s8 + $0x20] sm:$0xf] %vm1164_vm1, %v1387_v3  ;;  %v1390_v9 = vpack.c.bf16 %v1015_v4, %v1015_v4  ;;  %v1013_v12 = vmax.f32 %v913_v5, 0.0  ;;  %v768_v25 = vadd.f32 %v1468_v10, %v1869_v42 }
 0x126   : > { %v1470_v14 = vpop.f32.mrf.mxu0  ;;  %v925_v15 = vpop.f32.mrf.mxu1 }
 0x127   : > { %1176 = vst.msk [vmem:[%s1878_s8 + $0x2c] sm:$0xf] %vm1164_vm1, %v1390_v9  ;;  %v1388_v17 = vpack.c.bf16 %v1013_v12, %v1013_v12  ;;  %v1471_v18 = vadd.f32 %v1470_v14, %v1469_v7  ;;  %v926_v19 = vadd.f32 %v925_v15, %v765_v13  ;;  %v821_v15 = vadd.f32 %v1850_v16, %v1869_v42 }
 0x128   : > { %v1472_v20 = vpop.f32.mrf.mxu0  ;;  %v1560_v22 = vpop.f32.mrf.mxu1  ;;  %v824_v16 = vadd.f32 %v1852_v21, %v1869_v42 }
 0x129   : > { %1174 = vst.msk [vmem:[%s1878_s8 + $0x24] sm:$0xf] %vm1164_vm1, %v1388_v17  ;;  %v773_v23 = vadd.f32 %v1471_v18, %v1869_v42  ;;  %v1016_v24 = vmax.f32 %v926_v19, 0.0 }
 0x12a   : > { %v1473_v27 = vpop.f32.mrf.mxu0  ;;  %v928_v28 = vpop.f32.mrf.mxu1 }
 0x12b   : > { %v934_v29 = vadd.f32 %v1559_v8, %v773_v23  ;;  %v1391_v30 = vpack.c.bf16 %v1016_v24, %v1016_v24  ;;  %v1474_v32 = vadd.f32 %v1473_v27, %v1472_v20  ;;  %v929_v34 = vadd.f32 %v928_v28, %v768_v25 }
 0x12c   : > { %v1475_v36 = vpop.f32.mrf.mxu0  ;;  %v1563_v37 = vpop.f32.mrf.mxu1  ;;  %v1519_v23 = vadd.f32 %v1860_v35, %v1858_v33  ;;  %v813_v25 = vadd.f32 %v1846_v6, %v1869_v42  ;;  %v1522_v6 = vadd.f32 %v1864_v41, %v1862_v38 }
 0x12d   : > { %v1018_v39 = vmax.f32 %v934_v29, 0.0  ;;  %1177 = vst.msk [vmem:[%s1878_s8 + $0x30] sm:$0xf] %vm1164_vm1, %v1391_v30  ;;  %v776_v40 = vadd.f32 %v1474_v32, %v1869_v42  ;;  %v1017_v43 = vmax.f32 %v929_v34, 0.0 }
 0x12e   : > { %v1476_v44 = vpop.f32.mrf.mxu0  ;;  %v941_v45 = vpop.f32.mrf.mxu1 }
 0x12f   : > { %v1393_v47 = vpack.c.bf16 %v1018_v39, %v1018_v39  ;;  %v937_v46 = vadd.f32 %v1560_v22, %v776_v40  ;;  %v1392_v48 = vpack.c.bf16 %v1017_v43, %v1017_v43  ;;  %v1477_v49 = vadd.f32 %v1476_v44, %v1475_v36 }
 0x130   : > { %v1478_v50 = vpop.f32.mrf.mxu0  ;;  %v1564_v51 = vpop.f32.mrf.mxu1  ;;  %v816_v44 = vadd.f32 %v1848_v11, %v1869_v42 }
 0x131   : > { %1179 = vst.msk [vmem:[%s1878_s8 + $0x38] sm:$0xf] %vm1164_vm1, %v1393_v47  ;;  %v1019_v52 = vmax.f32 %v937_v46, 0.0  ;;  %1178 = vst.msk [vmem:[%s1878_s8 + $0x34] sm:$0xf] %vm1164_vm1, %v1392_v48  ;;  %v781_v53 = vadd.f32 %v1477_v49, %v1869_v42  ;;  %v837_v47 = vadd.f32 %v1519_v23, %v1869_v42 }
 0x132   : > { %v1479_v54 = vpop.f32.mrf.mxu0  ;;  %v944_v55 = vpop.f32.mrf.mxu1 }
 0x133   : > { %v1394_v57 = vpack.c.bf16 %v1019_v52, %v1019_v52  ;;  %v942_v56 = vadd.f32 %v941_v45, %v781_v53  ;;  %v1480_v58 = vadd.f32 %v1479_v54, %v1478_v50 }
 0x134   : > { %v1481_v59 = vpop.f32.mrf.mxu0  ;;  %v1924_v60 = vpop.f32.mrf.mxu1 }
 0x135   : > { %1180 = vst.msk [vmem:[%s1878_s8 + $0x3c] sm:$0xf] %vm1164_vm1, %v1394_v57  ;;  %v1020_v61 = vmax.f32 %v942_v56, 0.0  ;;  %v784_v62 = vadd.f32 %v1480_v58, %v1869_v42  ;;  %v829_v58 = vadd.f32 %v1854_v26, %v1869_v42 }
 0x136   : > { %v1482_v63 = vpop.f32.mrf.mxu0  ;;  %v957_v0 = vpop.f32.mrf.mxu1 }
 0x137   : > { %v1395_v1 = vpack.c.bf16 %v1020_v61, %v1020_v61  ;;  %v945_v2 = vadd.f32 %v944_v55, %v784_v62  ;;  %v1483_v3 = vadd.f32 %v1482_v63, %v1481_v59  ;;  %v840_v61 = vadd.f32 %v1522_v6, %v1869_v42 }
 0x138   : > { %v1484_v4 = vpop.f32.mrf.mxu0  ;;  %v1929_v5 = vpop.f32.mrf.mxu1 }
 0x139   : > { %1181 = vst.msk [vmem:[%s1878_s8 + $0x40] sm:$0xf] %vm1164_vm1, %v1395_v1  ;;  %v1021_v7 = vmax.f32 %v945_v2, 0.0  ;;  %v789_v8 = vadd.f32 %v1483_v3, %v1869_v42 }
 0x13a   : > { %v1485_v9 = vpop.f32.mrf.mxu0  ;;  %v960_v10 = vpop.f32.mrf.mxu1 }
 0x13b   : > { %v1396_v12 = vpack.c.bf16 %v1021_v7, %v1021_v7  ;;  %v950_v13 = vadd.f32 %v1563_v37, %v789_v8  ;;  %v1486_v14 = vadd.f32 %v1485_v9, %v1484_v4 }
 0x13c   : > { %v1487_v17 = vpop.f32.mrf.mxu0  ;;  %v1571_v18 = vpop.f32.mrf.mxu1 }
 0x13d   : > { %1182 = vst.msk [vmem:[%s1878_s8 + $0x44] sm:$0xf] %vm1164_vm1, %v1396_v12  ;;  %v1022_v19 = vmax.f32 %v950_v13, 0.0  ;;  %v792_v20 = vadd.f32 %v1486_v14, %v1869_v42  ;;  %v982_v22 = vadd.f32 %v1571_v18, %v821_v15  ;;  %v832_v14 = vadd.f32 %v1856_v31, %v1869_v42 }
 0x13e   : > { %v1488_v24 = vpop.f32.mrf.mxu0  ;;  %v973_v27 = vpop.f32.mrf.mxu1 }
 0x13f   : > { %v1397_v28 = vpack.c.bf16 %v1022_v19, %v1022_v19  ;;  %v953_v29 = vadd.f32 %v1564_v51, %v792_v20  ;;  %v1030_v30 = vmax.f32 %v982_v22, 0.0  ;;  %v1489_v32 = vadd.f32 %v1488_v24, %v1487_v17 }
 0x140   : > { %v974_v34 = vadd.f32 %v973_v27, %v813_v25  ;;  %v1490_v36 = vpop.f32.mrf.mxu0  ;;  %v1572_v37 = vpop.f32.mrf.mxu1 }
 0x141   : > { %1183 = vst.msk [vmem:[%s1878_s8 + $0x48] sm:$0xf] %vm1164_vm1, %v1397_v28  ;;  %v1023_v39 = vmax.f32 %v953_v29, 0.0  ;;  %v1405_v33 = vpack.c.bf16 %v1030_v30, %v1030_v30  ;;  %v797_v35 = vadd.f32 %v1489_v32, %v1869_v42  ;;  %v985_v40 = vadd.f32 %v1572_v37, %v824_v16 }
 0x142   : > { %v1028_v21 = vmax.f32 %v974_v34, 0.0  ;;  %v1491_v43 = vpop.f32.mrf.mxu0  ;;  %v976_v45 = vpop.f32.mrf.mxu1 }
 0x143   : > { %v1398_v46 = vpack.c.bf16 %v1023_v39, %v1023_v39  ;;  %1191 = vst.msk [vmem:[%s1878_s8 + $0x68] sm:$0xf] %vm1164_vm1, %v1405_v33  ;;  %v958_v48 = vadd.f32 %v957_v0, %v797_v35  ;;  %v1031_v49 = vmax.f32 %v985_v40, 0.0  ;;  %v1492_v50 = vadd.f32 %v1491_v43, %v1490_v36 }
 0x144   : > { %v1403_v51 = vpack.c.bf16 %v1028_v21, %v1028_v21  ;;  %v977_v52 = vadd.f32 %v976_v45, %v816_v44  ;;  %v1493_v53 = vpop.f32.mrf.mxu0  ;;  %v1575_v38 = vpop.f32.mrf.mxu1 }
 0x145   : > { %1184 = vst.msk [vmem:[%s1878_s8 + $0x4c] sm:$0xf] %vm1164_vm1, %v1398_v46  ;;  %v1024_v41 = vmax.f32 %v958_v48, 0.0  ;;  %v1406_v54 = vpack.c.bf16 %v1031_v49, %v1031_v49  ;;  %v800_v11 = vadd.f32 %v1492_v50, %v1869_v42  ;;  %v998_v55 = vadd.f32 %v1575_v38, %v837_v47 }
 0x146   : > { %1189 = vst.msk [vmem:[%s1878_s8 + $0x60] sm:$0xf] %vm1164_vm1, %v1403_v51  ;;  %v1029_v57 = vmax.f32 %v977_v52, 0.0  ;;  %v1494_v56 = vpop.f32.mrf.mxu0  ;;  %v989_v59 = vpop.f32.mrf.mxu1 }
 0x147   : > { %v1399_v62 = vpack.c.bf16 %v1024_v41, %v1024_v41  ;;  %1192 = vst.msk [vmem:[%s1878_s8 + $0x6c] sm:$0xf] %vm1164_vm1, %v1406_v54  ;;  %v961_v63 = vadd.f32 %v960_v10, %v800_v11  ;;  %v1034_v0 = vmax.f32 %v998_v55, 0.0  ;;  %v1495_v1 = vadd.f32 %v1494_v56, %v1493_v53 }
 0x148   : > { %v1404_v2 = vpack.c.bf16 %v1029_v57, %v1029_v57  ;;  %v990_v3 = vadd.f32 %v989_v59, %v829_v58  ;;  %v1496_v4 = vpop.f32.mrf.mxu0  ;;  %v1576_v7 = vpop.f32.mrf.mxu1 }
 0x149   : > { %1185 = vst.msk [vmem:[%s1878_s8 + $0x50] sm:$0xf] %vm1164_vm1, %v1399_v62  ;;  %v1025_v8 = vmax.f32 %v961_v63, 0.0  ;;  %v1409_v26 = vpack.c.bf16 %v1034_v0, %v1034_v0  ;;  %v805_v9 = vadd.f32 %v1495_v1, %v1869_v42  ;;  %v1001_v12 = vadd.f32 %v1576_v7, %v840_v61 }
 0x14a   : > { %1190 = vst.msk [vmem:[%s1878_s8 + $0x64] sm:$0xf] %vm1164_vm1, %v1404_v2  ;;  %v1032_v13 = vmax.f32 %v990_v3, 0.0  ;;  %v1497_v10 = vpop.f32.mrf.mxu0  ;;  %v992_v15 = vpop.f32.mrf.mxu1 }
 0x14b   : > { %v1400_v17 = vpack.c.bf16 %v1025_v8, %v1025_v8  ;;  %1195 = vst.msk [vmem:[%s1878_s8 + $0x78] sm:$0xf] %vm1164_vm1, %v1409_v26  ;;  %v966_v18 = vadd.f32 %v1924_v60, %v805_v9  ;;  %v1035_v19 = vmax.f32 %v1001_v12, 0.0  ;;  %v1498_v20 = vadd.f32 %v1497_v10, %v1496_v4 }
 0x14c   : > { %v1407_v22 = vpack.c.bf16 %v1032_v13, %v1032_v13  ;;  %v993_v23 = vadd.f32 %v992_v15, %v832_v14 }
 0x14d   : > { %1186 = vst.msk [vmem:[%s1878_s8 + $0x54] sm:$0xf] %vm1164_vm1, %v1400_v17  ;;  %v1026_v24 = vmax.f32 %v966_v18, 0.0  ;;  %v1410_v25 = vpack.c.bf16 %v1035_v19, %v1035_v19  ;;  %v808_v31 = vadd.f32 %v1498_v20, %v1869_v42 }
 0x14e   : > { %1193 = vst.msk [vmem:[%s1878_s8 + $0x70] sm:$0xf] %vm1164_vm1, %v1407_v22  ;;  %v1033_v27 = vmax.f32 %v993_v23, 0.0 }
 0x14f   : > { %v1401_v16 = vpack.c.bf16 %v1026_v24, %v1026_v24  ;;  %1196 = vst.msk [vmem:[%s1878_s8 + $0x7c] sm:$0xf] %vm1164_vm1, %v1410_v25  ;;  %v969_v60 = vadd.f32 %v1929_v5, %v808_v31 }
 0x150   : > { %v1408_v28 = vpack.c.bf16 %v1033_v27, %v1033_v27 }
 0x151   : > { %1187 = vst.msk [vmem:[%s1878_s8 + $0x58] sm:$0xf] %vm1164_vm1, %v1401_v16  ;;  %v1027_v29 = vmax.f32 %v969_v60, 0.0 }
 0x152   : > { %1194 = vst.msk [vmem:[%s1878_s8 + $0x74] sm:$0xf] %vm1164_vm1, %v1408_v28 }
 0x153   : > { %v1402_v30 = vpack.c.bf16 %v1027_v29, %v1027_v29 }
 0x155   : > { %1188 = vst.msk [vmem:[%s1878_s8 + $0x5c] sm:$0xf] %vm1164_vm1, %v1402_v30 }
 0x156 PF: > { %s13_s12 = sadd.s32 1, %s1690_s12  }
 0x157   : > { %p10_p4 = scmp.ge.s32.totalorder %s13_s12, 4  }
 0x159   :  { %12 = sbr.rel (!%p10_p4) target bundleno = 1 (0x1), region = 62 }

// kernel: net_forward.32
= control target key start
LH: loop header
LB: loop body
LE: loop exit
PB: predicated region body
PF: predicated region fallthrough
CT: control target
= control target key end

     0   :  { %s1830_s12 = smov 0   ;;  %s2355_s0 = inlined_call_operand.vmem [shape: bf16[512,288], index: 0, kind: input, shape index: {}]   ;;  %s2356_s1 = inlined_call_operand.vmem [shape: bf16[288,192], index: 1, kind: input, shape index: {}]   ;;  %s2357_s2 = inlined_call_operand.vmem [shape: f32[1,192], index: 2, kind: input, shape index: {}]   ;;  %s2358_s3 = inlined_call_operand.vmem [shape: bf16[512,192], index: 3, kind: output, shape index: {}]  }
   0x1 LB: > { %s1496_s13 = sadd.s32 4294967295, %s1807_s12   ;;  %p1500_p0 = scmp.ge.s32.totalorder %s1807_s12, 1  ;;  %s1807_s12 = sphi %s1830_s12, %s13_s12  }
   0x2   : > { %p139_p1 = scmp.lt.s32.totalorder %s1807_s12, 3 }
   0x4   : > { %p140_p2 = pnand %p1500_p0, %p139_p1 }
   0x5   : > { %s1501_s26 = sshll.u32 (!%p140_p2), %s1496_s13, 5 }
   0x6   : > { %143 = sbr.rel (%p140_p2) target bundleno = 404 (0x194), region = 32  ;;  %p166_p3 = scmp.lt.s32.totalorder (!%p140_p2), %s1501_s26, 63 }
   0xb   : > { %v1683_v0 = vld [vmem:[%s2356_s1 + $0x74] ss:$8 sps:$4 sm:$0xff]   ;;  %v1685_v1 = vld [vmem:[%s2356_s1 + $0x70] ss:$8 sps:$4 sm:$0xff]   ;;  %v1809_v2 = vmov 0   ;;  %s2362_s26 = smov (!%p166_p3, %s1501_s26), 63 }
   0xc   : > { %986 = vmatprep.mubr.bf16.mxu1 %v1809_v2  ;;  %761 = vmatprep.subr.bf16.mxu0 %v1683_v0  ;;  %v1686_v3 = vld [vmem:[%s2356_s1 + $0x64] ss:$8 sps:$4 sm:$0xff]   ;;  %v1688_v4 = vld [vmem:[%s2356_s1 + $0x60] ss:$8 sps:$4 sm:$0xff]   ;;  %v1689_v5 = vld [vmem:[%s2356_s1 + $0x54] ss:$8 sps:$4 sm:$0xff]  }
   0xd   : > { %762 = vmatpush1.bf16.msra.mxu0 %v1685_v1  ;;  %v1691_v6 = vld [vmem:[%s2356_s1 + $0x50] ss:$8 sps:$4 sm:$0xff]   ;;  %v1692_v7 = vld [vmem:[%s2356_s1 + $0x44] ss:$8 sps:$4 sm:$0xff]   ;;  %v1694_v8 = vld [vmem:[%s2356_s1 + $0x40] ss:$8 sps:$4 sm:$0xff]  }
   0xe   : > { %763 = vmatprep.subr.bf16.mxu0 %v1686_v3  ;;  %v1695_v9 = vld [vmem:[%s2356_s1 + $0x34] ss:$8 sps:$4 sm:$0xff]   ;;  %v1697_v10 = vld [vmem:[%s2356_s1 + $0x30] ss:$8 sps:$4 sm:$0xff]   ;;  %v1698_v11 = vld [vmem:[%s2356_s1 + $0x24] ss:$8 sps:$4 sm:$0xff]  }
   0xf   : > { %s1673_s10 = smul.u32 12, %s2362_s26  ;;  %v1700_v12 = vld [vmem:[%s2356_s1 + $0x20] ss:$8 sps:$4 sm:$0xff]   ;;  %v1724_v13 = vld [vmem:[%s2356_s1 + $0x114] ss:$8 sps:$4 sm:$0xff]   ;;  %vm712_vm0 = vcmask 261120  }
  0x10   : > { %v1727_v14 = vld [vmem:[%s2356_s1 + $0x110] ss:$8 sps:$4 sm:$0xff]   ;;  %v1701_v15 = vld [vmem:[%s2356_s1 + $0x14] ss:$8 sps:$4 sm:$0xff]   ;;  %966 = vmatprep.subr.bf16.mxu1 %v1724_v13  ;;  %v1730_v16 = vld [vmem:[%s2356_s1 + $0x104] ss:$8 sps:$4 sm:$0xff]  }
  0x11   : > { %764 = vmatpush1.bf16.msra.mxu0 %v1688_v4  ;;  %967 = vmatpush1.bf16.msra.mxu1 %v1727_v14  ;;  %v1733_v17 = vld [vmem:[%s2356_s1 + $0x100] ss:$8 sps:$4 sm:$0xff]   ;;  %s1896_s27 = scalar_lea.vmem %s2355_s0, %s1673_s10  ;;  %v1703_v18 = vld [vmem:[%s2356_s1 + $0x10] ss:$8 sps:$4 sm:$0xff]   ;;  %v1704_v19 = vld [vmem:[%s2356_s1 + $0x4] ss:$8 sps:$4 sm:$0xff]  }
  0x12   : > { %765 = vmatprep.subr.bf16.mxu0 %v1689_v5  ;;  %968 = vmatprep.subr.bf16.mxu1 %v1730_v16  ;;  %v1736_v20 = vld [vmem:[%s1896_s27 + $0x8] ss:$12 sps:$4 sm:$0xff]   ;;  %v1740_v21 = vld [vmem:[%s1896_s27 + $0x4] ss:$12 sps:$4 sm:$0xff]   ;;  %v1741_v26 = vld [vmem:[%s1896_s27 + $0x20] ss:$12 sps:$4 sm:$0xff]  }
  0x13   : > { %v1706_v22 = vld [vmem:[%s2356_s1] ss:$8 sps:$4 sm:$0xff]   ;;  %v1707_v23 = vld [vmem:[%s2356_s1 + $0xf4] ss:$8 sps:$4 sm:$0xff]   ;;  %793 = vmatprep.mubr.bf16.mxu0 %v1740_v21  ;;  %v1709_v24 = vld [vmem:[%s2356_s1 + $0xf0] ss:$8 sps:$4 sm:$0xff]  }
  0x14   : > { %v1710_v25 = vld [vmem:[%s2356_s1 + $0xe4] ss:$8 sps:$4 sm:$0xff]   ;;  %v1712_v27 = vld [vmem:[%s2356_s1 + $0xe0] ss:$8 sps:$4 sm:$0xff]   ;;  %v1713_v28 = vld [vmem:[%s2356_s1 + $0xd4] ss:$8 sps:$4 sm:$0xff]  }
  0x15   : > { %766 = vmatpush1.bf16.msra.mxu0 %v1691_v6  ;;  %969 = vmatpush1.bf16.msra.mxu1 %v1733_v17  ;;  %v1715_v29 = vld [vmem:[%s2356_s1 + $0xd0] ss:$8 sps:$4 sm:$0xff]   ;;  %v1716_v30 = vld [vmem:[%s2356_s1 + $0xc4] ss:$8 sps:$4 sm:$0xff]   ;;  %v1718_v32 = vld [vmem:[%s2356_s1 + $0xc0] ss:$8 sps:$4 sm:$0xff]  }
  0x16   : > { %767 = vmatprep.subr.bf16.mxu0 %v1692_v7  ;;  %v1745_v31 = vld [vmem:[%s1896_s27 + $0x38] ss:$12 sps:$4 sm:$0xff]   ;;  %v1719_v33 = vld [vmem:[%s2356_s1 + $0xb4] ss:$8 sps:$4 sm:$0xff]   ;;  %v1726_v37 = vld [vmem:[%s2356_s1 + $0xa0] ss:$8 sps:$4 sm:$0xff]  }
  0x17   : > { %v1721_v34 = vld [vmem:[%s2356_s1 + $0xb0] ss:$8 sps:$4 sm:$0xff]   ;;  %v1722_v35 = vld [vmem:[%s2356_s1 + $0xa4] ss:$8 sps:$4 sm:$0xff]   ;;  %v1728_v38 = vld [vmem:[%s2356_s1 + $0x94] ss:$8 sps:$4 sm:$0xff]  }
  0x18   : > { %1590 = vmatmul.mubr.msk.bf16.vlgmr.msra.gmra.mxu1 %vm712_vm0, %v1736_v20  ;;  %v1749_v36 = vld [vmem:[%s1896_s27 + $0x50] ss:$12 sps:$4 sm:$0xff]   ;;  %v1734_v40 = vld [vmem:[%s2356_s1 + $0x84] ss:$8 sps:$4 sm:$0xff]   ;;  %v1753_v41 = vld [vmem:[%s1896_s27 + $0x68] ss:$12 sps:$4 sm:$0xff]  }
  0x19   : > { %768 = vmatpush1.bf16.msra.mxu0 %v1694_v8  ;;  %996 = vmatprep.mubr.bf16.mxu1 %v1809_v2  ;;  %v1732_v39 = vld [vmem:[%s2356_s1 + $0x90] ss:$8 sps:$4 sm:$0xff]   ;;  %v1737_v42 = vld [vmem:[%s2356_s1 + $0x80] ss:$8 sps:$4 sm:$0xff]   ;;  %s1640_s17 = sshll.u32 %s2362_s26, 3  ;;  %vm1403_vm1 = vcmask 1043456  }
  0x1a   : > { %769 = vmatprep.subr.bf16.mxu0 %v1695_v9  ;;  %v1738_v43 = vld [vmem:[%s1896_s27] ss:$12 sps:$4 sm:$0xff]   ;;  %v1742_v44 = vld [vmem:[%s1896_s27 + $0x1c] ss:$12 sps:$4 sm:$0xff]   ;;  %v1744_v46 = vld [vmem:[%s1896_s27 + $0x18] ss:$12 sps:$4 sm:$0xff]   ;;  %s2083_s20 = scalar_lea.vmem %s2358_s3, %s1640_s17 }
  0x1b   : > { %v1757_v45 = vld [vmem:[%s1896_s27 + $0x80] ss:$12 sps:$4 sm:$0xff]   ;;  %v1761_v48 = vld [vmem:[%s1896_s27 + $0x98] ss:$12 sps:$4 sm:$0xff]   ;;  %v1748_v49 = vld [vmem:[%s1896_s27 + $0x30] ss:$12 sps:$4 sm:$0xff]  }
  0x1c   : > { %v1746_v47 = vld [vmem:[%s1896_s27 + $0x34] ss:$12 sps:$4 sm:$0xff]   ;;  %v1750_v50 = vld [vmem:[%s1896_s27 + $0x4c] ss:$12 sps:$4 sm:$0xff]   ;;  %v1765_v51 = vld [vmem:[%s1896_s27 + $0xb0] ss:$12 sps:$4 sm:$0xff]  }
  0x1d   : > { %770 = vmatpush1.bf16.msra.mxu0 %v1697_v10  ;;  %v1752_v52 = vld [vmem:[%s1896_s27 + $0x48] ss:$12 sps:$4 sm:$0xff]   ;;  %v1754_v53 = vld [vmem:[%s1896_s27 + $0x64] ss:$12 sps:$4 sm:$0xff]   ;;  %v1756_v55 = vld [vmem:[%s1896_s27 + $0x60] ss:$12 sps:$4 sm:$0xff]  }
  0x1e   : > { %771 = vmatprep.subr.bf16.mxu0 %v1698_v11  ;;  %v1769_v54 = vld [vmem:[%s1896_s27 + $0xc8] ss:$12 sps:$4 sm:$0xff]   ;;  %v1773_v57 = vld [vmem:[%s1896_s27 + $0xe0] ss:$12 sps:$4 sm:$0xff]   ;;  %v1760_v58 = vld [vmem:[%s1896_s27 + $0x78] ss:$12 sps:$4 sm:$0xff]  }
  0x1f   : > { %v1758_v56 = vld [vmem:[%s1896_s27 + $0x7c] ss:$12 sps:$4 sm:$0xff]   ;;  %v1762_v59 = vld [vmem:[%s1896_s27 + $0x94] ss:$12 sps:$4 sm:$0xff]   ;;  %v1777_v60 = vld [vmem:[%s1896_s27 + $0xf8] ss:$12 sps:$4 sm:$0xff]  }
  0x20   : > { %1591 = vmatmul.mubr.msk.bf16.gmra.mxu1 %vm712_vm0, %v1741_v26  ;;  %v1764_v61 = vld [vmem:[%s1896_s27 + $0x90] ss:$12 sps:$4 sm:$0xff]   ;;  %v1766_v62 = vld [vmem:[%s1896_s27 + $0xac] ss:$12 sps:$4 sm:$0xff]   ;;  %v1768_v0 = vld [vmem:[%s1896_s27 + $0xa8] ss:$12 sps:$4 sm:$0xff]  }
  0x21   : > { %772 = vmatpush1.bf16.msra.mxu0 %v1700_v12  ;;  %1006 = vmatprep.mubr.bf16.mxu1 %v1809_v2  ;;  %v1781_v63 = vld [vmem:[%s1896_s27 + $0x110] ss:$12 sps:$4 sm:$0xff]   ;;  %v1785_v3 = vld [vmem:[%s1896_s27 + $0x128] ss:$12 sps:$4 sm:$0xff]   ;;  %v1772_v4 = vld [vmem:[%s1896_s27 + $0xc0] ss:$12 sps:$4 sm:$0xff]  }
  0x22   : > { %773 = vmatprep.subr.bf16.mxu0 %v1701_v15  ;;  %v1770_v1 = vld [vmem:[%s1896_s27 + $0xc4] ss:$12 sps:$4 sm:$0xff]   ;;  %v1774_v5 = vld [vmem:[%s1896_s27 + $0xdc] ss:$12 sps:$4 sm:$0xff]   ;;  %v1789_v6 = vld [vmem:[%s1896_s27 + $0x140] ss:$12 sps:$4 sm:$0xff]  }
  0x23   : > { %v1776_v7 = vld [vmem:[%s1896_s27 + $0xd8] ss:$12 sps:$4 sm:$0xff]   ;;  %v1778_v8 = vld [vmem:[%s1896_s27 + $0xf4] ss:$12 sps:$4 sm:$0xff]   ;;  %v1780_v10 = vld [vmem:[%s1896_s27 + $0xf0] ss:$12 sps:$4 sm:$0xff]  }
  0x24   : > { %v1793_v9 = vld [vmem:[%s1896_s27 + $0x158] ss:$12 sps:$4 sm:$0xff]   ;;  %v1797_v12 = vld [vmem:[%s1896_s27 + $0x170] ss:$12 sps:$4 sm:$0xff]   ;;  %v1784_v13 = vld [vmem:[%s1896_s27 + $0x108] ss:$12 sps:$4 sm:$0xff]  }
  0x25   : > { %774 = vmatpush1.bf16.msra.mxu0 %v1703_v18  ;;  %v1782_v11 = vld [vmem:[%s1896_s27 + $0x10c] ss:$12 sps:$4 sm:$0xff]   ;;  %v1786_v14 = vld [vmem:[%s1896_s27 + $0x124] ss:$12 sps:$4 sm:$0xff]   ;;  %v1790_v16 = vld [vmem:[%s1896_s27 + $0x13c] ss:$12 sps:$4 sm:$0xff]  }
  0x26   : > { %775 = vmatprep.subr.bf16.mxu0 %v1704_v19  ;;  %v1788_v15 = vld [vmem:[%s1896_s27 + $0x120] ss:$12 sps:$4 sm:$0xff]   ;;  %v1792_v17 = vld [vmem:[%s1896_s27 + $0x138] ss:$12 sps:$4 sm:$0xff]   ;;  %v1800_v20 = vld [vmem:[%s1896_s27 + $0x168] ss:$12 sps:$4 sm:$0xff]  }
  0x27   : > { %v1794_v18 = vld [vmem:[%s1896_s27 + $0x154] ss:$12 sps:$4 sm:$0xff]   ;;  %v1798_v19 = vld [vmem:[%s1896_s27 + $0x16c] ss:$12 sps:$4 sm:$0xff]   ;;  %vm1404_vm2 = vcmask 523268  }
  0x28   : > { %1592 = vmatmul.mubr.msk.bf16.gmra.mxu1 %vm712_vm0, %v1745_v31  ;;  %vm2085_vm3 = vmor %vm1404_vm2, %vm1403_vm1 }
  0x29   : > { %776 = vmatpush1.bf16.msra.mxu0 %v1706_v22  ;;  %1016 = vmatprep.mubr.bf16.mxu1 %v1809_v2 }
  0x2a   : > { %777 = vmatprep.subr.bf16.mxu0 %v1707_v23 }
  0x2d   : > { %778 = vmatpush2.bf16.msra.mxu0 %v1709_v24 }
  0x2e   : > { %779 = vmatprep.subr.bf16.mxu0 %v1710_v25 }
  0x30   : > { %1593 = vmatmul.mubr.msk.bf16.gmra.mxu1 %vm712_vm0, %v1749_v36 }
  0x31   : > { %780 = vmatpush2.bf16.msra.mxu0 %v1712_v27  ;;  %1026 = vmatprep.mubr.bf16.mxu1 %v1809_v2 }
  0x32   : > { %781 = vmatprep.subr.bf16.mxu0 %v1713_v28 }
  0x35   : > { %782 = vmatpush2.bf16.msra.mxu0 %v1715_v29 }
  0x36   : > { %783 = vmatprep.subr.bf16.mxu0 %v1716_v30 }
  0x38   : > { %1594 = vmatmul.mubr.msk.bf16.gmra.mxu1 %vm712_vm0, %v1753_v41 }
  0x39   : > { %784 = vmatpush2.bf16.msra.mxu0 %v1718_v32  ;;  %1036 = vmatprep.mubr.bf16.mxu1 %v1809_v2  ;;  %v282_v32 = vlaneseq }
  0x3a   : > { %785 = vmatprep.subr.bf16.mxu0 %v1719_v33 }
  0x3d   : > { %786 = vmatpush2.bf16.msra.mxu0 %v1721_v34 }
  0x3e   : > { %787 = vmatprep.subr.bf16.mxu0 %v1722_v35  ;;  %v283_v35 = vshrl.u32 %v282_v32, 7 }
  0x40   : > { %1595 = vmatmul.mubr.msk.bf16.gmra.mxu1 %vm712_vm0, %v1757_v45  ;;  %v288_v41 = vsub.s32 1, %v283_v35 }
  0x41   : > { %788 = vmatpush2.bf16.msra.mxu0 %v1726_v37  ;;  %1046 = vmatprep.mubr.bf16.mxu1 %v1809_v2 }
  0x42   : > { %789 = vmatprep.subr.bf16.mxu0 %v1728_v38  ;;  %v284_v38 = vsub.s32 0, %v283_v35 }
  0x45   : > { %790 = vmatpush2.bf16.msra.mxu0 %v1732_v39 }
  0x46   : > { %791 = vmatprep.subr.bf16.mxu0 %v1734_v40  ;;  %v280_v40 = vld [vmem:[%s2357_s2] sm:$0x3] }
  0x47   : > { %v2063_v45 = vrot.slane %v280_v40, %v288_v41 }
  0x48   : > { %1596 = vmatmul.mubr.msk.bf16.gmra.mxu1 %vm712_vm0, %v1761_v48 }
  0x49   : > { %792 = vmatpush2.bf16.msra.mxu0 %v1737_v42  ;;  %1056 = vmatprep.mubr.bf16.mxu1 %v1809_v2 }
  0x4c   : > { %794 = vmatmul.mubr.bf16.vlgmr.msra.gmra.mxu0 %v1738_v43  ;;  %v2059_v43 = vrot.slane %v280_v40, %v284_v38 }
  0x4d   : > { %803 = vmatprep.mubr.bf16.mxu0 %v1742_v44 }
  0x50   : > { %1597 = vmatmul.mubr.msk.bf16.gmra.mxu1 %vm712_vm0, %v1765_v51 }
  0x51   : > { %1066 = vmatprep.mubr.bf16.mxu1 %v1809_v2 }
  0x54   : > { %804 = vmatmul.mubr.bf16.gmra.mxu0 %v1744_v46 }
  0x55   : > { %813 = vmatprep.mubr.bf16.mxu0 %v1746_v47 }
  0x58   : > { %1598 = vmatmul.mubr.msk.bf16.gmra.mxu1 %vm712_vm0, %v1769_v54 }
  0x59   : > { %1076 = vmatprep.mubr.bf16.mxu1 %v1809_v2 }
  0x5c   : > { %814 = vmatmul.mubr.bf16.gmra.mxu0 %v1748_v49 }
  0x5d   : > { %823 = vmatprep.mubr.bf16.mxu0 %v1750_v50 }
  0x60   : > { %1599 = vmatmul.mubr.msk.bf16.gmra.mxu1 %vm712_vm0, %v1773_v57 }
  0x61   : > { %1086 = vmatprep.mubr.bf16.mxu1 %v1809_v2 }
  0x64   : > { %824 = vmatmul.mubr.bf16.gmra.mxu0 %v1752_v52 }
  0x65   : > { %833 = vmatprep.mubr.bf16.mxu0 %v1754_v53 }
  0x68   : > { %1600 = vmatmul.mubr.msk.bf16.gmra.mxu1 %vm712_vm0, %v1777_v60 }
  0x69   : > { %1096 = vmatprep.mubr.bf16.mxu1 %v1809_v2 }
  0x6c   : > { %834 = vmatmul.mubr.bf16.gmra.mxu0 %v1756_v55 }
  0x6d   : > { %843 = vmatprep.mubr.bf16.mxu0 %v1758_v56 }
  0x70   : > { %1601 = vmatmul.mubr.msk.bf16.gmra.mxu1 %vm712_vm0, %v1781_v63 }
  0x71   : > { %1106 = vmatprep.mubr.bf16.mxu1 %v1809_v2 }
  0x74   : > { %844 = vmatmul.mubr.bf16.gmra.mxu0 %v1760_v58 }
  0x75   : > { %853 = vmatprep.mubr.bf16.mxu0 %v1762_v59 }
  0x78   : > { %1602 = vmatmul.mubr.msk.bf16.gmra.mxu1 %vm712_vm0, %v1785_v3 }
  0x79   : > { %1116 = vmatprep.mubr.bf16.mxu1 %v1809_v2 }
  0x7c   : > { %854 = vmatmul.mubr.bf16.gmra.mxu0 %v1764_v61 }
  0x7d   : > { %863 = vmatprep.mubr.bf16.mxu0 %v1766_v62 }
  0x80   : > { %1603 = vmatmul.mubr.msk.bf16.gmra.mxu1 %vm712_vm0, %v1789_v6 }
  0x81   : > { %1126 = vmatprep.mubr.bf16.mxu1 %v1809_v2 }
  0x84   : > { %864 = vmatmul.mubr.bf16.gmra.mxu0 %v1768_v0 }
  0x85   : > { %873 = vmatprep.mubr.bf16.mxu0 %v1770_v1 }
  0x88   : > { %1604 = vmatmul.mubr.msk.bf16.gmra.mxu1 %vm712_vm0, %v1793_v9 }
  0x89   : > { %1136 = vmatprep.mubr.bf16.mxu1 %v1809_v2  ;;  %v1796_v2 = vld [vmem:[%s1896_s27 + $0x150] ss:$12 sps:$4 sm:$0xff]  }
  0x8c   : > { %874 = vmatmul.mubr.bf16.gmra.mxu0 %v1772_v4 }
  0x8d   : > { %883 = vmatprep.mubr.bf16.mxu0 %v1774_v5 }
  0x90   : > { %1605 = vmatmul.mubr.msk.bf16.gmra.mxu1 %vm712_vm0, %v1797_v12 }
  0x94   : > { %884 = vmatmul.mubr.bf16.gmra.mxu0 %v1776_v7 }
  0x95   : > { %893 = vmatprep.mubr.bf16.mxu0 %v1778_v8 }
  0x9c   : > { %894 = vmatmul.mubr.bf16.gmra.mxu0 %v1780_v10 }
  0x9d   : > { %903 = vmatprep.mubr.bf16.mxu0 %v1782_v11 }
  0xa4   : > { %904 = vmatmul.mubr.bf16.gmra.mxu0 %v1784_v13 }
  0xa5   : > { %913 = vmatprep.mubr.bf16.mxu0 %v1786_v14 }
  0xac   : > { %914 = vmatmul.mubr.bf16.gmra.mxu0 %v1788_v15 }
  0xad   : > { %923 = vmatprep.mubr.bf16.mxu0 %v1790_v16 }
  0xb4   : > { %924 = vmatmul.mubr.bf16.gmra.mxu0 %v1792_v17 }
  0xb5   : > { %933 = vmatprep.mubr.bf16.mxu0 %v1794_v18 }
  0xbc   : > { %934 = vmatmul.mubr.bf16.gmra.mxu0 %v1796_v2 }
  0xbd   : > { %943 = vmatprep.mubr.bf16.mxu0 %v1798_v19 }
  0xc4   : > { %944 = vmatmul.mubr.bf16.gmra.mxu0 %v1800_v20 }
  0xd8   : > { %v988_v21 = vpop.f32.mrf.mxu1 }
  0xda   : > { %v990_v22 = vpop.f32.mrf.mxu1 }
  0xdc   : > { %v992_v23 = vpop.f32.mrf.mxu1 }
  0xde   : > { %v994_v24 = vpop.f32.mrf.mxu1 }
  0xe0   : > { %v998_v25 = vpop.f32.mrf.mxu1 }
  0xe2   : > { %v1000_v26 = vpop.f32.mrf.mxu1 }
  0xe4   : > { %v2034_v27 = vpop.f32.mrf.mxu1 }
  0xe6   : > { %v2036_v28 = vpop.f32.mrf.mxu1 }
  0xe8   : > { %v2038_v29 = vpop.f32.mrf.mxu1 }
  0xea   : > { %v2040_v30 = vpop.f32.mrf.mxu1 }
  0xec   : > { %v2042_v31 = vpop.f32.mrf.mxu1 }
  0xee   : > { %v2044_v33 = vpop.f32.mrf.mxu1 }
  0xf0   : > { %v2046_v34 = vpop.f32.mrf.mxu1 }
  0xf2   : > { %v2048_v36 = vpop.f32.mrf.mxu1 }
  0xf4   : > { %v2050_v37 = vpop.f32.mrf.mxu1 }
  0xf6   : > { %v2052_v39 = vpop.f32.mrf.mxu1 }
  0xf8   : > { %v2057_v42 = vpop.f32.mrf.mxu1 }
  0xfa   : > { %v2061_v44 = vpop.f32.mrf.mxu1 }
  0xfc   : > { %v2065_v46 = vpop.f32.mrf.mxu1 }
  0xfe   : > { %v2068_v49 = vpop.f32.mrf.mxu1 }
 0x100   : > { %v2071_v53 = vpop.f32.mrf.mxu1 }
 0x102   : > { %v2075_v57 = vpop.f32.mrf.mxu1 }
 0x104   : > { %v2078_v63 = vpop.f32.mrf.mxu1 }
 0x106   : > { %v2090_v6 = vpop.f32.mrf.mxu1 }
 0x108   : > { %v2096_v12 = vpop.f32.mrf.mxu1 }
 0x10a   : > { %v2099_v17 = vpop.f32.mrf.mxu1 }
 0x10c   : > { %v795_v47 = vpop.f32.mrf.mxu0 }
 0x10d   : > { %v796_v48 = vadd.f32 %v795_v47, %v2059_v43 }
 0x10e   : > { %v797_v50 = vpop.f32.mrf.mxu0 }
 0x10f   : > { %v989_v51 = vadd.f32 %v988_v21, %v796_v48  ;;  %v798_v52 = vadd.f32 %v797_v50, %v2063_v45 }
 0x110   : > { %v799_v54 = vpop.f32.mrf.mxu0 }
 0x111   : > { %v991_v55 = vadd.f32 %v990_v22, %v798_v52  ;;  %v800_v56 = vadd.f32 %v799_v54, %v2059_v43  ;;  %v1147_v59 = vmax.f32 %v989_v51, 0.0  ;;  %v2106_v22 = vpop.f32.mrf.mxu1 }
 0x112   : > { %v801_v58 = vpop.f32.mrf.mxu0 }
 0x113   : > { %v1148_v60 = vmax.f32 %v991_v55, 0.0  ;;  %v993_v61 = vadd.f32 %v992_v23, %v800_v56  ;;  %v802_v62 = vadd.f32 %v801_v58, %v2063_v45  ;;  %v2110_v32 = vpop.f32.mrf.mxu1 }
 0x114   : > { %v805_v1 = vpop.f32.mrf.mxu0 }
 0x115   : > { %v1641_v3 = vpack.c.bf16 %v1148_v60, %v1147_v59  ;;  %v995_v4 = vadd.f32 %v994_v24, %v802_v62  ;;  %v806_v5 = vadd.f32 %v805_v1, %v2059_v43  ;;  %v1149_v8 = vmax.f32 %v993_v61, 0.0  ;;  %v2117_v47 = vpop.f32.mrf.mxu1 }
 0x116   : > { %v807_v7 = vpop.f32.mrf.mxu0 }
 0x117   : > { %1406 = vst.msk [vmem:[%s2083_s20] sm:$0xff] %vm2085_vm3, %v1641_v3  ;;  %v1150_v9 = vmax.f32 %v995_v4, 0.0  ;;  %v999_v10 = vadd.f32 %v998_v25, %v806_v5  ;;  %v808_v11 = vadd.f32 %v807_v7, %v2063_v45  ;;  %v2121_v52 = vpop.f32.mrf.mxu1 }
 0x118   : > { %v809_v13 = vpop.f32.mrf.mxu0 }
 0x119   : > { %v1642_v14 = vpack.c.bf16 %v1150_v9, %v1149_v8  ;;  %v1001_v15 = vadd.f32 %v1000_v26, %v808_v11  ;;  %v810_v16 = vadd.f32 %v809_v13, %v2059_v43  ;;  %v1151_v2 = vmax.f32 %v999_v10, 0.0  ;;  %v2128_v59 = vpop.f32.mrf.mxu1 }
 0x11a   : > { %v811_v18 = vpop.f32.mrf.mxu0 }
 0x11b   : > { %1407 = vst.msk [vmem:[%s2083_s20 + $0x8] sm:$0xff] %vm2085_vm3, %v1642_v14  ;;  %v1152_v19 = vmax.f32 %v1001_v15, 0.0  ;;  %v1003_v20 = vadd.f32 %v2034_v27, %v810_v16  ;;  %v812_v21 = vadd.f32 %v811_v18, %v2063_v45  ;;  %v2132_v1 = vpop.f32.mrf.mxu1 }
 0x11c   : > { %v815_v23 = vpop.f32.mrf.mxu0 }
 0x11d   : > { %v1643_v24 = vpack.c.bf16 %v1152_v19, %v1151_v2  ;;  %v1005_v25 = vadd.f32 %v2036_v28, %v812_v21  ;;  %v816_v26 = vadd.f32 %v815_v23, %v2059_v43  ;;  %v1153_v38 = vmax.f32 %v1003_v20, 0.0  ;;  %v2139_v8 = vpop.f32.mrf.mxu1 }
 0x11e   : > { %v817_v35 = vpop.f32.mrf.mxu0 }
 0x11f   : > { %1408 = vst.msk [vmem:[%s2083_s20 + $0x10] sm:$0xff] %vm2085_vm3, %v1643_v24  ;;  %v1154_v40 = vmax.f32 %v1005_v25, 0.0  ;;  %v1009_v27 = vadd.f32 %v2038_v29, %v816_v26  ;;  %v818_v41 = vadd.f32 %v817_v35, %v2063_v45  ;;  %v2143_v13 = vpop.f32.mrf.mxu1 }
 0x120   : > { %v819_v48 = vpop.f32.mrf.mxu0 }
 0x121   : > { %v1644_v50 = vpack.c.bf16 %v1154_v40, %v1153_v38  ;;  %v1011_v28 = vadd.f32 %v2040_v30, %v818_v41  ;;  %v820_v51 = vadd.f32 %v819_v48, %v2059_v43  ;;  %v1155_v55 = vmax.f32 %v1009_v27, 0.0  ;;  %v2150_v2 = vpop.f32.mrf.mxu1 }
 0x122   : > { %v821_v54 = vpop.f32.mrf.mxu0 }
 0x123   : > { %1409 = vst.msk [vmem:[%s2083_s20 + $0x18] sm:$0xff] %vm2085_vm3, %v1644_v50  ;;  %v1156_v56 = vmax.f32 %v1011_v28, 0.0  ;;  %v1013_v29 = vadd.f32 %v2042_v31, %v820_v51  ;;  %v822_v58 = vadd.f32 %v821_v54, %v2063_v45  ;;  %v2154_v23 = vpop.f32.mrf.mxu1 }
 0x124   : > { %v825_v60 = vpop.f32.mrf.mxu0 }
 0x125   : > { %v1645_v61 = vpack.c.bf16 %v1156_v56, %v1155_v55  ;;  %v1015_v30 = vadd.f32 %v2044_v33, %v822_v58  ;;  %v826_v62 = vadd.f32 %v825_v60, %v2059_v43  ;;  %v1157_v4 = vmax.f32 %v1013_v29, 0.0  ;;  %v2161_v38 = vpop.f32.mrf.mxu1 }
 0x126   : > { %v827_v3 = vpop.f32.mrf.mxu0 }
 0x127   : > { %1410 = vst.msk [vmem:[%s2083_s20 + $0x20] sm:$0xff] %vm2085_vm3, %v1645_v61  ;;  %v1158_v5 = vmax.f32 %v1015_v30, 0.0  ;;  %v1019_v31 = vadd.f32 %v2046_v34, %v826_v62  ;;  %v828_v7 = vadd.f32 %v827_v3, %v2063_v45  ;;  %v2165_v48 = vpop.f32.mrf.mxu1 }
 0x128   : > { %v829_v9 = vpop.f32.mrf.mxu0 }
 0x129   : > { %v1646_v10 = vpack.c.bf16 %v1158_v5, %v1157_v4  ;;  %v1021_v33 = vadd.f32 %v2048_v36, %v828_v7  ;;  %v830_v11 = vadd.f32 %v829_v9, %v2059_v43  ;;  %v1159_v15 = vmax.f32 %v1019_v31, 0.0  ;;  %v2172_v55 = vpop.f32.mrf.mxu1 }
 0x12a   : > { %v831_v14 = vpop.f32.mrf.mxu0 }
 0x12b   : > { %1411 = vst.msk [vmem:[%s2083_s20 + $0x28] sm:$0xff] %vm2085_vm3, %v1646_v10  ;;  %v1160_v16 = vmax.f32 %v1021_v33, 0.0  ;;  %v1023_v34 = vadd.f32 %v2050_v37, %v830_v11  ;;  %v832_v18 = vadd.f32 %v831_v14, %v2063_v45  ;;  %v2176_v60 = vpop.f32.mrf.mxu1 }
 0x12c   : > { %v835_v19 = vpop.f32.mrf.mxu0 }
 0x12d   : > { %v1647_v20 = vpack.c.bf16 %v1160_v16, %v1159_v15  ;;  %v1025_v36 = vadd.f32 %v2052_v39, %v832_v18  ;;  %v836_v21 = vadd.f32 %v835_v19, %v2059_v43  ;;  %v1161_v25 = vmax.f32 %v1023_v34, 0.0  ;;  %v2183_v4 = vpop.f32.mrf.mxu1 }
 0x12e   : > { %v837_v24 = vpop.f32.mrf.mxu0 }
 0x12f   : > { %1412 = vst.msk [vmem:[%s2083_s20 + $0x30] sm:$0xff] %vm2085_vm3, %v1647_v20  ;;  %v1162_v26 = vmax.f32 %v1025_v36, 0.0  ;;  %v1029_v37 = vadd.f32 %v2057_v42, %v836_v21  ;;  %v838_v35 = vadd.f32 %v837_v24, %v2063_v45  ;;  %v2187_v9 = vpop.f32.mrf.mxu1 }
 0x130   : > { %v839_v40 = vpop.f32.mrf.mxu0 }
 0x131   : > { %v1648_v27 = vpack.c.bf16 %v1162_v26, %v1161_v25  ;;  %v1031_v39 = vadd.f32 %v2061_v44, %v838_v35  ;;  %v840_v41 = vadd.f32 %v839_v40, %v2059_v43  ;;  %v1163_v28 = vmax.f32 %v1029_v37, 0.0  ;;  %v2194_v15 = vpop.f32.mrf.mxu1 }
 0x132   : > { %v841_v50 = vpop.f32.mrf.mxu0 }
 0x133   : > { %1413 = vst.msk [vmem:[%s2083_s20 + $0x38] sm:$0xff] %vm2085_vm3, %v1648_v27  ;;  %v1164_v51 = vmax.f32 %v1031_v39, 0.0  ;;  %v1033_v42 = vadd.f32 %v2065_v46, %v840_v41  ;;  %v842_v54 = vadd.f32 %v841_v50, %v2063_v45  ;;  %v2198_v19 = vpop.f32.mrf.mxu1 }
 0x134   : > { %v845_v56 = vpop.f32.mrf.mxu0 }
 0x135   : > { %v1649_v29 = vpack.c.bf16 %v1164_v51, %v1163_v28  ;;  %v1035_v44 = vadd.f32 %v2068_v49, %v842_v54  ;;  %v846_v58 = vadd.f32 %v845_v56, %v2059_v43  ;;  %v1165_v30 = vmax.f32 %v1033_v42, 0.0  ;;  %v2205_v26 = vpop.f32.mrf.mxu1 }
 0x136   : > { %v847_v61 = vpop.f32.mrf.mxu0 }
 0x137   : > { %1414 = vst.msk [vmem:[%s2083_s20 + $0x40] sm:$0xff] %vm2085_vm3, %v1649_v29  ;;  %v1166_v62 = vmax.f32 %v1035_v44, 0.0  ;;  %v1039_v46 = vadd.f32 %v2071_v53, %v846_v58  ;;  %v848_v3 = vadd.f32 %v847_v61, %v2063_v45  ;;  %v2214_v28 = vpop.f32.mrf.mxu1 }
 0x138   : > { %v849_v5 = vpop.f32.mrf.mxu0 }
 0x139   : > { %v1650_v31 = vpack.c.bf16 %v1166_v62, %v1165_v30  ;;  %v1041_v49 = vadd.f32 %v2075_v57, %v848_v3  ;;  %v850_v7 = vadd.f32 %v849_v5, %v2059_v43  ;;  %v1167_v33 = vmax.f32 %v1039_v46, 0.0  ;;  %v2223_v61 = vpop.f32.mrf.mxu1 }
 0x13a   : > { %v851_v10 = vpop.f32.mrf.mxu0 }
 0x13b   : > { %1415 = vst.msk [vmem:[%s2083_s20 + $0x48] sm:$0xff] %vm2085_vm3, %v1650_v31  ;;  %v1168_v11 = vmax.f32 %v1041_v49, 0.0  ;;  %v1043_v53 = vadd.f32 %v2078_v63, %v850_v7  ;;  %v852_v14 = vadd.f32 %v851_v10, %v2063_v45  ;;  %v2232_v7 = vpop.f32.mrf.mxu1 }
 0x13c   : > { %v855_v16 = vpop.f32.mrf.mxu0 }
 0x13d   : > { %v1651_v34 = vpack.c.bf16 %v1168_v11, %v1167_v33  ;;  %v1045_v57 = vadd.f32 %v2090_v6, %v852_v14  ;;  %v856_v18 = vadd.f32 %v855_v16, %v2059_v43  ;;  %v1169_v36 = vmax.f32 %v1043_v53, 0.0 }
 0x13e   : > { %v857_v20 = vpop.f32.mrf.mxu0 }
 0x13f   : > { %1416 = vst.msk [vmem:[%s2083_s20 + $0x50] sm:$0xff] %vm2085_vm3, %v1651_v34  ;;  %v1170_v21 = vmax.f32 %v1045_v57, 0.0  ;;  %v1049_v63 = vadd.f32 %v2096_v12, %v856_v18  ;;  %v858_v24 = vadd.f32 %v857_v20, %v2063_v45  ;;  %v2241_v57 = vpop.f32.mrf.mxu1 }
 0x140   : > { %v859_v25 = vpop.f32.mrf.mxu0 }
 0x141   : > { %v1652_v37 = vpack.c.bf16 %v1170_v21, %v1169_v36  ;;  %v1051_v6 = vadd.f32 %v2099_v17, %v858_v24  ;;  %v860_v35 = vadd.f32 %v859_v25, %v2059_v43  ;;  %v1171_v27 = vmax.f32 %v1049_v63, 0.0 }
 0x142   : > { %v861_v40 = vpop.f32.mrf.mxu0 }
 0x143   : > { %1417 = vst.msk [vmem:[%s2083_s20 + $0x58] sm:$0xff] %vm2085_vm3, %v1652_v37  ;;  %v1172_v39 = vmax.f32 %v1051_v6, 0.0  ;;  %v1053_v41 = vadd.f32 %v2106_v22, %v860_v35  ;;  %v862_v12 = vadd.f32 %v861_v40, %v2063_v45  ;;  %v2250_v37 = vpop.f32.mrf.mxu1 }
 0x144   : > { %v865_v50 = vpop.f32.mrf.mxu0 }
 0x145   : > { %v1653_v51 = vpack.c.bf16 %v1172_v39, %v1171_v27  ;;  %v1055_v42 = vadd.f32 %v2110_v32, %v862_v12  ;;  %v866_v17 = vadd.f32 %v865_v50, %v2059_v43  ;;  %v1173_v56 = vmax.f32 %v1053_v41, 0.0  ;;  %v2259_v50 = vpop.f32.mrf.mxu1 }
 0x146   : > { %v867_v54 = vpop.f32.mrf.mxu0 }
 0x147   : > { %1418 = vst.msk [vmem:[%s2083_s20 + $0x60] sm:$0xff] %vm2085_vm3, %v1653_v51  ;;  %v1174_v29 = vmax.f32 %v1055_v42, 0.0  ;;  %v1059_v44 = vadd.f32 %v2117_v47, %v866_v17  ;;  %v868_v22 = vadd.f32 %v867_v54, %v2063_v45 }
 0x148   : > { %v869_v58 = vpop.f32.mrf.mxu0 }
 0x149   : > { %v1654_v30 = vpack.c.bf16 %v1174_v29, %v1173_v56  ;;  %v1061_v62 = vadd.f32 %v2121_v52, %v868_v22  ;;  %v870_v32 = vadd.f32 %v869_v58, %v2059_v43  ;;  %v1175_v3 = vmax.f32 %v1059_v44, 0.0  ;;  %v2268_v22 = vpop.f32.mrf.mxu1 }
 0x14a   : > { %v871_v46 = vpop.f32.mrf.mxu0 }
 0x14b   : > { %1419 = vst.msk [vmem:[%s2083_s20 + $0x68] sm:$0xff] %vm2085_vm3, %v1654_v30  ;;  %v1176_v5 = vmax.f32 %v1061_v62, 0.0  ;;  %v1063_v31 = vadd.f32 %v2128_v59, %v870_v32  ;;  %v872_v47 = vadd.f32 %v871_v46, %v2063_v45 }
 0x14c   : > { %v875_v49 = vpop.f32.mrf.mxu0 }
 0x14d   : > { %v1655_v10 = vpack.c.bf16 %v1176_v5, %v1175_v3  ;;  %v1065_v33 = vadd.f32 %v2132_v1, %v872_v47  ;;  %v876_v52 = vadd.f32 %v875_v49, %v2059_v43  ;;  %v1177_v53 = vmax.f32 %v1063_v31, 0.0  ;;  %v2277_v31 = vpop.f32.mrf.mxu1 }
 0x14e   : > { %v877_v11 = vpop.f32.mrf.mxu0 }
 0x14f   : > { %1420 = vst.msk [vmem:[%s2083_s20 + $0x70] sm:$0xff] %vm2085_vm3, %v1655_v10  ;;  %v1178_v14 = vmax.f32 %v1065_v33, 0.0  ;;  %v1069_v16 = vadd.f32 %v2139_v8, %v876_v52  ;;  %v878_v59 = vadd.f32 %v877_v11, %v2063_v45 }
 0x150   : > { %v879_v34 = vpop.f32.mrf.mxu0 }
 0x151   : > { %v1656_v18 = vpack.c.bf16 %v1178_v14, %v1177_v53  ;;  %v1071_v20 = vadd.f32 %v2143_v13, %v878_v59  ;;  %v880_v1 = vadd.f32 %v879_v34, %v2059_v43  ;;  %v1179_v21 = vmax.f32 %v1069_v16, 0.0  ;;  %v1120_v14 = vpop.f32.mrf.mxu1 }
 0x152   : > { %v881_v36 = vpop.f32.mrf.mxu0 }
 0x153   : > { %1421 = vst.msk [vmem:[%s2083_s20 + $0x78] sm:$0xff] %vm2085_vm3, %v1656_v18  ;;  %v1180_v63 = vmax.f32 %v1071_v20, 0.0  ;;  %v1073_v24 = vadd.f32 %v2150_v2, %v880_v1  ;;  %v882_v8 = vadd.f32 %v881_v36, %v2063_v45 }
 0x154   : > { %v885_v25 = vpop.f32.mrf.mxu0 }
 0x155   : > { %v1657_v6 = vpack.c.bf16 %v1180_v63, %v1179_v21  ;;  %v1075_v35 = vadd.f32 %v2154_v23, %v882_v8  ;;  %v886_v13 = vadd.f32 %v885_v25, %v2059_v43  ;;  %v1181_v27 = vmax.f32 %v1073_v24, 0.0  ;;  %v1122_v21 = vpop.f32.mrf.mxu1 }
 0x156   : > { %v887_v40 = vpop.f32.mrf.mxu0 }
 0x157   : > { %1422 = vst.msk [vmem:[%s2083_s20 + $0x80] sm:$0xff] %vm2085_vm3, %v1657_v6  ;;  %v1182_v39 = vmax.f32 %v1075_v35, 0.0  ;;  %v1079_v41 = vadd.f32 %v2161_v38, %v886_v13  ;;  %v888_v2 = vadd.f32 %v887_v40, %v2063_v45  ;;  %v1124_v40 = vpop.f32.mrf.mxu1 }
 0x158   : > { %v889_v12 = vpop.f32.mrf.mxu0 }
 0x159   : > { %v1658_v51 = vpack.c.bf16 %v1182_v39, %v1181_v27  ;;  %v1081_v42 = vadd.f32 %v2165_v48, %v888_v2  ;;  %v890_v23 = vadd.f32 %v889_v12, %v2059_v43  ;;  %v1183_v54 = vmax.f32 %v1079_v41, 0.0 }
 0x15a   : > { %v891_v17 = vpop.f32.mrf.mxu0 }
 0x15b   : > { %1423 = vst.msk [vmem:[%s2083_s20 + $0x88] sm:$0xff] %vm2085_vm3, %v1658_v51  ;;  %v1184_v56 = vmax.f32 %v1081_v42, 0.0  ;;  %v1083_v29 = vadd.f32 %v2172_v55, %v890_v23  ;;  %v892_v38 = vadd.f32 %v891_v17, %v2063_v45  ;;  %v1128_v23 = vpop.f32.mrf.mxu1 }
 0x15c   : > { %v895_v44 = vpop.f32.mrf.mxu0 }
 0x15d   : > { %v1659_v58 = vpack.c.bf16 %v1184_v56, %v1183_v54  ;;  %v1085_v30 = vadd.f32 %v2176_v60, %v892_v38  ;;  %v896_v48 = vadd.f32 %v895_v44, %v2059_v43  ;;  %v1185_v32 = vmax.f32 %v1083_v29, 0.0 }
 0x15e   : > { %v897_v62 = vpop.f32.mrf.mxu0 }
 0x15f   : > { %1424 = vst.msk [vmem:[%s2083_s20 + $0x90] sm:$0xff] %vm2085_vm3, %v1659_v58  ;;  %v1186_v46 = vmax.f32 %v1085_v30, 0.0  ;;  %v1089_v3 = vadd.f32 %v2183_v4, %v896_v48  ;;  %v898_v55 = vadd.f32 %v897_v62, %v2063_v45  ;;  %v1130_v30 = vpop.f32.mrf.mxu1 }
 0x160   : > { %v899_v5 = vpop.f32.mrf.mxu0 }
 0x161   : > { %v1660_v47 = vpack.c.bf16 %v1186_v46, %v1185_v32  ;;  %v1091_v49 = vadd.f32 %v2187_v9, %v898_v55  ;;  %v900_v60 = vadd.f32 %v899_v5, %v2059_v43  ;;  %v1187_v33 = vmax.f32 %v1089_v3, 0.0 }
 0x162   : > { %v901_v10 = vpop.f32.mrf.mxu0 }
 0x163   : > { %1425 = vst.msk [vmem:[%s2083_s20 + $0x98] sm:$0xff] %vm2085_vm3, %v1660_v47  ;;  %v1188_v52 = vmax.f32 %v1091_v49, 0.0  ;;  %v1093_v11 = vadd.f32 %v2194_v15, %v900_v60  ;;  %v902_v4 = vadd.f32 %v901_v10, %v2063_v45  ;;  %v1132_v47 = vpop.f32.mrf.mxu1 }
 0x164   : > { %v905_v53 = vpop.f32.mrf.mxu0 }
 0x165   : > { %v1661_v16 = vpack.c.bf16 %v1188_v52, %v1187_v33  ;;  %v1095_v59 = vadd.f32 %v2198_v19, %v902_v4  ;;  %v906_v9 = vadd.f32 %v905_v53, %v2059_v43  ;;  %v1189_v18 = vmax.f32 %v1093_v11, 0.0 }
 0x166   : > { %v907_v34 = vpop.f32.mrf.mxu0 }
 0x167   : > { %1426 = vst.msk [vmem:[%s2083_s20 + $0xa0] sm:$0xff] %vm2085_vm3, %v1661_v16  ;;  %v1190_v20 = vmax.f32 %v1095_v59, 0.0  ;;  %v1099_v1 = vadd.f32 %v2205_v26, %v906_v9  ;;  %v908_v15 = vadd.f32 %v907_v34, %v2063_v45 }
 0x168   : > { %v909_v36 = vpop.f32.mrf.mxu0 }
 0x169   : > { %v1662_v63 = vpack.c.bf16 %v1190_v20, %v1189_v18  ;;  %v1101_v24 = vadd.f32 %v2214_v28, %v908_v15  ;;  %v910_v19 = vadd.f32 %v909_v36, %v2059_v43  ;;  %v1191_v25 = vmax.f32 %v1099_v1, 0.0 }
 0x16a   : > { %v911_v8 = vpop.f32.mrf.mxu0 }
 0x16b   : > { %1427 = vst.msk [vmem:[%s2083_s20 + $0xa8] sm:$0xff] %vm2085_vm3, %v1662_v63  ;;  %v1192_v6 = vmax.f32 %v1101_v24, 0.0  ;;  %v1103_v35 = vadd.f32 %v2223_v61, %v910_v19  ;;  %v912_v26 = vadd.f32 %v911_v8, %v2063_v45 }
 0x16c   : > { %v915_v13 = vpop.f32.mrf.mxu0 }
 0x16d   : > { %v1663_v27 = vpack.c.bf16 %v1192_v6, %v1191_v25  ;;  %v1105_v39 = vadd.f32 %v2232_v7, %v912_v26  ;;  %v916_v28 = vadd.f32 %v915_v13, %v2059_v43  ;;  %v1193_v2 = vmax.f32 %v1103_v35, 0.0 }
 0x16e   : > { %v917_v41 = vpop.f32.mrf.mxu0 }
 0x16f   : > { %1428 = vst.msk [vmem:[%s2083_s20 + $0xb0] sm:$0xff] %vm2085_vm3, %v1663_v27  ;;  %v1194_v12 = vmax.f32 %v1105_v39, 0.0  ;;  %v1109_v51 = vadd.f32 %v2241_v57, %v916_v28  ;;  %v918_v61 = vadd.f32 %v917_v41, %v2063_v45 }
 0x170   : > { %v919_v42 = vpop.f32.mrf.mxu0 }
 0x171   : > { %v1664_v17 = vpack.c.bf16 %v1194_v12, %v1193_v2  ;;  %v1111_v54 = vadd.f32 %v2250_v37, %v918_v61  ;;  %v920_v7 = vadd.f32 %v919_v42, %v2059_v43  ;;  %v1195_v29 = vmax.f32 %v1109_v51, 0.0 }
 0x172   : > { %v921_v56 = vpop.f32.mrf.mxu0 }
 0x173   : > { %1429 = vst.msk [vmem:[%s2083_s20 + $0xb8] sm:$0xff] %vm2085_vm3, %v1664_v17  ;;  %v1196_v38 = vmax.f32 %v1111_v54, 0.0  ;;  %v1113_v44 = vadd.f32 %v2259_v50, %v920_v7  ;;  %v922_v57 = vadd.f32 %v921_v56, %v2063_v45 }
 0x174   : > { %v925_v58 = vpop.f32.mrf.mxu0 }
 0x175   : > { %v1665_v48 = vpack.c.bf16 %v1196_v38, %v1195_v29  ;;  %v1115_v62 = vadd.f32 %v2268_v22, %v922_v57  ;;  %v926_v37 = vadd.f32 %v925_v58, %v2059_v43  ;;  %v1197_v46 = vmax.f32 %v1113_v44, 0.0 }
 0x176   : > { %v927_v32 = vpop.f32.mrf.mxu0 }
 0x177   : > { %1430 = vst.msk [vmem:[%s2083_s20 + $0xc0] sm:$0xff] %vm2085_vm3, %v1665_v48  ;;  %v1198_v3 = vmax.f32 %v1115_v62, 0.0  ;;  %v1119_v55 = vadd.f32 %v2277_v31, %v926_v37  ;;  %v928_v50 = vadd.f32 %v927_v32, %v2063_v45  ;;  %v1134_v31 = vpop.f32.mrf.mxu1 }
 0x178   : > { %v929_v5 = vpop.f32.mrf.mxu0 }
 0x179   : > { %v1666_v49 = vpack.c.bf16 %v1198_v3, %v1197_v46  ;;  %v1121_v60 = vadd.f32 %v1120_v14, %v928_v50  ;;  %v930_v10 = vadd.f32 %v929_v5, %v2059_v43  ;;  %v1199_v33 = vmax.f32 %v1119_v55, 0.0  ;;  %v1138_v36 = vpop.f32.mrf.mxu1 }
 0x17a   : > { %v931_v22 = vpop.f32.mrf.mxu0 }
 0x17b   : > { %1431 = vst.msk [vmem:[%s2083_s20 + $0xc8] sm:$0xff] %vm2085_vm3, %v1666_v49  ;;  %v1200_v52 = vmax.f32 %v1121_v60, 0.0  ;;  %v1123_v11 = vadd.f32 %v1122_v21, %v930_v10  ;;  %v932_v4 = vadd.f32 %v931_v22, %v2063_v45  ;;  %v1140_v26 = vpop.f32.mrf.mxu1 }
 0x17c   : > { %v935_v53 = vpop.f32.mrf.mxu0 }
 0x17d   : > { %v1667_v16 = vpack.c.bf16 %v1200_v52, %v1199_v33  ;;  %v1125_v59 = vadd.f32 %v1124_v40, %v932_v4  ;;  %v936_v9 = vadd.f32 %v935_v53, %v2059_v43  ;;  %v1201_v14 = vmax.f32 %v1123_v11, 0.0  ;;  %v1142_v61 = vpop.f32.mrf.mxu1 }
 0x17e   : > { %v937_v34 = vpop.f32.mrf.mxu0 }
 0x17f   : > { %1432 = vst.msk [vmem:[%s2083_s20 + $0xd0] sm:$0xff] %vm2085_vm3, %v1667_v16  ;;  %v1202_v18 = vmax.f32 %v1125_v59, 0.0  ;;  %v1129_v20 = vadd.f32 %v1128_v23, %v936_v9  ;;  %v938_v1 = vadd.f32 %v937_v34, %v2063_v45  ;;  %v1144_v57 = vpop.f32.mrf.mxu1 }
 0x180   : > { %v939_v15 = vpop.f32.mrf.mxu0 }
 0x181   : > { %v1668_v21 = vpack.c.bf16 %v1202_v18, %v1201_v14  ;;  %v1131_v63 = vadd.f32 %v1130_v30, %v938_v1  ;;  %v940_v24 = vadd.f32 %v939_v15, %v2059_v43  ;;  %v1203_v8 = vmax.f32 %v1129_v20, 0.0 }
 0x182   : > { %v941_v19 = vpop.f32.mrf.mxu0 }
 0x183   : > { %1433 = vst.msk [vmem:[%s2083_s20 + $0xd8] sm:$0xff] %vm2085_vm3, %v1668_v21  ;;  %v1204_v25 = vmax.f32 %v1131_v63, 0.0  ;;  %v1133_v6 = vadd.f32 %v1132_v47, %v940_v24  ;;  %v942_v35 = vadd.f32 %v941_v19, %v2063_v45 }
 0x184   : > { %v945_v13 = vpop.f32.mrf.mxu0 }
 0x185   : > { %v1669_v40 = vpack.c.bf16 %v1204_v25, %v1203_v8  ;;  %v1135_v27 = vadd.f32 %v1134_v31, %v942_v35  ;;  %v946_v39 = vadd.f32 %v945_v13, %v2059_v43  ;;  %v1205_v41 = vmax.f32 %v1133_v6, 0.0 }
 0x186   : > { %v947_v28 = vpop.f32.mrf.mxu0 }
 0x187   : > { %1434 = vst.msk [vmem:[%s2083_s20 + $0xe0] sm:$0xff] %vm2085_vm3, %v1669_v40  ;;  %v1206_v2 = vmax.f32 %v1135_v27, 0.0  ;;  %v1139_v12 = vadd.f32 %v1138_v36, %v946_v39  ;;  %v948_v51 = vadd.f32 %v947_v28, %v2063_v45 }
 0x188   : > { %v949_v42 = vpop.f32.mrf.mxu0 }
 0x189   : > { %v1670_v23 = vpack.c.bf16 %v1206_v2, %v1205_v41  ;;  %v1141_v17 = vadd.f32 %v1140_v26, %v948_v51  ;;  %v950_v54 = vadd.f32 %v949_v42, %v2059_v43  ;;  %v1207_v56 = vmax.f32 %v1139_v12, 0.0 }
 0x18a   : > { %v951_v7 = vpop.f32.mrf.mxu0 }
 0x18b   : > { %1435 = vst.msk [vmem:[%s2083_s20 + $0xe8] sm:$0xff] %vm2085_vm3, %v1670_v23  ;;  %v1208_v29 = vmax.f32 %v1141_v17, 0.0  ;;  %v1143_v38 = vadd.f32 %v1142_v61, %v950_v54  ;;  %v952_v44 = vadd.f32 %v951_v7, %v2063_v45 }
 0x18d   : > { %v1671_v58 = vpack.c.bf16 %v1208_v29, %v1207_v56  ;;  %v1145_v30 = vadd.f32 %v1144_v57, %v952_v44  ;;  %v1209_v48 = vmax.f32 %v1143_v38, 0.0 }
 0x18f   : > { %1436 = vst.msk [vmem:[%s2083_s20 + $0xf0] sm:$0xff] %vm2085_vm3, %v1671_v58  ;;  %v1210_v62 = vmax.f32 %v1145_v30, 0.0 }
 0x191   : > { %v1672_v37 = vpack.c.bf16 %v1210_v62, %v1209_v48 }
 0x193   : > { %1437 = vst.msk [vmem:[%s2083_s20 + $0xf8] sm:$0xff] %vm2085_vm3, %v1672_v37 }
 0x194 PF: > { %s13_s12 = sadd.s32 1, %s1807_s12  }
 0x195   : > { %p10_p4 = scmp.ge.s32.totalorder %s13_s12, 4  }
 0x197   :  { %12 = sbr.rel (!%p10_p4) target bundleno = 1 (0x1), region = 62 }

// kernel: net_forward.33
= control target key start
LH: loop header
LB: loop body
LE: loop exit
PB: predicated region body
PF: predicated region fallthrough
CT: control target
= control target key end

     0   :  { %s2633_s12 = smov 0   ;;  %s3350_s0 = inlined_call_operand.vmem [shape: bf16[512,576], index: 0, kind: input, shape index: {}]   ;;  %s3351_s1 = inlined_call_operand.vmem [shape: bf16[576,192], index: 1, kind: input, shape index: {}]   ;;  %s3352_s2 = inlined_call_operand.vmem [shape: f32[1,192], index: 2, kind: input, shape index: {}]   ;;  %s3353_s3 = inlined_call_operand.vmem [shape: bf16[512,192], index: 3, kind: output, shape index: {}]  }
   0x1 LB: > { %s2097_s13 = sadd.s32 4294967295, %s2610_s12   ;;  %p2101_p0 = scmp.ge.s32.totalorder %s2610_s12, 1  ;;  %s2610_s12 = sphi %s2633_s12, %s13_s12  }
   0x2   : > { %p139_p1 = scmp.lt.s32.totalorder %s2610_s12, 3 }
   0x4   : > { %p140_p2 = pnand %p2101_p0, %p139_p1 }
   0x6   : > { %143 = sbr.rel (%p140_p2) target bundleno = 468 (0x1d4), region = 32 }
   0xb   : > { %v2384_v0 = vld [vmem:[%s3351_s1 + $0x74] ss:$8 sps:$4 sm:$0xff]   ;;  %v2386_v1 = vld [vmem:[%s3351_s1 + $0x70] ss:$8 sps:$4 sm:$0xff]   ;;  %v2387_v2 = vld [vmem:[%s3351_s1 + $0x64] ss:$8 sps:$4 sm:$0xff]  }
   0xc   : > { %1169 = vmatprep.subr.bf16.mxu0 %v2384_v0  ;;  %2342 = vmatprep.subr.bf16.mxu1 %v2384_v0  ;;  %v2389_v3 = vld [vmem:[%s3351_s1 + $0x60] ss:$8 sps:$4 sm:$0xff]   ;;  %v2390_v4 = vld [vmem:[%s3351_s1 + $0x54] ss:$8 sps:$4 sm:$0xff]   ;;  %s2102_s24 = sshll.u32 %s2097_s13, 5  ;;  %vm1120_vm0 = vcmask 523264  }
   0xd   : > { %1170 = vmatpush1.bf16.msra.mxu0 %v2386_v1  ;;  %2358 = vmatpush1.bf16.msra.mxu1 %v2386_v1  ;;  %v2392_v5 = vld [vmem:[%s3351_s1 + $0x50] ss:$8 sps:$4 sm:$0xff]   ;;  %p166_p3 = scmp.lt.s32.totalorder %s2102_s24, 63  ;;  %v2393_v6 = vld [vmem:[%s3351_s1 + $0x44] ss:$8 sps:$4 sm:$0xff]   ;;  %vm2004_vm1 = vcmask 1043456  }
   0xe   : > { %1171 = vmatprep.subr.bf16.mxu0 %v2387_v2  ;;  %2343 = vmatprep.subr.bf16.mxu1 %v2387_v2  ;;  %v2395_v7 = vld [vmem:[%s3351_s1 + $0x40] ss:$8 sps:$4 sm:$0xff]   ;;  %v2396_v8 = vld [vmem:[%s3351_s1 + $0x34] ss:$8 sps:$4 sm:$0xff]   ;;  %v2398_v9 = vld [vmem:[%s3351_s1 + $0x30] ss:$8 sps:$4 sm:$0xff]  }
   0xf   : > { %s3395_s24 = smov (!%p166_p3, %s2102_s24), 63  ;;  %v2399_v10 = vld [vmem:[%s3351_s1 + $0x24] ss:$8 sps:$4 sm:$0xff]   ;;  %v2401_v11 = vld [vmem:[%s3351_s1 + $0x20] ss:$8 sps:$4 sm:$0xff]   ;;  %vm2005_vm2 = vcmask 523268  }
  0x10   : > { %s2374_s8 = smul.u32 20, %s3395_s24  ;;  %v2402_v12 = vld [vmem:[%s3351_s1 + $0x14] ss:$8 sps:$4 sm:$0xff]   ;;  %v2404_v14 = vld [vmem:[%s3351_s1 + $0x10] ss:$8 sps:$4 sm:$0xff]   ;;  %vm3161_vm3 = vmor %vm2005_vm2, %vm2004_vm1 }
  0x11   : > { %1172 = vmatpush1.bf16.msra.mxu0 %v2389_v3  ;;  %2359 = vmatpush1.bf16.msra.mxu1 %v2389_v3  ;;  %v2405_v16 = vld [vmem:[%s3351_s1 + $0x4] ss:$8 sps:$4 sm:$0xff]   ;;  %v2407_v17 = vld [vmem:[%s3351_s1] ss:$8 sps:$4 sm:$0xff]   ;;  %v2408_v18 = vld [vmem:[%s3351_s1 + $0xf4] ss:$8 sps:$4 sm:$0xff]  }
  0x12   : > { %1173 = vmatprep.subr.bf16.mxu0 %v2390_v4  ;;  %2344 = vmatprep.subr.bf16.mxu1 %v2390_v4  ;;  %s2683_s16 = scalar_lea.vmem %s3350_s0, %s2374_s8  ;;  %v2410_v19 = vld [vmem:[%s3351_s1 + $0xf0] ss:$8 sps:$4 sm:$0xff]   ;;  %v2411_v20 = vld [vmem:[%s3351_s1 + $0xe4] ss:$8 sps:$4 sm:$0xff]   ;;  %v2413_v21 = vld [vmem:[%s3351_s1 + $0xe0] ss:$8 sps:$4 sm:$0xff]  }
  0x13   : > { %v2434_v13 = vld [vmem:[%s2683_s16 + $0x4] ss:$20 sps:$4 sm:$0xff]   ;;  %v2414_v22 = vld [vmem:[%s3351_s1 + $0xd4] ss:$8 sps:$4 sm:$0xff]   ;;  %v2419_v25 = vld [vmem:[%s3351_s1 + $0xc0] ss:$8 sps:$4 sm:$0xff]  }
  0x14   : > { %v2437_v15 = vld [vmem:[%s2683_s16 + $0x144] ss:$20 sps:$4 sm:$0xff]   ;;  %1201 = vmatprep.mubr.bf16.mxu0 %v2434_v13  ;;  %v2420_v26 = vld [vmem:[%s3351_s1 + $0xb4] ss:$8 sps:$4 sm:$0xff]   ;;  %v2425_v29 = vld [vmem:[%s3351_s1 + $0xa0] ss:$8 sps:$4 sm:$0xff]  }
  0x15   : > { %1174 = vmatpush1.bf16.msra.mxu0 %v2392_v5  ;;  %2360 = vmatpush1.bf16.msra.mxu1 %v2392_v5  ;;  %v2416_v23 = vld [vmem:[%s3351_s1 + $0xd0] ss:$8 sps:$4 sm:$0xff]   ;;  %v2417_v24 = vld [vmem:[%s3351_s1 + $0xc4] ss:$8 sps:$4 sm:$0xff]   ;;  %v2426_v30 = vld [vmem:[%s3351_s1 + $0x94] ss:$8 sps:$4 sm:$0xff]  }
  0x16   : > { %1175 = vmatprep.subr.bf16.mxu0 %v2393_v6  ;;  %2345 = vmatprep.subr.bf16.mxu1 %v2393_v6  ;;  %v2422_v27 = vld [vmem:[%s3351_s1 + $0xb0] ss:$8 sps:$4 sm:$0xff]   ;;  %v2423_v28 = vld [vmem:[%s3351_s1 + $0xa4] ss:$8 sps:$4 sm:$0xff]   ;;  %v2431_v33 = vld [vmem:[%s3351_s1 + $0x80] ss:$8 sps:$4 sm:$0xff]  }
  0x17   : > { %1281 = vmatprep.mubr.bf16.mxu1 %v2437_v15  ;;  %v2428_v31 = vld [vmem:[%s3351_s1 + $0x90] ss:$8 sps:$4 sm:$0xff]   ;;  %v2429_v32 = vld [vmem:[%s3351_s1 + $0x84] ss:$8 sps:$4 sm:$0xff]   ;;  %v2440_v34 = vld [vmem:[%s3351_s1 + $0x174] ss:$8 sps:$4 sm:$0xff]  }
  0x18   : > { %v2432_v35 = vld [vmem:[%s2683_s16] ss:$20 sps:$4 sm:$0xff]   ;;  %v2438_v38 = vld [vmem:[%s3351_s1 + $0x170] ss:$8 sps:$4 sm:$0xff]   ;;  %v2446_v40 = vld [vmem:[%s3351_s1 + $0x164] ss:$8 sps:$4 sm:$0xff]  }
  0x19   : > { %1176 = vmatpush1.bf16.msra.mxu0 %v2395_v7  ;;  %2361 = vmatpush1.bf16.msra.mxu1 %v2395_v7  ;;  %v2443_v36 = vld [vmem:[%s3351_s1 + $0x234] ss:$8 sps:$4 sm:$0xff]   ;;  %v2441_v39 = vld [vmem:[%s3351_s1 + $0x230] ss:$8 sps:$4 sm:$0xff]   ;;  %v2447_v41 = vld [vmem:[%s2683_s16 + $0x2c] ss:$20 sps:$4 sm:$0xff]  }
  0x1a   : > { %1177 = vmatprep.subr.bf16.mxu0 %v2396_v8  ;;  %2346 = vmatprep.subr.bf16.mxu1 %v2396_v8  ;;  %v2435_v37 = vld [vmem:[%s2683_s16 + $0x140] ss:$20 sps:$4 sm:$0xff]   ;;  %v2470_v43 = vld [vmem:[%s3351_s1 + $0x224] ss:$8 sps:$4 sm:$0xff]   ;;  %v2451_v48 = vld [vmem:[%s2683_s16 + $0x28] ss:$20 sps:$4 sm:$0xff]  }
  0x1b   : > { %v2449_v42 = vld [vmem:[%s2683_s16 + $0x16c] ss:$20 sps:$4 sm:$0xff]   ;;  %v2455_v45 = vld [vmem:[%s3351_s1 + $0x154] ss:$8 sps:$4 sm:$0xff]   ;;  %v2453_v50 = vld [vmem:[%s3351_s1 + $0x150] ss:$8 sps:$4 sm:$0xff]  }
  0x1c   : > { %v2444_v44 = vld [vmem:[%s3351_s1 + $0x160] ss:$8 sps:$4 sm:$0xff]   ;;  %v2497_v47 = vld [vmem:[%s3351_s1 + $0x214] ss:$8 sps:$4 sm:$0xff]   ;;  %v2458_v52 = vld [vmem:[%s3351_s1 + $0x144] ss:$8 sps:$4 sm:$0xff]  }
  0x1d   : > { %1178 = vmatpush1.bf16.msra.mxu0 %v2398_v9  ;;  %2362 = vmatpush1.bf16.msra.mxu1 %v2398_v9  ;;  %v2468_v46 = vld [vmem:[%s3351_s1 + $0x220] ss:$8 sps:$4 sm:$0xff]   ;;  %v2495_v54 = vld [vmem:[%s3351_s1 + $0x210] ss:$8 sps:$4 sm:$0xff]   ;;  %v2524_v55 = vld [vmem:[%s3351_s1 + $0x204] ss:$8 sps:$4 sm:$0xff]  }
  0x1e   : > { %1179 = vmatprep.subr.bf16.mxu0 %v2399_v10  ;;  %2347 = vmatprep.subr.bf16.mxu1 %v2399_v10  ;;  %v2452_v49 = vld [vmem:[%s2683_s16 + $0x168] ss:$20 sps:$4 sm:$0xff]   ;;  %v2463_v57 = vld [vmem:[%s2683_s16 + $0x50] ss:$20 sps:$4 sm:$0xff]   ;;  %v2478_v2 = vld [vmem:[%s2683_s16 + $0x78] ss:$20 sps:$4 sm:$0xff]  }
  0x1f   : > { %v2459_v51 = vld [vmem:[%s2683_s16 + $0x54] ss:$20 sps:$4 sm:$0xff]   ;;  %v2464_v59 = vld [vmem:[%s2683_s16 + $0x190] ss:$20 sps:$4 sm:$0xff]   ;;  %v2479_v4 = vld [vmem:[%s2683_s16 + $0x1b8] ss:$20 sps:$4 sm:$0xff]  }
  0x20   : > { %v2461_v53 = vld [vmem:[%s2683_s16 + $0x194] ss:$20 sps:$4 sm:$0xff]   ;;  %v2465_v61 = vld [vmem:[%s3351_s1 + $0x130] ss:$8 sps:$4 sm:$0xff]   ;;  %v2473_v62 = vld [vmem:[%s3351_s1 + $0x124] ss:$8 sps:$4 sm:$0xff]  }
  0x21   : > { %1180 = vmatpush1.bf16.msra.mxu0 %v2401_v11  ;;  %2363 = vmatpush1.bf16.msra.mxu1 %v2401_v11  ;;  %v2456_v56 = vld [vmem:[%s3351_s1 + $0x140] ss:$8 sps:$4 sm:$0xff]   ;;  %v2467_v58 = vld [vmem:[%s3351_s1 + $0x134] ss:$8 sps:$4 sm:$0xff]   ;;  %v2480_v5 = vld [vmem:[%s3351_s1 + $0x110] ss:$8 sps:$4 sm:$0xff]  }
  0x22   : > { %1181 = vmatprep.subr.bf16.mxu0 %v2402_v12  ;;  %2348 = vmatprep.subr.bf16.mxu1 %v2402_v12  ;;  %v2522_v60 = vld [vmem:[%s3351_s1 + $0x200] ss:$8 sps:$4 sm:$0xff]   ;;  %v2474_v63 = vld [vmem:[%s2683_s16 + $0x7c] ss:$20 sps:$4 sm:$0xff]   ;;  %v2485_v6 = vld [vmem:[%s3351_s1 + $0x104] ss:$8 sps:$4 sm:$0xff]  }
  0x23   : > { %v2476_v0 = vld [vmem:[%s2683_s16 + $0x1bc] ss:$20 sps:$4 sm:$0xff]   ;;  %v2471_v1 = vld [vmem:[%s3351_s1 + $0x120] ss:$8 sps:$4 sm:$0xff]   ;;  %v2486_v7 = vld [vmem:[%s2683_s16 + $0xa4] ss:$20 sps:$4 sm:$0xff]  }
  0x24   : > { %v2482_v3 = vld [vmem:[%s3351_s1 + $0x114] ss:$8 sps:$4 sm:$0xff]   ;;  %v2488_v8 = vld [vmem:[%s2683_s16 + $0x1e4] ss:$20 sps:$4 sm:$0xff]   ;;  %v2483_v9 = vld [vmem:[%s3351_s1 + $0x100] ss:$8 sps:$4 sm:$0xff]  }
  0x25   : > { %1182 = vmatpush1.bf16.msra.mxu0 %v2404_v14  ;;  %2364 = vmatpush1.bf16.msra.mxu1 %v2404_v14  ;;  %v2490_v10 = vld [vmem:[%s2683_s16 + $0xa0] ss:$20 sps:$4 sm:$0xff]   ;;  %v2492_v13 = vld [vmem:[%s3351_s1 + $0x1f0] ss:$8 sps:$4 sm:$0xff]   ;;  %v2500_v14 = vld [vmem:[%s3351_s1 + $0x1e4] ss:$8 sps:$4 sm:$0xff]  }
  0x26   : > { %1183 = vmatprep.subr.bf16.mxu0 %v2405_v16  ;;  %2349 = vmatprep.subr.bf16.mxu1 %v2405_v16  ;;  %v2494_v11 = vld [vmem:[%s3351_s1 + $0x1f4] ss:$8 sps:$4 sm:$0xff]   ;;  %v2501_v15 = vld [vmem:[%s2683_s16 + $0xcc] ss:$20 sps:$4 sm:$0xff]  }
  0x27   : > { %v2491_v12 = vld [vmem:[%s2683_s16 + $0x1e0] ss:$20 sps:$4 sm:$0xff]  }
  0x28   : > { %v2503_v16 = vld [vmem:[%s2683_s16 + $0x20c] ss:$20 sps:$4 sm:$0xff]  }
  0x29   : > { %1184 = vmatpush1.bf16.msra.mxu0 %v2407_v17  ;;  %2365 = vmatpush1.bf16.msra.mxu1 %v2407_v17  ;;  %v2498_v17 = vld [vmem:[%s3351_s1 + $0x1e0] ss:$8 sps:$4 sm:$0xff]  }
  0x2a   : > { %1185 = vmatprep.subr.bf16.mxu0 %v2408_v18  ;;  %2350 = vmatprep.subr.bf16.mxu1 %v2408_v18  ;;  %v2505_v18 = vld [vmem:[%s2683_s16 + $0xc8] ss:$20 sps:$4 sm:$0xff]  }
  0x2d   : > { %1186 = vmatpush2.bf16.msra.mxu0 %v2410_v19  ;;  %2366 = vmatpush2.bf16.msra.mxu1 %v2410_v19  ;;  %v2506_v19 = vld [vmem:[%s2683_s16 + $0x208] ss:$20 sps:$4 sm:$0xff]  }
  0x2e   : > { %1187 = vmatprep.subr.bf16.mxu0 %v2411_v20  ;;  %2351 = vmatprep.subr.bf16.mxu1 %v2411_v20  ;;  %v2509_v20 = vld [vmem:[%s3351_s1 + $0x1d4] ss:$8 sps:$4 sm:$0xff]  }
  0x31   : > { %1188 = vmatpush2.bf16.msra.mxu0 %v2413_v21  ;;  %2367 = vmatpush2.bf16.msra.mxu1 %v2413_v21  ;;  %v2507_v21 = vld [vmem:[%s3351_s1 + $0x1d0] ss:$8 sps:$4 sm:$0xff]  }
  0x32   : > { %1189 = vmatprep.subr.bf16.mxu0 %v2414_v22  ;;  %2352 = vmatprep.subr.bf16.mxu1 %v2414_v22  ;;  %v2513_v22 = vld [vmem:[%s2683_s16 + $0xf4] ss:$20 sps:$4 sm:$0xff]  }
  0x35   : > { %1190 = vmatpush2.bf16.msra.mxu0 %v2416_v23  ;;  %2368 = vmatpush2.bf16.msra.mxu1 %v2416_v23  ;;  %v2512_v23 = vld [vmem:[%s3351_s1 + $0x1c4] ss:$8 sps:$4 sm:$0xff]  }
  0x36   : > { %1191 = vmatprep.subr.bf16.mxu0 %v2417_v24  ;;  %2353 = vmatprep.subr.bf16.mxu1 %v2417_v24  ;;  %v2515_v24 = vld [vmem:[%s2683_s16 + $0x234] ss:$20 sps:$4 sm:$0xff]  }
  0x39   : > { %1192 = vmatpush2.bf16.msra.mxu0 %v2419_v25  ;;  %2369 = vmatpush2.bf16.msra.mxu1 %v2419_v25  ;;  %v2510_v25 = vld [vmem:[%s3351_s1 + $0x1c0] ss:$8 sps:$4 sm:$0xff]  }
  0x3a   : > { %1193 = vmatprep.subr.bf16.mxu0 %v2420_v26  ;;  %2354 = vmatprep.subr.bf16.mxu1 %v2420_v26  ;;  %v2521_v26 = vld [vmem:[%s3351_s1 + $0x1b4] ss:$8 sps:$4 sm:$0xff]  }
  0x3d   : > { %1194 = vmatpush2.bf16.msra.mxu0 %v2422_v27  ;;  %2370 = vmatpush2.bf16.msra.mxu1 %v2422_v27  ;;  %v2517_v27 = vld [vmem:[%s2683_s16 + $0xf0] ss:$20 sps:$4 sm:$0xff]  }
  0x3e   : > { %1195 = vmatprep.subr.bf16.mxu0 %v2423_v28  ;;  %2355 = vmatprep.subr.bf16.mxu1 %v2423_v28  ;;  %v2518_v28 = vld [vmem:[%s2683_s16 + $0x230] ss:$20 sps:$4 sm:$0xff]  }
  0x41   : > { %1196 = vmatpush2.bf16.msra.mxu0 %v2425_v29  ;;  %2371 = vmatpush2.bf16.msra.mxu1 %v2425_v29  ;;  %v2519_v29 = vld [vmem:[%s3351_s1 + $0x1b0] ss:$8 sps:$4 sm:$0xff]  }
  0x42   : > { %1197 = vmatprep.subr.bf16.mxu0 %v2426_v30  ;;  %2356 = vmatprep.subr.bf16.mxu1 %v2426_v30  ;;  %v2528_v30 = vld [vmem:[%s2683_s16 + $0x11c] ss:$20 sps:$4 sm:$0xff]  }
  0x45   : > { %1198 = vmatpush2.bf16.msra.mxu0 %v2428_v31  ;;  %2372 = vmatpush2.bf16.msra.mxu1 %v2428_v31  ;;  %v2527_v31 = vld [vmem:[%s3351_s1 + $0x1a4] ss:$8 sps:$4 sm:$0xff]  }
  0x46   : > { %1199 = vmatprep.subr.bf16.mxu0 %v2429_v32  ;;  %2357 = vmatprep.subr.bf16.mxu1 %v2429_v32  ;;  %v2530_v32 = vld [vmem:[%s2683_s16 + $0x25c] ss:$20 sps:$4 sm:$0xff]  }
  0x49   : > { %1200 = vmatpush2.bf16.msra.mxu0 %v2431_v33  ;;  %2373 = vmatpush2.bf16.msra.mxu1 %v2431_v33  ;;  %v2525_v33 = vld [vmem:[%s3351_s1 + $0x1a0] ss:$8 sps:$4 sm:$0xff]  }
  0x4a   : > { %1362 = vmatprep.subr.bf16.mxu1 %v2440_v34  ;;  %1563 = vmatprep.subr.bf16.mxu0 %v2443_v36  ;;  %v2536_v34 = vld [vmem:[%s3351_s1 + $0x194] ss:$8 sps:$4 sm:$0xff]   ;;  %v2533_v36 = vld [vmem:[%s2683_s16 + $0x258] ss:$20 sps:$4 sm:$0xff]  }
  0x4c   : > { %1202 = vmatmul.mubr.bf16.vlgmr.msra.gmra.mxu0 %v2432_v35  ;;  %1282 = vmatmul.mubr.bf16.vlgmr.msra.gmra.mxu1 %v2435_v37  ;;  %v2532_v35 = vld [vmem:[%s2683_s16 + $0x118] ss:$20 sps:$4 sm:$0xff]  }
  0x4d   : > { %1363 = vmatpush1.bf16.msra.mxu1 %v2438_v38  ;;  %1564 = vmatpush1.bf16.msra.mxu0 %v2441_v39  ;;  %v2534_v37 = vld [vmem:[%s3351_s1 + $0x190] ss:$8 sps:$4 sm:$0xff]   ;;  %v2542_v38 = vld [vmem:[%s2683_s16 + $0xc] ss:$20 sps:$4 sm:$0xff]  }
  0x4e   : > { %1364 = vmatprep.subr.bf16.mxu1 %v2446_v40  ;;  %1211 = vmatprep.mubr.bf16.mxu0 %v2447_v41  ;;  %v2539_v39 = vld [vmem:[%s3351_s1 + $0x184] ss:$8 sps:$4 sm:$0xff]   ;;  %v2537_v40 = vld [vmem:[%s3351_s1 + $0x180] ss:$8 sps:$4 sm:$0xff]   ;;  %v2612_v41 = vmov 0  }
  0x4f   : > { %1291 = vmatprep.mubr.bf16.mxu1 %v2449_v42  ;;  %1565 = vmatprep.subr.bf16.mxu0 %v2470_v43  ;;  %v2540_v42 = vld [vmem:[%s2683_s16 + $0x8] ss:$20 sps:$4 sm:$0xff]   ;;  %v2543_v43 = vld [vmem:[%s2683_s16 + $0x10] ss:$20 sps:$4 sm:$0xff]  }
  0x51   : > { %1365 = vmatpush1.bf16.msra.mxu1 %v2444_v44  ;;  %1566 = vmatpush1.bf16.msra.mxu0 %v2468_v46  ;;  %v2544_v44 = vld [vmem:[%s2683_s16 + $0x34] ss:$20 sps:$4 sm:$0xff]   ;;  %v2547_v46 = vld [vmem:[%s2683_s16 + $0x38] ss:$20 sps:$4 sm:$0xff]  }
  0x52   : > { %1366 = vmatprep.subr.bf16.mxu1 %v2455_v45  ;;  %1567 = vmatprep.subr.bf16.mxu0 %v2497_v47  ;;  %v2546_v45 = vld [vmem:[%s2683_s16 + $0x30] ss:$20 sps:$4 sm:$0xff]  }
  0x53   : > { %v2548_v47 = vld [vmem:[%s2683_s16 + $0x5c] ss:$20 sps:$4 sm:$0xff]  }
  0x54   : > { %1212 = vmatmul.mubr.bf16.gmra.mxu0 %v2451_v48  ;;  %1292 = vmatmul.mubr.bf16.gmra.mxu1 %v2452_v49  ;;  %v2550_v48 = vld [vmem:[%s2683_s16 + $0x58] ss:$20 sps:$4 sm:$0xff]   ;;  %v2551_v49 = vld [vmem:[%s2683_s16 + $0x60] ss:$20 sps:$4 sm:$0xff]  }
  0x55   : > { %1367 = vmatpush1.bf16.msra.mxu1 %v2453_v50  ;;  %1221 = vmatprep.mubr.bf16.mxu0 %v2459_v51  ;;  %v2552_v50 = vld [vmem:[%s2683_s16 + $0x84] ss:$20 sps:$4 sm:$0xff]   ;;  %v2554_v51 = vld [vmem:[%s2683_s16 + $0x80] ss:$20 sps:$4 sm:$0xff]  }
  0x56   : > { %1368 = vmatprep.subr.bf16.mxu1 %v2458_v52  ;;  %1301 = vmatprep.mubr.bf16.mxu1 %v2461_v53  ;;  %v2555_v52 = vld [vmem:[%s2683_s16 + $0x88] ss:$20 sps:$4 sm:$0xff]   ;;  %v2556_v53 = vld [vmem:[%s2683_s16 + $0xac] ss:$20 sps:$4 sm:$0xff]  }
  0x57   : > { %1568 = vmatpush1.bf16.msra.mxu0 %v2495_v54  ;;  %v2558_v54 = vld [vmem:[%s2683_s16 + $0xa8] ss:$20 sps:$4 sm:$0xff]  }
  0x58   : > { %1569 = vmatprep.subr.bf16.mxu0 %v2524_v55  ;;  %v2559_v55 = vld [vmem:[%s2683_s16 + $0xb0] ss:$20 sps:$4 sm:$0xff]  }
  0x59   : > { %1369 = vmatpush1.bf16.msra.mxu1 %v2456_v56  ;;  %v2560_v56 = vld [vmem:[%s2683_s16 + $0xd4] ss:$20 sps:$4 sm:$0xff]  }
  0x5a   : > { %1370 = vmatprep.subr.bf16.mxu1 %v2467_v58  ;;  %v2563_v58 = vld [vmem:[%s2683_s16 + $0xd8] ss:$20 sps:$4 sm:$0xff]  }
  0x5b   : > { %1570 = vmatpush1.bf16.msra.mxu0 %v2522_v60  ;;  %v2566_v60 = vld [vmem:[%s2683_s16 + $0xf8] ss:$20 sps:$4 sm:$0xff]  }
  0x5c   : > { %1222 = vmatmul.mubr.bf16.gmra.mxu0 %v2463_v57  ;;  %1302 = vmatmul.mubr.bf16.gmra.mxu1 %v2464_v59  ;;  %v2562_v57 = vld [vmem:[%s2683_s16 + $0xd0] ss:$20 sps:$4 sm:$0xff]  }
  0x5d   : > { %1371 = vmatpush1.bf16.msra.mxu1 %v2465_v61  ;;  %1231 = vmatprep.mubr.bf16.mxu0 %v2474_v63  ;;  %v2564_v59 = vld [vmem:[%s2683_s16 + $0xfc] ss:$20 sps:$4 sm:$0xff]   ;;  %v2567_v61 = vld [vmem:[%s2683_s16 + $0x100] ss:$20 sps:$4 sm:$0xff]  }
  0x5e   : > { %1372 = vmatprep.subr.bf16.mxu1 %v2473_v62  ;;  %1311 = vmatprep.mubr.bf16.mxu1 %v2476_v0  ;;  %v2568_v62 = vld [vmem:[%s2683_s16 + $0x124] ss:$20 sps:$4 sm:$0xff]   ;;  %v2570_v63 = vld [vmem:[%s2683_s16 + $0x120] ss:$20 sps:$4 sm:$0xff]   ;;  %v2571_v0 = vld [vmem:[%s2683_s16 + $0x128] ss:$20 sps:$4 sm:$0xff]  }
  0x61   : > { %1373 = vmatpush1.bf16.msra.mxu1 %v2471_v1  ;;  %v2572_v1 = vld [vmem:[%s2683_s16 + $0x14c] ss:$20 sps:$4 sm:$0xff]  }
  0x62   : > { %1374 = vmatprep.subr.bf16.mxu1 %v2482_v3  ;;  %v2575_v3 = vld [vmem:[%s2683_s16 + $0x150] ss:$20 sps:$4 sm:$0xff]  }
  0x64   : > { %1232 = vmatmul.mubr.bf16.gmra.mxu0 %v2478_v2  ;;  %1312 = vmatmul.mubr.bf16.gmra.mxu1 %v2479_v4  ;;  %v2574_v2 = vld [vmem:[%s2683_s16 + $0x148] ss:$20 sps:$4 sm:$0xff]  }
  0x65   : > { %1375 = vmatpush1.bf16.msra.mxu1 %v2480_v5  ;;  %1241 = vmatprep.mubr.bf16.mxu0 %v2486_v7  ;;  %v2576_v4 = vld [vmem:[%s2683_s16 + $0x174] ss:$20 sps:$4 sm:$0xff]   ;;  %v2578_v5 = vld [vmem:[%s2683_s16 + $0x170] ss:$20 sps:$4 sm:$0xff]  }
  0x66   : > { %1376 = vmatprep.subr.bf16.mxu1 %v2485_v6  ;;  %1321 = vmatprep.mubr.bf16.mxu1 %v2488_v8  ;;  %v2579_v6 = vld [vmem:[%s2683_s16 + $0x178] ss:$20 sps:$4 sm:$0xff]   ;;  %v2580_v7 = vld [vmem:[%s2683_s16 + $0x19c] ss:$20 sps:$4 sm:$0xff]  }
  0x67   : > { %v2582_v8 = vld [vmem:[%s2683_s16 + $0x198] ss:$20 sps:$4 sm:$0xff]  }
  0x69   : > { %1377 = vmatpush1.bf16.msra.mxu1 %v2483_v9  ;;  %v2583_v9 = vld [vmem:[%s2683_s16 + $0x1a0] ss:$20 sps:$4 sm:$0xff]  }
  0x6a   : > { %1378 = vmatprep.subr.bf16.mxu1 %v2494_v11  ;;  %v2586_v11 = vld [vmem:[%s2683_s16 + $0x1c0] ss:$20 sps:$4 sm:$0xff]  }
  0x6c   : > { %1242 = vmatmul.mubr.bf16.gmra.mxu0 %v2490_v10  ;;  %1322 = vmatmul.mubr.bf16.gmra.mxu1 %v2491_v12  ;;  %v2584_v10 = vld [vmem:[%s2683_s16 + $0x1c4] ss:$20 sps:$4 sm:$0xff]   ;;  %v2587_v12 = vld [vmem:[%s2683_s16 + $0x1c8] ss:$20 sps:$4 sm:$0xff]  }
  0x6d   : > { %1379 = vmatpush2.bf16.msra.mxu1 %v2492_v13  ;;  %1251 = vmatprep.mubr.bf16.mxu0 %v2501_v15  ;;  %v2588_v13 = vld [vmem:[%s2683_s16 + $0x1ec] ss:$20 sps:$4 sm:$0xff]   ;;  %v2591_v15 = vld [vmem:[%s2683_s16 + $0x1f0] ss:$20 sps:$4 sm:$0xff]  }
  0x6e   : > { %1380 = vmatprep.subr.bf16.mxu1 %v2500_v14  ;;  %1331 = vmatprep.mubr.bf16.mxu1 %v2503_v16  ;;  %v2590_v14 = vld [vmem:[%s2683_s16 + $0x1e8] ss:$20 sps:$4 sm:$0xff]  }
  0x6f   : > { %v2592_v16 = vld [vmem:[%s2683_s16 + $0x214] ss:$20 sps:$4 sm:$0xff]  }
  0x71   : > { %1381 = vmatpush2.bf16.msra.mxu1 %v2498_v17  ;;  %v2594_v17 = vld [vmem:[%s2683_s16 + $0x210] ss:$20 sps:$4 sm:$0xff]  }
  0x72   : > { %1382 = vmatprep.subr.bf16.mxu1 %v2509_v20  ;;  %v2598_v20 = vld [vmem:[%s2683_s16 + $0x238] ss:$20 sps:$4 sm:$0xff]  }
  0x74   : > { %1252 = vmatmul.mubr.bf16.gmra.mxu0 %v2505_v18  ;;  %1332 = vmatmul.mubr.bf16.gmra.mxu1 %v2506_v19  ;;  %v2595_v18 = vld [vmem:[%s2683_s16 + $0x218] ss:$20 sps:$4 sm:$0xff]   ;;  %v2596_v19 = vld [vmem:[%s2683_s16 + $0x23c] ss:$20 sps:$4 sm:$0xff]  }
  0x75   : > { %1383 = vmatpush2.bf16.msra.mxu1 %v2507_v21  ;;  %1261 = vmatprep.mubr.bf16.mxu0 %v2513_v22  ;;  %v2599_v21 = vld [vmem:[%s2683_s16 + $0x240] ss:$20 sps:$4 sm:$0xff]   ;;  %v2600_v22 = vld [vmem:[%s2683_s16 + $0x264] ss:$20 sps:$4 sm:$0xff]  }
  0x76   : > { %1384 = vmatprep.subr.bf16.mxu1 %v2512_v23  ;;  %1341 = vmatprep.mubr.bf16.mxu1 %v2515_v24  ;;  %v350_v23 = vlaneseq  ;;  %v2602_v24 = vld [vmem:[%s2683_s16 + $0x260] ss:$20 sps:$4 sm:$0xff]  }
  0x79   : > { %1385 = vmatpush2.bf16.msra.mxu1 %v2510_v25  ;;  %v2603_v25 = vld [vmem:[%s2683_s16 + $0x268] ss:$20 sps:$4 sm:$0xff]   ;;  %s2309_s16 = sshll.u32 %s3395_s24, 3 }
  0x7a   : > { %1386 = vmatprep.subr.bf16.mxu1 %v2521_v26  ;;  %v351_v26 = vshrl.u32 %v350_v23, 7  ;;  %s3158_s21 = scalar_lea.vmem %s3353_s3, %s2309_s16 }
  0x7c   : > { %1262 = vmatmul.mubr.bf16.gmra.mxu0 %v2517_v27  ;;  %1342 = vmatmul.mubr.bf16.gmra.mxu1 %v2518_v28  ;;  %v352_v27 = vsub.s32 0, %v351_v26  ;;  %v348_v28 = vld [vmem:[%s3352_s2] sm:$0x3] }
  0x7d   : > { %1387 = vmatpush2.bf16.msra.mxu1 %v2519_v29  ;;  %1271 = vmatprep.mubr.bf16.mxu0 %v2528_v30  ;;  %v356_v29 = vsub.s32 1, %v351_v26 }
  0x7e   : > { %1388 = vmatprep.subr.bf16.mxu1 %v2527_v31  ;;  %1351 = vmatprep.mubr.bf16.mxu1 %v2530_v32  ;;  %v2980_v30 = vrot.slane %v348_v28, %v352_v27 }
  0x7f   : > { %v2982_v31 = vrot.slane %v348_v28, %v356_v29 }
  0x81   : > { %1389 = vmatpush2.bf16.msra.mxu1 %v2525_v33 }
  0x82   : > { %1390 = vmatprep.subr.bf16.mxu1 %v2536_v34 }
  0x84   : > { %1272 = vmatmul.mubr.bf16.gmra.mxu0 %v2532_v35  ;;  %1352 = vmatmul.mubr.bf16.gmra.mxu1 %v2533_v36 }
  0x85   : > { %1391 = vmatpush2.bf16.msra.mxu1 %v2534_v37  ;;  %1394 = vmatprep.mubr.bf16.mxu1 %v2542_v38 }
  0x86   : > { %1392 = vmatprep.subr.bf16.mxu1 %v2539_v39  ;;  %1587 = vmatprep.mubr.bf16.mxu0 %v2612_v41 }
  0x89   : > { %1393 = vmatpush2.bf16.msra.mxu1 %v2537_v40 }
  0x8c   : > { %1395 = vmatmul.mubr.bf16.vlgmr.msra.gmra.mxu1 %v2540_v42  ;;  %2259 = vmatmul.mubr.msk.bf16.vlgmr.msra.gmra.mxu0 %vm1120_vm0, %v2543_v43 }
  0x8d   : > { %1404 = vmatprep.mubr.bf16.mxu1 %v2544_v44  ;;  %1597 = vmatprep.mubr.bf16.mxu0 %v2612_v41 }
  0x94   : > { %1405 = vmatmul.mubr.bf16.gmra.mxu1 %v2546_v45  ;;  %2260 = vmatmul.mubr.msk.bf16.gmra.mxu0 %vm1120_vm0, %v2547_v46 }
  0x95   : > { %1414 = vmatprep.mubr.bf16.mxu1 %v2548_v47  ;;  %1607 = vmatprep.mubr.bf16.mxu0 %v2612_v41 }
  0x9c   : > { %1415 = vmatmul.mubr.bf16.gmra.mxu1 %v2550_v48  ;;  %2261 = vmatmul.mubr.msk.bf16.gmra.mxu0 %vm1120_vm0, %v2551_v49 }
  0x9d   : > { %1424 = vmatprep.mubr.bf16.mxu1 %v2552_v50  ;;  %1617 = vmatprep.mubr.bf16.mxu0 %v2612_v41 }
  0xa4   : > { %1425 = vmatmul.mubr.bf16.gmra.mxu1 %v2554_v51  ;;  %2262 = vmatmul.mubr.msk.bf16.gmra.mxu0 %vm1120_vm0, %v2555_v52 }
  0xa5   : > { %1434 = vmatprep.mubr.bf16.mxu1 %v2556_v53  ;;  %1627 = vmatprep.mubr.bf16.mxu0 %v2612_v41 }
  0xac   : > { %1435 = vmatmul.mubr.bf16.gmra.mxu1 %v2558_v54  ;;  %2263 = vmatmul.mubr.msk.bf16.gmra.mxu0 %vm1120_vm0, %v2559_v55 }
  0xad   : > { %1444 = vmatprep.mubr.bf16.mxu1 %v2560_v56  ;;  %1637 = vmatprep.mubr.bf16.mxu0 %v2612_v41 }
  0xb4   : > { %1445 = vmatmul.mubr.bf16.gmra.mxu1 %v2562_v57  ;;  %2264 = vmatmul.mubr.msk.bf16.gmra.mxu0 %vm1120_vm0, %v2563_v58 }
  0xb5   : > { %1454 = vmatprep.mubr.bf16.mxu1 %v2564_v59  ;;  %1647 = vmatprep.mubr.bf16.mxu0 %v2612_v41 }
  0xbc   : > { %1455 = vmatmul.mubr.bf16.gmra.mxu1 %v2566_v60  ;;  %2265 = vmatmul.mubr.msk.bf16.gmra.mxu0 %vm1120_vm0, %v2567_v61 }
  0xbd   : > { %1464 = vmatprep.mubr.bf16.mxu1 %v2568_v62  ;;  %1657 = vmatprep.mubr.bf16.mxu0 %v2612_v41 }
  0xc4   : > { %1465 = vmatmul.mubr.bf16.gmra.mxu1 %v2570_v63  ;;  %2266 = vmatmul.mubr.msk.bf16.gmra.mxu0 %vm1120_vm0, %v2571_v0 }
  0xc5   : > { %1474 = vmatprep.mubr.bf16.mxu1 %v2572_v1  ;;  %1667 = vmatprep.mubr.bf16.mxu0 %v2612_v41 }
  0xcc   : > { %1475 = vmatmul.mubr.bf16.gmra.mxu1 %v2574_v2  ;;  %2267 = vmatmul.mubr.msk.bf16.gmra.mxu0 %vm1120_vm0, %v2575_v3 }
  0xcd   : > { %1484 = vmatprep.mubr.bf16.mxu1 %v2576_v4  ;;  %1677 = vmatprep.mubr.bf16.mxu0 %v2612_v41 }
  0xd4   : > { %1485 = vmatmul.mubr.bf16.gmra.mxu1 %v2578_v5  ;;  %2268 = vmatmul.mubr.msk.bf16.gmra.mxu0 %vm1120_vm0, %v2579_v6 }
  0xd5   : > { %1494 = vmatprep.mubr.bf16.mxu1 %v2580_v7  ;;  %1687 = vmatprep.mubr.bf16.mxu0 %v2612_v41 }
  0xdc   : > { %1495 = vmatmul.mubr.bf16.gmra.mxu1 %v2582_v8  ;;  %2269 = vmatmul.mubr.msk.bf16.gmra.mxu0 %vm1120_vm0, %v2583_v9 }
  0xdd   : > { %1504 = vmatprep.mubr.bf16.mxu1 %v2584_v10  ;;  %1697 = vmatprep.mubr.bf16.mxu0 %v2612_v41 }
  0xe4   : > { %1505 = vmatmul.mubr.bf16.gmra.mxu1 %v2586_v11  ;;  %2270 = vmatmul.mubr.msk.bf16.gmra.mxu0 %vm1120_vm0, %v2587_v12 }
  0xe5   : > { %1514 = vmatprep.mubr.bf16.mxu1 %v2588_v13  ;;  %1707 = vmatprep.mubr.bf16.mxu0 %v2612_v41 }
  0xec   : > { %1515 = vmatmul.mubr.bf16.gmra.mxu1 %v2590_v14  ;;  %2271 = vmatmul.mubr.msk.bf16.gmra.mxu0 %vm1120_vm0, %v2591_v15 }
  0xed   : > { %1524 = vmatprep.mubr.bf16.mxu1 %v2592_v16  ;;  %1717 = vmatprep.mubr.bf16.mxu0 %v2612_v41 }
  0xf4   : > { %1525 = vmatmul.mubr.bf16.gmra.mxu1 %v2594_v17  ;;  %2272 = vmatmul.mubr.msk.bf16.gmra.mxu0 %vm1120_vm0, %v2595_v18 }
  0xf5   : > { %1534 = vmatprep.mubr.bf16.mxu1 %v2596_v19  ;;  %1727 = vmatprep.mubr.bf16.mxu0 %v2612_v41 }
  0xfc   : > { %1535 = vmatmul.mubr.bf16.gmra.mxu1 %v2598_v20  ;;  %2273 = vmatmul.mubr.msk.bf16.gmra.mxu0 %vm1120_vm0, %v2599_v21 }
  0xfd   : > { %1544 = vmatprep.mubr.bf16.mxu1 %v2600_v22  ;;  %1737 = vmatprep.mubr.bf16.mxu0 %v2612_v41 }
 0x104   : > { %1545 = vmatmul.mubr.bf16.gmra.mxu1 %v2602_v24  ;;  %2274 = vmatmul.mubr.msk.bf16.gmra.mxu0 %vm1120_vm0, %v2603_v25 }
 0x10c   : > { %v2984_v32 = vpop.f32.mrf.mxu0  ;;  %v1283_v33 = vpop.f32.mrf.mxu1 }
 0x10d   : > { %v2987_v34 = vadd.f32 %v1283_v33, %v2980_v30 }
 0x10e   : > { %v2989_v35 = vpop.f32.mrf.mxu0  ;;  %v1285_v36 = vpop.f32.mrf.mxu1 }
 0x10f   : > { %v2992_v37 = vadd.f32 %v1285_v36, %v2982_v31 }
 0x110   : > { %v2994_v38 = vpop.f32.mrf.mxu0  ;;  %v1287_v39 = vpop.f32.mrf.mxu1 }
 0x111   : > { %v2997_v40 = vadd.f32 %v1287_v39, %v2980_v30 }
 0x112   : > { %v2999_v41 = vpop.f32.mrf.mxu0  ;;  %v1289_v42 = vpop.f32.mrf.mxu1 }
 0x113   : > { %v3002_v43 = vadd.f32 %v1289_v42, %v2982_v31 }
 0x114   : > { %v3004_v44 = vpop.f32.mrf.mxu0  ;;  %v1293_v45 = vpop.f32.mrf.mxu1 }
 0x115   : > { %v3007_v46 = vadd.f32 %v1293_v45, %v2980_v30 }
 0x116   : > { %v3009_v47 = vpop.f32.mrf.mxu0  ;;  %v1295_v48 = vpop.f32.mrf.mxu1 }
 0x117   : > { %v3012_v49 = vadd.f32 %v1295_v48, %v2982_v31 }
 0x118   : > { %v3014_v50 = vpop.f32.mrf.mxu0  ;;  %v1297_v51 = vpop.f32.mrf.mxu1 }
 0x119   : > { %v3017_v52 = vadd.f32 %v1297_v51, %v2980_v30 }
 0x11a   : > { %v3019_v53 = vpop.f32.mrf.mxu0  ;;  %v1299_v54 = vpop.f32.mrf.mxu1 }
 0x11b   : > { %v3022_v55 = vadd.f32 %v1299_v54, %v2982_v31 }
 0x11c   : > { %v3024_v56 = vpop.f32.mrf.mxu0  ;;  %v1303_v57 = vpop.f32.mrf.mxu1 }
 0x11d   : > { %v3027_v58 = vadd.f32 %v1303_v57, %v2980_v30 }
 0x11e   : > { %v3029_v59 = vpop.f32.mrf.mxu0  ;;  %v1305_v60 = vpop.f32.mrf.mxu1 }
 0x11f   : > { %v3032_v61 = vadd.f32 %v1305_v60, %v2982_v31 }
 0x120   : > { %v3034_v62 = vpop.f32.mrf.mxu0  ;;  %v1307_v63 = vpop.f32.mrf.mxu1 }
 0x121   : > { %v3037_v0 = vadd.f32 %v1307_v63, %v2980_v30 }
 0x122   : > { %v3039_v1 = vpop.f32.mrf.mxu0  ;;  %v1309_v2 = vpop.f32.mrf.mxu1 }
 0x123   : > { %v3042_v3 = vadd.f32 %v1309_v2, %v2982_v31 }
 0x124   : > { %v3044_v4 = vpop.f32.mrf.mxu0  ;;  %v1313_v5 = vpop.f32.mrf.mxu1 }
 0x125   : > { %v3047_v6 = vadd.f32 %v1313_v5, %v2980_v30 }
 0x126   : > { %v3049_v7 = vpop.f32.mrf.mxu0  ;;  %v1315_v8 = vpop.f32.mrf.mxu1 }
 0x127   : > { %v3052_v9 = vadd.f32 %v1315_v8, %v2982_v31 }
 0x128   : > { %v3054_v10 = vpop.f32.mrf.mxu0  ;;  %v1317_v11 = vpop.f32.mrf.mxu1 }
 0x129   : > { %3354 = vst [vmem:[#allocation2_spill] sm:$0xff] %v3052_v9  ;;  %v3057_v12 = vadd.f32 %v1317_v11, %v2980_v30 }
 0x12a   : > { %v3059_v13 = vpop.f32.mrf.mxu0  ;;  %v1319_v14 = vpop.f32.mrf.mxu1 }
 0x12b   : > { %3355 = vst [vmem:[#allocation3_spill] sm:$0xff] %v3057_v12  ;;  %v3062_v15 = vadd.f32 %v1319_v14, %v2982_v31 }
 0x12c   : > { %v3064_v16 = vpop.f32.mrf.mxu0  ;;  %v1323_v17 = vpop.f32.mrf.mxu1 }
 0x12d   : > { %3356 = vst [vmem:[#allocation4_spill] sm:$0xff] %v3062_v15  ;;  %v3067_v18 = vadd.f32 %v1323_v17, %v2980_v30 }
 0x12e   : > { %v3069_v19 = vpop.f32.mrf.mxu0  ;;  %v1325_v20 = vpop.f32.mrf.mxu1 }
 0x12f   : > { %3357 = vst [vmem:[#allocation5_spill] sm:$0xff] %v3067_v18  ;;  %v3072_v21 = vadd.f32 %v1325_v20, %v2982_v31 }
 0x130   : > { %v3074_v22 = vpop.f32.mrf.mxu0  ;;  %v1327_v23 = vpop.f32.mrf.mxu1 }
 0x131   : > { %3358 = vst [vmem:[#allocation6_spill] sm:$0xff] %v3072_v21  ;;  %v3077_v24 = vadd.f32 %v1327_v23, %v2980_v30 }
 0x132   : > { %v3079_v25 = vpop.f32.mrf.mxu0  ;;  %v1329_v26 = vpop.f32.mrf.mxu1 }
 0x133   : > { %3359 = vst [vmem:[#allocation7_spill] sm:$0xff] %v3077_v24  ;;  %v3082_v27 = vadd.f32 %v1329_v26, %v2982_v31 }
 0x134   : > { %v3084_v28 = vpop.f32.mrf.mxu0  ;;  %v1333_v29 = vpop.f32.mrf.mxu1 }
 0x135   : > { %3360 = vst [vmem:[#allocation8_spill] sm:$0xff] %v3082_v27  ;;  %v3087_v33 = vadd.f32 %v1333_v29, %v2980_v30 }
 0x136   : > { %v3089_v36 = vpop.f32.mrf.mxu0  ;;  %v1335_v39 = vpop.f32.mrf.mxu1 }
 0x137   : > { %3361 = vst [vmem:[#allocation9_spill] sm:$0xff] %v3087_v33  ;;  %v3092_v42 = vadd.f32 %v1335_v39, %v2982_v31 }
 0x138   : > { %v3094_v45 = vpop.f32.mrf.mxu0  ;;  %v1337_v48 = vpop.f32.mrf.mxu1 }
 0x139   : > { %3362 = vst [vmem:[#allocation10_spill] sm:$0xff] %v3092_v42  ;;  %v3097_v51 = vadd.f32 %v1337_v48, %v2980_v30 }
 0x13a   : > { %v3099_v54 = vpop.f32.mrf.mxu0  ;;  %v1339_v57 = vpop.f32.mrf.mxu1 }
 0x13b   : > { %3363 = vst [vmem:[#allocation11_spill] sm:$0xff] %v3097_v51  ;;  %v3102_v60 = vadd.f32 %v1339_v57, %v2982_v31 }
 0x13c   : > { %v3104_v63 = vpop.f32.mrf.mxu0  ;;  %v1343_v2 = vpop.f32.mrf.mxu1 }
 0x13d   : > { %3364 = vst [vmem:[#allocation12_spill] sm:$0xff] %v3102_v60  ;;  %v3107_v5 = vadd.f32 %v1343_v2, %v2980_v30 }
 0x13e   : > { %v3109_v8 = vpop.f32.mrf.mxu0  ;;  %v1345_v11 = vpop.f32.mrf.mxu1 }
 0x13f   : > { %3365 = vst [vmem:[#allocation13_spill] sm:$0xff] %v3107_v5  ;;  %v3112_v14 = vadd.f32 %v1345_v11, %v2982_v31 }
 0x140   : > { %v3114_v17 = vpop.f32.mrf.mxu0  ;;  %v1347_v20 = vpop.f32.mrf.mxu1 }
 0x141   : > { %3366 = vst [vmem:[#allocation14_spill] sm:$0xff] %v3112_v14  ;;  %v3117_v23 = vadd.f32 %v1347_v20, %v2980_v30 }
 0x142   : > { %v3119_v26 = vpop.f32.mrf.mxu0  ;;  %v1349_v29 = vpop.f32.mrf.mxu1 }
 0x143   : > { %3367 = vst [vmem:[#allocation15_spill] sm:$0xff] %v3117_v23  ;;  %v3122_v39 = vadd.f32 %v1349_v29, %v2982_v31 }
 0x144   : > { %v3124_v48 = vpop.f32.mrf.mxu0  ;;  %v1353_v57 = vpop.f32.mrf.mxu1 }
 0x145   : > { %3368 = vst [vmem:[#allocation16_spill] sm:$0xff] %v3122_v39  ;;  %v3127_v2 = vadd.f32 %v1353_v57, %v2980_v30  ;;  %v1204_v57 = vadd.f32 %v2984_v32, %v2980_v30  ;;  %v1210_v32 = vadd.f32 %v2999_v41, %v2982_v31 }
 0x146   : > { %v3129_v11 = vpop.f32.mrf.mxu0  ;;  %v1355_v14 = vpop.f32.mrf.mxu1 }
 0x147   : > { %3369 = vst [vmem:[#allocation17_spill] sm:$0xff] %v3127_v2  ;;  %v3132_v5 = vadd.f32 %v1355_v14, %v2982_v31  ;;  %v1206_v14 = vadd.f32 %v2989_v35, %v2982_v31  ;;  %v1214_v35 = vadd.f32 %v3004_v44, %v2980_v30  ;;  %v1216_v44 = vadd.f32 %v3009_v47, %v2982_v31 }
 0x148   : > { %v3134_v20 = vpop.f32.mrf.mxu0  ;;  %v1357_v23 = vpop.f32.mrf.mxu1  ;;  %v1220_v47 = vadd.f32 %v3019_v53, %v2982_v31  ;;  %v1226_v53 = vadd.f32 %v3029_v59, %v2982_v31  ;;  %v1230_v59 = vadd.f32 %v3039_v1, %v2982_v31  ;;  %v1236_v1 = vadd.f32 %v3049_v7, %v2982_v31 }
 0x149   : > { %3370 = vst [vmem:[#allocation18_spill] sm:$0xff] %v3132_v5  ;;  %v3137_v60 = vadd.f32 %v1357_v23, %v2980_v30  ;;  %v1208_v23 = vadd.f32 %v2994_v38, %v2980_v30  ;;  %v1240_v7 = vadd.f32 %v3059_v13, %v2982_v31  ;;  %v1246_v13 = vadd.f32 %v3069_v19, %v2982_v31 }
 0x14a   : > { %v3139_v29 = vpop.f32.mrf.mxu0  ;;  %v1359_v39 = vpop.f32.mrf.mxu1  ;;  %v1250_v19 = vadd.f32 %v3079_v25, %v2982_v31  ;;  %v1256_v25 = vadd.f32 %v3089_v36, %v2982_v31  ;;  %v1260_v36 = vadd.f32 %v3099_v54, %v2982_v31  ;;  %v1266_v54 = vadd.f32 %v3109_v8, %v2982_v31 }
 0x14b   : > { %3371 = vst [vmem:[#allocation19_spill] sm:$0xff] %v3137_v60  ;;  %v3144_v2 = vadd.f32 %v1359_v39, %v2982_v31  ;;  %v1270_v8 = vadd.f32 %v3119_v26, %v2982_v31  ;;  %v1276_v26 = vadd.f32 %v3129_v11, %v2982_v31  ;;  %v1280_v11 = vadd.f32 %v3139_v29, %v2982_v31 }
 0x14c   : > { %v1396_v51 = vpop.f32.mrf.mxu1  ;;  %v1589_v42 = vpop.f32.mrf.mxu0 }
 0x14d   : > { %3372 = vst [vmem:[#allocation20_spill] sm:$0xff] %v3144_v2  ;;  %v1397_v5 = vadd.f32 %v1396_v51, %v1204_v57 }
 0x14e   : > { %v1398_v33 = vpop.f32.mrf.mxu1  ;;  %v1591_v27 = vpop.f32.mrf.mxu0 }
 0x14f   : > { %v1590_v60 = vadd.f32 %v1589_v42, %v1397_v5  ;;  %v1399_v24 = vadd.f32 %v1398_v33, %v1206_v14 }
 0x150   : > { %v1400_v21 = vpop.f32.mrf.mxu1  ;;  %v1593_v18 = vpop.f32.mrf.mxu0 }
 0x151   : > { %v1592_v39 = vadd.f32 %v1591_v27, %v1399_v24  ;;  %v1401_v2 = vadd.f32 %v1400_v21, %v1208_v23  ;;  %v1748_v15 = vmax.f32 %v1590_v60, 0.0  ;;  %v1218_v60 = vadd.f32 %v3014_v50, %v2980_v30 }
 0x152   : > { %v1402_v51 = vpop.f32.mrf.mxu1  ;;  %v1595_v57 = vpop.f32.mrf.mxu0  ;;  %v1224_v50 = vadd.f32 %v3024_v56, %v2980_v30  ;;  %v1228_v56 = vadd.f32 %v3034_v62, %v2980_v30  ;;  %v1234_v62 = vadd.f32 %v3044_v4, %v2980_v30  ;;  %v1238_v4 = vadd.f32 %v3054_v10, %v2980_v30 }
 0x153   : > { %v1749_v12 = vmax.f32 %v1592_v39, 0.0  ;;  %v1594_v38 = vadd.f32 %v1593_v18, %v1401_v2  ;;  %v1403_v42 = vadd.f32 %v1402_v51, %v1210_v32  ;;  %v1244_v10 = vadd.f32 %v3064_v16, %v2980_v30 }
 0x154   : > { %v1406_v21 = vpop.f32.mrf.mxu1  ;;  %v1599_v24 = vpop.f32.mrf.mxu0  ;;  %v1248_v16 = vadd.f32 %v3074_v22, %v2980_v30  ;;  %v1254_v22 = vadd.f32 %v3084_v28, %v2980_v30  ;;  %v1258_v28 = vadd.f32 %v3094_v45, %v2980_v30  ;;  %v1264_v45 = vadd.f32 %v3104_v63, %v2980_v30 }
 0x155   : > { %v2310_v27 = vpack.c.bf16 %v1749_v12, %v1748_v15  ;;  %v1596_v33 = vadd.f32 %v1595_v57, %v1403_v42  ;;  %v1407_v18 = vadd.f32 %v1406_v21, %v1214_v35  ;;  %v1750_v14 = vmax.f32 %v1594_v38, 0.0 }
 0x156   : > { %v1408_v5 = vpop.f32.mrf.mxu1  ;;  %v1601_v2 = vpop.f32.mrf.mxu0  ;;  %v1268_v63 = vadd.f32 %v3114_v17, %v2980_v30  ;;  %v1274_v17 = vadd.f32 %v3124_v48, %v2980_v30  ;;  %v1278_v48 = vadd.f32 %v3134_v20, %v2980_v30 }
 0x157   : > { %2007 = vst.msk [vmem:[%s3158_s21] sm:$0xff] %vm3161_vm3, %v2310_v27  ;;  %v1751_v23 = vmax.f32 %v1596_v33, 0.0  ;;  %v1600_v32 = vadd.f32 %v1599_v24, %v1407_v18  ;;  %v1409_v39 = vadd.f32 %v1408_v5, %v1216_v44 }
 0x158   : > { %v1410_v51 = vpop.f32.mrf.mxu1  ;;  %v1603_v9 = vpop.f32.mrf.mxu0 }
 0x159   : > { %v2311_v12 = vpack.c.bf16 %v1751_v23, %v1750_v14  ;;  %v1602_v15 = vadd.f32 %v1601_v2, %v1409_v39  ;;  %v1411_v35 = vadd.f32 %v1410_v51, %v1218_v60  ;;  %v1752_v38 = vmax.f32 %v1600_v32, 0.0 }
 0x15a   : > { %v1412_v57 = vpop.f32.mrf.mxu1  ;;  %v1605_v42 = vpop.f32.mrf.mxu0 }
 0x15b   : > { %2008 = vst.msk [vmem:[%s3158_s21 + $0x8] sm:$0xff] %vm3161_vm3, %v2311_v12  ;;  %v1753_v21 = vmax.f32 %v1602_v15, 0.0  ;;  %v1604_v24 = vadd.f32 %v1603_v9, %v1411_v35  ;;  %v1413_v44 = vadd.f32 %v1412_v57, %v1220_v47 }
 0x15c   : > { %v1416_v27 = vpop.f32.mrf.mxu1  ;;  %v1609_v33 = vpop.f32.mrf.mxu0 }
 0x15d   : > { %v2312_v18 = vpack.c.bf16 %v1753_v21, %v1752_v38  ;;  %v1606_v60 = vadd.f32 %v1605_v42, %v1413_v44  ;;  %v1417_v5 = vadd.f32 %v1416_v27, %v1224_v50  ;;  %v1754_v23 = vmax.f32 %v1604_v24, 0.0 }
 0x15e   : > { %v1418_v2 = vpop.f32.mrf.mxu1  ;;  %v1611_v14 = vpop.f32.mrf.mxu0 }
 0x15f   : > { %2009 = vst.msk [vmem:[%s3158_s21 + $0x10] sm:$0xff] %vm3161_vm3, %v2312_v18  ;;  %v1755_v9 = vmax.f32 %v1606_v60, 0.0  ;;  %v1610_v32 = vadd.f32 %v1609_v33, %v1417_v5  ;;  %v1419_v39 = vadd.f32 %v1418_v2, %v1226_v53 }
 0x160   : > { %v1420_v51 = vpop.f32.mrf.mxu1  ;;  %v1613_v47 = vpop.f32.mrf.mxu0 }
 0x161   : > { %v2313_v12 = vpack.c.bf16 %v1755_v9, %v1754_v23  ;;  %v1612_v15 = vadd.f32 %v1611_v14, %v1419_v39  ;;  %v1421_v35 = vadd.f32 %v1420_v51, %v1228_v56  ;;  %v1756_v42 = vmax.f32 %v1610_v32, 0.0 }
 0x162   : > { %v1422_v50 = vpop.f32.mrf.mxu1  ;;  %v1615_v57 = vpop.f32.mrf.mxu0 }
 0x163   : > { %2010 = vst.msk [vmem:[%s3158_s21 + $0x18] sm:$0xff] %vm3161_vm3, %v2313_v12  ;;  %v1757_v38 = vmax.f32 %v1612_v15, 0.0  ;;  %v1614_v21 = vadd.f32 %v1613_v47, %v1421_v35  ;;  %v1423_v24 = vadd.f32 %v1422_v50, %v1230_v59 }
 0x164   : > { %v1426_v44 = vpop.f32.mrf.mxu1  ;;  %v1619_v27 = vpop.f32.mrf.mxu0 }
 0x165   : > { %v2314_v33 = vpack.c.bf16 %v1757_v38, %v1756_v42  ;;  %v1616_v53 = vadd.f32 %v1615_v57, %v1423_v24  ;;  %v1427_v18 = vadd.f32 %v1426_v44, %v1234_v62  ;;  %v1758_v56 = vmax.f32 %v1614_v21, 0.0 }
 0x166   : > { %v1428_v60 = vpop.f32.mrf.mxu1  ;;  %v1621_v5 = vpop.f32.mrf.mxu0 }
 0x167   : > { %2011 = vst.msk [vmem:[%s3158_s21 + $0x20] sm:$0xff] %vm3161_vm3, %v2314_v33  ;;  %v1759_v2 = vmax.f32 %v1616_v53, 0.0  ;;  %v1620_v14 = vadd.f32 %v1619_v27, %v1427_v18  ;;  %v1429_v23 = vadd.f32 %v1428_v60, %v1236_v1 }
 0x168   : > { %v1430_v9 = vpop.f32.mrf.mxu1  ;;  %v1623_v32 = vpop.f32.mrf.mxu0 }
 0x169   : > { %v2315_v39 = vpack.c.bf16 %v1759_v2, %v1758_v56  ;;  %v1622_v51 = vadd.f32 %v1621_v5, %v1429_v23  ;;  %v1431_v47 = vadd.f32 %v1430_v9, %v1238_v4  ;;  %v1760_v15 = vmax.f32 %v1620_v14, 0.0 }
 0x16a   : > { %v1432_v59 = vpop.f32.mrf.mxu1  ;;  %v1625_v12 = vpop.f32.mrf.mxu0 }
 0x16b   : > { %2012 = vst.msk [vmem:[%s3158_s21 + $0x28] sm:$0xff] %vm3161_vm3, %v2315_v39  ;;  %v1761_v35 = vmax.f32 %v1622_v51, 0.0  ;;  %v1624_v62 = vadd.f32 %v1623_v32, %v1431_v47  ;;  %v1433_v50 = vadd.f32 %v1432_v59, %v1240_v7 }
 0x16c   : > { %v1436_v57 = vpop.f32.mrf.mxu1  ;;  %v1629_v42 = vpop.f32.mrf.mxu0 }
 0x16d   : > { %v2316_v38 = vpack.c.bf16 %v1761_v35, %v1760_v15  ;;  %v1626_v21 = vadd.f32 %v1625_v12, %v1433_v50  ;;  %v1437_v24 = vadd.f32 %v1436_v57, %v1244_v10  ;;  %v1762_v1 = vmax.f32 %v1624_v62, 0.0 }
 0x16e   : > { %v1438_v44 = vpop.f32.mrf.mxu1  ;;  %v1631_v27 = vpop.f32.mrf.mxu0 }
 0x16f   : > { %2013 = vst.msk [vmem:[%s3158_s21 + $0x30] sm:$0xff] %vm3161_vm3, %v2316_v38  ;;  %v1763_v33 = vmax.f32 %v1626_v21, 0.0  ;;  %v1630_v53 = vadd.f32 %v1629_v42, %v1437_v24  ;;  %v1439_v18 = vadd.f32 %v1438_v44, %v1246_v13 }
 0x170   : > { %v1440_v4 = vpop.f32.mrf.mxu1  ;;  %v1633_v60 = vpop.f32.mrf.mxu0 }
 0x171   : > { %v2317_v5 = vpack.c.bf16 %v1763_v33, %v1762_v1  ;;  %v1632_v56 = vadd.f32 %v1631_v27, %v1439_v18  ;;  %v1441_v2 = vadd.f32 %v1440_v4, %v1248_v16  ;;  %v1764_v9 = vmax.f32 %v1630_v53, 0.0 }
 0x172   : > { %v1442_v14 = vpop.f32.mrf.mxu1  ;;  %v1635_v23 = vpop.f32.mrf.mxu0 }
 0x173   : > { %2014 = vst.msk [vmem:[%s3158_s21 + $0x38] sm:$0xff] %vm3161_vm3, %v2317_v5  ;;  %v1765_v32 = vmax.f32 %v1632_v56, 0.0  ;;  %v1634_v7 = vadd.f32 %v1633_v60, %v1441_v2  ;;  %v1443_v39 = vadd.f32 %v1442_v14, %v1250_v19 }
 0x174   : > { %v1446_v51 = vpop.f32.mrf.mxu1  ;;  %v1639_v47 = vpop.f32.mrf.mxu0 }
 0x175   : > { %v2318_v10 = vpack.c.bf16 %v1765_v32, %v1764_v9  ;;  %v1636_v59 = vadd.f32 %v1635_v23, %v1443_v39  ;;  %v1447_v12 = vadd.f32 %v1446_v51, %v1254_v22  ;;  %v1766_v62 = vmax.f32 %v1634_v7, 0.0 }
 0x176   : > { %v1448_v15 = vpop.f32.mrf.mxu1  ;;  %v1641_v35 = vpop.f32.mrf.mxu0 }
 0x177   : > { %2015 = vst.msk [vmem:[%s3158_s21 + $0x40] sm:$0xff] %vm3161_vm3, %v2318_v10  ;;  %v1767_v50 = vmax.f32 %v1636_v59, 0.0  ;;  %v1640_v57 = vadd.f32 %v1639_v47, %v1447_v12  ;;  %v1449_v42 = vadd.f32 %v1448_v15, %v1256_v25 }
 0x178   : > { %v1450_v13 = vpop.f32.mrf.mxu1  ;;  %v1643_v38 = vpop.f32.mrf.mxu0 }
 0x179   : > { %v2319_v21 = vpack.c.bf16 %v1767_v50, %v1766_v62  ;;  %v1642_v24 = vadd.f32 %v1641_v35, %v1449_v42  ;;  %v1451_v16 = vadd.f32 %v1450_v13, %v1258_v28  ;;  %v1768_v1 = vmax.f32 %v1640_v57, 0.0 }
 0x17a   : > { %v1452_v44 = vpop.f32.mrf.mxu1  ;;  %v1645_v27 = vpop.f32.mrf.mxu0 }
 0x17b   : > { %2016 = vst.msk [vmem:[%s3158_s21 + $0x48] sm:$0xff] %vm3161_vm3, %v2319_v21  ;;  %v1769_v33 = vmax.f32 %v1642_v24, 0.0  ;;  %v1644_v53 = vadd.f32 %v1643_v38, %v1451_v16  ;;  %v1453_v18 = vadd.f32 %v1452_v44, %v1260_v36 }
 0x17c   : > { %v1456_v4 = vpop.f32.mrf.mxu1  ;;  %v1649_v60 = vpop.f32.mrf.mxu0 }
 0x17d   : > { %v2320_v19 = vpack.c.bf16 %v1769_v33, %v1768_v1  ;;  %v1646_v5 = vadd.f32 %v1645_v27, %v1453_v18  ;;  %v1457_v56 = vadd.f32 %v1456_v4, %v1264_v45  ;;  %v1770_v14 = vmax.f32 %v1644_v53, 0.0 }
 0x17e   : > { %v1458_v2 = vpop.f32.mrf.mxu1  ;;  %v1651_v22 = vpop.f32.mrf.mxu0 }
 0x17f   : > { %2017 = vst.msk [vmem:[%s3158_s21 + $0x50] sm:$0xff] %vm3161_vm3, %v2320_v19  ;;  %v1771_v23 = vmax.f32 %v1646_v5, 0.0  ;;  %v1650_v9 = vadd.f32 %v1649_v60, %v1457_v56  ;;  %v1459_v32 = vadd.f32 %v1458_v2, %v1266_v54 }
 0x180   : > { %v1460_v7 = vpop.f32.mrf.mxu1  ;;  %v1653_v39 = vpop.f32.mrf.mxu0 }
 0x181   : > { %v2321_v51 = vpack.c.bf16 %v1771_v23, %v1770_v14  ;;  %v1652_v47 = vadd.f32 %v1651_v22, %v1459_v32  ;;  %v1461_v25 = vadd.f32 %v1460_v7, %v1268_v63  ;;  %v1772_v12 = vmax.f32 %v1650_v9, 0.0 }
 0x182   : > { %v1462_v10 = vpop.f32.mrf.mxu1  ;;  %v1655_v59 = vpop.f32.mrf.mxu0 }
 0x183   : > { %2018 = vst.msk [vmem:[%s3158_s21 + $0x58] sm:$0xff] %vm3161_vm3, %v2321_v51  ;;  %v1773_v28 = vmax.f32 %v1652_v47, 0.0  ;;  %v1654_v15 = vadd.f32 %v1653_v39, %v1461_v25  ;;  %v1463_v35 = vadd.f32 %v1462_v10, %v1270_v8 }
 0x184   : > { %v1466_v62 = vpop.f32.mrf.mxu1  ;;  %v1659_v50 = vpop.f32.mrf.mxu0 }
 0x185   : > { %v2322_v57 = vpack.c.bf16 %v1773_v28, %v1772_v12  ;;  %v1656_v42 = vadd.f32 %v1655_v59, %v1463_v35  ;;  %v1467_v13 = vadd.f32 %v1466_v62, %v1274_v17  ;;  %v1774_v21 = vmax.f32 %v1654_v15, 0.0 }
 0x186   : > { %v1468_v38 = vpop.f32.mrf.mxu1  ;;  %v1661_v36 = vpop.f32.mrf.mxu0 }
 0x187   : > { %2019 = vst.msk [vmem:[%s3158_s21 + $0x60] sm:$0xff] %vm3161_vm3, %v2322_v57  ;;  %v1775_v24 = vmax.f32 %v1656_v42, 0.0  ;;  %v1660_v16 = vadd.f32 %v1659_v50, %v1467_v13  ;;  %v1469_v45 = vadd.f32 %v1468_v38, %v1276_v26 }
 0x188   : > { %v1470_v44 = vpop.f32.mrf.mxu1  ;;  %v1663_v27 = vpop.f32.mrf.mxu0 }
 0x189   : > { %v2323_v1 = vpack.c.bf16 %v1775_v24, %v1774_v21  ;;  %v1662_v33 = vadd.f32 %v1661_v36, %v1469_v45  ;;  %v1471_v53 = vadd.f32 %v1470_v44, %v1278_v48  ;;  %v1776_v18 = vmax.f32 %v1660_v16, 0.0 }
 0x18a   : > { %v1472_v30 = vpop.f32.mrf.mxu1  ;;  %v1665_v20 = vpop.f32.mrf.mxu0 }
 0x18b   : > { %2020 = vst.msk [vmem:[%s3158_s21 + $0x68] sm:$0xff] %vm3161_vm3, %v2323_v1  ;;  %v1777_v4 = vmax.f32 %v1662_v33, 0.0  ;;  %v1664_v60 = vadd.f32 %v1663_v27, %v1471_v53  ;;  %v1473_v54 = vadd.f32 %v1472_v30, %v1280_v11 }
 0x18c   : > { %v1476_v19 = vpop.f32.mrf.mxu1  ;;  %v1669_v5 = vpop.f32.mrf.mxu0 }
 0x18d   : > { %v2324_v56 = vpack.c.bf16 %v1777_v4, %v1776_v18  ;;  %v1666_v63 = vadd.f32 %v1665_v20, %v1473_v54  ;;  %v1477_v31 = vadd.f32 %v1476_v19, %v2987_v34  ;;  %v1778_v22 = vmax.f32 %v1664_v60, 0.0 }
 0x18e   : > { %v1478_v29 = vpop.f32.mrf.mxu1  ;;  %v1671_v2 = vpop.f32.mrf.mxu0 }
 0x18f   : > { %2021 = vst.msk [vmem:[%s3158_s21 + $0x70] sm:$0xff] %vm3161_vm3, %v2324_v56  ;;  %v1779_v14 = vmax.f32 %v1666_v63, 0.0  ;;  %v1670_v23 = vadd.f32 %v1669_v5, %v1477_v31  ;;  %v1479_v9 = vadd.f32 %v1478_v29, %v2992_v37 }
 0x190   : > { %v1480_v32 = vpop.f32.mrf.mxu1  ;;  %v1673_v7 = vpop.f32.mrf.mxu0 }
 0x191   : > { %v2325_v39 = vpack.c.bf16 %v1779_v14, %v1778_v22  ;;  %v1672_v8 = vadd.f32 %v1671_v2, %v1479_v9  ;;  %v1481_v51 = vadd.f32 %v1480_v32, %v2997_v40  ;;  %v1780_v34 = vmax.f32 %v1670_v23, 0.0 }
 0x192   : > { %v1482_v47 = vpop.f32.mrf.mxu1  ;;  %v1675_v25 = vpop.f32.mrf.mxu0 }
 0x193   : > { %2022 = vst.msk [vmem:[%s3158_s21 + $0x78] sm:$0xff] %vm3161_vm3, %v2325_v39  ;;  %v1781_v17 = vmax.f32 %v1672_v8, 0.0  ;;  %v1674_v10 = vadd.f32 %v1673_v7, %v1481_v51  ;;  %v1483_v59 = vadd.f32 %v1482_v47, %v3002_v43  ;;  %v3375_v51 = vld [vmem:[#allocation2_spill] sm:$0xff] }
 0x194   : > { %v1486_v12 = vpop.f32.mrf.mxu1  ;;  %v1679_v28 = vpop.f32.mrf.mxu0 }
 0x195   : > { %v2326_v37 = vpack.c.bf16 %v1781_v17, %v1780_v34  ;;  %v1676_v15 = vadd.f32 %v1675_v25, %v1483_v59  ;;  %v1487_v35 = vadd.f32 %v1486_v12, %v3007_v46  ;;  %v1782_v40 = vmax.f32 %v1674_v10, 0.0  ;;  %v3376_v10 = vld [vmem:[#allocation3_spill] sm:$0xff] }
 0x196   : > { %v1488_v62 = vpop.f32.mrf.mxu1  ;;  %v1681_v50 = vpop.f32.mrf.mxu0 }
 0x197   : > { %2023 = vst.msk [vmem:[%s3158_s21 + $0x80] sm:$0xff] %vm3161_vm3, %v2326_v37  ;;  %v1783_v26 = vmax.f32 %v1676_v15, 0.0  ;;  %v1680_v57 = vadd.f32 %v1679_v28, %v1487_v35  ;;  %v1489_v42 = vadd.f32 %v1488_v62, %v3012_v49  ;;  %v3377_v35 = vld [vmem:[#allocation4_spill] sm:$0xff] }
 0x198   : > { %v1490_v13 = vpop.f32.mrf.mxu1  ;;  %v1683_v48 = vpop.f32.mrf.mxu0 }
 0x199   : > { %v2327_v43 = vpack.c.bf16 %v1783_v26, %v1782_v40  ;;  %v1682_v38 = vadd.f32 %v1681_v50, %v1489_v42  ;;  %v1491_v36 = vadd.f32 %v1490_v13, %v3017_v52  ;;  %v1784_v46 = vmax.f32 %v1680_v57, 0.0  ;;  %v3378_v42 = vld [vmem:[#allocation5_spill] sm:$0xff] }
 0x19a   : > { %v1492_v21 = vpop.f32.mrf.mxu1  ;;  %v1685_v24 = vpop.f32.mrf.mxu0 }
 0x19b   : > { %2024 = vst.msk [vmem:[%s3158_s21 + $0x88] sm:$0xff] %vm3161_vm3, %v2327_v43  ;;  %v1785_v16 = vmax.f32 %v1682_v38, 0.0  ;;  %v1684_v45 = vadd.f32 %v1683_v48, %v1491_v36  ;;  %v1493_v44 = vadd.f32 %v1492_v21, %v3022_v55 }
 0x19c   : > { %v1496_v27 = vpop.f32.mrf.mxu1  ;;  %v1689_v11 = vpop.f32.mrf.mxu0 }
 0x19d   : > { %v2328_v49 = vpack.c.bf16 %v1785_v16, %v1784_v46  ;;  %v1686_v1 = vadd.f32 %v1685_v24, %v1493_v44  ;;  %v1497_v33 = vadd.f32 %v1496_v27, %v3027_v58  ;;  %v1786_v52 = vmax.f32 %v1684_v45, 0.0  ;;  %v3379_v24 = vld [vmem:[#allocation6_spill] sm:$0xff] }
 0x19e   : > { %v1498_v53 = vpop.f32.mrf.mxu1  ;;  %v1691_v30 = vpop.f32.mrf.mxu0 }
 0x19f   : > { %2025 = vst.msk [vmem:[%s3158_s21 + $0x90] sm:$0xff] %vm3161_vm3, %v2328_v49  ;;  %v1787_v20 = vmax.f32 %v1686_v1, 0.0  ;;  %v1690_v18 = vadd.f32 %v1689_v11, %v1497_v33  ;;  %v1499_v4 = vadd.f32 %v1498_v53, %v3032_v61  ;;  %v3380_v11 = vld [vmem:[#allocation7_spill] sm:$0xff] }
 0x1a0   : > { %v1500_v60 = vpop.f32.mrf.mxu1  ;;  %v1693_v54 = vpop.f32.mrf.mxu0 }
 0x1a1   : > { %v2329_v55 = vpack.c.bf16 %v1787_v20, %v1786_v52  ;;  %v1692_v19 = vadd.f32 %v1691_v30, %v1499_v4  ;;  %v1501_v5 = vadd.f32 %v1500_v60, %v3037_v0  ;;  %v1788_v58 = vmax.f32 %v1690_v18, 0.0  ;;  %v3381_v20 = vld [vmem:[#allocation8_spill] sm:$0xff] }
 0x1a2   : > { %v1502_v56 = vpop.f32.mrf.mxu1  ;;  %v1695_v63 = vpop.f32.mrf.mxu0 }
 0x1a3   : > { %2026 = vst.msk [vmem:[%s3158_s21 + $0x98] sm:$0xff] %vm3161_vm3, %v2329_v55  ;;  %v1789_v31 = vmax.f32 %v1692_v19, 0.0  ;;  %v1694_v29 = vadd.f32 %v1693_v54, %v1501_v5  ;;  %v1503_v2 = vadd.f32 %v1502_v56, %v3042_v3  ;;  %v3382_v19 = vld [vmem:[#allocation9_spill] sm:$0xff] }
 0x1a4   : > { %v1506_v22 = vpop.f32.mrf.mxu1  ;;  %v1699_v14 = vpop.f32.mrf.mxu0 }
 0x1a5   : > { %v2330_v61 = vpack.c.bf16 %v1789_v31, %v1788_v58  ;;  %v1696_v23 = vadd.f32 %v1695_v63, %v1503_v2  ;;  %v1507_v9 = vadd.f32 %v1506_v22, %v3047_v6  ;;  %v1790_v0 = vmax.f32 %v1694_v29, 0.0  ;;  %v3383_v2 = vld [vmem:[#allocation10_spill] sm:$0xff] }
 0x1a6   : > { %v1508_v32 = vpop.f32.mrf.mxu1  ;;  %v1701_v7 = vpop.f32.mrf.mxu0 }
 0x1a7   : > { %2027 = vst.msk [vmem:[%s3158_s21 + $0xa0] sm:$0xff] %vm3161_vm3, %v2330_v61  ;;  %v1791_v39 = vmax.f32 %v1696_v23, 0.0  ;;  %v1700_v8 = vadd.f32 %v1699_v14, %v1507_v9  ;;  %v1509_v47 = vadd.f32 %v1508_v32, %v3375_v51  ;;  %v3384_v32 = vld [vmem:[#allocation11_spill] sm:$0xff] }
 0x1a8   : > { %v1510_v25 = vpop.f32.mrf.mxu1  ;;  %v1703_v34 = vpop.f32.mrf.mxu0 }
 0x1a9   : > { %v2331_v3 = vpack.c.bf16 %v1791_v39, %v1790_v0  ;;  %v1702_v17 = vadd.f32 %v1701_v7, %v1509_v47  ;;  %v1511_v59 = vadd.f32 %v1510_v25, %v3376_v10  ;;  %v1792_v6 = vmax.f32 %v1700_v8, 0.0  ;;  %v3385_v25 = vld [vmem:[#allocation12_spill] sm:$0xff] }
 0x1aa   : > { %v1512_v12 = vpop.f32.mrf.mxu1  ;;  %v1705_v28 = vpop.f32.mrf.mxu0 }
 0x1ab   : > { %2028 = vst.msk [vmem:[%s3158_s21 + $0xa8] sm:$0xff] %vm3161_vm3, %v2331_v3  ;;  %v1793_v37 = vmax.f32 %v1702_v17, 0.0  ;;  %v1704_v15 = vadd.f32 %v1703_v34, %v1511_v59  ;;  %v1513_v62 = vadd.f32 %v1512_v12, %v3377_v35  ;;  %v3386_v12 = vld [vmem:[#allocation13_spill] sm:$0xff] }
 0x1ac   : > { %v1516_v50 = vpop.f32.mrf.mxu1  ;;  %v1709_v40 = vpop.f32.mrf.mxu0 }
 0x1ad   : > { %v2332_v26 = vpack.c.bf16 %v1793_v37, %v1792_v6  ;;  %v1706_v57 = vadd.f32 %v1705_v28, %v1513_v62  ;;  %v1517_v13 = vadd.f32 %v1516_v50, %v3378_v42  ;;  %v1794_v38 = vmax.f32 %v1704_v15, 0.0  ;;  %v3387_v50 = vld [vmem:[#allocation14_spill] sm:$0xff] }
 0x1ae   : > { %v1518_v48 = vpop.f32.mrf.mxu1  ;;  %v1711_v43 = vpop.f32.mrf.mxu0 }
 0x1af   : > { %2029 = vst.msk [vmem:[%s3158_s21 + $0xb0] sm:$0xff] %vm3161_vm3, %v2332_v26  ;;  %v1795_v36 = vmax.f32 %v1706_v57, 0.0  ;;  %v1710_v21 = vadd.f32 %v1709_v40, %v1517_v13  ;;  %v1519_v46 = vadd.f32 %v1518_v48, %v3379_v24  ;;  %v3388_v48 = vld [vmem:[#allocation15_spill] sm:$0xff] }
 0x1b0   : > { %v1520_v16 = vpop.f32.mrf.mxu1  ;;  %v1713_v45 = vpop.f32.mrf.mxu0 }
 0x1b1   : > { %v2333_v44 = vpack.c.bf16 %v1795_v36, %v1794_v38  ;;  %v1712_v27 = vadd.f32 %v1711_v43, %v1519_v46  ;;  %v1521_v49 = vadd.f32 %v1520_v16, %v3380_v11  ;;  %v1796_v53 = vmax.f32 %v1710_v21, 0.0  ;;  %v3389_v16 = vld [vmem:[#allocation16_spill] sm:$0xff] }
 0x1b2   : > { %v1522_v1 = vpop.f32.mrf.mxu1  ;;  %v1715_v33 = vpop.f32.mrf.mxu0 }
 0x1b3   : > { %2030 = vst.msk [vmem:[%s3158_s21 + $0xb8] sm:$0xff] %vm3161_vm3, %v2333_v44  ;;  %v1797_v30 = vmax.f32 %v1712_v27, 0.0  ;;  %v1714_v52 = vadd.f32 %v1713_v45, %v1521_v49  ;;  %v1523_v18 = vadd.f32 %v1522_v1, %v3381_v20  ;;  %v3390_v1 = vld [vmem:[#allocation17_spill] sm:$0xff] }
 0x1b4   : > { %v1526_v4 = vpop.f32.mrf.mxu1  ;;  %v1719_v60 = vpop.f32.mrf.mxu0 }
 0x1b5   : > { %v2334_v54 = vpack.c.bf16 %v1797_v30, %v1796_v53  ;;  %v1716_v55 = vadd.f32 %v1715_v33, %v1523_v18  ;;  %v1527_v5 = vadd.f32 %v1526_v4, %v3382_v19  ;;  %v1798_v58 = vmax.f32 %v1714_v52, 0.0  ;;  %v3391_v4 = vld [vmem:[#allocation18_spill] sm:$0xff] }
 0x1b6   : > { %v1528_v56 = vpop.f32.mrf.mxu1  ;;  %v1721_v63 = vpop.f32.mrf.mxu0 }
 0x1b7   : > { %2031 = vst.msk [vmem:[%s3158_s21 + $0xc0] sm:$0xff] %vm3161_vm3, %v2334_v54  ;;  %v1799_v31 = vmax.f32 %v1716_v55, 0.0  ;;  %v1720_v29 = vadd.f32 %v1719_v60, %v1527_v5  ;;  %v1529_v22 = vadd.f32 %v1528_v56, %v3383_v2  ;;  %v3392_v56 = vld [vmem:[#allocation19_spill] sm:$0xff] }
 0x1b8   : > { %v1530_v14 = vpop.f32.mrf.mxu1  ;;  %v1723_v61 = vpop.f32.mrf.mxu0 }
 0x1b9   : > { %v2335_v23 = vpack.c.bf16 %v1799_v31, %v1798_v58  ;;  %v1722_v9 = vadd.f32 %v1721_v63, %v1529_v22  ;;  %v1531_v7 = vadd.f32 %v1530_v14, %v3384_v32  ;;  %v1800_v8 = vmax.f32 %v1720_v29, 0.0  ;;  %v3393_v22 = vld [vmem:[#allocation20_spill] sm:$0xff] }
 0x1ba   : > { %v1532_v0 = vpop.f32.mrf.mxu1  ;;  %v1725_v39 = vpop.f32.mrf.mxu0 }
 0x1bb   : > { %2032 = vst.msk [vmem:[%s3158_s21 + $0xc8] sm:$0xff] %vm3161_vm3, %v2335_v23  ;;  %v1801_v51 = vmax.f32 %v1722_v9, 0.0  ;;  %v1724_v47 = vadd.f32 %v1723_v61, %v1531_v7  ;;  %v1533_v34 = vadd.f32 %v1532_v0, %v3385_v25 }
 0x1bc   : > { %v1536_v3 = vpop.f32.mrf.mxu1  ;;  %v1729_v17 = vpop.f32.mrf.mxu0 }
 0x1bd   : > { %v2336_v10 = vpack.c.bf16 %v1801_v51, %v1800_v8  ;;  %v1726_v59 = vadd.f32 %v1725_v39, %v1533_v34  ;;  %v1537_v28 = vadd.f32 %v1536_v3, %v3386_v12  ;;  %v1802_v15 = vmax.f32 %v1724_v47, 0.0 }
 0x1be   : > { %v1538_v6 = vpop.f32.mrf.mxu1  ;;  %v1731_v37 = vpop.f32.mrf.mxu0 }
 0x1bf   : > { %2033 = vst.msk [vmem:[%s3158_s21 + $0xd0] sm:$0xff] %vm3161_vm3, %v2336_v10  ;;  %v1803_v35 = vmax.f32 %v1726_v59, 0.0  ;;  %v1730_v62 = vadd.f32 %v1729_v17, %v1537_v28  ;;  %v1539_v40 = vadd.f32 %v1538_v6, %v3387_v50 }
 0x1c0   : > { %v1540_v26 = vpop.f32.mrf.mxu1  ;;  %v1733_v57 = vpop.f32.mrf.mxu0 }
 0x1c1   : > { %v2337_v42 = vpack.c.bf16 %v1803_v35, %v1802_v15  ;;  %v1732_v13 = vadd.f32 %v1731_v37, %v1539_v40  ;;  %v1541_v43 = vadd.f32 %v1540_v26, %v3388_v48  ;;  %v1804_v21 = vmax.f32 %v1730_v62, 0.0 }
 0x1c2   : > { %v1542_v38 = vpop.f32.mrf.mxu1  ;;  %v1735_v36 = vpop.f32.mrf.mxu0 }
 0x1c3   : > { %2034 = vst.msk [vmem:[%s3158_s21 + $0xd8] sm:$0xff] %vm3161_vm3, %v2337_v42  ;;  %v1805_v24 = vmax.f32 %v1732_v13, 0.0  ;;  %v1734_v46 = vadd.f32 %v1733_v57, %v1541_v43  ;;  %v1543_v45 = vadd.f32 %v1542_v38, %v3389_v16 }
 0x1c4   : > { %v1546_v44 = vpop.f32.mrf.mxu1  ;;  %v1739_v27 = vpop.f32.mrf.mxu0 }
 0x1c5   : > { %v2338_v11 = vpack.c.bf16 %v1805_v24, %v1804_v21  ;;  %v1736_v49 = vadd.f32 %v1735_v36, %v1543_v45  ;;  %v1547_v33 = vadd.f32 %v1546_v44, %v3390_v1  ;;  %v1806_v52 = vmax.f32 %v1734_v46, 0.0 }
 0x1c6   : > { %v1548_v53 = vpop.f32.mrf.mxu1  ;;  %v1741_v30 = vpop.f32.mrf.mxu0 }
 0x1c7   : > { %2035 = vst.msk [vmem:[%s3158_s21 + $0xe0] sm:$0xff] %vm3161_vm3, %v2338_v11  ;;  %v1807_v20 = vmax.f32 %v1736_v49, 0.0  ;;  %v1740_v18 = vadd.f32 %v1739_v27, %v1547_v33  ;;  %v1549_v60 = vadd.f32 %v1548_v53, %v3391_v4 }
 0x1c8   : > { %v1550_v54 = vpop.f32.mrf.mxu1  ;;  %v1743_v55 = vpop.f32.mrf.mxu0 }
 0x1c9   : > { %v2339_v19 = vpack.c.bf16 %v1807_v20, %v1806_v52  ;;  %v1742_v5 = vadd.f32 %v1741_v30, %v1549_v60  ;;  %v1551_v63 = vadd.f32 %v1550_v54, %v3392_v56  ;;  %v1808_v31 = vmax.f32 %v1740_v18, 0.0 }
 0x1ca   : > { %v1552_v58 = vpop.f32.mrf.mxu1  ;;  %v1745_v61 = vpop.f32.mrf.mxu0 }
 0x1cb   : > { %2036 = vst.msk [vmem:[%s3158_s21 + $0xe8] sm:$0xff] %vm3161_vm3, %v2339_v19  ;;  %v1809_v29 = vmax.f32 %v1742_v5, 0.0  ;;  %v1744_v2 = vadd.f32 %v1743_v55, %v1551_v63  ;;  %v1553_v14 = vadd.f32 %v1552_v58, %v3393_v22 }
 0x1cd   : > { %v2340_v23 = vpack.c.bf16 %v1809_v29, %v1808_v31  ;;  %v1746_v9 = vadd.f32 %v1745_v61, %v1553_v14  ;;  %v1810_v32 = vmax.f32 %v1744_v2, 0.0 }
 0x1cf   : > { %2037 = vst.msk [vmem:[%s3158_s21 + $0xf0] sm:$0xff] %vm3161_vm3, %v2340_v23  ;;  %v1811_v7 = vmax.f32 %v1746_v9, 0.0 }
 0x1d1   : > { %v2341_v0 = vpack.c.bf16 %v1811_v7, %v1810_v32 }
 0x1d3   : > { %2038 = vst.msk [vmem:[%s3158_s21 + $0xf8] sm:$0xff] %vm3161_vm3, %v2341_v0 }
 0x1d4 PF: > { %s13_s12 = sadd.s32 1, %s2610_s12  }
 0x1d5   : > { %p10_p4 = scmp.ge.s32.totalorder %s13_s12, 4  }
 0x1d7   :  { %12 = sbr.rel (!%p10_p4) target bundleno = 1 (0x1), region = 62 }

// kernel: net_forward.40
= control target key start
LH: loop header
LB: loop body
LE: loop exit
PB: predicated region body
PF: predicated region fallthrough
CT: control target
= control target key end

     0   :  { %s1126_s12 = smov 0   ;;  %s1372_s0 = inlined_call_operand.vmem [shape: bf16[128,192], index: 0, kind: input, shape index: {}]   ;;  %s1373_s1 = inlined_call_operand.vmem [shape: bf16[192,512], index: 1, kind: input, shape index: {}]   ;;  %s1374_s2 = inlined_call_operand.vmem [shape: f32[1,512], index: 2, kind: input, shape index: {}]   ;;  %s1375_s3 = inlined_call_operand.vmem [shape: bf16[128,512], index: 3, kind: output, shape index: {}]  }
   0x1 LB: > { %s895_s13 = sadd.s32 4294967295, %s1104_s12   ;;  %p899_p0 = scmp.ge.s32.totalorder %s1104_s12, 1  ;;  %s1104_s12 = sphi %s1126_s12, %s13_s12  }
   0x2   : > { %p139_p1 = scmp.lt.s32.totalorder %s1104_s12, 3 }
   0x4   : > { %p140_p2 = pnand %p899_p0, %p139_p1 }
   0x5   : > { %s900_s4 = sshll.u32 (!%p140_p2), %s895_s13, 3 }
   0x6   : > { %143 = sbr.rel (%p140_p2) target bundleno = 290 (0x122), region = 32  ;;  %p166_p3 = scmp.lt.s32.totalorder (!%p140_p2), %s900_s4, 15 }
   0xb   : > { %v1014_v0 = vld [vmem:[%s1373_s1 + $0xe4] ss:$16 sps:$4 sm:$0xff]   ;;  %v1016_v1 = vld [vmem:[%s1373_s1 + $0xec] ss:$16 sps:$4 sm:$0xff]   ;;  %v1018_v2 = vld [vmem:[%s1373_s1 + $0xe0] ss:$16 sps:$4 sm:$0xff]   ;;  %v238_v56 = vlaneseq }
   0xc   : > { %547 = vmatprep.subr.bf16.mxu0 %v1014_v0  ;;  %v1019_v3 = vld [vmem:[%s1373_s1 + $0xe8] ss:$16 sps:$4 sm:$0xff]   ;;  %620 = vmatprep.subr.bf16.mxu1 %v1016_v1  ;;  %v1020_v4 = vld [vmem:[%s1373_s1 + $0xc4] ss:$16 sps:$4 sm:$0xff]   ;;  %v1022_v5 = vld [vmem:[%s1373_s1 + $0xcc] ss:$16 sps:$4 sm:$0xff]  }
   0xd   : > { %548 = vmatpush1.bf16.msra.mxu0 %v1018_v2  ;;  %621 = vmatpush1.bf16.msra.mxu1 %v1019_v3  ;;  %v1024_v6 = vld [vmem:[%s1373_s1 + $0xc0] ss:$16 sps:$4 sm:$0xff]   ;;  %v1025_v7 = vld [vmem:[%s1373_s1 + $0xc8] ss:$16 sps:$4 sm:$0xff]   ;;  %v1026_v8 = vld [vmem:[%s1373_s1 + $0xa4] ss:$16 sps:$4 sm:$0xff]  }
   0xe   : > { %549 = vmatprep.subr.bf16.mxu0 %v1020_v4  ;;  %622 = vmatprep.subr.bf16.mxu1 %v1022_v5  ;;  %v1028_v9 = vld [vmem:[%s1373_s1 + $0xac] ss:$16 sps:$4 sm:$0xff]   ;;  %v1030_v10 = vld [vmem:[%s1373_s1 + $0xa0] ss:$16 sps:$4 sm:$0xff]   ;;  %v1031_v11 = vld [vmem:[%s1373_s1 + $0xa8] ss:$16 sps:$4 sm:$0xff]  }
   0xf   : > { %v1032_v12 = vld [vmem:[%s1373_s1 + $0x84] ss:$16 sps:$4 sm:$0xff]   ;;  %v1034_v13 = vld [vmem:[%s1373_s1 + $0x8c] ss:$16 sps:$4 sm:$0xff]   ;;  %v1036_v14 = vld [vmem:[%s1373_s1 + $0x80] ss:$16 sps:$4 sm:$0xff]  }
  0x10   : > { %v1037_v15 = vld [vmem:[%s1373_s1 + $0x88] ss:$16 sps:$4 sm:$0xff]   ;;  %v1038_v16 = vld [vmem:[%s1373_s1 + $0x64] ss:$16 sps:$4 sm:$0xff]   ;;  %v1040_v17 = vld [vmem:[%s1373_s1 + $0x6c] ss:$16 sps:$4 sm:$0xff]  }
  0x11   : > { %550 = vmatpush1.bf16.msra.mxu0 %v1024_v6  ;;  %623 = vmatpush1.bf16.msra.mxu1 %v1025_v7  ;;  %v1042_v18 = vld [vmem:[%s1373_s1 + $0x60] ss:$16 sps:$4 sm:$0xff]   ;;  %v1043_v19 = vld [vmem:[%s1373_s1 + $0x68] ss:$16 sps:$4 sm:$0xff]   ;;  %v1044_v20 = vld [vmem:[%s1373_s1 + $0x44] ss:$16 sps:$4 sm:$0xff]  }
  0x12   : > { %551 = vmatprep.subr.bf16.mxu0 %v1026_v8  ;;  %624 = vmatprep.subr.bf16.mxu1 %v1028_v9  ;;  %v1046_v21 = vld [vmem:[%s1373_s1 + $0x4c] ss:$16 sps:$4 sm:$0xff]   ;;  %v1048_v22 = vld [vmem:[%s1373_s1 + $0x40] ss:$16 sps:$4 sm:$0xff]   ;;  %v1049_v23 = vld [vmem:[%s1373_s1 + $0x48] ss:$16 sps:$4 sm:$0xff]  }
  0x13   : > { %v1050_v24 = vld [vmem:[%s1373_s1 + $0x24] ss:$16 sps:$4 sm:$0xff]   ;;  %v1052_v25 = vld [vmem:[%s1373_s1 + $0x2c] ss:$16 sps:$4 sm:$0xff]   ;;  %v1054_v26 = vld [vmem:[%s1373_s1 + $0x20] ss:$16 sps:$4 sm:$0xff]  }
  0x14   : > { %v1055_v27 = vld [vmem:[%s1373_s1 + $0x28] ss:$16 sps:$4 sm:$0xff]   ;;  %s1377_s4 = smov (!%p166_p3, %s900_s4), 15  ;;  %v1056_v28 = vld [vmem:[%s1373_s1 + $0x4] ss:$16 sps:$4 sm:$0xff]   ;;  %vm534_vm0 = vcmask 523264  }
  0x15   : > { %552 = vmatpush1.bf16.msra.mxu0 %v1030_v10  ;;  %625 = vmatpush1.bf16.msra.mxu1 %v1031_v11  ;;  %v1058_v29 = vld [vmem:[%s1373_s1 + $0xc] ss:$16 sps:$4 sm:$0xff]   ;;  %v1060_v30 = vld [vmem:[%s1373_s1] ss:$16 sps:$4 sm:$0xff]   ;;  %s988_s26 = sshll.u32 %s1377_s4, 3  ;;  %v239_v57 = vshrl.u32 %v238_v56, 7 }
  0x16   : > { %553 = vmatprep.subr.bf16.mxu0 %v1032_v12  ;;  %626 = vmatprep.subr.bf16.mxu1 %v1034_v13  ;;  %v1061_v31 = vld [vmem:[%s1373_s1 + $0x8] ss:$16 sps:$4 sm:$0xff]   ;;  %v1062_v32 = vld [vmem:[%s1373_s1 + $0x164] ss:$16 sps:$4 sm:$0xff]   ;;  %v1064_v33 = vld [vmem:[%s1373_s1 + $0x16c] ss:$16 sps:$4 sm:$0xff]   ;;  %s1244_s9 = scalar_lea.vmem %s1372_s0, %s988_s26 }
  0x17   : > { %v1066_v34 = vld [vmem:[%s1373_s1 + $0x160] ss:$16 sps:$4 sm:$0xff]   ;;  %v1067_v35 = vld [vmem:[%s1373_s1 + $0x168] ss:$16 sps:$4 sm:$0xff]   ;;  %v1068_v36 = vld [vmem:[%s1373_s1 + $0x144] ss:$16 sps:$4 sm:$0xff]  }
  0x18   : > { %v1070_v37 = vld [vmem:[%s1373_s1 + $0x14c] ss:$16 sps:$4 sm:$0xff]   ;;  %v1072_v39 = vld [vmem:[%s1373_s1 + $0x140] ss:$16 sps:$4 sm:$0xff]   ;;  %v1073_v40 = vld [vmem:[%s1373_s1 + $0x148] ss:$16 sps:$4 sm:$0xff]  }
  0x19   : > { %554 = vmatpush1.bf16.msra.mxu0 %v1036_v14  ;;  %627 = vmatpush1.bf16.msra.mxu1 %v1037_v15  ;;  %v1088_v38 = vld [vmem:[%s1244_s9 + $0x4] ss:$8 sps:$4 sm:$0xff]   ;;  %v1078_v43 = vld [vmem:[%s1373_s1 + $0x120] ss:$16 sps:$4 sm:$0xff]   ;;  %v1079_v44 = vld [vmem:[%s1373_s1 + $0x128] ss:$16 sps:$4 sm:$0xff]  }
  0x1a   : > { %555 = vmatprep.subr.bf16.mxu0 %v1038_v16  ;;  %628 = vmatprep.subr.bf16.mxu1 %v1040_v17  ;;  %v1074_v41 = vld [vmem:[%s1373_s1 + $0x124] ss:$16 sps:$4 sm:$0xff]   ;;  %v1076_v42 = vld [vmem:[%s1373_s1 + $0x12c] ss:$16 sps:$4 sm:$0xff]   ;;  %v1084_v47 = vld [vmem:[%s1373_s1 + $0x100] ss:$16 sps:$4 sm:$0xff]  }
  0x1b   : > { %962 = vmatprep.mubr.msk.bf16.mxu0 %vm534_vm0, %v1088_v38  ;;  %966 = vmatprep.mubr.msk.bf16.mxu1 %vm534_vm0, %v1088_v38  ;;  %v1080_v45 = vld [vmem:[%s1373_s1 + $0x104] ss:$16 sps:$4 sm:$0xff]   ;;  %v1082_v46 = vld [vmem:[%s1373_s1 + $0x10c] ss:$16 sps:$4 sm:$0xff]   ;;  %v1085_v48 = vld [vmem:[%s1373_s1 + $0x108] ss:$16 sps:$4 sm:$0xff]  }
  0x1c   : > { %v1086_v49 = vld [vmem:[%s1244_s9] ss:$8 sps:$4 sm:$0xff]   ;;  %v1089_v50 = vld [vmem:[%s1244_s9 + $0x14] ss:$8 sps:$4 sm:$0xff]   ;;  %v1091_v51 = vld [vmem:[%s1244_s9 + $0x10] ss:$8 sps:$4 sm:$0xff]  }
  0x1d   : > { %556 = vmatpush1.bf16.msra.mxu0 %v1042_v18  ;;  %629 = vmatpush1.bf16.msra.mxu1 %v1043_v19  ;;  %v1092_v52 = vld [vmem:[%s1244_s9 + $0x24] ss:$8 sps:$4 sm:$0xff]   ;;  %v1094_v53 = vld [vmem:[%s1244_s9 + $0x20] ss:$8 sps:$4 sm:$0xff]   ;;  %v1095_v54 = vld [vmem:[%s1244_s9 + $0x34] ss:$8 sps:$4 sm:$0xff]  }
  0x1e   : > { %557 = vmatprep.subr.bf16.mxu0 %v1044_v20  ;;  %630 = vmatprep.subr.bf16.mxu1 %v1046_v21  ;;  %v1097_v55 = vld [vmem:[%s1244_s9 + $0x30] ss:$8 sps:$4 sm:$0xff]   ;;  %v240_v58 = vsub.s32 0, %v239_v57  ;;  %v248_v59 = vsub.s32 2, %v239_v57  ;;  %v236_v60 = vld [vmem:[%s1374_s2] sm:$0xf] }
  0x1f   : > { %v244_v61 = vsub.s32 1, %v239_v57  ;;  %v252_v62 = vsub.s32 3, %v239_v57  ;;  %s989_s9 = sshll.u32 %s1377_s4, 4 }
  0x20   : > { %v1307_v63 = vrot.slane %v236_v60, %v240_v58  ;;  %v1309_v0 = vrot.slane %v236_v60, %v248_v59  ;;  %s1323_s19 = scalar_lea.vmem %s1375_s3, %s989_s9 }
  0x21   : > { %558 = vmatpush1.bf16.msra.mxu0 %v1048_v22  ;;  %631 = vmatpush1.bf16.msra.mxu1 %v1049_v23  ;;  %v1311_v1 = vrot.slane %v236_v60, %v244_v61  ;;  %v1313_v2 = vrot.slane %v236_v60, %v252_v62 }
  0x22   : > { %559 = vmatprep.subr.bf16.mxu0 %v1050_v24  ;;  %632 = vmatprep.subr.bf16.mxu1 %v1052_v25 }
  0x25   : > { %560 = vmatpush1.bf16.msra.mxu0 %v1054_v26  ;;  %633 = vmatpush1.bf16.msra.mxu1 %v1055_v27 }
  0x26   : > { %561 = vmatprep.subr.bf16.mxu0 %v1056_v28  ;;  %634 = vmatprep.subr.bf16.mxu1 %v1058_v29 }
  0x29   : > { %562 = vmatpush1.bf16.msra.mxu0 %v1060_v30  ;;  %635 = vmatpush1.bf16.msra.mxu1 %v1061_v31 }
  0x2a   : > { %571 = vmatprep.subr.bf16.mxu0 %v1062_v32  ;;  %644 = vmatprep.subr.bf16.mxu1 %v1064_v33 }
  0x2d   : > { %572 = vmatpush2.bf16.msra.mxu0 %v1066_v34  ;;  %645 = vmatpush2.bf16.msra.mxu1 %v1067_v35 }
  0x2e   : > { %573 = vmatprep.subr.bf16.mxu0 %v1068_v36  ;;  %646 = vmatprep.subr.bf16.mxu1 %v1070_v37 }
  0x31   : > { %574 = vmatpush2.bf16.msra.mxu0 %v1072_v39  ;;  %647 = vmatpush2.bf16.msra.mxu1 %v1073_v40 }
  0x32   : > { %575 = vmatprep.subr.bf16.mxu0 %v1074_v41  ;;  %648 = vmatprep.subr.bf16.mxu1 %v1076_v42 }
  0x35   : > { %576 = vmatpush2.bf16.msra.mxu0 %v1078_v43  ;;  %649 = vmatpush2.bf16.msra.mxu1 %v1079_v44 }
  0x36   : > { %577 = vmatprep.subr.bf16.mxu0 %v1080_v45  ;;  %650 = vmatprep.subr.bf16.mxu1 %v1082_v46 }
  0x39   : > { %578 = vmatpush2.bf16.msra.mxu0 %v1084_v47  ;;  %651 = vmatpush2.bf16.msra.mxu1 %v1085_v48 }
  0x3c   : > { %580 = vmatmul.mubr.bf16.vlgmr.msra.gmra.mxu0 %v1086_v49  ;;  %653 = vmatmul.mubr.bf16.vlgmr.msra.gmra.mxu1 %v1086_v49 }
  0x3d   : > { %963 = vmatprep.mubr.msk.bf16.mxu0 %vm534_vm0, %v1089_v50  ;;  %967 = vmatprep.mubr.msk.bf16.mxu1 %vm534_vm0, %v1089_v50 }
  0x44   : > { %590 = vmatmul.mubr.bf16.gmra.mxu0 %v1091_v51  ;;  %663 = vmatmul.mubr.bf16.gmra.mxu1 %v1091_v51 }
  0x45   : > { %964 = vmatprep.mubr.msk.bf16.mxu0 %vm534_vm0, %v1092_v52  ;;  %968 = vmatprep.mubr.msk.bf16.mxu1 %vm534_vm0, %v1092_v52 }
  0x4c   : > { %600 = vmatmul.mubr.bf16.gmra.mxu0 %v1094_v53  ;;  %673 = vmatmul.mubr.bf16.gmra.mxu1 %v1094_v53 }
  0x4d   : > { %965 = vmatprep.mubr.msk.bf16.mxu0 %vm534_vm0, %v1095_v54  ;;  %969 = vmatprep.mubr.msk.bf16.mxu1 %vm534_vm0, %v1095_v54 }
  0x54   : > { %610 = vmatmul.mubr.bf16.gmra.mxu0 %v1097_v55  ;;  %683 = vmatmul.mubr.bf16.gmra.mxu1 %v1097_v55 }
  0xfc   : > { %v581_v3 = vpop.f32.mrf.mxu0  ;;  %v654_v4 = vpop.f32.mrf.mxu1 }
  0xfd   : > { %v582_v5 = vadd.f32 %v581_v3, %v1307_v63  ;;  %v655_v6 = vadd.f32 %v654_v4, %v1309_v0 }
  0xfe   : > { %v583_v7 = vpop.f32.mrf.mxu0  ;;  %v656_v8 = vpop.f32.mrf.mxu1 }
  0xff   : > { %v584_v9 = vadd.f32 %v583_v7, %v1311_v1  ;;  %v657_v10 = vadd.f32 %v656_v8, %v1313_v2  ;;  %v693_v13 = vmax.f32 %v582_v5, 0.0  ;;  %v695_v14 = vmax.f32 %v655_v6, 0.0 }
 0x100   : > { %v585_v11 = vpop.f32.mrf.mxu0  ;;  %v658_v12 = vpop.f32.mrf.mxu1 }
 0x101   : > { %v694_v15 = vmax.f32 %v584_v9, 0.0  ;;  %v696_v16 = vmax.f32 %v657_v10, 0.0  ;;  %v586_v17 = vadd.f32 %v585_v11, %v1307_v63  ;;  %v659_v18 = vadd.f32 %v658_v12, %v1309_v0 }
 0x102   : > { %v587_v19 = vpop.f32.mrf.mxu0  ;;  %v660_v20 = vpop.f32.mrf.mxu1 }
 0x103   : > { %v990_v21 = vpack.c.bf16 %v694_v15, %v693_v13  ;;  %v991_v22 = vpack.c.bf16 %v696_v16, %v695_v14  ;;  %v588_v23 = vadd.f32 %v587_v19, %v1311_v1  ;;  %v661_v24 = vadd.f32 %v660_v20, %v1313_v2 }
 0x104   : > { %v591_v25 = vpop.f32.mrf.mxu0  ;;  %v664_v26 = vpop.f32.mrf.mxu1  ;;  %v697_v29 = vmax.f32 %v586_v17, 0.0  ;;  %v699_v30 = vmax.f32 %v659_v18, 0.0 }
 0x105   : > { %821 = vst [vmem:[%s1323_s19] sm:$0xff] %v990_v21  ;;  %822 = vst [vmem:[%s1323_s19 + $0x8] sm:$0xff] %v991_v22  ;;  %v592_v27 = vadd.f32 %v591_v25, %v1307_v63  ;;  %v665_v28 = vadd.f32 %v664_v26, %v1309_v0  ;;  %v698_v31 = vmax.f32 %v588_v23, 0.0  ;;  %v700_v32 = vmax.f32 %v661_v24, 0.0 }
 0x106   : > { %v593_v33 = vpop.f32.mrf.mxu0  ;;  %v666_v34 = vpop.f32.mrf.mxu1 }
 0x107   : > { %v594_v35 = vadd.f32 %v593_v33, %v1311_v1  ;;  %v667_v36 = vadd.f32 %v666_v34, %v1313_v2  ;;  %v992_v37 = vpack.c.bf16 %v698_v31, %v697_v29  ;;  %v993_v38 = vpack.c.bf16 %v700_v32, %v699_v30 }
 0x108   : > { %v595_v39 = vpop.f32.mrf.mxu0  ;;  %v668_v40 = vpop.f32.mrf.mxu1  ;;  %v701_v41 = vmax.f32 %v592_v27, 0.0  ;;  %v703_v42 = vmax.f32 %v665_v28, 0.0 }
 0x109   : > { %v702_v43 = vmax.f32 %v594_v35, 0.0  ;;  %v704_v44 = vmax.f32 %v667_v36, 0.0  ;;  %823 = vst [vmem:[%s1323_s19 + $0x10] sm:$0xff] %v992_v37  ;;  %824 = vst [vmem:[%s1323_s19 + $0x18] sm:$0xff] %v993_v38  ;;  %v596_v45 = vadd.f32 %v595_v39, %v1307_v63  ;;  %v669_v46 = vadd.f32 %v668_v40, %v1309_v0 }
 0x10a   : > { %v597_v47 = vpop.f32.mrf.mxu0  ;;  %v670_v48 = vpop.f32.mrf.mxu1 }
 0x10b   : > { %v994_v49 = vpack.c.bf16 %v702_v43, %v701_v41  ;;  %v995_v50 = vpack.c.bf16 %v704_v44, %v703_v42  ;;  %v598_v51 = vadd.f32 %v597_v47, %v1311_v1  ;;  %v671_v52 = vadd.f32 %v670_v48, %v1313_v2 }
 0x10c   : > { %v601_v53 = vpop.f32.mrf.mxu0  ;;  %v674_v54 = vpop.f32.mrf.mxu1  ;;  %v705_v57 = vmax.f32 %v596_v45, 0.0  ;;  %v707_v58 = vmax.f32 %v669_v46, 0.0 }
 0x10d   : > { %825 = vst [vmem:[%s1323_s19 + $0x20] sm:$0xff] %v994_v49  ;;  %826 = vst [vmem:[%s1323_s19 + $0x28] sm:$0xff] %v995_v50  ;;  %v602_v55 = vadd.f32 %v601_v53, %v1307_v63  ;;  %v675_v56 = vadd.f32 %v674_v54, %v1309_v0  ;;  %v706_v59 = vmax.f32 %v598_v51, 0.0  ;;  %v708_v60 = vmax.f32 %v671_v52, 0.0 }
 0x10e   : > { %v603_v61 = vpop.f32.mrf.mxu0  ;;  %v676_v62 = vpop.f32.mrf.mxu1 }
 0x10f   : > { %v604_v3 = vadd.f32 %v603_v61, %v1311_v1  ;;  %v677_v4 = vadd.f32 %v676_v62, %v1313_v2  ;;  %v996_v5 = vpack.c.bf16 %v706_v59, %v705_v57  ;;  %v997_v6 = vpack.c.bf16 %v708_v60, %v707_v58 }
 0x110   : > { %v605_v7 = vpop.f32.mrf.mxu0  ;;  %v678_v8 = vpop.f32.mrf.mxu1  ;;  %v709_v9 = vmax.f32 %v602_v55, 0.0  ;;  %v711_v10 = vmax.f32 %v675_v56, 0.0 }
 0x111   : > { %v710_v11 = vmax.f32 %v604_v3, 0.0  ;;  %v712_v12 = vmax.f32 %v677_v4, 0.0  ;;  %827 = vst [vmem:[%s1323_s19 + $0x30] sm:$0xff] %v996_v5  ;;  %828 = vst [vmem:[%s1323_s19 + $0x38] sm:$0xff] %v997_v6  ;;  %v606_v13 = vadd.f32 %v605_v7, %v1307_v63  ;;  %v679_v14 = vadd.f32 %v678_v8, %v1309_v0 }
 0x112   : > { %v607_v15 = vpop.f32.mrf.mxu0  ;;  %v680_v16 = vpop.f32.mrf.mxu1 }
 0x113   : > { %v998_v17 = vpack.c.bf16 %v710_v11, %v709_v9  ;;  %v999_v18 = vpack.c.bf16 %v712_v12, %v711_v10  ;;  %v608_v19 = vadd.f32 %v607_v15, %v1311_v1  ;;  %v681_v20 = vadd.f32 %v680_v16, %v1313_v2 }
 0x114   : > { %v611_v21 = vpop.f32.mrf.mxu0  ;;  %v684_v22 = vpop.f32.mrf.mxu1  ;;  %v713_v25 = vmax.f32 %v606_v13, 0.0  ;;  %v715_v26 = vmax.f32 %v679_v14, 0.0 }
 0x115   : > { %829 = vst [vmem:[%s1323_s19 + $0x40] sm:$0xff] %v998_v17  ;;  %830 = vst [vmem:[%s1323_s19 + $0x48] sm:$0xff] %v999_v18  ;;  %v612_v23 = vadd.f32 %v611_v21, %v1307_v63  ;;  %v685_v24 = vadd.f32 %v684_v22, %v1309_v0  ;;  %v714_v27 = vmax.f32 %v608_v19, 0.0  ;;  %v716_v28 = vmax.f32 %v681_v20, 0.0 }
 0x116   : > { %v613_v29 = vpop.f32.mrf.mxu0  ;;  %v686_v30 = vpop.f32.mrf.mxu1 }
 0x117   : > { %v614_v31 = vadd.f32 %v613_v29, %v1311_v1  ;;  %v687_v32 = vadd.f32 %v686_v30, %v1313_v2  ;;  %v1000_v33 = vpack.c.bf16 %v714_v27, %v713_v25  ;;  %v1001_v34 = vpack.c.bf16 %v716_v28, %v715_v26 }
 0x118   : > { %v615_v35 = vpop.f32.mrf.mxu0  ;;  %v688_v36 = vpop.f32.mrf.mxu1  ;;  %v717_v37 = vmax.f32 %v612_v23, 0.0  ;;  %v719_v38 = vmax.f32 %v685_v24, 0.0 }
 0x119   : > { %v718_v39 = vmax.f32 %v614_v31, 0.0  ;;  %v720_v40 = vmax.f32 %v687_v32, 0.0  ;;  %831 = vst [vmem:[%s1323_s19 + $0x50] sm:$0xff] %v1000_v33  ;;  %832 = vst [vmem:[%s1323_s19 + $0x58] sm:$0xff] %v1001_v34  ;;  %v616_v41 = vadd.f32 %v615_v35, %v1307_v63  ;;  %v689_v42 = vadd.f32 %v688_v36, %v1309_v0 }
 0x11a   : > { %v617_v43 = vpop.f32.mrf.mxu0  ;;  %v690_v44 = vpop.f32.mrf.mxu1 }
 0x11b   : > { %v1002_v45 = vpack.c.bf16 %v718_v39, %v717_v37  ;;  %v1003_v46 = vpack.c.bf16 %v720_v40, %v719_v38  ;;  %v618_v47 = vadd.f32 %v617_v43, %v1311_v1  ;;  %v691_v48 = vadd.f32 %v690_v44, %v1313_v2 }
 0x11c   : > { %v721_v49 = vmax.f32 %v616_v41, 0.0  ;;  %v723_v50 = vmax.f32 %v689_v42, 0.0 }
 0x11d   : > { %833 = vst [vmem:[%s1323_s19 + $0x60] sm:$0xff] %v1002_v45  ;;  %834 = vst [vmem:[%s1323_s19 + $0x68] sm:$0xff] %v1003_v46  ;;  %v722_v51 = vmax.f32 %v618_v47, 0.0  ;;  %v724_v52 = vmax.f32 %v691_v48, 0.0 }
 0x11f   : > { %v1004_v53 = vpack.c.bf16 %v722_v51, %v721_v49  ;;  %v1005_v63 = vpack.c.bf16 %v724_v52, %v723_v50 }
 0x121   : > { %835 = vst [vmem:[%s1323_s19 + $0x70] sm:$0xff] %v1004_v53  ;;  %836 = vst [vmem:[%s1323_s19 + $0x78] sm:$0xff] %v1005_v63 }
 0x122 PF: > { %s13_s12 = sadd.s32 1, %s1104_s12  }
 0x123   : > { %p10_p4 = scmp.ge.s32.totalorder %s13_s12, 4  }
 0x125   :  { %12 = sbr.rel (!%p10_p4) target bundleno = 1 (0x1), region = 62 }

// kernel: net_forward.39
= control target key start
LH: loop header
LB: loop body
LE: loop exit
PB: predicated region body
PF: predicated region fallthrough
CT: control target
= control target key end

     0   :  { %s3251_s12 = smov 0   ;;  %s4181_s0 = inlined_call_operand.vmem [shape: bf16[128,1728], index: 0, kind: input, shape index: {}]   ;;  %s4182_s1 = inlined_call_operand.vmem [shape: bf16[1728,192], index: 1, kind: input, shape index: {}]   ;;  %s4183_s2 = inlined_call_operand.vmem [shape: f32[1,192], index: 2, kind: input, shape index: {}]   ;;  %s4184_s3 = inlined_call_operand.vmem [shape: bf16[128,192], index: 3, kind: output, shape index: {}]  }
   0x1 LB: > { %s2477_s13 = sadd.s32 4294967295, %s3229_s12   ;;  %p2481_p0 = scmp.ge.s32.totalorder %s3229_s12, 1  ;;  %s3229_s12 = sphi %s3251_s12, %s13_s12  }
   0x2   : > { %p139_p1 = scmp.lt.s32.totalorder %s3229_s12, 3 }
   0x4   : > { %p140_p2 = pnand %p2481_p0, %p139_p1 }
   0x6   : > { %143 = sbr.rel (%p140_p2) target bundleno = 467 (0x1d3), region = 32 }
   0xb   : > { %v2815_v0 = vld [vmem:[%s4182_s1 + $0x74] ss:$8 sps:$4 sm:$0xff]   ;;  %v2819_v2 = vld [vmem:[%s4182_s1 + $0x70] ss:$8 sps:$4 sm:$0xff]   ;;  %v2821_v4 = vld [vmem:[%s4182_s1 + $0x64] ss:$8 sps:$4 sm:$0xff]  }
   0xc   : > { %v2817_v1 = vld [vmem:[%s4182_s1 + $0x174] ss:$8 sps:$4 sm:$0xff]   ;;  %1833 = vmatprep.subr.bf16.mxu0 %v2815_v0  ;;  %v2820_v3 = vld [vmem:[%s4182_s1 + $0x170] ss:$8 sps:$4 sm:$0xff]   ;;  %v2823_v5 = vld [vmem:[%s4182_s1 + $0x164] ss:$8 sps:$4 sm:$0xff]  }
   0xd   : > { %1906 = vmatprep.subr.bf16.mxu1 %v2817_v1  ;;  %1834 = vmatpush1.bf16.msra.mxu0 %v2819_v2  ;;  %v2825_v6 = vld [vmem:[%s4182_s1 + $0x60] ss:$8 sps:$4 sm:$0xff]   ;;  %v2827_v8 = vld [vmem:[%s4182_s1 + $0x54] ss:$8 sps:$4 sm:$0xff]   ;;  %v2831_v10 = vld [vmem:[%s4182_s1 + $0x50] ss:$8 sps:$4 sm:$0xff]  }
   0xe   : > { %1907 = vmatpush1.bf16.msra.mxu1 %v2820_v3  ;;  %1835 = vmatprep.subr.bf16.mxu0 %v2821_v4  ;;  %v2826_v7 = vld [vmem:[%s4182_s1 + $0x160] ss:$8 sps:$4 sm:$0xff]   ;;  %v2829_v9 = vld [vmem:[%s4182_s1 + $0x154] ss:$8 sps:$4 sm:$0xff]   ;;  %v2832_v11 = vld [vmem:[%s4182_s1 + $0x150] ss:$8 sps:$4 sm:$0xff]  }
   0xf   : > { %1908 = vmatprep.subr.bf16.mxu1 %v2823_v5  ;;  %v2833_v12 = vld [vmem:[%s4182_s1 + $0x44] ss:$8 sps:$4 sm:$0xff]   ;;  %v2837_v14 = vld [vmem:[%s4182_s1 + $0x40] ss:$8 sps:$4 sm:$0xff]   ;;  %v2839_v16 = vld [vmem:[%s4182_s1 + $0x34] ss:$8 sps:$4 sm:$0xff]  }
  0x10   : > { %v2835_v13 = vld [vmem:[%s4182_s1 + $0x144] ss:$8 sps:$4 sm:$0xff]   ;;  %v2838_v15 = vld [vmem:[%s4182_s1 + $0x140] ss:$8 sps:$4 sm:$0xff]   ;;  %v2841_v17 = vld [vmem:[%s4182_s1 + $0x134] ss:$8 sps:$4 sm:$0xff]  }
  0x11   : > { %1836 = vmatpush1.bf16.msra.mxu0 %v2825_v6  ;;  %v2843_v18 = vld [vmem:[%s4182_s1 + $0x30] ss:$8 sps:$4 sm:$0xff]   ;;  %v2845_v20 = vld [vmem:[%s4182_s1 + $0x24] ss:$8 sps:$4 sm:$0xff]   ;;  %v2849_v22 = vld [vmem:[%s4182_s1 + $0x20] ss:$8 sps:$4 sm:$0xff]  }
  0x12   : > { %1909 = vmatpush1.bf16.msra.mxu1 %v2826_v7  ;;  %1837 = vmatprep.subr.bf16.mxu0 %v2827_v8  ;;  %v2844_v19 = vld [vmem:[%s4182_s1 + $0x130] ss:$8 sps:$4 sm:$0xff]   ;;  %v2847_v21 = vld [vmem:[%s4182_s1 + $0x124] ss:$8 sps:$4 sm:$0xff]   ;;  %v2850_v23 = vld [vmem:[%s4182_s1 + $0x120] ss:$8 sps:$4 sm:$0xff]  }
  0x13   : > { %1910 = vmatprep.subr.bf16.mxu1 %v2829_v9  ;;  %v2851_v24 = vld [vmem:[%s4182_s1 + $0x14] ss:$8 sps:$4 sm:$0xff]   ;;  %v2855_v26 = vld [vmem:[%s4182_s1 + $0x10] ss:$8 sps:$4 sm:$0xff]   ;;  %v2857_v28 = vld [vmem:[%s4182_s1 + $0x4] ss:$8 sps:$4 sm:$0xff]  }
  0x14   : > { %v2853_v25 = vld [vmem:[%s4182_s1 + $0x114] ss:$8 sps:$4 sm:$0xff]   ;;  %v2856_v27 = vld [vmem:[%s4182_s1 + $0x110] ss:$8 sps:$4 sm:$0xff]   ;;  %v2859_v29 = vld [vmem:[%s4182_s1 + $0x104] ss:$8 sps:$4 sm:$0xff]  }
  0x15   : > { %1838 = vmatpush1.bf16.msra.mxu0 %v2831_v10  ;;  %s2482_s24 = sshll.u32 %s2477_s13, 3  ;;  %v2861_v30 = vld [vmem:[%s4182_s1] ss:$8 sps:$4 sm:$0xff]   ;;  %v2863_v32 = vld [vmem:[%s4182_s1 + $0xf4] ss:$8 sps:$4 sm:$0xff]   ;;  %vm1820_vm0 = vcmask 523264  }
  0x16   : > { %1911 = vmatpush1.bf16.msra.mxu1 %v2832_v11  ;;  %1839 = vmatprep.subr.bf16.mxu0 %v2833_v12  ;;  %v2862_v31 = vld [vmem:[%s4182_s1 + $0x100] ss:$8 sps:$4 sm:$0xff]   ;;  %p166_p3 = scmp.lt.s32.totalorder %s2482_s24, 15  ;;  %v2865_v33 = vld [vmem:[%s4182_s1 + $0x1f4] ss:$8 sps:$4 sm:$0xff]   ;;  %vm2408_vm1 = vcmask 1043456  }
  0x17   : > { %1912 = vmatprep.subr.bf16.mxu1 %v2835_v13  ;;  %v2867_v34 = vld [vmem:[%s4182_s1 + $0xf0] ss:$8 sps:$4 sm:$0xff]   ;;  %v2869_v36 = vld [vmem:[%s4182_s1 + $0xe4] ss:$8 sps:$4 sm:$0xff]   ;;  %v2873_v38 = vld [vmem:[%s4182_s1 + $0xe0] ss:$8 sps:$4 sm:$0xff]  }
  0x18   : > { %v2868_v35 = vld [vmem:[%s4182_s1 + $0x1f0] ss:$8 sps:$4 sm:$0xff]   ;;  %s4228_s24 = smov (!%p166_p3, %s2482_s24), 15  ;;  %v2871_v37 = vld [vmem:[%s4182_s1 + $0x1e4] ss:$8 sps:$4 sm:$0xff]   ;;  %vm2409_vm2 = vcmask 523268  }
  0x19   : > { %1840 = vmatpush1.bf16.msra.mxu0 %v2837_v14  ;;  %v2874_v39 = vld [vmem:[%s4182_s1 + $0x1e0] ss:$8 sps:$4 sm:$0xff]   ;;  %v2875_v40 = vld [vmem:[%s4182_s1 + $0xd4] ss:$8 sps:$4 sm:$0xff]   ;;  %s2806_s21 = smul.u32 56, %s4228_s24  ;;  %vm4141_vm3 = vmor %vm2409_vm2, %vm2408_vm1 }
  0x1a   : > { %1913 = vmatpush1.bf16.msra.mxu1 %v2838_v15  ;;  %1841 = vmatprep.subr.bf16.mxu0 %v2839_v16  ;;  %v2877_v41 = vld [vmem:[%s4182_s1 + $0x1d4] ss:$8 sps:$4 sm:$0xff]   ;;  %v2879_v42 = vld [vmem:[%s4182_s1 + $0xd0] ss:$8 sps:$4 sm:$0xff]   ;;  %v2881_v44 = vld [vmem:[%s4182_s1 + $0xc4] ss:$8 sps:$4 sm:$0xff]  }
  0x1b   : > { %1914 = vmatprep.subr.bf16.mxu1 %v2841_v17  ;;  %v2880_v43 = vld [vmem:[%s4182_s1 + $0x1d0] ss:$8 sps:$4 sm:$0xff]   ;;  %s3402_s13 = scalar_lea.vmem %s4181_s0, %s2806_s21  ;;  %v2883_v45 = vld [vmem:[%s4182_s1 + $0x1c4] ss:$8 sps:$4 sm:$0xff]   ;;  %v2885_v46 = vld [vmem:[%s4182_s1 + $0xc0] ss:$8 sps:$4 sm:$0xff]  }
  0x1c   : > { %v2886_v47 = vld [vmem:[%s4182_s1 + $0x1c0] ss:$8 sps:$4 sm:$0xff]   ;;  %v2887_v48 = vld [vmem:[%s4182_s1 + $0xb4] ss:$8 sps:$4 sm:$0xff]   ;;  %v2916_v51 = vld [vmem:[%s3402_s13 + $0xc] ss:$56 sps:$4 sm:$0xff]  }
  0x1d   : > { %1842 = vmatpush1.bf16.msra.mxu0 %v2843_v18  ;;  %v2913_v49 = vld [vmem:[%s3402_s13 + $0x4] ss:$56 sps:$4 sm:$0xff]   ;;  %v2891_v52 = vld [vmem:[%s4182_s1 + $0xb0] ss:$8 sps:$4 sm:$0xff]   ;;  %1938 = vmatprep.mubr.bf16.mxu1 %v2916_v51  ;;  %v2897_v56 = vld [vmem:[%s4182_s1 + $0xa0] ss:$8 sps:$4 sm:$0xff]  }
  0x1e   : > { %1915 = vmatpush1.bf16.msra.mxu1 %v2844_v19  ;;  %1843 = vmatprep.subr.bf16.mxu0 %v2845_v20  ;;  %v2889_v50 = vld [vmem:[%s4182_s1 + $0x1b4] ss:$8 sps:$4 sm:$0xff]   ;;  %v2892_v53 = vld [vmem:[%s4182_s1 + $0x1b0] ss:$8 sps:$4 sm:$0xff]   ;;  %v2893_v54 = vld [vmem:[%s4182_s1 + $0xa4] ss:$8 sps:$4 sm:$0xff]  }
  0x1f   : > { %1916 = vmatprep.subr.bf16.mxu1 %v2847_v21  ;;  %1865 = vmatprep.mubr.bf16.mxu0 %v2913_v49  ;;  %v2895_v55 = vld [vmem:[%s4182_s1 + $0x1a4] ss:$8 sps:$4 sm:$0xff]   ;;  %v2898_v57 = vld [vmem:[%s4182_s1 + $0x1a0] ss:$8 sps:$4 sm:$0xff]   ;;  %v2899_v58 = vld [vmem:[%s4182_s1 + $0x94] ss:$8 sps:$4 sm:$0xff]  }
  0x20   : > { %v2901_v59 = vld [vmem:[%s4182_s1 + $0x194] ss:$8 sps:$4 sm:$0xff]   ;;  %v2903_v60 = vld [vmem:[%s4182_s1 + $0x90] ss:$8 sps:$4 sm:$0xff]   ;;  %v2905_v62 = vld [vmem:[%s4182_s1 + $0x84] ss:$8 sps:$4 sm:$0xff]  }
  0x21   : > { %1844 = vmatpush1.bf16.msra.mxu0 %v2849_v22  ;;  %v2904_v61 = vld [vmem:[%s4182_s1 + $0x190] ss:$8 sps:$4 sm:$0xff]   ;;  %v2907_v63 = vld [vmem:[%s4182_s1 + $0x184] ss:$8 sps:$4 sm:$0xff]   ;;  %v2909_v0 = vld [vmem:[%s4182_s1 + $0x80] ss:$8 sps:$4 sm:$0xff]  }
  0x22   : > { %1917 = vmatpush1.bf16.msra.mxu1 %v2850_v23  ;;  %1845 = vmatprep.subr.bf16.mxu0 %v2851_v24  ;;  %v2910_v1 = vld [vmem:[%s4182_s1 + $0x180] ss:$8 sps:$4 sm:$0xff]   ;;  %v2919_v2 = vld [vmem:[%s4182_s1 + $0x274] ss:$8 sps:$4 sm:$0xff]   ;;  %v2917_v6 = vld [vmem:[%s4182_s1 + $0x270] ss:$8 sps:$4 sm:$0xff]  }
  0x23   : > { %1918 = vmatprep.subr.bf16.mxu1 %v2853_v25  ;;  %v2922_v3 = vld [vmem:[%s4182_s1 + $0x374] ss:$8 sps:$4 sm:$0xff]   ;;  %v2911_v4 = vld [vmem:[%s3402_s13] ss:$56 sps:$4 sm:$0xff]   ;;  %v2925_v8 = vld [vmem:[%s4182_s1 + $0x264] ss:$8 sps:$4 sm:$0xff]  }
  0x24   : > { %v2914_v5 = vld [vmem:[%s3402_s13 + $0x8] ss:$56 sps:$4 sm:$0xff]   ;;  %v2920_v7 = vld [vmem:[%s4182_s1 + $0x370] ss:$8 sps:$4 sm:$0xff]   ;;  %v2928_v9 = vld [vmem:[%s4182_s1 + $0x364] ss:$8 sps:$4 sm:$0xff]  }
  0x25   : > { %1846 = vmatpush1.bf16.msra.mxu0 %v2855_v26  ;;  %v2923_v10 = vld [vmem:[%s4182_s1 + $0x260] ss:$8 sps:$4 sm:$0xff]   ;;  %v2965_v11 = vld [vmem:[%s3402_s13 + $0x74] ss:$56 sps:$4 sm:$0xff]   ;;  %v2929_v15 = vld [vmem:[%s4182_s1 + $0x250] ss:$8 sps:$4 sm:$0xff]  }
  0x26   : > { %1919 = vmatpush1.bf16.msra.mxu1 %v2856_v27  ;;  %1847 = vmatprep.subr.bf16.mxu0 %v2857_v28  ;;  %v2926_v12 = vld [vmem:[%s4182_s1 + $0x360] ss:$8 sps:$4 sm:$0xff]   ;;  %v2931_v13 = vld [vmem:[%s4182_s1 + $0x254] ss:$8 sps:$4 sm:$0xff]   ;;  %v2932_v16 = vld [vmem:[%s4182_s1 + $0x350] ss:$8 sps:$4 sm:$0xff]  }
  0x27   : > { %1920 = vmatprep.subr.bf16.mxu1 %v2859_v29  ;;  %v2934_v14 = vld [vmem:[%s4182_s1 + $0x354] ss:$8 sps:$4 sm:$0xff]   ;;  %v2973_v17 = vld [vmem:[%s3402_s13 + $0x70] ss:$56 sps:$4 sm:$0xff]   ;;  %v2937_v20 = vld [vmem:[%s4182_s1 + $0x244] ss:$8 sps:$4 sm:$0xff]  }
  0x28   : > { %v2974_v18 = vld [vmem:[%s3402_s13 + $0x7c] ss:$56 sps:$4 sm:$0xff]   ;;  %v2976_v19 = vld [vmem:[%s3402_s13 + $0x78] ss:$56 sps:$4 sm:$0xff]   ;;  %v2940_v21 = vld [vmem:[%s4182_s1 + $0x344] ss:$8 sps:$4 sm:$0xff]  }
  0x29   : > { %1848 = vmatpush1.bf16.msra.mxu0 %v2861_v30  ;;  %v2935_v22 = vld [vmem:[%s4182_s1 + $0x240] ss:$8 sps:$4 sm:$0xff]   ;;  %v2983_v23 = vld [vmem:[%s3402_s13 + $0xe4] ss:$56 sps:$4 sm:$0xff]   ;;  %v2941_v27 = vld [vmem:[%s4182_s1 + $0x230] ss:$8 sps:$4 sm:$0xff]  }
  0x2a   : > { %1921 = vmatpush1.bf16.msra.mxu1 %v2862_v31  ;;  %1849 = vmatprep.subr.bf16.mxu0 %v2863_v32  ;;  %v2938_v24 = vld [vmem:[%s4182_s1 + $0x340] ss:$8 sps:$4 sm:$0xff]   ;;  %v2943_v25 = vld [vmem:[%s4182_s1 + $0x234] ss:$8 sps:$4 sm:$0xff]   ;;  %v2944_v28 = vld [vmem:[%s4182_s1 + $0x330] ss:$8 sps:$4 sm:$0xff]  }
  0x2b   : > { %1922 = vmatprep.subr.bf16.mxu1 %v2865_v33  ;;  %v2946_v26 = vld [vmem:[%s4182_s1 + $0x334] ss:$8 sps:$4 sm:$0xff]   ;;  %v2991_v29 = vld [vmem:[%s3402_s13 + $0xe0] ss:$56 sps:$4 sm:$0xff]   ;;  %v2992_v30 = vld [vmem:[%s3402_s13 + $0xec] ss:$56 sps:$4 sm:$0xff]  }
  0x2c   : > { %v2994_v31 = vld [vmem:[%s3402_s13 + $0xe8] ss:$56 sps:$4 sm:$0xff]   ;;  %v2949_v32 = vld [vmem:[%s4182_s1 + $0x224] ss:$8 sps:$4 sm:$0xff]   ;;  %v2972_v49 = vld [vmem:[%s4182_s1 + $0x3f4] ss:$8 sps:$4 sm:$0xff]  }
  0x2d   : > { %1850 = vmatpush2.bf16.msra.mxu0 %v2867_v34  ;;  %v2952_v33 = vld [vmem:[%s4182_s1 + $0x324] ss:$8 sps:$4 sm:$0xff]   ;;  %v2947_v34 = vld [vmem:[%s4182_s1 + $0x220] ss:$8 sps:$4 sm:$0xff]   ;;  %v2970_v51 = vld [vmem:[%s4182_s1 + $0x3f0] ss:$8 sps:$4 sm:$0xff]  }
  0x2e   : > { %1923 = vmatpush2.bf16.msra.mxu1 %v2868_v35  ;;  %1851 = vmatprep.subr.bf16.mxu0 %v2869_v36  ;;  %v3001_v35 = vld [vmem:[%s3402_s13 + $0x154] ss:$56 sps:$4 sm:$0xff]   ;;  %v2950_v36 = vld [vmem:[%s4182_s1 + $0x320] ss:$8 sps:$4 sm:$0xff]  }
  0x2f   : > { %1924 = vmatprep.subr.bf16.mxu1 %v2871_v37  ;;  %v2955_v37 = vld [vmem:[%s4182_s1 + $0x214] ss:$8 sps:$4 sm:$0xff]  }
  0x31   : > { %1852 = vmatpush2.bf16.msra.mxu0 %v2873_v38  ;;  %v2958_v38 = vld [vmem:[%s4182_s1 + $0x314] ss:$8 sps:$4 sm:$0xff]  }
  0x32   : > { %1925 = vmatpush2.bf16.msra.mxu1 %v2874_v39  ;;  %1853 = vmatprep.subr.bf16.mxu0 %v2875_v40  ;;  %v2953_v39 = vld [vmem:[%s4182_s1 + $0x210] ss:$8 sps:$4 sm:$0xff]  }
  0x33   : > { %1926 = vmatprep.subr.bf16.mxu1 %v2877_v41  ;;  %v2956_v40 = vld [vmem:[%s4182_s1 + $0x310] ss:$8 sps:$4 sm:$0xff]  }
  0x34   : > { %v3009_v41 = vld [vmem:[%s3402_s13 + $0x150] ss:$56 sps:$4 sm:$0xff]  }
  0x35   : > { %1854 = vmatpush2.bf16.msra.mxu0 %v2879_v42  ;;  %v3010_v42 = vld [vmem:[%s3402_s13 + $0x15c] ss:$56 sps:$4 sm:$0xff]  }
  0x36   : > { %1927 = vmatpush2.bf16.msra.mxu1 %v2880_v43  ;;  %1855 = vmatprep.subr.bf16.mxu0 %v2881_v44  ;;  %v3012_v43 = vld [vmem:[%s3402_s13 + $0x158] ss:$56 sps:$4 sm:$0xff]   ;;  %v2961_v44 = vld [vmem:[%s4182_s1 + $0x204] ss:$8 sps:$4 sm:$0xff]  }
  0x37   : > { %1928 = vmatprep.subr.bf16.mxu1 %v2883_v45  ;;  %v2964_v45 = vld [vmem:[%s4182_s1 + $0x304] ss:$8 sps:$4 sm:$0xff]  }
  0x39   : > { %1856 = vmatpush2.bf16.msra.mxu0 %v2885_v46  ;;  %v2959_v46 = vld [vmem:[%s4182_s1 + $0x200] ss:$8 sps:$4 sm:$0xff]  }
  0x3a   : > { %1929 = vmatpush2.bf16.msra.mxu1 %v2886_v47  ;;  %1857 = vmatprep.subr.bf16.mxu0 %v2887_v48  ;;  %v2962_v47 = vld [vmem:[%s4182_s1 + $0x300] ss:$8 sps:$4 sm:$0xff]   ;;  %v2969_v48 = vld [vmem:[%s4182_s1 + $0x2f4] ss:$8 sps:$4 sm:$0xff]  }
  0x3b   : > { %1930 = vmatprep.subr.bf16.mxu1 %v2889_v50  ;;  %v2967_v50 = vld [vmem:[%s4182_s1 + $0x2f0] ss:$8 sps:$4 sm:$0xff]  }
  0x3d   : > { %1858 = vmatpush2.bf16.msra.mxu0 %v2891_v52  ;;  %v2979_v52 = vld [vmem:[%s4182_s1 + $0x2e4] ss:$8 sps:$4 sm:$0xff]  }
  0x3e   : > { %1931 = vmatpush2.bf16.msra.mxu1 %v2892_v53  ;;  %1859 = vmatprep.subr.bf16.mxu0 %v2893_v54  ;;  %v2982_v53 = vld [vmem:[%s4182_s1 + $0x3e4] ss:$8 sps:$4 sm:$0xff]  }
  0x3f   : > { %1932 = vmatprep.subr.bf16.mxu1 %v2895_v55  ;;  %v3033_v54 = vld [vmem:[%s3402_s13 + $0x14] ss:$56 sps:$4 sm:$0xff]  }
  0x40   : > { %v3036_v55 = vld [vmem:[%s3402_s13 + $0x1c] ss:$56 sps:$4 sm:$0xff]  }
  0x41   : > { %1860 = vmatpush2.bf16.msra.mxu0 %v2897_v56  ;;  %v2977_v56 = vld [vmem:[%s4182_s1 + $0x2e0] ss:$8 sps:$4 sm:$0xff]  }
  0x42   : > { %1933 = vmatpush2.bf16.msra.mxu1 %v2898_v57  ;;  %1861 = vmatprep.subr.bf16.mxu0 %v2899_v58  ;;  %v2980_v57 = vld [vmem:[%s4182_s1 + $0x3e0] ss:$8 sps:$4 sm:$0xff]   ;;  %v2987_v58 = vld [vmem:[%s4182_s1 + $0x2d4] ss:$8 sps:$4 sm:$0xff]  }
  0x43   : > { %1934 = vmatprep.subr.bf16.mxu1 %v2901_v59  ;;  %v2990_v59 = vld [vmem:[%s4182_s1 + $0x3d4] ss:$8 sps:$4 sm:$0xff]  }
  0x45   : > { %1862 = vmatpush2.bf16.msra.mxu0 %v2903_v60  ;;  %v2985_v60 = vld [vmem:[%s4182_s1 + $0x2d0] ss:$8 sps:$4 sm:$0xff]  }
  0x46   : > { %1935 = vmatpush2.bf16.msra.mxu1 %v2904_v61  ;;  %1863 = vmatprep.subr.bf16.mxu0 %v2905_v62  ;;  %v2988_v61 = vld [vmem:[%s4182_s1 + $0x3d0] ss:$8 sps:$4 sm:$0xff]   ;;  %v2997_v62 = vld [vmem:[%s4182_s1 + $0x2c4] ss:$8 sps:$4 sm:$0xff]  }
  0x47   : > { %1936 = vmatprep.subr.bf16.mxu1 %v2907_v63  ;;  %v3000_v63 = vld [vmem:[%s4182_s1 + $0x3c4] ss:$8 sps:$4 sm:$0xff]  }
  0x49   : > { %1864 = vmatpush2.bf16.msra.mxu0 %v2909_v0  ;;  %v2995_v0 = vld [vmem:[%s4182_s1 + $0x2c0] ss:$8 sps:$4 sm:$0xff]  }
  0x4a   : > { %1937 = vmatpush2.bf16.msra.mxu1 %v2910_v1  ;;  %1979 = vmatprep.subr.bf16.mxu0 %v2919_v2  ;;  %v2998_v1 = vld [vmem:[%s4182_s1 + $0x3c0] ss:$8 sps:$4 sm:$0xff]   ;;  %v3005_v2 = vld [vmem:[%s4182_s1 + $0x2b4] ss:$8 sps:$4 sm:$0xff]  }
  0x4b   : > { %2052 = vmatprep.subr.bf16.mxu1 %v2922_v3  ;;  %v3008_v3 = vld [vmem:[%s4182_s1 + $0x3b4] ss:$8 sps:$4 sm:$0xff]  }
  0x4c   : > { %1866 = vmatmul.mubr.bf16.vlgmr.msra.gmra.mxu0 %v2911_v4  ;;  %v3003_v4 = vld [vmem:[%s4182_s1 + $0x2b0] ss:$8 sps:$4 sm:$0xff]  }
  0x4d   : > { %1939 = vmatmul.mubr.bf16.vlgmr.msra.gmra.mxu1 %v2914_v5  ;;  %1980 = vmatpush1.bf16.msra.mxu0 %v2917_v6  ;;  %v3006_v5 = vld [vmem:[%s4182_s1 + $0x3b0] ss:$8 sps:$4 sm:$0xff]   ;;  %v3015_v6 = vld [vmem:[%s4182_s1 + $0x2a4] ss:$8 sps:$4 sm:$0xff]  }
  0x4e   : > { %2053 = vmatpush1.bf16.msra.mxu1 %v2920_v7  ;;  %1981 = vmatprep.subr.bf16.mxu0 %v2925_v8  ;;  %v3018_v7 = vld [vmem:[%s4182_s1 + $0x3a4] ss:$8 sps:$4 sm:$0xff]   ;;  %v3013_v8 = vld [vmem:[%s4182_s1 + $0x2a0] ss:$8 sps:$4 sm:$0xff]  }
  0x4f   : > { %2054 = vmatprep.subr.bf16.mxu1 %v2928_v9  ;;  %1875 = vmatprep.mubr.bf16.mxu0 %v2965_v11  ;;  %v3016_v9 = vld [vmem:[%s4182_s1 + $0x3a0] ss:$8 sps:$4 sm:$0xff]   ;;  %v3024_v11 = vld [vmem:[%s4182_s1 + $0x394] ss:$8 sps:$4 sm:$0xff]  }
  0x50   : > { %1948 = vmatprep.mubr.bf16.mxu1 %v2974_v18  ;;  %v3039_v18 = vld [vmem:[%s4182_s1 + $0x474] ss:$8 sps:$4 sm:$0xff]  }
  0x51   : > { %1982 = vmatpush1.bf16.msra.mxu0 %v2923_v10  ;;  %v3021_v10 = vld [vmem:[%s4182_s1 + $0x294] ss:$8 sps:$4 sm:$0xff]  }
  0x52   : > { %2055 = vmatpush1.bf16.msra.mxu1 %v2926_v12  ;;  %1983 = vmatprep.subr.bf16.mxu0 %v2931_v13  ;;  %v3019_v12 = vld [vmem:[%s4182_s1 + $0x290] ss:$8 sps:$4 sm:$0xff]  }
  0x53   : > { %2056 = vmatprep.subr.bf16.mxu1 %v2934_v14  ;;  %v3022_v13 = vld [vmem:[%s4182_s1 + $0x390] ss:$8 sps:$4 sm:$0xff]   ;;  %v3027_v14 = vld [vmem:[%s4182_s1 + $0x284] ss:$8 sps:$4 sm:$0xff]  }
  0x54   : > { %1876 = vmatmul.mubr.bf16.gmra.mxu0 %v2973_v17  ;;  %v3028_v17 = vld [vmem:[%s4182_s1 + $0x380] ss:$8 sps:$4 sm:$0xff]  }
  0x55   : > { %1949 = vmatmul.mubr.bf16.gmra.mxu1 %v2976_v19  ;;  %1984 = vmatpush1.bf16.msra.mxu0 %v2929_v15  ;;  %v3030_v15 = vld [vmem:[%s4182_s1 + $0x384] ss:$8 sps:$4 sm:$0xff]   ;;  %v3042_v19 = vld [vmem:[%s4182_s1 + $0x574] ss:$8 sps:$4 sm:$0xff]  }
  0x56   : > { %2057 = vmatpush1.bf16.msra.mxu1 %v2932_v16  ;;  %1985 = vmatprep.subr.bf16.mxu0 %v2937_v20  ;;  %v3025_v16 = vld [vmem:[%s4182_s1 + $0x280] ss:$8 sps:$4 sm:$0xff]  }
  0x57   : > { %2058 = vmatprep.subr.bf16.mxu1 %v2940_v21  ;;  %1885 = vmatprep.mubr.bf16.mxu0 %v2983_v23  ;;  %v3031_v20 = vld [vmem:[%s3402_s13 + $0x10] ss:$56 sps:$4 sm:$0xff]  }
  0x58   : > { %1958 = vmatprep.mubr.bf16.mxu1 %v2992_v30  ;;  %v3034_v21 = vld [vmem:[%s3402_s13 + $0x18] ss:$56 sps:$4 sm:$0xff]   ;;  %v3054_v30 = vld [vmem:[%s4182_s1 + $0x454] ss:$8 sps:$4 sm:$0xff]  }
  0x59   : > { %1986 = vmatpush1.bf16.msra.mxu0 %v2935_v22  ;;  %v3037_v22 = vld [vmem:[%s4182_s1 + $0x470] ss:$8 sps:$4 sm:$0xff]  }
  0x5a   : > { %2059 = vmatpush1.bf16.msra.mxu1 %v2938_v24  ;;  %1987 = vmatprep.subr.bf16.mxu0 %v2943_v25  ;;  %v3040_v23 = vld [vmem:[%s4182_s1 + $0x570] ss:$8 sps:$4 sm:$0xff]   ;;  %v3045_v24 = vld [vmem:[%s4182_s1 + $0x464] ss:$8 sps:$4 sm:$0xff]  }
  0x5b   : > { %2060 = vmatprep.subr.bf16.mxu1 %v2946_v26  ;;  %v3048_v25 = vld [vmem:[%s4182_s1 + $0x564] ss:$8 sps:$4 sm:$0xff]  }
  0x5c   : > { %1886 = vmatmul.mubr.bf16.gmra.mxu0 %v2991_v29  ;;  %v3049_v26 = vld [vmem:[%s3402_s13 + $0x84] ss:$56 sps:$4 sm:$0xff]   ;;  %v3046_v29 = vld [vmem:[%s4182_s1 + $0x560] ss:$8 sps:$4 sm:$0xff]  }
  0x5d   : > { %1959 = vmatmul.mubr.bf16.gmra.mxu1 %v2994_v31  ;;  %1988 = vmatpush1.bf16.msra.mxu0 %v2941_v27  ;;  %v3058_v27 = vld [vmem:[%s3402_s13 + $0x8c] ss:$56 sps:$4 sm:$0xff]   ;;  %v3057_v31 = vld [vmem:[%s4182_s1 + $0x554] ss:$8 sps:$4 sm:$0xff]  }
  0x5e   : > { %2061 = vmatpush1.bf16.msra.mxu1 %v2944_v28  ;;  %1989 = vmatprep.subr.bf16.mxu0 %v2949_v32  ;;  %v3043_v28 = vld [vmem:[%s4182_s1 + $0x460] ss:$8 sps:$4 sm:$0xff]  }
  0x5f   : > { %2062 = vmatprep.subr.bf16.mxu1 %v2952_v33  ;;  %1895 = vmatprep.mubr.bf16.mxu0 %v3001_v35  ;;  %v3051_v32 = vld [vmem:[%s3402_s13 + $0x80] ss:$56 sps:$4 sm:$0xff]  }
  0x60   : > { %1968 = vmatprep.mubr.bf16.mxu1 %v3010_v42  ;;  %v3052_v33 = vld [vmem:[%s4182_s1 + $0x450] ss:$8 sps:$4 sm:$0xff]   ;;  %v3060_v35 = vld [vmem:[%s3402_s13 + $0x88] ss:$56 sps:$4 sm:$0xff]   ;;  %v3072_v42 = vld [vmem:[%s4182_s1 + $0x434] ss:$8 sps:$4 sm:$0xff]  }
  0x61   : > { %1990 = vmatpush1.bf16.msra.mxu0 %v2947_v34  ;;  %v3055_v34 = vld [vmem:[%s4182_s1 + $0x550] ss:$8 sps:$4 sm:$0xff]  }
  0x62   : > { %2063 = vmatpush1.bf16.msra.mxu1 %v2950_v36  ;;  %1991 = vmatprep.subr.bf16.mxu0 %v2955_v37  ;;  %v3063_v36 = vld [vmem:[%s4182_s1 + $0x444] ss:$8 sps:$4 sm:$0xff]  }
  0x63   : > { %2064 = vmatprep.subr.bf16.mxu1 %v2958_v38  ;;  %v3066_v37 = vld [vmem:[%s4182_s1 + $0x544] ss:$8 sps:$4 sm:$0xff]  }
  0x64   : > { %1896 = vmatmul.mubr.bf16.gmra.mxu0 %v3009_v41  ;;  %v3067_v38 = vld [vmem:[%s3402_s13 + $0xf4] ss:$56 sps:$4 sm:$0xff]   ;;  %v3064_v41 = vld [vmem:[%s4182_s1 + $0x540] ss:$8 sps:$4 sm:$0xff]  }
  0x65   : > { %1969 = vmatmul.mubr.bf16.gmra.mxu1 %v3012_v43  ;;  %1992 = vmatpush1.bf16.msra.mxu0 %v2953_v39  ;;  %v3076_v39 = vld [vmem:[%s3402_s13 + $0xfc] ss:$56 sps:$4 sm:$0xff]  }
  0x66   : > { %2065 = vmatpush1.bf16.msra.mxu1 %v2956_v40  ;;  %1993 = vmatprep.subr.bf16.mxu0 %v2961_v44  ;;  %v3061_v40 = vld [vmem:[%s4182_s1 + $0x440] ss:$8 sps:$4 sm:$0xff]   ;;  %v3075_v43 = vld [vmem:[%s4182_s1 + $0x534] ss:$8 sps:$4 sm:$0xff]  }
  0x67   : > { %2066 = vmatprep.subr.bf16.mxu1 %v2964_v45  ;;  %2011 = vmatprep.mubr.bf16.mxu0 %v3033_v54  ;;  %v3069_v44 = vld [vmem:[%s3402_s13 + $0xf0] ss:$56 sps:$4 sm:$0xff]   ;;  %v3090_v54 = vld [vmem:[%s4182_s1 + $0x414] ss:$8 sps:$4 sm:$0xff]  }
  0x68   : > { %2084 = vmatprep.mubr.bf16.mxu1 %v3036_v55  ;;  %v3070_v45 = vld [vmem:[%s4182_s1 + $0x430] ss:$8 sps:$4 sm:$0xff]   ;;  %v3093_v55 = vld [vmem:[%s4182_s1 + $0x514] ss:$8 sps:$4 sm:$0xff]  }
  0x69   : > { %1994 = vmatpush1.bf16.msra.mxu0 %v2959_v46  ;;  %v3073_v46 = vld [vmem:[%s4182_s1 + $0x530] ss:$8 sps:$4 sm:$0xff]  }
  0x6a   : > { %2067 = vmatpush1.bf16.msra.mxu1 %v2962_v47  ;;  %1995 = vmatprep.subr.bf16.mxu0 %v2969_v48  ;;  %v3078_v47 = vld [vmem:[%s3402_s13 + $0xf8] ss:$56 sps:$4 sm:$0xff]   ;;  %v3081_v48 = vld [vmem:[%s4182_s1 + $0x424] ss:$8 sps:$4 sm:$0xff]  }
  0x6b   : > { %2068 = vmatprep.subr.bf16.mxu1 %v2972_v49  ;;  %v3084_v49 = vld [vmem:[%s4182_s1 + $0x524] ss:$8 sps:$4 sm:$0xff]  }
  0x6d   : > { %1996 = vmatpush2.bf16.msra.mxu0 %v2967_v50  ;;  %v3085_v50 = vld [vmem:[%s3402_s13 + $0x164] ss:$56 sps:$4 sm:$0xff]  }
  0x6e   : > { %2069 = vmatpush2.bf16.msra.mxu1 %v2970_v51  ;;  %1997 = vmatprep.subr.bf16.mxu0 %v2979_v52  ;;  %v3094_v51 = vld [vmem:[%s3402_s13 + $0x16c] ss:$56 sps:$4 sm:$0xff]   ;;  %v3079_v52 = vld [vmem:[%s4182_s1 + $0x420] ss:$8 sps:$4 sm:$0xff]  }
  0x6f   : > { %2070 = vmatprep.subr.bf16.mxu1 %v2982_v53  ;;  %v3082_v53 = vld [vmem:[%s4182_s1 + $0x520] ss:$8 sps:$4 sm:$0xff]  }
  0x71   : > { %1998 = vmatpush2.bf16.msra.mxu0 %v2977_v56  ;;  %v3087_v56 = vld [vmem:[%s3402_s13 + $0x160] ss:$56 sps:$4 sm:$0xff]  }
  0x72   : > { %2071 = vmatpush2.bf16.msra.mxu1 %v2980_v57  ;;  %1999 = vmatprep.subr.bf16.mxu0 %v2987_v58  ;;  %v3088_v57 = vld [vmem:[%s4182_s1 + $0x410] ss:$8 sps:$4 sm:$0xff]  }
  0x73   : > { %2072 = vmatprep.subr.bf16.mxu1 %v2990_v59  ;;  %v3091_v58 = vld [vmem:[%s4182_s1 + $0x510] ss:$8 sps:$4 sm:$0xff]   ;;  %v3096_v59 = vld [vmem:[%s3402_s13 + $0x168] ss:$56 sps:$4 sm:$0xff]  }
  0x75   : > { %2000 = vmatpush2.bf16.msra.mxu0 %v2985_v60  ;;  %v3099_v60 = vld [vmem:[%s4182_s1 + $0x404] ss:$8 sps:$4 sm:$0xff]  }
  0x76   : > { %2073 = vmatpush2.bf16.msra.mxu1 %v2988_v61  ;;  %2001 = vmatprep.subr.bf16.mxu0 %v2997_v62  ;;  %v3102_v61 = vld [vmem:[%s4182_s1 + $0x504] ss:$8 sps:$4 sm:$0xff]  }
  0x77   : > { %2074 = vmatprep.subr.bf16.mxu1 %v3000_v63  ;;  %v3153_v62 = vld [vmem:[%s3402_s13 + $0x24] ss:$56 sps:$4 sm:$0xff]  }
  0x78   : > { %v3156_v63 = vld [vmem:[%s3402_s13 + $0x2c] ss:$56 sps:$4 sm:$0xff]  }
  0x79   : > { %2002 = vmatpush2.bf16.msra.mxu0 %v2995_v0  ;;  %v3097_v0 = vld [vmem:[%s4182_s1 + $0x400] ss:$8 sps:$4 sm:$0xff]  }
  0x7a   : > { %2075 = vmatpush2.bf16.msra.mxu1 %v2998_v1  ;;  %2003 = vmatprep.subr.bf16.mxu0 %v3005_v2  ;;  %v3100_v1 = vld [vmem:[%s4182_s1 + $0x500] ss:$8 sps:$4 sm:$0xff]   ;;  %v3105_v2 = vld [vmem:[%s4182_s1 + $0x4f4] ss:$8 sps:$4 sm:$0xff]  }
  0x7b   : > { %2076 = vmatprep.subr.bf16.mxu1 %v3008_v3  ;;  %v3108_v3 = vld [vmem:[%s4182_s1 + $0x5f4] ss:$8 sps:$4 sm:$0xff]  }
  0x7d   : > { %2004 = vmatpush2.bf16.msra.mxu0 %v3003_v4  ;;  %v3103_v4 = vld [vmem:[%s4182_s1 + $0x4f0] ss:$8 sps:$4 sm:$0xff]  }
  0x7e   : > { %2077 = vmatpush2.bf16.msra.mxu1 %v3006_v5  ;;  %2005 = vmatprep.subr.bf16.mxu0 %v3015_v6  ;;  %v3106_v5 = vld [vmem:[%s4182_s1 + $0x5f0] ss:$8 sps:$4 sm:$0xff]   ;;  %v3111_v6 = vld [vmem:[%s4182_s1 + $0x4e4] ss:$8 sps:$4 sm:$0xff]  }
  0x7f   : > { %2078 = vmatprep.subr.bf16.mxu1 %v3018_v7  ;;  %v3114_v7 = vld [vmem:[%s4182_s1 + $0x5e4] ss:$8 sps:$4 sm:$0xff]  }
  0x81   : > { %2006 = vmatpush2.bf16.msra.mxu0 %v3013_v8  ;;  %v3109_v8 = vld [vmem:[%s4182_s1 + $0x4e0] ss:$8 sps:$4 sm:$0xff]  }
  0x82   : > { %2079 = vmatpush2.bf16.msra.mxu1 %v3016_v9  ;;  %2007 = vmatprep.subr.bf16.mxu0 %v3021_v10  ;;  %v3112_v9 = vld [vmem:[%s4182_s1 + $0x5e0] ss:$8 sps:$4 sm:$0xff]   ;;  %v3117_v10 = vld [vmem:[%s4182_s1 + $0x4d4] ss:$8 sps:$4 sm:$0xff]  }
  0x83   : > { %2080 = vmatprep.subr.bf16.mxu1 %v3024_v11  ;;  %v3120_v11 = vld [vmem:[%s4182_s1 + $0x5d4] ss:$8 sps:$4 sm:$0xff]  }
  0x85   : > { %2008 = vmatpush2.bf16.msra.mxu0 %v3019_v12  ;;  %v3115_v12 = vld [vmem:[%s4182_s1 + $0x4d0] ss:$8 sps:$4 sm:$0xff]  }
  0x86   : > { %2081 = vmatpush2.bf16.msra.mxu1 %v3022_v13  ;;  %2009 = vmatprep.subr.bf16.mxu0 %v3027_v14  ;;  %v3118_v13 = vld [vmem:[%s4182_s1 + $0x5d0] ss:$8 sps:$4 sm:$0xff]   ;;  %v3123_v14 = vld [vmem:[%s4182_s1 + $0x4c4] ss:$8 sps:$4 sm:$0xff]  }
  0x87   : > { %2082 = vmatprep.subr.bf16.mxu1 %v3030_v15  ;;  %v3126_v15 = vld [vmem:[%s4182_s1 + $0x5c4] ss:$8 sps:$4 sm:$0xff]  }
  0x89   : > { %2010 = vmatpush2.bf16.msra.mxu0 %v3025_v16  ;;  %v3121_v16 = vld [vmem:[%s4182_s1 + $0x4c0] ss:$8 sps:$4 sm:$0xff]  }
  0x8a   : > { %2083 = vmatpush2.bf16.msra.mxu1 %v3028_v17  ;;  %2125 = vmatprep.subr.bf16.mxu0 %v3039_v18  ;;  %v3124_v17 = vld [vmem:[%s4182_s1 + $0x5c0] ss:$8 sps:$4 sm:$0xff]   ;;  %v3129_v18 = vld [vmem:[%s4182_s1 + $0x4b4] ss:$8 sps:$4 sm:$0xff]  }
  0x8b   : > { %2198 = vmatprep.subr.bf16.mxu1 %v3042_v19  ;;  %v3132_v19 = vld [vmem:[%s4182_s1 + $0x5b4] ss:$8 sps:$4 sm:$0xff]  }
  0x8c   : > { %2012 = vmatmul.mubr.bf16.vlgmr.msra.gmra.mxu0 %v3031_v20  ;;  %v3127_v20 = vld [vmem:[%s4182_s1 + $0x4b0] ss:$8 sps:$4 sm:$0xff]  }
  0x8d   : > { %2085 = vmatmul.mubr.bf16.vlgmr.msra.gmra.mxu1 %v3034_v21  ;;  %2126 = vmatpush1.bf16.msra.mxu0 %v3037_v22  ;;  %v3130_v21 = vld [vmem:[%s4182_s1 + $0x5b0] ss:$8 sps:$4 sm:$0xff]   ;;  %v3135_v22 = vld [vmem:[%s4182_s1 + $0x4a4] ss:$8 sps:$4 sm:$0xff]  }
  0x8e   : > { %2199 = vmatpush1.bf16.msra.mxu1 %v3040_v23  ;;  %2127 = vmatprep.subr.bf16.mxu0 %v3045_v24  ;;  %v3138_v23 = vld [vmem:[%s4182_s1 + $0x5a4] ss:$8 sps:$4 sm:$0xff]   ;;  %v3133_v24 = vld [vmem:[%s4182_s1 + $0x4a0] ss:$8 sps:$4 sm:$0xff]  }
  0x8f   : > { %2200 = vmatprep.subr.bf16.mxu1 %v3048_v25  ;;  %2021 = vmatprep.mubr.bf16.mxu0 %v3049_v26  ;;  %v3136_v25 = vld [vmem:[%s4182_s1 + $0x5a0] ss:$8 sps:$4 sm:$0xff]   ;;  %v3141_v26 = vld [vmem:[%s4182_s1 + $0x494] ss:$8 sps:$4 sm:$0xff]  }
  0x90   : > { %2094 = vmatprep.mubr.bf16.mxu1 %v3058_v27  ;;  %v3144_v27 = vld [vmem:[%s4182_s1 + $0x594] ss:$8 sps:$4 sm:$0xff]  }
  0x91   : > { %2128 = vmatpush1.bf16.msra.mxu0 %v3043_v28  ;;  %v3139_v28 = vld [vmem:[%s4182_s1 + $0x490] ss:$8 sps:$4 sm:$0xff]  }
  0x92   : > { %2201 = vmatpush1.bf16.msra.mxu1 %v3046_v29  ;;  %2129 = vmatprep.subr.bf16.mxu0 %v3054_v30  ;;  %v3142_v29 = vld [vmem:[%s4182_s1 + $0x590] ss:$8 sps:$4 sm:$0xff]   ;;  %v3147_v30 = vld [vmem:[%s4182_s1 + $0x484] ss:$8 sps:$4 sm:$0xff]  }
  0x93   : > { %2202 = vmatprep.subr.bf16.mxu1 %v3057_v31  ;;  %v3150_v31 = vld [vmem:[%s4182_s1 + $0x584] ss:$8 sps:$4 sm:$0xff]  }
  0x94   : > { %2022 = vmatmul.mubr.bf16.gmra.mxu0 %v3051_v32  ;;  %v3145_v32 = vld [vmem:[%s4182_s1 + $0x480] ss:$8 sps:$4 sm:$0xff]  }
  0x95   : > { %2095 = vmatmul.mubr.bf16.gmra.mxu1 %v3060_v35  ;;  %2130 = vmatpush1.bf16.msra.mxu0 %v3052_v33  ;;  %v3148_v33 = vld [vmem:[%s4182_s1 + $0x580] ss:$8 sps:$4 sm:$0xff]  }
  0x96   : > { %2203 = vmatpush1.bf16.msra.mxu1 %v3055_v34  ;;  %2131 = vmatprep.subr.bf16.mxu0 %v3063_v36  ;;  %v3159_v34 = vld [vmem:[%s4182_s1 + $0x674] ss:$8 sps:$4 sm:$0xff]   ;;  %v3151_v35 = vld [vmem:[%s3402_s13 + $0x20] ss:$56 sps:$4 sm:$0xff]  }
  0x97   : > { %2204 = vmatprep.subr.bf16.mxu1 %v3066_v37  ;;  %2031 = vmatprep.mubr.bf16.mxu0 %v3067_v38  ;;  %v3154_v36 = vld [vmem:[%s3402_s13 + $0x28] ss:$56 sps:$4 sm:$0xff]   ;;  %v3157_v37 = vld [vmem:[%s4182_s1 + $0x670] ss:$8 sps:$4 sm:$0xff]   ;;  %v3162_v38 = vld [vmem:[%s4182_s1 + $0x664] ss:$8 sps:$4 sm:$0xff]  }
  0x98   : > { %2104 = vmatprep.mubr.bf16.mxu1 %v3076_v39  ;;  %v3163_v39 = vld [vmem:[%s3402_s13 + $0x94] ss:$56 sps:$4 sm:$0xff]  }
  0x99   : > { %2132 = vmatpush1.bf16.msra.mxu0 %v3061_v40  ;;  %v3169_v40 = vld [vmem:[%s3402_s13 + $0x9c] ss:$56 sps:$4 sm:$0xff]  }
  0x9a   : > { %2205 = vmatpush1.bf16.msra.mxu1 %v3064_v41  ;;  %2133 = vmatprep.subr.bf16.mxu0 %v3072_v42  ;;  %v3160_v41 = vld [vmem:[%s4182_s1 + $0x660] ss:$8 sps:$4 sm:$0xff]   ;;  %v3168_v42 = vld [vmem:[%s4182_s1 + $0x654] ss:$8 sps:$4 sm:$0xff]  }
  0x9b   : > { %2206 = vmatprep.subr.bf16.mxu1 %v3075_v43  ;;  %v3165_v43 = vld [vmem:[%s3402_s13 + $0x90] ss:$56 sps:$4 sm:$0xff]  }
  0x9c   : > { %2032 = vmatmul.mubr.bf16.gmra.mxu0 %v3069_v44  ;;  %v3171_v44 = vld [vmem:[%s3402_s13 + $0x98] ss:$56 sps:$4 sm:$0xff]  }
  0x9d   : > { %2105 = vmatmul.mubr.bf16.gmra.mxu1 %v3078_v47  ;;  %2134 = vmatpush1.bf16.msra.mxu0 %v3070_v45  ;;  %v3166_v45 = vld [vmem:[%s4182_s1 + $0x650] ss:$8 sps:$4 sm:$0xff]   ;;  %v3175_v47 = vld [vmem:[%s3402_s13 + $0x104] ss:$56 sps:$4 sm:$0xff]  }
  0x9e   : > { %2207 = vmatpush1.bf16.msra.mxu1 %v3073_v46  ;;  %2135 = vmatprep.subr.bf16.mxu0 %v3081_v48  ;;  %v3174_v46 = vld [vmem:[%s4182_s1 + $0x644] ss:$8 sps:$4 sm:$0xff]  }
  0x9f   : > { %2208 = vmatprep.subr.bf16.mxu1 %v3084_v49  ;;  %2041 = vmatprep.mubr.bf16.mxu0 %v3085_v50  ;;  %v3181_v48 = vld [vmem:[%s3402_s13 + $0x10c] ss:$56 sps:$4 sm:$0xff]   ;;  %v3172_v49 = vld [vmem:[%s4182_s1 + $0x640] ss:$8 sps:$4 sm:$0xff]   ;;  %v3180_v50 = vld [vmem:[%s4182_s1 + $0x634] ss:$8 sps:$4 sm:$0xff]  }
  0xa0   : > { %2114 = vmatprep.mubr.bf16.mxu1 %v3094_v51  ;;  %v3177_v51 = vld [vmem:[%s3402_s13 + $0x100] ss:$56 sps:$4 sm:$0xff]  }
  0xa1   : > { %2136 = vmatpush1.bf16.msra.mxu0 %v3079_v52  ;;  %v3183_v52 = vld [vmem:[%s3402_s13 + $0x108] ss:$56 sps:$4 sm:$0xff]  }
  0xa2   : > { %2209 = vmatpush1.bf16.msra.mxu1 %v3082_v53  ;;  %2137 = vmatprep.subr.bf16.mxu0 %v3090_v54  ;;  %v3178_v53 = vld [vmem:[%s4182_s1 + $0x630] ss:$8 sps:$4 sm:$0xff]   ;;  %v3186_v54 = vld [vmem:[%s4182_s1 + $0x624] ss:$8 sps:$4 sm:$0xff]  }
  0xa3   : > { %2210 = vmatprep.subr.bf16.mxu1 %v3093_v55  ;;  %v3187_v55 = vld [vmem:[%s3402_s13 + $0x174] ss:$56 sps:$4 sm:$0xff]  }
  0xa4   : > { %2042 = vmatmul.mubr.bf16.gmra.mxu0 %v3087_v56  ;;  %v3193_v56 = vld [vmem:[%s3402_s13 + $0x17c] ss:$56 sps:$4 sm:$0xff]  }
  0xa5   : > { %2115 = vmatmul.mubr.bf16.gmra.mxu1 %v3096_v59  ;;  %2138 = vmatpush1.bf16.msra.mxu0 %v3088_v57  ;;  %v3184_v57 = vld [vmem:[%s4182_s1 + $0x620] ss:$8 sps:$4 sm:$0xff]  }
  0xa6   : > { %2211 = vmatpush1.bf16.msra.mxu1 %v3091_v58  ;;  %2139 = vmatprep.subr.bf16.mxu0 %v3099_v60  ;;  %v3192_v58 = vld [vmem:[%s4182_s1 + $0x614] ss:$8 sps:$4 sm:$0xff]   ;;  %v3189_v59 = vld [vmem:[%s3402_s13 + $0x170] ss:$56 sps:$4 sm:$0xff]  }
  0xa7   : > { %2212 = vmatprep.subr.bf16.mxu1 %v3102_v61  ;;  %2157 = vmatprep.mubr.bf16.mxu0 %v3153_v62  ;;  %v3195_v60 = vld [vmem:[%s3402_s13 + $0x178] ss:$56 sps:$4 sm:$0xff]   ;;  %v3198_v62 = vld [vmem:[%s4182_s1 + $0x604] ss:$8 sps:$4 sm:$0xff]  }
  0xa8   : > { %2230 = vmatprep.mubr.bf16.mxu1 %v3156_v63  ;;  %v3190_v61 = vld [vmem:[%s4182_s1 + $0x610] ss:$8 sps:$4 sm:$0xff]   ;;  %v3213_v63 = vld [vmem:[%s3402_s13 + $0x34] ss:$56 sps:$4 sm:$0xff]  }
  0xa9   : > { %2140 = vmatpush1.bf16.msra.mxu0 %v3097_v0  ;;  %v3216_v0 = vld [vmem:[%s3402_s13 + $0x114] ss:$56 sps:$4 sm:$0xff]  }
  0xaa   : > { %2213 = vmatpush1.bf16.msra.mxu1 %v3100_v1  ;;  %2141 = vmatprep.subr.bf16.mxu0 %v3105_v2  ;;  %v3196_v1 = vld [vmem:[%s4182_s1 + $0x600] ss:$8 sps:$4 sm:$0xff]   ;;  %v3201_v2 = vld [vmem:[%s4182_s1 + $0x6b4] ss:$8 sps:$4 sm:$0xff]  }
  0xab   : > { %2214 = vmatprep.subr.bf16.mxu1 %v3108_v3  ;;  %v3199_v3 = vld [vmem:[%s4182_s1 + $0x6b0] ss:$8 sps:$4 sm:$0xff]  }
  0xad   : > { %2142 = vmatpush2.bf16.msra.mxu0 %v3103_v4  ;;  %v3204_v4 = vld [vmem:[%s4182_s1 + $0x6a4] ss:$8 sps:$4 sm:$0xff]  }
  0xae   : > { %2215 = vmatpush2.bf16.msra.mxu1 %v3106_v5  ;;  %2143 = vmatprep.subr.bf16.mxu0 %v3111_v6  ;;  %v3202_v5 = vld [vmem:[%s4182_s1 + $0x6a0] ss:$8 sps:$4 sm:$0xff]   ;;  %v3207_v6 = vld [vmem:[%s4182_s1 + $0x694] ss:$8 sps:$4 sm:$0xff]  }
  0xaf   : > { %2216 = vmatprep.subr.bf16.mxu1 %v3114_v7  ;;  %v3205_v7 = vld [vmem:[%s4182_s1 + $0x690] ss:$8 sps:$4 sm:$0xff]  }
  0xb1   : > { %2144 = vmatpush2.bf16.msra.mxu0 %v3109_v8  ;;  %v3210_v8 = vld [vmem:[%s4182_s1 + $0x684] ss:$8 sps:$4 sm:$0xff]  }
  0xb2   : > { %2217 = vmatpush2.bf16.msra.mxu1 %v3112_v9  ;;  %2145 = vmatprep.subr.bf16.mxu0 %v3117_v10  ;;  %v3208_v9 = vld [vmem:[%s4182_s1 + $0x680] ss:$8 sps:$4 sm:$0xff]  }
  0xb3   : > { %2218 = vmatprep.subr.bf16.mxu1 %v3120_v11  ;;  %v3211_v10 = vld [vmem:[%s3402_s13 + $0x30] ss:$56 sps:$4 sm:$0xff]  }
  0xb4   : > { %v3214_v11 = vld [vmem:[%s3402_s13 + $0x110] ss:$56 sps:$4 sm:$0xff]  }
  0xb5   : > { %2146 = vmatpush2.bf16.msra.mxu0 %v3115_v12  ;;  %v3217_v12 = vld [vmem:[%s3402_s13 + $0xa4] ss:$56 sps:$4 sm:$0xff]  }
  0xb6   : > { %2219 = vmatpush2.bf16.msra.mxu1 %v3118_v13  ;;  %2147 = vmatprep.subr.bf16.mxu0 %v3123_v14  ;;  %v3219_v13 = vld [vmem:[%s3402_s13 + $0x184] ss:$56 sps:$4 sm:$0xff]   ;;  %v454_v14 = vlaneseq }
  0xb7   : > { %2220 = vmatprep.subr.bf16.mxu1 %v3126_v15  ;;  %v3221_v15 = vld [vmem:[%s3402_s13 + $0xa0] ss:$56 sps:$4 sm:$0xff]  }
  0xb9   : > { %2148 = vmatpush2.bf16.msra.mxu0 %v3121_v16  ;;  %v3222_v16 = vld [vmem:[%s3402_s13 + $0x180] ss:$56 sps:$4 sm:$0xff]   ;;  %s2773_s13 = sshll.u32 %s4228_s24, 3 }
  0xba   : > { %2221 = vmatpush2.bf16.msra.mxu1 %v3124_v17  ;;  %2149 = vmatprep.subr.bf16.mxu0 %v3129_v18  ;;  %v455_v17 = vshrl.u32 %v454_v14, 7  ;;  %s4137_s17 = scalar_lea.vmem %s4184_s3, %s2773_s13 }
  0xbb   : > { %2222 = vmatprep.subr.bf16.mxu1 %v3132_v19  ;;  %v452_v19 = vld [vmem:[%s4183_s2] sm:$0x3] }
  0xbc   : > { %v456_v18 = vsub.s32 0, %v455_v17 }
  0xbd   : > { %2150 = vmatpush2.bf16.msra.mxu0 %v3127_v20  ;;  %v460_v20 = vsub.s32 1, %v455_v17 }
  0xbe   : > { %2223 = vmatpush2.bf16.msra.mxu1 %v3130_v21  ;;  %2151 = vmatprep.subr.bf16.mxu0 %v3135_v22  ;;  %v457_v21 = vrot.slane %v452_v19, %v456_v18 }
  0xbf   : > { %2224 = vmatprep.subr.bf16.mxu1 %v3138_v23  ;;  %v461_v22 = vrot.slane %v452_v19, %v460_v20 }
  0xc1   : > { %2152 = vmatpush2.bf16.msra.mxu0 %v3133_v24 }
  0xc2   : > { %2225 = vmatpush2.bf16.msra.mxu1 %v3136_v25  ;;  %2153 = vmatprep.subr.bf16.mxu0 %v3141_v26 }
  0xc3   : > { %2226 = vmatprep.subr.bf16.mxu1 %v3144_v27 }
  0xc5   : > { %2154 = vmatpush2.bf16.msra.mxu0 %v3139_v28 }
  0xc6   : > { %2227 = vmatpush2.bf16.msra.mxu1 %v3142_v29  ;;  %2155 = vmatprep.subr.bf16.mxu0 %v3147_v30 }
  0xc7   : > { %2228 = vmatprep.subr.bf16.mxu1 %v3150_v31 }
  0xc9   : > { %2156 = vmatpush2.bf16.msra.mxu0 %v3145_v32 }
  0xca   : > { %2229 = vmatpush2.bf16.msra.mxu1 %v3148_v33  ;;  %2271 = vmatprep.subr.bf16.mxu0 %v3159_v34 }
  0xcb   : > { %2782 = vmatprep.subr.bf16.mxu1 %v3159_v34 }
  0xcc   : > { %2158 = vmatmul.mubr.bf16.vlgmr.msra.gmra.mxu0 %v3151_v35 }
  0xcd   : > { %2231 = vmatmul.mubr.bf16.vlgmr.msra.gmra.mxu1 %v3154_v36  ;;  %2272 = vmatpush1.bf16.msra.mxu0 %v3157_v37 }
  0xce   : > { %2794 = vmatpush1.bf16.msra.mxu1 %v3157_v37  ;;  %2273 = vmatprep.subr.bf16.mxu0 %v3162_v38 }
  0xcf   : > { %2783 = vmatprep.subr.bf16.mxu1 %v3162_v38  ;;  %2167 = vmatprep.mubr.bf16.mxu0 %v3163_v39 }
  0xd0   : > { %2240 = vmatprep.mubr.bf16.mxu1 %v3169_v40 }
  0xd1   : > { %2274 = vmatpush1.bf16.msra.mxu0 %v3160_v41 }
  0xd2   : > { %2795 = vmatpush1.bf16.msra.mxu1 %v3160_v41  ;;  %2275 = vmatprep.subr.bf16.mxu0 %v3168_v42 }
  0xd3   : > { %2784 = vmatprep.subr.bf16.mxu1 %v3168_v42 }
  0xd4   : > { %2168 = vmatmul.mubr.bf16.gmra.mxu0 %v3165_v43 }
  0xd5   : > { %2241 = vmatmul.mubr.bf16.gmra.mxu1 %v3171_v44  ;;  %2276 = vmatpush1.bf16.msra.mxu0 %v3166_v45 }
  0xd6   : > { %2796 = vmatpush1.bf16.msra.mxu1 %v3166_v45  ;;  %2277 = vmatprep.subr.bf16.mxu0 %v3174_v46 }
  0xd7   : > { %2785 = vmatprep.subr.bf16.mxu1 %v3174_v46  ;;  %2177 = vmatprep.mubr.bf16.mxu0 %v3175_v47 }
  0xd8   : > { %2250 = vmatprep.mubr.bf16.mxu1 %v3181_v48 }
  0xd9   : > { %2278 = vmatpush1.bf16.msra.mxu0 %v3172_v49 }
  0xda   : > { %2797 = vmatpush1.bf16.msra.mxu1 %v3172_v49  ;;  %2279 = vmatprep.subr.bf16.mxu0 %v3180_v50 }
  0xdb   : > { %2786 = vmatprep.subr.bf16.mxu1 %v3180_v50 }
  0xdc   : > { %2178 = vmatmul.mubr.bf16.gmra.mxu0 %v3177_v51 }
  0xdd   : > { %2251 = vmatmul.mubr.bf16.gmra.mxu1 %v3183_v52  ;;  %2280 = vmatpush1.bf16.msra.mxu0 %v3178_v53 }
  0xde   : > { %2798 = vmatpush1.bf16.msra.mxu1 %v3178_v53  ;;  %2281 = vmatprep.subr.bf16.mxu0 %v3186_v54 }
  0xdf   : > { %2787 = vmatprep.subr.bf16.mxu1 %v3186_v54  ;;  %2187 = vmatprep.mubr.bf16.mxu0 %v3187_v55 }
  0xe0   : > { %2260 = vmatprep.mubr.bf16.mxu1 %v3193_v56 }
  0xe1   : > { %2282 = vmatpush1.bf16.msra.mxu0 %v3184_v57 }
  0xe2   : > { %2799 = vmatpush1.bf16.msra.mxu1 %v3184_v57  ;;  %2283 = vmatprep.subr.bf16.mxu0 %v3192_v58 }
  0xe3   : > { %2788 = vmatprep.subr.bf16.mxu1 %v3192_v58 }
  0xe4   : > { %2188 = vmatmul.mubr.bf16.gmra.mxu0 %v3189_v59 }
  0xe5   : > { %2261 = vmatmul.mubr.bf16.gmra.mxu1 %v3195_v60  ;;  %2284 = vmatpush1.bf16.msra.mxu0 %v3190_v61 }
  0xe6   : > { %2800 = vmatpush1.bf16.msra.mxu1 %v3190_v61  ;;  %2285 = vmatprep.subr.bf16.mxu0 %v3198_v62 }
  0xe7   : > { %2789 = vmatprep.subr.bf16.mxu1 %v3198_v62  ;;  %2759 = vmatprep.mubr.msk.bf16.mxu0 %vm1820_vm0, %v3213_v63 }
  0xe8   : > { %2761 = vmatprep.mubr.msk.bf16.mxu1 %vm1820_vm0, %v3216_v0 }
  0xe9   : > { %2286 = vmatpush1.bf16.msra.mxu0 %v3196_v1 }
  0xea   : > { %2801 = vmatpush1.bf16.msra.mxu1 %v3196_v1  ;;  %2295 = vmatprep.subr.bf16.mxu0 %v3201_v2 }
  0xeb   : > { %2790 = vmatprep.subr.bf16.mxu1 %v3201_v2 }
  0xed   : > { %2296 = vmatpush2.bf16.msra.mxu0 %v3199_v3 }
  0xee   : > { %2802 = vmatpush2.bf16.msra.mxu1 %v3199_v3  ;;  %2297 = vmatprep.subr.bf16.mxu0 %v3204_v4 }
  0xef   : > { %2791 = vmatprep.subr.bf16.mxu1 %v3204_v4 }
  0xf1   : > { %2298 = vmatpush2.bf16.msra.mxu0 %v3202_v5 }
  0xf2   : > { %2803 = vmatpush2.bf16.msra.mxu1 %v3202_v5  ;;  %2299 = vmatprep.subr.bf16.mxu0 %v3207_v6 }
  0xf3   : > { %2792 = vmatprep.subr.bf16.mxu1 %v3207_v6 }
  0xf5   : > { %2300 = vmatpush2.bf16.msra.mxu0 %v3205_v7 }
  0xf6   : > { %2804 = vmatpush2.bf16.msra.mxu1 %v3205_v7  ;;  %2301 = vmatprep.subr.bf16.mxu0 %v3210_v8 }
  0xf7   : > { %2793 = vmatprep.subr.bf16.mxu1 %v3210_v8 }
  0xf9   : > { %2302 = vmatpush2.bf16.msra.mxu0 %v3208_v9 }
  0xfa   : > { %2805 = vmatpush2.bf16.msra.mxu1 %v3208_v9 }
  0xfc   : > { %2304 = vmatmul.mubr.bf16.vlgmr.msra.gmra.mxu0 %v3211_v10 }
  0xfd   : > { %2324 = vmatmul.mubr.bf16.vlgmr.msra.gmra.mxu1 %v3214_v11  ;;  %2760 = vmatprep.mubr.msk.bf16.mxu0 %vm1820_vm0, %v3217_v12 }
  0xfe   : > { %2762 = vmatprep.mubr.msk.bf16.mxu1 %vm1820_vm0, %v3219_v13 }
 0x104   : > { %2314 = vmatmul.mubr.bf16.gmra.mxu0 %v3221_v15 }
 0x105   : > { %2334 = vmatmul.mubr.bf16.gmra.mxu1 %v3222_v16 }
 0x10c   : > { %v1867_v23 = vpop.f32.mrf.mxu0 }
 0x10d   : > { %v1940_v24 = vpop.f32.mrf.mxu1  ;;  %v1868_v25 = vadd.f32 %v1867_v23, %v457_v21 }
 0x10e   : > { %v1869_v26 = vpop.f32.mrf.mxu0 }
 0x10f   : > { %v1942_v27 = vpop.f32.mrf.mxu1  ;;  %v3980_v28 = vadd.f32 %v1940_v24, %v1868_v25  ;;  %v1870_v29 = vadd.f32 %v1869_v26, %v461_v22 }
 0x110   : > { %v1871_v30 = vpop.f32.mrf.mxu0 }
 0x111   : > { %v1944_v31 = vpop.f32.mrf.mxu1  ;;  %v3982_v32 = vadd.f32 %v1942_v27, %v1870_v29  ;;  %v1872_v33 = vadd.f32 %v1871_v30, %v457_v21 }
 0x112   : > { %v1873_v34 = vpop.f32.mrf.mxu0 }
 0x113   : > { %v1946_v35 = vpop.f32.mrf.mxu1  ;;  %v3984_v36 = vadd.f32 %v1944_v31, %v1872_v33  ;;  %v1874_v37 = vadd.f32 %v1873_v34, %v461_v22 }
 0x114   : > { %v1877_v38 = vpop.f32.mrf.mxu0 }
 0x115   : > { %v1950_v39 = vpop.f32.mrf.mxu1  ;;  %v3986_v40 = vadd.f32 %v1946_v35, %v1874_v37  ;;  %v1878_v41 = vadd.f32 %v1877_v38, %v457_v21 }
 0x116   : > { %v1879_v42 = vpop.f32.mrf.mxu0 }
 0x117   : > { %v1952_v43 = vpop.f32.mrf.mxu1  ;;  %v1880_v44 = vadd.f32 %v1879_v42, %v461_v22  ;;  %v3988_v45 = vadd.f32 %v1950_v39, %v1878_v41 }
 0x118   : > { %v1881_v46 = vpop.f32.mrf.mxu0 }
 0x119   : > { %v1954_v47 = vpop.f32.mrf.mxu1  ;;  %v1882_v48 = vadd.f32 %v1881_v46, %v457_v21  ;;  %v3990_v49 = vadd.f32 %v1952_v43, %v1880_v44 }
 0x11a   : > { %v1883_v50 = vpop.f32.mrf.mxu0 }
 0x11b   : > { %v1956_v51 = vpop.f32.mrf.mxu1  ;;  %v1884_v52 = vadd.f32 %v1883_v50, %v461_v22  ;;  %v3992_v53 = vadd.f32 %v1954_v47, %v1882_v48 }
 0x11c   : > { %v1887_v54 = vpop.f32.mrf.mxu0 }
 0x11d   : > { %v1960_v55 = vpop.f32.mrf.mxu1  ;;  %v1888_v56 = vadd.f32 %v1887_v54, %v457_v21  ;;  %v3994_v57 = vadd.f32 %v1956_v51, %v1884_v52 }
 0x11e   : > { %v1889_v58 = vpop.f32.mrf.mxu0 }
 0x11f   : > { %v1962_v59 = vpop.f32.mrf.mxu1  ;;  %v1890_v60 = vadd.f32 %v1889_v58, %v461_v22  ;;  %v3996_v61 = vadd.f32 %v1960_v55, %v1888_v56 }
 0x120   : > { %v1891_v62 = vpop.f32.mrf.mxu0 }
 0x121   : > { %v1964_v63 = vpop.f32.mrf.mxu1  ;;  %v1892_v0 = vadd.f32 %v1891_v62, %v457_v21  ;;  %v3998_v1 = vadd.f32 %v1962_v59, %v1890_v60 }
 0x122   : > { %v1893_v2 = vpop.f32.mrf.mxu0 }
 0x123   : > { %v1966_v3 = vpop.f32.mrf.mxu1  ;;  %v1894_v4 = vadd.f32 %v1893_v2, %v461_v22  ;;  %v4000_v5 = vadd.f32 %v1964_v63, %v1892_v0 }
 0x124   : > { %v1897_v6 = vpop.f32.mrf.mxu0 }
 0x125   : > { %v1970_v7 = vpop.f32.mrf.mxu1  ;;  %v1898_v8 = vadd.f32 %v1897_v6, %v457_v21  ;;  %v4002_v9 = vadd.f32 %v1966_v3, %v1894_v4 }
 0x126   : > { %v1899_v10 = vpop.f32.mrf.mxu0 }
 0x127   : > { %v1972_v11 = vpop.f32.mrf.mxu1  ;;  %v1900_v12 = vadd.f32 %v1899_v10, %v461_v22  ;;  %v4004_v13 = vadd.f32 %v1970_v7, %v1898_v8 }
 0x128   : > { %v1901_v14 = vpop.f32.mrf.mxu0 }
 0x129   : > { %v1974_v15 = vpop.f32.mrf.mxu1  ;;  %v1902_v16 = vadd.f32 %v1901_v14, %v457_v21  ;;  %v4006_v17 = vadd.f32 %v1972_v11, %v1900_v12 }
 0x12a   : > { %v1903_v18 = vpop.f32.mrf.mxu0 }
 0x12b   : > { %v1976_v19 = vpop.f32.mrf.mxu1  ;;  %v1904_v20 = vadd.f32 %v1903_v18, %v461_v22  ;;  %v4008_v23 = vadd.f32 %v1974_v15, %v1902_v16 }
 0x12d   : > { %v4010_v24 = vadd.f32 %v1976_v19, %v1904_v20 }
 0x14c   : > { %v2013_v25 = vpop.f32.mrf.mxu0 }
 0x14d   : > { %v4012_v26 = vpop.f32.mrf.mxu1 }
 0x14e   : > { %v2015_v27 = vpop.f32.mrf.mxu0 }
 0x14f   : > { %v4014_v29 = vpop.f32.mrf.mxu1 }
 0x150   : > { %v2017_v30 = vpop.f32.mrf.mxu0 }
 0x151   : > { %v4016_v31 = vpop.f32.mrf.mxu1 }
 0x152   : > { %v2019_v33 = vpop.f32.mrf.mxu0 }
 0x153   : > { %v4018_v21 = vpop.f32.mrf.mxu1 }
 0x154   : > { %v2023_v34 = vpop.f32.mrf.mxu0 }
 0x155   : > { %v4020_v35 = vpop.f32.mrf.mxu1 }
 0x156   : > { %v2025_v22 = vpop.f32.mrf.mxu0 }
 0x157   : > { %v4022_v37 = vpop.f32.mrf.mxu1 }
 0x158   : > { %v2027_v38 = vpop.f32.mrf.mxu0 }
 0x159   : > { %v4024_v39 = vpop.f32.mrf.mxu1 }
 0x15a   : > { %v2029_v41 = vpop.f32.mrf.mxu0 }
 0x15b   : > { %v4026_v42 = vpop.f32.mrf.mxu1 }
 0x15c   : > { %v2033_v43 = vpop.f32.mrf.mxu0 }
 0x15d   : > { %v2106_v44 = vpop.f32.mrf.mxu1 }
 0x15e   : > { %v2035_v46 = vpop.f32.mrf.mxu0 }
 0x15f   : > { %v2108_v47 = vpop.f32.mrf.mxu1 }
 0x160   : > { %v2037_v48 = vpop.f32.mrf.mxu0 }
 0x161   : > { %v4028_v50 = vpop.f32.mrf.mxu1 }
 0x162   : > { %v2039_v51 = vpop.f32.mrf.mxu0 }
 0x163   : > { %v4030_v52 = vpop.f32.mrf.mxu1 }
 0x164   : > { %v2043_v54 = vpop.f32.mrf.mxu0 }
 0x165   : > { %v4032_v55 = vpop.f32.mrf.mxu1 }
 0x166   : > { %v2045_v56 = vpop.f32.mrf.mxu0 }
 0x167   : > { %v4034_v58 = vpop.f32.mrf.mxu1 }
 0x168   : > { %4185 = vst [vmem:[#allocation2_spill] sm:$0xff] %v4034_v58  ;;  %v4036_v59 = vpop.f32.mrf.mxu0  ;;  %v2036_v58 = vadd.f32 %v2035_v46, %v3998_v1 }
 0x169   : > { %v4038_v60 = vpop.f32.mrf.mxu1 }
 0x16a   : > { %4186 = vst [vmem:[#allocation3_spill] sm:$0xff] %v4038_v60  ;;  %v4040_v62 = vpop.f32.mrf.mxu0 }
 0x16b   : > { %v4042_v63 = vpop.f32.mrf.mxu1 }
 0x16c   : > { %4187 = vst [vmem:[#allocation4_spill] sm:$0xff] %v4042_v63 }
 0x18c   : > { %v2159_v0 = vpop.f32.mrf.mxu0 }
 0x18d   : > { %v4044_v2 = vpop.f32.mrf.mxu1 }
 0x18e   : > { %4188 = vst [vmem:[#allocation5_spill] sm:$0xff] %v4044_v2  ;;  %v2161_v3 = vpop.f32.mrf.mxu0 }
 0x18f   : > { %v4046_v4 = vpop.f32.mrf.mxu1 }
 0x190   : > { %4189 = vst [vmem:[#allocation6_spill] sm:$0xff] %v4046_v4  ;;  %v2163_v6 = vpop.f32.mrf.mxu0 }
 0x191   : > { %v4048_v7 = vpop.f32.mrf.mxu1 }
 0x192   : > { %4190 = vst [vmem:[#allocation7_spill] sm:$0xff] %v4048_v7  ;;  %v4050_v8 = vpop.f32.mrf.mxu0 }
 0x193   : > { %4191 = vst [vmem:[#allocation8_spill] sm:$0xff] %v4050_v8  ;;  %v4052_v10 = vpop.f32.mrf.mxu1 }
 0x194   : > { %4192 = vst [vmem:[#allocation9_spill] sm:$0xff] %v4052_v10  ;;  %v4054_v11 = vpop.f32.mrf.mxu0 }
 0x195   : > { %4193 = vst [vmem:[#allocation10_spill] sm:$0xff] %v4054_v11  ;;  %v4056_v12 = vpop.f32.mrf.mxu1 }
 0x196   : > { %4194 = vst [vmem:[#allocation11_spill] sm:$0xff] %v4056_v12  ;;  %v4058_v14 = vpop.f32.mrf.mxu0 }
 0x197   : > { %4195 = vst [vmem:[#allocation12_spill] sm:$0xff] %v4058_v14  ;;  %v4060_v15 = vpop.f32.mrf.mxu1 }
 0x198   : > { %4196 = vst [vmem:[#allocation13_spill] sm:$0xff] %v4060_v15  ;;  %v4062_v16 = vpop.f32.mrf.mxu0 }
 0x199   : > { %4197 = vst [vmem:[#allocation14_spill] sm:$0xff] %v4062_v16  ;;  %v4064_v18 = vpop.f32.mrf.mxu1  ;;  %v2018_v16 = vadd.f32 %v2017_v30, %v3984_v36  ;;  %v2109_v30 = vadd.f32 %v2108_v47, %v2036_v58  ;;  %v4206_v47 = vld [vmem:[#allocation2_spill] sm:$0xff] }
 0x19a   : > { %4198 = vst [vmem:[#allocation15_spill] sm:$0xff] %v4064_v18  ;;  %v4066_v19 = vpop.f32.mrf.mxu0  ;;  %v2014_v18 = vadd.f32 %v2013_v25, %v3980_v28 }
 0x19b   : > { %4199 = vst [vmem:[#allocation16_spill] sm:$0xff] %v4066_v19  ;;  %v4068_v20 = vpop.f32.mrf.mxu1  ;;  %v2034_v19 = vadd.f32 %v2033_v43, %v3996_v61  ;;  %v2028_v61 = vadd.f32 %v2027_v38, %v3992_v53  ;;  %v2091_v1 = vadd.f32 %v4016_v31, %v2018_v16  ;;  %v2048_v38 = vadd.f32 %v4036_v59, %v4008_v23  ;;  %v4209_v59 = vld [vmem:[#allocation6_spill] sm:$0xff] }
 0x19c   : > { %4200 = vst [vmem:[#allocation17_spill] sm:$0xff] %v4068_v20  ;;  %v2179_v7 = vpop.f32.mrf.mxu0  ;;  %v2016_v20 = vadd.f32 %v2015_v27, %v3982_v32  ;;  %v2087_v28 = vadd.f32 %v4012_v26, %v2014_v18  ;;  %v2030_v32 = vadd.f32 %v2029_v41, %v3994_v57  ;;  %v2038_v27 = vadd.f32 %v2037_v48, %v4000_v5 }
 0x19d   : > { %v2252_v63 = vpop.f32.mrf.mxu1  ;;  %v2107_v25 = vadd.f32 %v2106_v44, %v2034_v19  ;;  %v2046_v5 = vadd.f32 %v2045_v56, %v4006_v17  ;;  %v2164_v41 = vadd.f32 %v2163_v6, %v2091_v1  ;;  %v4211_v6 = vld [vmem:[#allocation4_spill] sm:$0xff] }
 0x19e   : > { %v2181_v60 = vpop.f32.mrf.mxu0  ;;  %v2089_v36 = vadd.f32 %v4014_v29, %v2016_v20  ;;  %v2160_v26 = vadd.f32 %v2159_v0, %v2087_v28  ;;  %v4213_v18 = vld [vmem:[#allocation12_spill] sm:$0xff] }
 0x19f   : > { %v2254_v10 = vpop.f32.mrf.mxu1  ;;  %v2180_v53 = vadd.f32 %v2179_v7, %v2107_v25  ;;  %v2119_v48 = vadd.f32 %v4206_v47, %v2046_v5  ;;  %v4216_v25 = vld [vmem:[#allocation11_spill] sm:$0xff] }
 0x1a0   : > { %v2183_v4 = vpop.f32.mrf.mxu0 }
 0x1a1   : > { %v4070_v11 = vpop.f32.mrf.mxu1  ;;  %v2253_v46 = vadd.f32 %v2252_v63, %v2180_v53  ;;  %v4212_v63 = vld [vmem:[#allocation7_spill] sm:$0xff] }
 0x1a2   : > { %4201 = vst [vmem:[#allocation18_spill] sm:$0xff] %v4070_v11  ;;  %v2185_v12 = vpop.f32.mrf.mxu0 }
 0x1a3   : > { %v4072_v8 = vpop.f32.mrf.mxu1 }
 0x1a4   : > { %4202 = vst [vmem:[#allocation19_spill] sm:$0xff] %v4072_v8  ;;  %v4074_v14 = vpop.f32.mrf.mxu0  ;;  %v2020_v8 = vadd.f32 %v2019_v33, %v3986_v40  ;;  %v2101_v33 = vadd.f32 %v4024_v39, %v2028_v61  ;;  %v4205_v39 = vld [vmem:[#allocation5_spill] sm:$0xff] }
 0x1a5   : > { %4203 = vst [vmem:[#allocation20_spill] sm:$0xff] %v4074_v14  ;;  %v4076_v15 = vpop.f32.mrf.mxu1  ;;  %v2024_v14 = vadd.f32 %v2023_v34, %v3988_v45  ;;  %v2040_v45 = vadd.f32 %v2039_v51, %v4002_v9  ;;  %v2103_v34 = vadd.f32 %v4026_v42, %v2030_v32  ;;  %v2182_v9 = vadd.f32 %v2181_v60, %v2109_v30  ;;  %v4215_v32 = vld [vmem:[#allocation9_spill] sm:$0xff] }
 0x1a6   : > { %4204 = vst [vmem:[#allocation21_spill] sm:$0xff] %v4076_v15  ;;  %v4083_v2 = vpop.f32.mrf.mxu0  ;;  %v2026_v15 = vadd.f32 %v2025_v22, %v3990_v49  ;;  %v2044_v49 = vadd.f32 %v2043_v54, %v4004_v13  ;;  %v2093_v57 = vadd.f32 %v4018_v21, %v2020_v8  ;;  %v2162_v22 = vadd.f32 %v2161_v3, %v2089_v36  ;;  %v4208_v54 = vld [vmem:[#allocation10_spill] sm:$0xff]  ;;  %v4210_v3 = vld [vmem:[#allocation3_spill] sm:$0xff] }
 0x1a7   : > { %v4085_v11 = vpop.f32.mrf.mxu1  ;;  %v2097_v29 = vadd.f32 %v4020_v35, %v2024_v14  ;;  %v2111_v13 = vadd.f32 %v4028_v50, %v2038_v27  ;;  %v2050_v21 = vadd.f32 %v4040_v62, %v4010_v24  ;;  %v2113_v17 = vadd.f32 %v4030_v52, %v2040_v45  ;;  %v4207_v50 = vld [vmem:[#allocation8_spill] sm:$0xff] }
 0x1a8   : > { %v4096_v43 = vpop.f32.mrf.mxu0  ;;  %v2099_v31 = vadd.f32 %v4022_v37, %v2026_v15  ;;  %v2117_v37 = vadd.f32 %v4032_v55, %v2044_v49  ;;  %v2233_v42 = vadd.f32 %v4205_v39, %v2160_v26  ;;  %v2166_v51 = vadd.f32 %v4207_v50, %v2093_v57 }
 0x1a9   : > { %v4098_v40 = vpop.f32.mrf.mxu1  ;;  %v2170_v23 = vadd.f32 %v4208_v54, %v2097_v29  ;;  %v2184_v56 = vadd.f32 %v2183_v4, %v2111_v13  ;;  %v2235_v60 = vadd.f32 %v4209_v59, %v2162_v22  ;;  %v2255_v62 = vadd.f32 %v2254_v10, %v2182_v9  ;;  %v4217_v1 = vld [vmem:[#allocation18_spill] sm:$0xff] }
 0x1aa   : > { %v2195_v35 = vpop.f32.mrf.mxu0  ;;  %v2121_v55 = vadd.f32 %v4210_v3, %v2048_v38  ;;  %v2123_v7 = vadd.f32 %v4211_v6, %v2050_v21  ;;  %v2237_v8 = vadd.f32 %v4212_v63, %v2164_v41  ;;  %v2186_v14 = vadd.f32 %v2185_v12, %v2113_v17  ;;  %v4218_v29 = vld [vmem:[#allocation14_spill] sm:$0xff] }
 0x1ab   : > { %v4113_v44 = vpop.f32.mrf.mxu1  ;;  %v2172_v19 = vadd.f32 %v4213_v18, %v2099_v31  ;;  %v2239_v10 = vadd.f32 %v4215_v32, %v2166_v51  ;;  %v2243_v36 = vadd.f32 %v4216_v25, %v2170_v23  ;;  %v2257_v27 = vadd.f32 %v4217_v1, %v2184_v56  ;;  %v4219_v5 = vld [vmem:[#allocation19_spill] sm:$0xff] }
 0x1ac   : > { %v4214_v20 = vld [vmem:[#allocation20_spill] sm:$0xff]  ;;  %v2192_v30 = vadd.f32 %v4083_v2, %v2119_v48  ;;  %v2174_v31 = vadd.f32 %v4218_v29, %v2101_v33  ;;  %v2259_v22 = vadd.f32 %v4219_v5, %v2186_v14  ;;  %v4222_v33 = vld [vmem:[#allocation13_spill] sm:$0xff]  ;;  %v2194_v48 = vadd.f32 %v4096_v43, %v2121_v55 }
 0x1ad   : > { %v2190_v4 = vadd.f32 %v4214_v20, %v2117_v37  ;;  %v2245_v41 = vadd.f32 %v4222_v33, %v2172_v19  ;;  %v4223_v17 = vld [vmem:[#allocation21_spill] sm:$0xff] }
 0x1ae   : > { %v2265_v56 = vadd.f32 %v4085_v11, %v2192_v30  ;;  %v4225_v11 = vld [vmem:[#allocation15_spill] sm:$0xff]  ;;  %v2267_v6 = vadd.f32 %v4098_v40, %v2194_v48  ;;  %v4226_v20 = vld [vmem:[#allocation17_spill] sm:$0xff] }
 0x1af   : > { %v2263_v37 = vadd.f32 %v4223_v17, %v2190_v4 }
 0x1bc   : > { %v2305_v24 = vpop.f32.mrf.mxu0 }
 0x1bd   : > { %v2325_v58 = vpop.f32.mrf.mxu1  ;;  %v2306_v0 = vadd.f32 %v2305_v24, %v2233_v42  ;;  %v2196_v24 = vadd.f32 %v2195_v35, %v2123_v7  ;;  %v2247_v35 = vadd.f32 %v4225_v11, %v2174_v31 }
 0x1be   : > { %v2326_v52 = vadd.f32 %v2325_v58, %v2253_v46  ;;  %v2307_v15 = vpop.f32.mrf.mxu0  ;;  %v4224_v46 = vld [vmem:[#allocation16_spill] sm:$0xff] }
 0x1bf   : > { %v2327_v16 = vpop.f32.mrf.mxu1  ;;  %v2308_v28 = vadd.f32 %v2307_v15, %v2235_v60  ;;  %v2344_v12 = vmax.f32 %v2306_v0, 0.0  ;;  %v2176_v47 = vadd.f32 %v4224_v46, %v2103_v34 }
 0x1c0   : > { %v2328_v61 = vadd.f32 %v2327_v16, %v2255_v62  ;;  %v2309_v45 = vpop.f32.mrf.mxu0  ;;  %v2352_v26 = vmax.f32 %v2326_v52, 0.0 }
 0x1c1   : > { %v2329_v49 = vpop.f32.mrf.mxu1  ;;  %v2345_v53 = vmax.f32 %v2308_v28, 0.0  ;;  %v2310_v2 = vadd.f32 %v2309_v45, %v2237_v8  ;;  %v2249_v4 = vadd.f32 %v4226_v20, %v2176_v47  ;;  %v2269_v28 = vadd.f32 %v4113_v44, %v2196_v24 }
 0x1c2   : > { %v2353_v57 = vmax.f32 %v2328_v61, 0.0  ;;  %v2330_v13 = vadd.f32 %v2329_v49, %v2257_v27  ;;  %v2311_v38 = vpop.f32.mrf.mxu0 }
 0x1c3   : > { %v2331_v21 = vpop.f32.mrf.mxu1  ;;  %v2774_v39 = vpack.c.bf16 %v2345_v53, %v2344_v12  ;;  %v2312_v50 = vadd.f32 %v2311_v38, %v2239_v10  ;;  %v2346_v60 = vmax.f32 %v2310_v2, 0.0 }
 0x1c4   : > { %v2778_v42 = vpack.c.bf16 %v2353_v57, %v2352_v26  ;;  %v2332_v51 = vadd.f32 %v2331_v21, %v2259_v22  ;;  %v2315_v54 = vpop.f32.mrf.mxu0  ;;  %v2354_v62 = vmax.f32 %v2330_v13, 0.0 }
 0x1c5   : > { %v2335_v23 = vpop.f32.mrf.mxu1  ;;  %2411 = vst.msk [vmem:[%s4137_s17] sm:$0xff] %vm4141_vm3, %v2774_v39  ;;  %v2316_v58 = vadd.f32 %v2315_v54, %v2243_v36  ;;  %v2347_v34 = vmax.f32 %v2312_v50, 0.0 }
 0x1c6   : > { %2415 = vst.msk [vmem:[%s4137_s17 + $0x20] sm:$0xff] %vm4141_vm3, %v2778_v42  ;;  %v2336_v59 = vadd.f32 %v2335_v23, %v2263_v37  ;;  %v2355_v0 = vmax.f32 %v2332_v51, 0.0  ;;  %v2317_v43 = vpop.f32.mrf.mxu0 }
 0x1c7   : > { %v2337_v52 = vpop.f32.mrf.mxu1  ;;  %v2318_v3 = vadd.f32 %v2317_v43, %v2245_v41  ;;  %v2775_v7 = vpack.c.bf16 %v2347_v34, %v2346_v60  ;;  %v2348_v15 = vmax.f32 %v2316_v58, 0.0 }
 0x1c8   : > { %v2338_v55 = vadd.f32 %v2337_v52, %v2265_v56  ;;  %v2779_v63 = vpack.c.bf16 %v2355_v0, %v2354_v62  ;;  %v2319_v8 = vpop.f32.mrf.mxu0  ;;  %v2356_v16 = vmax.f32 %v2336_v59, 0.0 }
 0x1c9   : > { %v2339_v14 = vpop.f32.mrf.mxu1  ;;  %v2349_v18 = vmax.f32 %v2318_v3, 0.0  ;;  %2412 = vst.msk [vmem:[%s4137_s17 + $0x8] sm:$0xff] %vm4141_vm3, %v2775_v7  ;;  %v2320_v40 = vadd.f32 %v2319_v8, %v2247_v35 }
 0x1ca   : > { %v2357_v19 = vmax.f32 %v2338_v55, 0.0  ;;  %2416 = vst.msk [vmem:[%s4137_s17 + $0x28] sm:$0xff] %vm4141_vm3, %v2779_v63  ;;  %v2340_v61 = vadd.f32 %v2339_v14, %v2267_v6  ;;  %v2321_v32 = vpop.f32.mrf.mxu0 }
 0x1cb   : > { %v2341_v10 = vpop.f32.mrf.mxu1  ;;  %v2776_v25 = vpack.c.bf16 %v2349_v18, %v2348_v15  ;;  %v2322_v1 = vadd.f32 %v2321_v32, %v2249_v4  ;;  %v2350_v44 = vmax.f32 %v2320_v40, 0.0 }
 0x1cc   : > { %v2780_v36 = vpack.c.bf16 %v2357_v19, %v2356_v16  ;;  %v2342_v27 = vadd.f32 %v2341_v10, %v2269_v28  ;;  %v2358_v30 = vmax.f32 %v2340_v61, 0.0 }
 0x1cd   : > { %2413 = vst.msk [vmem:[%s4137_s17 + $0x10] sm:$0xff] %vm4141_vm3, %v2776_v25  ;;  %v2351_v45 = vmax.f32 %v2322_v1, 0.0 }
 0x1ce   : > { %2417 = vst.msk [vmem:[%s4137_s17 + $0x30] sm:$0xff] %vm4141_vm3, %v2780_v36  ;;  %v2359_v49 = vmax.f32 %v2342_v27, 0.0 }
 0x1cf   : > { %v2777_v12 = vpack.c.bf16 %v2351_v45, %v2350_v44 }
 0x1d0   : > { %v2781_v26 = vpack.c.bf16 %v2359_v49, %v2358_v30 }
 0x1d1   : > { %2414 = vst.msk [vmem:[%s4137_s17 + $0x18] sm:$0xff] %vm4141_vm3, %v2777_v12 }
 0x1d2   : > { %2418 = vst.msk [vmem:[%s4137_s17 + $0x38] sm:$0xff] %vm4141_vm3, %v2781_v26 }
 0x1d3 PF: > { %s13_s12 = sadd.s32 1, %s3229_s12  }
 0x1d4   : > { %p10_p4 = scmp.ge.s32.totalorder %s13_s12, 4  }
 0x1d6   :  { %12 = sbr.rel (!%p10_p4) target bundleno = 1 (0x1), region = 62 }

// kernel: net_forward.43
= control target key start
LH: loop header
LB: loop body
LE: loop exit
PB: predicated region body
PF: predicated region fallthrough
CT: control target
= control target key end

     0   :  { %s1015_s0 = inlined_call_operand.vmem [shape: bf16[2,64,512], index: 0, kind: input, shape index: {}]   ;;  %s1016_s1 = inlined_call_operand.vmem [shape: f32[512,100], index: 1, kind: input, shape index: {}]   ;;  %s1017_s2 = inlined_call_operand.vmem [shape: f32[1,100], index: 2, kind: input, shape index: {}]   ;;  %s1018_s3 = inlined_call_operand.hbm [shape: f32[2,100], index: 3, kind: output, shape index: {}]  }
   0x1   :  { %v255_v0 = vld [vmem:[%s1016_s1 + $0xf8] sm:$0xff]  ;;  %v254_v4 = vld [vmem:[%s1016_s1 + $0xf0] sm:$0xff]  ;;  %v253_v8 = vld [vmem:[%s1016_s1 + $0xe8] sm:$0xff] }
   0x2   :  { %v287_v1 = vld [vmem:[%s1016_s1 + $0x1f8] sm:$0xff]  ;;  %469 = vmatprep.subr.mxu0 %v255_v0  ;;  %v286_v5 = vld [vmem:[%s1016_s1 + $0x1f0] sm:$0xff]  ;;  %v285_v9 = vld [vmem:[%s1016_s1 + $0x1e8] sm:$0xff] }
   0x3   :  { %v239_v2 = vld [vmem:[%s1016_s1 + $0x78] sm:$0xff]  ;;  %504 = vmatprep.subr.mxu1 %v287_v1  ;;  %v238_v6 = vld [vmem:[%s1016_s1 + $0x70] sm:$0xff]  ;;  %v237_v10 = vld [vmem:[%s1016_s1 + $0x68] sm:$0xff] }
   0x4   :  { %v271_v3 = vld [vmem:[%s1016_s1 + $0x178] sm:$0xff]  ;;  %470 = vmatpush3.msra.mxu0 %v239_v2  ;;  %v270_v7 = vld [vmem:[%s1016_s1 + $0x170] sm:$0xff]  ;;  %v269_v11 = vld [vmem:[%s1016_s1 + $0x168] sm:$0xff] }
   0x5   :  { %505 = vmatpush3.msra.mxu1 %v271_v3  ;;  %471 = vmatprep.subr.mxu0 %v254_v4  ;;  %v252_v12 = vld [vmem:[%s1016_s1 + $0xe0] sm:$0xff]  ;;  %v251_v16 = vld [vmem:[%s1016_s1 + $0xd8] sm:$0xff]  ;;  %v250_v20 = vld [vmem:[%s1016_s1 + $0xd0] sm:$0xff] }
   0x6   :  { %506 = vmatprep.subr.mxu1 %v286_v5  ;;  %472 = vmatpush3.msra.mxu0 %v238_v6  ;;  %v284_v13 = vld [vmem:[%s1016_s1 + $0x1e0] sm:$0xff]  ;;  %v283_v17 = vld [vmem:[%s1016_s1 + $0x1d8] sm:$0xff]  ;;  %v282_v21 = vld [vmem:[%s1016_s1 + $0x1d0] sm:$0xff] }
   0x7   :  { %507 = vmatpush3.msra.mxu1 %v270_v7  ;;  %473 = vmatprep.subr.mxu0 %v253_v8  ;;  %v236_v14 = vld [vmem:[%s1016_s1 + $0x60] sm:$0xff]  ;;  %v235_v18 = vld [vmem:[%s1016_s1 + $0x58] sm:$0xff]  ;;  %v234_v22 = vld [vmem:[%s1016_s1 + $0x50] sm:$0xff] }
   0x8   :  { %508 = vmatprep.subr.mxu1 %v285_v9  ;;  %v268_v15 = vld [vmem:[%s1016_s1 + $0x160] sm:$0xff]  ;;  %474 = vmatpush3.msra.mxu0 %v237_v10  ;;  %v267_v19 = vld [vmem:[%s1016_s1 + $0x158] sm:$0xff]  ;;  %v266_v23 = vld [vmem:[%s1016_s1 + $0x150] sm:$0xff] }
   0x9   :  { %509 = vmatpush3.msra.mxu1 %v269_v11  ;;  %475 = vmatprep.subr.mxu0 %v252_v12  ;;  %v249_v24 = vld [vmem:[%s1016_s1 + $0xc8] sm:$0xff]  ;;  %v248_v28 = vld [vmem:[%s1016_s1 + $0xc0] sm:$0xff]  ;;  %v247_v32 = vld [vmem:[%s1016_s1 + $0xb8] sm:$0xff] }
   0xa   :  { %510 = vmatprep.subr.mxu1 %v284_v13  ;;  %476 = vmatpush3.msra.mxu0 %v236_v14  ;;  %v281_v25 = vld [vmem:[%s1016_s1 + $0x1c8] sm:$0xff]  ;;  %v280_v29 = vld [vmem:[%s1016_s1 + $0x1c0] sm:$0xff]  ;;  %v279_v33 = vld [vmem:[%s1016_s1 + $0x1b8] sm:$0xff] }
   0xb   :  { %511 = vmatpush3.msra.mxu1 %v268_v15  ;;  %477 = vmatprep.subr.mxu0 %v251_v16  ;;  %v233_v26 = vld [vmem:[%s1016_s1 + $0x48] sm:$0xff]  ;;  %v232_v30 = vld [vmem:[%s1016_s1 + $0x40] sm:$0xff]  ;;  %v231_v34 = vld [vmem:[%s1016_s1 + $0x38] sm:$0xff] }
   0xc   :  { %512 = vmatprep.subr.mxu1 %v283_v17  ;;  %478 = vmatpush3.msra.mxu0 %v235_v18  ;;  %v265_v27 = vld [vmem:[%s1016_s1 + $0x148] sm:$0xff]  ;;  %v264_v31 = vld [vmem:[%s1016_s1 + $0x140] sm:$0xff]  ;;  %v263_v35 = vld [vmem:[%s1016_s1 + $0x138] sm:$0xff] }
   0xd   :  { %513 = vmatpush3.msra.mxu1 %v267_v19  ;;  %479 = vmatprep.subr.mxu0 %v250_v20  ;;  %v246_v36 = vld [vmem:[%s1016_s1 + $0xb0] sm:$0xff]  ;;  %v245_v40 = vld [vmem:[%s1016_s1 + $0xa8] sm:$0xff]  ;;  %v244_v44 = vld [vmem:[%s1016_s1 + $0xa0] sm:$0xff] }
   0xe   :  { %514 = vmatprep.subr.mxu1 %v282_v21  ;;  %480 = vmatpush3.msra.mxu0 %v234_v22  ;;  %v278_v37 = vld [vmem:[%s1016_s1 + $0x1b0] sm:$0xff]  ;;  %v277_v41 = vld [vmem:[%s1016_s1 + $0x1a8] sm:$0xff]  ;;  %v276_v45 = vld [vmem:[%s1016_s1 + $0x1a0] sm:$0xff] }
   0xf   :  { %515 = vmatpush3.msra.mxu1 %v266_v23  ;;  %481 = vmatprep.subr.mxu0 %v249_v24  ;;  %v230_v38 = vld [vmem:[%s1016_s1 + $0x30] sm:$0xff]  ;;  %v229_v42 = vld [vmem:[%s1016_s1 + $0x28] sm:$0xff]  ;;  %v228_v46 = vld [vmem:[%s1016_s1 + $0x20] sm:$0xff] }
  0x10   :  { %516 = vmatprep.subr.mxu1 %v281_v25  ;;  %482 = vmatpush3.msra.mxu0 %v233_v26  ;;  %v262_v39 = vld [vmem:[%s1016_s1 + $0x130] sm:$0xff]  ;;  %v261_v43 = vld [vmem:[%s1016_s1 + $0x128] sm:$0xff]  ;;  %v260_v47 = vld [vmem:[%s1016_s1 + $0x120] sm:$0xff] }
  0x11   :  { %517 = vmatpush3.msra.mxu1 %v265_v27  ;;  %483 = vmatprep.subr.mxu0 %v248_v28  ;;  %v243_v48 = vld [vmem:[%s1016_s1 + $0x98] sm:$0xff]  ;;  %v742_v52 = vld [vmem:[%s1015_s0] sm:$0xff]  ;;  %v747_v53 = vld [vmem:[%s1015_s0 + $0x10] sm:$0xff] }
  0x12   :  { %518 = vmatprep.subr.mxu1 %v280_v29  ;;  %484 = vmatpush3.msra.mxu0 %v232_v30  ;;  %v275_v49 = vld [vmem:[%s1016_s1 + $0x198] sm:$0xff]  ;;  %v752_v54 = vld [vmem:[%s1015_s0 + $0x20] sm:$0xff]  ;;  %v242_v55 = vld [vmem:[%s1016_s1 + $0x90] sm:$0xff]  ;;  %v48_v60 = vunpack.c.h.bf16 %v742_v52  ;;  %v52_v61 = vunpack.c.h.bf16 %v747_v53  ;;  %v47_v18 = vunpack.c.l.bf16 %v742_v52 }
  0x13   :  { %519 = vmatpush3.msra.mxu1 %v264_v31  ;;  %485 = vmatprep.subr.mxu0 %v247_v32  ;;  %v227_v50 = vld [vmem:[%s1016_s1 + $0x18] sm:$0xff]  ;;  %v274_v56 = vld [vmem:[%s1016_s1 + $0x190] sm:$0xff]  ;;  %v768_v58 = vld [vmem:[%s1015_s0 + $0x40] sm:$0xff]  ;;  %v56_v62 = vunpack.c.h.bf16 %v752_v54 }
  0x14   :  { %520 = vmatprep.subr.mxu1 %v279_v33  ;;  %486 = vmatpush3.msra.mxu0 %v231_v34  ;;  %v259_v51 = vld [vmem:[%s1016_s1 + $0x118] sm:$0xff]  ;;  %v763_v57 = vld [vmem:[%s1015_s0 + $0x30] sm:$0xff]  ;;  %v787_v1 = vld [vmem:[%s1015_s0 + $0x60] sm:$0xff]  ;;  %v124_v11 = vadd.f32 %v52_v61, %v48_v60  ;;  %v64_v22 = vunpack.c.h.bf16 %v768_v58 }
  0x15   :  { %521 = vmatpush3.msra.mxu1 %v263_v35  ;;  %487 = vmatprep.subr.mxu0 %v246_v36  ;;  %v773_v59 = vld [vmem:[%s1015_s0 + $0x50] sm:$0xff]  ;;  %v797_v3 = vld [vmem:[%s1015_s0 + $0x80] sm:$0xff]  ;;  %v241_v4 = vld [vmem:[%s1016_s1 + $0x88] sm:$0xff]  ;;  %v60_v9 = vunpack.c.h.bf16 %v763_v57  ;;  %v72_v29 = vunpack.c.h.bf16 %v787_v1 }
  0x16   :  { %522 = vmatprep.subr.mxu1 %v278_v37  ;;  %488 = vmatpush3.msra.mxu0 %v230_v38  ;;  %v226_v63 = vld [vmem:[%s1016_s1 + $0x10] sm:$0xff]  ;;  %v273_v5 = vld [vmem:[%s1016_s1 + $0x188] sm:$0xff]  ;;  %v813_v7 = vld [vmem:[%s1015_s0 + $0xa0] sm:$0xff]  ;;  %v80_v10 = vunpack.c.h.bf16 %v797_v3  ;;  %v68_v23 = vunpack.c.h.bf16 %v773_v59  ;;  %v125_v24 = vadd.f32 %v124_v11, %v56_v62 }
  0x17   :  { %523 = vmatpush3.msra.mxu1 %v262_v39  ;;  %489 = vmatprep.subr.mxu0 %v245_v40  ;;  %v258_v0 = vld [vmem:[%s1016_s1 + $0x110] sm:$0xff]  ;;  %v225_v12 = vld [vmem:[%s1016_s1 + $0x8] sm:$0xff]  ;;  %v831_v14 = vld [vmem:[%s1015_s0 + $0xc0] sm:$0xff]  ;;  %v88_v17 = vunpack.c.h.bf16 %v813_v7 }
  0x18   :  { %524 = vmatprep.subr.mxu1 %v277_v41  ;;  %490 = vmatpush3.msra.mxu0 %v229_v42  ;;  %v792_v2 = vld [vmem:[%s1015_s0 + $0x70] sm:$0xff]  ;;  %v257_v13 = vld [vmem:[%s1016_s1 + $0x108] sm:$0xff]  ;;  %v240_v19 = vld [vmem:[%s1016_s1 + $0x80] sm:$0xff]  ;;  %v96_v35 = vunpack.c.h.bf16 %v831_v14  ;;  %v126_v37 = vadd.f32 %v125_v24, %v60_v9  ;;  %v59_v9 = vunpack.c.l.bf16 %v763_v57 }
  0x19   :  { %525 = vmatpush3.msra.mxu1 %v261_v43  ;;  %491 = vmatprep.subr.mxu0 %v244_v44  ;;  %v808_v6 = vld [vmem:[%s1015_s0 + $0x90] sm:$0xff]  ;;  %v272_v20 = vld [vmem:[%s1016_s1 + $0x180] sm:$0xff]  ;;  %v857_v25 = vld [vmem:[%s1015_s0 + $0x8] sm:$0xff]  ;;  %v76_v30 = vunpack.c.h.bf16 %v792_v2 }
  0x1a   :  { %526 = vmatprep.subr.mxu1 %v276_v45  ;;  %492 = vmatpush3.msra.mxu0 %v228_v46  ;;  %v818_v8 = vld [vmem:[%s1015_s0 + $0xb0] sm:$0xff]  ;;  %v84_v16 = vunpack.c.h.bf16 %v808_v6  ;;  %v850_v21 = vld [vmem:[%s1015_s0 + $0xe0] sm:$0xff]  ;;  %v877_v34 = vld [vmem:[%s1015_s0 + $0x18] sm:$0xff] }
  0x1b   :  { %527 = vmatpush3.msra.mxu1 %v260_v47  ;;  %493 = vmatprep.subr.mxu0 %v243_v48  ;;  %v836_v15 = vld [vmem:[%s1015_s0 + $0xd0] sm:$0xff]  ;;  %v224_v27 = vld [vmem:[%s1016_s1] sm:$0xff]  ;;  %v92_v31 = vunpack.c.h.bf16 %v818_v8  ;;  %v884_v38 = vld [vmem:[%s1015_s0 + $0x28] sm:$0xff]  ;;  %v104_v42 = vunpack.c.h.bf16 %v850_v21  ;;  %v50_v47 = vunpack.c.h.bf16 %v857_v25  ;;  %v54_v48 = vunpack.c.h.bf16 %v877_v34 }
  0x1c   :  { %528 = vmatprep.subr.mxu1 %v275_v49  ;;  %494 = vmatpush3.msra.mxu0 %v227_v50  ;;  %v866_v28 = vld [vmem:[%s1015_s0 + $0xf0] sm:$0xff]  ;;  %v176_v32 = vadd.f32 %v84_v16, %v80_v10  ;;  %v256_v33 = vld [vmem:[%s1016_s1 + $0x100] sm:$0xff]  ;;  %v100_v36 = vunpack.c.h.bf16 %v836_v15  ;;  %v889_v39 = vld [vmem:[%s1015_s0 + $0x38] sm:$0xff]  ;;  %v127_v50 = vadd.f32 %v126_v37, %v64_v22 }
  0x1d   :  { %529 = vmatpush3.msra.mxu1 %v259_v51  ;;  %495 = vmatprep.subr.mxu0 %v242_v55  ;;  %v894_v40 = vld [vmem:[%s1015_s0 + $0x48] sm:$0xff]  ;;  %v901_v44 = vld [vmem:[%s1015_s0 + $0x58] sm:$0xff]  ;;  %v108_v49 = vunpack.c.h.bf16 %v866_v28 }
  0x1e   :  { %530 = vmatprep.subr.mxu1 %v274_v56  ;;  %496 = vmatpush3.msra.mxu0 %v226_v63  ;;  %v177_v43 = vadd.f32 %v176_v32, %v88_v17  ;;  %v906_v45 = vld [vmem:[%s1015_s0 + $0x88] sm:$0xff]  ;;  %v911_v46 = vld [vmem:[%s1015_s0 + $0x98] sm:$0xff]  ;;  %v128_v10 = vadd.f32 %v127_v50, %v68_v23  ;;  %v70_v16 = vunpack.c.h.bf16 %v901_v44 }
  0x1f   :  { %531 = vmatpush3.msra.mxu1 %v258_v0  ;;  %497 = vmatprep.subr.mxu0 %v241_v4  ;;  %v919_v51 = vld [vmem:[%s1015_s0 + $0xa8] sm:$0xff]  ;;  %v924_v55 = vld [vmem:[%s1015_s0 + $0xb8] sm:$0xff]  ;;  %v82_v56 = vunpack.c.h.bf16 %v906_v45  ;;  %v86_v60 = vunpack.c.h.bf16 %v911_v46  ;;  %v58_v4 = vunpack.c.h.bf16 %v884_v38 }
  0x20   :  { %532 = vmatprep.subr.mxu1 %v273_v5  ;;  %498 = vmatpush3.msra.mxu0 %v225_v12  ;;  %v178_v61 = vadd.f32 %v177_v43, %v92_v31  ;;  %v931_v62 = vld [vmem:[%s1015_s0 + $0x68] sm:$0xff]  ;;  %v936_v63 = vld [vmem:[%s1015_s0 + $0x78] sm:$0xff]  ;;  %v90_v5 = vunpack.c.h.bf16 %v919_v51  ;;  %v62_v12 = vunpack.c.h.bf16 %v889_v39 }
  0x21   :  { %533 = vmatpush3.msra.mxu1 %v257_v13  ;;  %499 = vmatprep.subr.mxu0 %v240_v19  ;;  %v941_v0 = vld [vmem:[%s1015_s0 + $0xc8] sm:$0xff]  ;;  %v949_v11 = vld [vmem:[%s1015_s0 + $0xd8] sm:$0xff]  ;;  %v66_v13 = vunpack.c.h.bf16 %v894_v40 }
  0x22   :  { %534 = vmatprep.subr.mxu1 %v272_v20  ;;  %500 = vmatpush3.msra.mxu0 %v224_v27 }
  0x23   :  { %535 = vmatpush3.msra.mxu1 %v256_v33 }
  0x24   :  { %8 = vsyncpa [#allocation3], 0  ;;  %v179_v17 = vadd.f32 %v178_v61, %v96_v35  ;;  %v957_v57 = vld [vmem:[%s1015_s0 + $0xe8] sm:$0xff]  ;;  %v94_v19 = vunpack.c.h.bf16 %v924_v55  ;;  %v150_v20 = vadd.f32 %v54_v48, %v50_v47  ;;  %v202_v22 = vadd.f32 %v86_v60, %v82_v56  ;;  %v963_v24 = vld [vmem:[%s1015_s0 + $0xf8] sm:$0xff]  ;;  %s562_s15 = smov [#allocation2]  }
  0x25   :  { %v129_v23 = vadd.f32 %v128_v10, %v72_v29  ;;  %v74_v27 = vunpack.c.h.bf16 %v931_v62  ;;  %v78_v31 = vunpack.c.h.bf16 %v936_v63  ;;  %v98_v32 = vunpack.c.h.bf16 %v941_v0  ;;  %s460_s16 = sshll.u32 %s562_s15, 4  ;;  %s461_s16 = int_to_ptr.vmem [resolvable:$true] %s460_s16 }
  0x26   :  { %v180_v33 = vadd.f32 %v179_v17, %v100_v36  ;;  %v102_v35 = vunpack.c.h.bf16 %v949_v11  ;;  %v151_v37 = vadd.f32 %v150_v20, %v58_v4  ;;  %v203_v43 = vadd.f32 %v202_v22, %v90_v5  ;;  %s540_s17 = scalar_lea.vmem %s461_s16, 32  ;;  %p545_p1 = scmp.lt.s32.totalorder %s461_s16, %s461_s16 }
  0x27   :  { %v130_v50 = vadd.f32 %v129_v23, %v76_v30  ;;  %v106_v47 = vunpack.c.h.bf16 %v957_v57  ;;  %v79_v29 = vunpack.c.l.bf16 %v797_v3  ;;  %v83_v48 = vunpack.c.l.bf16 %v808_v6  ;;  %p541_p0 = scmp.ne.s32.totalorder %s461_s16, %s540_s17  ;;  %p546_p2 = scmp.lt.s32.totalorder %s540_s17, %s540_s17 }
  0x28   :  { %v181_v56 = vadd.f32 %v180_v33, %v104_v42  ;;  %v110_v60 = vunpack.c.h.bf16 %v963_v24  ;;  %v152_v61 = vadd.f32 %v151_v37, %v62_v12  ;;  %v204_v10 = vadd.f32 %v203_v43, %v94_v19 }
  0x29   :  { %v131_v41 = vrot.slane %v130_v50, 4  ;;  %v63_v26 = vunpack.c.l.bf16 %v768_v58  ;;  %v67_v36 = vunpack.c.l.bf16 %v773_v59  ;;  %v87_v4 = vunpack.c.l.bf16 %v813_v7  ;;  %p547_p3 = por %p546_p2, %p545_p1 }
  0x2a   :  { %v182_v5 = vadd.f32 %v181_v56, %v108_v49  ;;  %v153_v30 = vadd.f32 %v152_v61, %v66_v13  ;;  %v205_v17 = vadd.f32 %v204_v10, %v98_v32  ;;  %v1019_v3 = vunpack.c.l.bf16 %v747_v53 }
  0x2b   :  { %v132_v42 = vadd.f32 %v131_v41, %v130_v50  ;;  %v71_v20 = vunpack.c.l.bf16 %v787_v1  ;;  %v91_v12 = vunpack.c.l.bf16 %v818_v8  ;;  %v163_v19 = vadd.f32 %v83_v48, %v79_v29  ;;  %p548_p4 = pnand %p547_p3, %p541_p0 }
  0x2c   :  { %v111_v6 = vadd.f32 %v1019_v3, %v47_v18  ;;  %v183_v22 = vrot.slane %v182_v5, 4  ;;  %v154_v58 = vadd.f32 %v153_v30, %v70_v16  ;;  %v206_v23 = vadd.f32 %v205_v17, %v102_v35 }
  0x2d   :  { %v1020_v59 = vunpack.c.l.bf16 %v752_v54  ;;  %v133_v49 = vrot.slane %v132_v42, 2  ;;  %v75_v13 = vunpack.c.l.bf16 %v792_v2  ;;  %v95_v52 = vunpack.c.l.bf16 %v831_v14 }
  0x2e   :  { %v164_v32 = vadd.f32 %v163_v19, %v87_v4  ;;  %v184_v53 = vadd.f32 %v183_v22, %v182_v5  ;;  %v155_v18 = vadd.f32 %v154_v58, %v74_v27  ;;  %v207_v41 = vadd.f32 %v206_v23, %v106_v47 }
  0x2f   :  { %v112_v7 = vadd.f32 %v111_v6, %v1020_v59  ;;  %v134_v1 = vadd.f32 %v133_v49, %v132_v42  ;;  %vm303_vm0 = vcmask 1041409   ;;  %v99_v8 = vunpack.c.l.bf16 %v836_v15 }
  0x30   :  { %v103_v16 = vunpack.c.l.bf16 %v850_v21  ;;  %v165_v35 = vadd.f32 %v164_v32, %v91_v12  ;;  %v185_v37 = vrot.slane %v184_v53, 2  ;;  %v156_v54 = vadd.f32 %v155_v18, %v78_v31 }
  0x31   :  { %v113_v33 = vadd.f32 %v112_v7, %v59_v9  ;;  %v208_v43 = vadd.f32 %v207_v41, %v110_v60  ;;  %v135_v29 = vrot.slane %v134_v1, 1  ;;  %v107_v2 = vunpack.c.l.bf16 %v866_v28 }
  0x32   :  { %v166_v14 = vadd.f32 %v165_v35, %v95_v52  ;;  %v49_v48 = vunpack.c.l.bf16 %v857_v25  ;;  %v186_v27 = vadd.f32 %v185_v37, %v184_v53  ;;  %v157_v47 = vrot.slane %v156_v54, 4 }
  0x33   :  { %v114_v50 = vadd.f32 %v113_v33, %v63_v26  ;;  %v209_v9 = vrot.slane %v208_v43, 4  ;;  %v136_v61 = vadd.f32 %v135_v29, %v134_v1  ;;  %v53_v15 = vunpack.c.l.bf16 %v877_v34 }
  0x34   :  { %v167_v10 = vadd.f32 %v166_v14, %v99_v8  ;;  %v57_v21 = vunpack.c.l.bf16 %v884_v38  ;;  %v187_v4 = vrot.slane %v186_v27, 1  ;;  %v158_v31 = vadd.f32 %v157_v47, %v156_v54 }
  0x35   :  { %v115_v56 = vadd.f32 %v114_v50, %v67_v36  ;;  %v210_v60 = vadd.f32 %v209_v9, %v208_v43  ;;  %v217_v5 = vmul.f32 0.015625, %v136_v61  ;;  %v81_v28 = vunpack.c.l.bf16 %v906_v45 }
  0x36   :  { %v168_v30 = vadd.f32 %v167_v10, %v103_v16  ;;  %v85_v25 = vunpack.c.l.bf16 %v911_v46  ;;  %v188_v17 = vadd.f32 %v187_v4, %v186_v27  ;;  %v159_v3 = vrot.slane %v158_v31, 2 }
  0x37   :  { %v116_v26 = vadd.f32 %v115_v56, %v71_v20  ;;  %v211_v6 = vrot.slane %v210_v60, 2  ;;  %v61_v12 = vunpack.c.l.bf16 %v889_v39  ;;  %v65_v34 = vunpack.c.l.bf16 %v894_v40 }
  0x38   :  { %v169_v42 = vadd.f32 %v168_v30, %v107_v2  ;;  %v89_v38 = vunpack.c.l.bf16 %v919_v51  ;;  %v221_v19 = vmul.f32 0.015625, %v188_v17  ;;  %v160_v22 = vadd.f32 %v159_v3, %v158_v31 }
  0x39   :  { %v117_v36 = vadd.f32 %v116_v26, %v75_v13  ;;  %v212_v20 = vadd.f32 %v211_v6, %v210_v60  ;;  %v93_v45 = vunpack.c.l.bf16 %v924_v55  ;;  %v137_v59 = vadd.f32 %v53_v15, %v49_v48 }
  0x3a   :  { %v170_v23 = vrot.slane %v169_v42, 4  ;;  %v189_v46 = vadd.f32 %v85_v25, %v81_v28  ;;  %v305_v7 = vsel %vm303_vm0, %v221_v19, %v217_v5  ;;  %v161_v49 = vrot.slane %v160_v22, 1 }
  0x3b   :  { %v118_v58 = vrot.slane %v117_v36, 4  ;;  %v213_v13 = vrot.slane %v212_v20, 1  ;;  %376 = vmatprep.mubr.f32.mxu0 %v305_v7  ;;  %v97_v40 = vunpack.c.l.bf16 %v941_v0  ;;  %v138_v32 = vadd.f32 %v137_v59, %v57_v21 }
  0x3c   :  { %v171_v39 = vadd.f32 %v170_v23, %v169_v42  ;;  %v190_v51 = vadd.f32 %v189_v46, %v89_v38  ;;  %v162_v53 = vadd.f32 %v161_v49, %v160_v22  ;;  %v69_v33 = vunpack.c.l.bf16 %v901_v44 }
  0x3d   :  { %v119_v52 = vadd.f32 %v118_v58, %v117_v36  ;;  %v214_v18 = vadd.f32 %v213_v13, %v212_v20  ;;  %v101_v55 = vunpack.c.l.bf16 %v949_v11  ;;  %v139_v8 = vadd.f32 %v138_v32, %v61_v12  ;;  %v468_v20 = vld [vmem:[%s1017_s2] ss:$0 sm:$0xff] }
  0x3e   :  { %v172_v1 = vrot.slane %v171_v39, 2  ;;  %v191_v16 = vadd.f32 %v190_v51, %v93_v45  ;;  %v219_v35 = vmul.f32 0.015625, %v162_v53  ;;  %v73_v43 = vunpack.c.l.bf16 %v931_v62 }
  0x3f   :  { %v120_v41 = vrot.slane %v119_v52, 2  ;;  %v223_v37 = vmul.f32 0.015625, %v214_v18  ;;  %v105_v0 = vunpack.c.l.bf16 %v957_v57  ;;  %v140_v29 = vadd.f32 %v139_v8, %v65_v34 }
  0x40   :  { %v173_v50 = vadd.f32 %v172_v1, %v171_v39  ;;  %v192_v2 = vadd.f32 %v191_v16, %v97_v40  ;;  %v77_v44 = vunpack.c.l.bf16 %v936_v63  ;;  %v109_v11 = vunpack.c.l.bf16 %v963_v24 }
  0x41   :  { %v121_v54 = vadd.f32 %v120_v41, %v119_v52  ;;  %v307_v14 = vsel %vm303_vm0, %v223_v37, %v219_v35  ;;  %v141_v47 = vadd.f32 %v140_v29, %v69_v33  ;;  %vm452_vm1 = vcmask 812032  }
  0x42   :  { %446 = vmatprep.mubr.f32.mxu1 %v307_v14  ;;  %v174_v27 = vrot.slane %v173_v50, 1  ;;  %v193_v9 = vadd.f32 %v192_v2, %v101_v55 }
  0x43   :  { %v122_v48 = vrot.slane %v121_v54, 1  ;;  %v142_v10 = vadd.f32 %v141_v47, %v73_v43 }
  0x44   :  { %v175_v61 = vadd.f32 %v174_v27, %v173_v50  ;;  %v194_v62 = vadd.f32 %v193_v9, %v105_v0 }
  0x45   :  { %v123_v56 = vadd.f32 %v122_v48, %v121_v54  ;;  %v143_v57 = vadd.f32 %v142_v10, %v77_v44 }
  0x46   :  { %v220_v21 = vmul.f32 0.015625, %v175_v61  ;;  %v195_v4 = vadd.f32 %v194_v62, %v109_v11 }
  0x47   :  { %v216_v15 = vmul.f32 0.015625, %v123_v56  ;;  %v144_v60 = vrot.slane %v143_v57, 4 }
  0x48   :  { %v196_v26 = vrot.slane %v195_v4, 4 }
  0x49   :  { %v304_v31 = vsel %vm303_vm0, %v220_v21, %v216_v15  ;;  %v145_v63 = vadd.f32 %v144_v60, %v143_v57 }
  0x4a   :  { %377 = vmatmul.mubr.f32.vlgmr.msra.gmra.mxu0 %v304_v31  ;;  %v197_v5 = vadd.f32 %v196_v26, %v195_v4 }
  0x4b   :  { %v146_v30 = vrot.slane %v145_v63, 2 }
  0x4c   :  { %v198_v28 = vrot.slane %v197_v5, 2 }
  0x4d   :  { %v147_v24 = vadd.f32 %v146_v30, %v145_v63 }
  0x4e   :  { %v199_v25 = vadd.f32 %v198_v28, %v197_v5 }
  0x4f   :  { %v148_v17 = vrot.slane %v147_v24, 1 }
  0x50   :  { %v200_v3 = vrot.slane %v199_v25, 1 }
  0x51   :  { %v149_v6 = vadd.f32 %v148_v17, %v147_v24 }
  0x52   :  { %v201_v36 = vadd.f32 %v200_v3, %v199_v25 }
  0x53   :  { %v218_v42 = vmul.f32 0.015625, %v149_v6 }
  0x54   :  { %v222_v12 = vmul.f32 0.015625, %v201_v36 }
  0x56   :  { %v306_v34 = vsel %vm303_vm0, %v222_v12, %v218_v42 }
  0x57   :  { %447 = vmatmul.mubr.f32.vlgmr.msra.gmra.mxu1 %v306_v34 }
 0x10a   :  { %v501_v38 = vpop.f32.mrf.mxu0 }
 0x10c   :  { %v502_v19 = vpop.f32.mrf.mxu0 }
 0x10d   :  { %v503_v22 = vadd.f32 %v502_v19, %v501_v38 }
 0x10f   :  { %v379_v23 = vadd.f32 %v503_v22, %v468_v20 }
 0x117   :  { %v536_v58 = vpop.f32.mrf.mxu1 }
 0x119   :  { %v537_v45 = vpop.f32.mrf.mxu1 }
 0x11a   :  { %v538_v59 = vadd.f32 %v537_v45, %v536_v58 }
 0x11c   :  { %v449_v46 = vadd.f32 %v538_v59, %v379_v23 }
 0x11e   :  { %453 = vst.msk [vmem:[#allocation2] sm:$0x3] %vm452_vm1, %v449_v46 }
 0x11f   :  { %551 = shalt.err (!%p548_p4)
}
 0x120   :  { %463 = dma.vmem_to_hbm [thread:$0]  %s461_s16, 32, %s1018_s3, [#allocation3]  }
 0x121   :  { %560 = dma.done.wait [#allocation3], 32  }
 0x122   :  { %561 = vsyncadd [#allocation3], 4294967264 }
 0x123   :  { %467 = vsyncpa [#allocation3], 1 }

// kernel: net_forward.41
= control target key start
LH: loop header
LB: loop body
LE: loop exit
PB: predicated region body
PF: predicated region fallthrough
CT: control target
= control target key end

     0   :  { %s2002_s12 = smov 0   ;;  %s2555_s0 = inlined_call_operand.vmem [shape: bf16[128,512], index: 0, kind: input, shape index: {}]   ;;  %s2556_s1 = inlined_call_operand.vmem [shape: bf16[512,512], index: 1, kind: input, shape index: {}]   ;;  %s2557_s2 = inlined_call_operand.vmem [shape: f32[1,512], index: 2, kind: input, shape index: {}]   ;;  %s2558_s3 = inlined_call_operand.vmem [shape: bf16[128,512], index: 3, kind: output, shape index: {}]  }
   0x1 LB: > { %s1559_s13 = sadd.s32 4294967295, %s1980_s12   ;;  %p1563_p0 = scmp.ge.s32.totalorder %s1980_s12, 1  ;;  %s1980_s12 = sphi %s2002_s12, %s13_s12  }
   0x2   : > { %p139_p1 = scmp.lt.s32.totalorder %s1980_s12, 3 }
   0x4   : > { %p140_p2 = pnand %p1563_p0, %p139_p1 }
   0x5   : > { %s1564_s24 = sshll.u32 (!%p140_p2), %s1559_s13, 3 }
   0x6   : > { %143 = sbr.rel (%p140_p2) target bundleno = 372 (0x174), region = 32  ;;  %p166_p3 = scmp.lt.s32.totalorder (!%p140_p2), %s1564_s24, 15 }
   0xb   : > { %v1758_v0 = vld [vmem:[%s2556_s1 + $0xe4] ss:$16 sps:$4 sm:$0xff]   ;;  %v1762_v2 = vld [vmem:[%s2556_s1 + $0xe0] ss:$16 sps:$4 sm:$0xff]   ;;  %s2560_s24 = smov (!%p166_p3, %s1564_s24), 15 }
   0xc   : > { %v1760_v1 = vld [vmem:[%s2556_s1 + $0x2e4] ss:$16 sps:$4 sm:$0xff]   ;;  %1065 = vmatprep.subr.bf16.mxu0 %v1758_v0  ;;  %v1763_v3 = vld [vmem:[%s2556_s1 + $0x2e0] ss:$16 sps:$4 sm:$0xff]   ;;  %s1732_s23 = sshll.u32 %s2560_s24, 4 }
   0xd   : > { %1138 = vmatprep.subr.bf16.mxu1 %v1760_v1  ;;  %v1764_v4 = vld [vmem:[%s2556_s1 + $0xc4] ss:$16 sps:$4 sm:$0xff]   ;;  %1066 = vmatpush1.bf16.msra.mxu0 %v1762_v2  ;;  %v1768_v6 = vld [vmem:[%s2556_s1 + $0xc0] ss:$16 sps:$4 sm:$0xff]   ;;  %s2155_s13 = scalar_lea.vmem %s2555_s0, %s1732_s23  ;;  %v1862_v2 = vld [vmem:[%s2556_s1 + $0xec] ss:$16 sps:$4 sm:$0xff]   ;;  %s2506_s14 = scalar_lea.vmem %s2558_s3, %s1732_s23 }
   0xe   : > { %1139 = vmatpush1.bf16.msra.mxu1 %v1763_v3  ;;  %v1766_v5 = vld [vmem:[%s2556_s1 + $0x2c4] ss:$16 sps:$4 sm:$0xff]   ;;  %1067 = vmatprep.subr.bf16.mxu0 %v1764_v4  ;;  %v1769_v7 = vld [vmem:[%s2556_s1 + $0x2c0] ss:$16 sps:$4 sm:$0xff]   ;;  %v2176_v51 = vld [vmem:[%s2155_s13 + $0xc] ss:$16 sps:$4 sm:$0xff]  }
   0xf   : > { %1140 = vmatprep.subr.bf16.mxu1 %v1766_v5  ;;  %v1770_v8 = vld [vmem:[%s2556_s1 + $0xa4] ss:$16 sps:$4 sm:$0xff]   ;;  %v1774_v10 = vld [vmem:[%s2556_s1 + $0xa0] ss:$16 sps:$4 sm:$0xff]   ;;  %1170 = vmatprep.mubr.bf16.mxu1 %v2176_v51  ;;  %v1865_v3 = vld [vmem:[%s2556_s1 + $0x2ec] ss:$16 sps:$4 sm:$0xff]  }
  0x10   : > { %v1772_v9 = vld [vmem:[%s2556_s1 + $0x2a4] ss:$16 sps:$4 sm:$0xff]   ;;  %v1775_v11 = vld [vmem:[%s2556_s1 + $0x2a0] ss:$16 sps:$4 sm:$0xff]   ;;  %v2232_v5 = vld [vmem:[%s2155_s13 + $0x8] ss:$16 sps:$4 sm:$0xff]  }
  0x11   : > { %1068 = vmatpush1.bf16.msra.mxu0 %v1768_v6  ;;  %v1776_v12 = vld [vmem:[%s2556_s1 + $0x84] ss:$16 sps:$4 sm:$0xff]   ;;  %v1780_v14 = vld [vmem:[%s2556_s1 + $0x80] ss:$16 sps:$4 sm:$0xff]   ;;  %v1860_v6 = vld [vmem:[%s2556_s1 + $0xe8] ss:$16 sps:$4 sm:$0xff]  }
  0x12   : > { %1141 = vmatpush1.bf16.msra.mxu1 %v1769_v7  ;;  %1069 = vmatprep.subr.bf16.mxu0 %v1770_v8  ;;  %v1778_v13 = vld [vmem:[%s2556_s1 + $0x284] ss:$16 sps:$4 sm:$0xff]   ;;  %v1781_v15 = vld [vmem:[%s2556_s1 + $0x280] ss:$16 sps:$4 sm:$0xff]   ;;  %v1863_v7 = vld [vmem:[%s2556_s1 + $0x2e8] ss:$16 sps:$4 sm:$0xff]  }
  0x13   : > { %1142 = vmatprep.subr.bf16.mxu1 %v1772_v9  ;;  %v1782_v16 = vld [vmem:[%s2556_s1 + $0x64] ss:$16 sps:$4 sm:$0xff]   ;;  %v1786_v18 = vld [vmem:[%s2556_s1 + $0x60] ss:$16 sps:$4 sm:$0xff]   ;;  %v1868_v8 = vld [vmem:[%s2556_s1 + $0xcc] ss:$16 sps:$4 sm:$0xff]  }
  0x14   : > { %v1784_v17 = vld [vmem:[%s2556_s1 + $0x264] ss:$16 sps:$4 sm:$0xff]   ;;  %v1787_v19 = vld [vmem:[%s2556_s1 + $0x260] ss:$16 sps:$4 sm:$0xff]   ;;  %v1871_v9 = vld [vmem:[%s2556_s1 + $0x2cc] ss:$16 sps:$4 sm:$0xff]  }
  0x15   : > { %1070 = vmatpush1.bf16.msra.mxu0 %v1774_v10  ;;  %v1788_v20 = vld [vmem:[%s2556_s1 + $0x44] ss:$16 sps:$4 sm:$0xff]   ;;  %v1792_v22 = vld [vmem:[%s2556_s1 + $0x40] ss:$16 sps:$4 sm:$0xff]   ;;  %v1866_v10 = vld [vmem:[%s2556_s1 + $0xc8] ss:$16 sps:$4 sm:$0xff]  }
  0x16   : > { %1143 = vmatpush1.bf16.msra.mxu1 %v1775_v11  ;;  %1071 = vmatprep.subr.bf16.mxu0 %v1776_v12  ;;  %v1790_v21 = vld [vmem:[%s2556_s1 + $0x244] ss:$16 sps:$4 sm:$0xff]   ;;  %v1793_v23 = vld [vmem:[%s2556_s1 + $0x240] ss:$16 sps:$4 sm:$0xff]   ;;  %v1869_v11 = vld [vmem:[%s2556_s1 + $0x2c8] ss:$16 sps:$4 sm:$0xff]  }
  0x17   : > { %1144 = vmatprep.subr.bf16.mxu1 %v1778_v13  ;;  %v1794_v24 = vld [vmem:[%s2556_s1 + $0x24] ss:$16 sps:$4 sm:$0xff]   ;;  %v1798_v26 = vld [vmem:[%s2556_s1 + $0x20] ss:$16 sps:$4 sm:$0xff]   ;;  %v1874_v12 = vld [vmem:[%s2556_s1 + $0xac] ss:$16 sps:$4 sm:$0xff]  }
  0x18   : > { %v1796_v25 = vld [vmem:[%s2556_s1 + $0x224] ss:$16 sps:$4 sm:$0xff]   ;;  %v1799_v27 = vld [vmem:[%s2556_s1 + $0x220] ss:$16 sps:$4 sm:$0xff]   ;;  %v1877_v13 = vld [vmem:[%s2556_s1 + $0x2ac] ss:$16 sps:$4 sm:$0xff]  }
  0x19   : > { %1072 = vmatpush1.bf16.msra.mxu0 %v1780_v14  ;;  %v1800_v28 = vld [vmem:[%s2556_s1 + $0x4] ss:$16 sps:$4 sm:$0xff]   ;;  %v1804_v30 = vld [vmem:[%s2556_s1] ss:$16 sps:$4 sm:$0xff]   ;;  %v1872_v14 = vld [vmem:[%s2556_s1 + $0xa8] ss:$16 sps:$4 sm:$0xff]  }
  0x1a   : > { %1145 = vmatpush1.bf16.msra.mxu1 %v1781_v15  ;;  %1073 = vmatprep.subr.bf16.mxu0 %v1782_v16  ;;  %v1802_v29 = vld [vmem:[%s2556_s1 + $0x204] ss:$16 sps:$4 sm:$0xff]   ;;  %v1805_v31 = vld [vmem:[%s2556_s1 + $0x200] ss:$16 sps:$4 sm:$0xff]   ;;  %v1875_v15 = vld [vmem:[%s2556_s1 + $0x2a8] ss:$16 sps:$4 sm:$0xff]  }
  0x1b   : > { %1146 = vmatprep.subr.bf16.mxu1 %v1784_v17  ;;  %v1806_v32 = vld [vmem:[%s2556_s1 + $0x1e4] ss:$16 sps:$4 sm:$0xff]   ;;  %v1810_v34 = vld [vmem:[%s2556_s1 + $0x1e0] ss:$16 sps:$4 sm:$0xff]  }
  0x1c   : > { %v1808_v33 = vld [vmem:[%s2556_s1 + $0x3e4] ss:$16 sps:$4 sm:$0xff]   ;;  %v1811_v35 = vld [vmem:[%s2556_s1 + $0x3e0] ss:$16 sps:$4 sm:$0xff]  }
  0x1d   : > { %1074 = vmatpush1.bf16.msra.mxu0 %v1786_v18  ;;  %v1812_v36 = vld [vmem:[%s2556_s1 + $0x1c4] ss:$16 sps:$4 sm:$0xff]   ;;  %v1816_v38 = vld [vmem:[%s2556_s1 + $0x1c0] ss:$16 sps:$4 sm:$0xff]   ;;  %v2273_v18 = vld [vmem:[%s2155_s13 + $0x2c] ss:$16 sps:$4 sm:$0xff]  }
  0x1e   : > { %1147 = vmatpush1.bf16.msra.mxu1 %v1787_v19  ;;  %1075 = vmatprep.subr.bf16.mxu0 %v1788_v20  ;;  %v1814_v37 = vld [vmem:[%s2556_s1 + $0x3c4] ss:$16 sps:$4 sm:$0xff]   ;;  %v1817_v39 = vld [vmem:[%s2556_s1 + $0x3c0] ss:$16 sps:$4 sm:$0xff]   ;;  %v2276_v19 = vld [vmem:[%s2155_s13 + $0x28] ss:$16 sps:$4 sm:$0xff]  }
  0x1f   : > { %1148 = vmatprep.subr.bf16.mxu1 %v1790_v21  ;;  %v1818_v40 = vld [vmem:[%s2556_s1 + $0x1a4] ss:$16 sps:$4 sm:$0xff]   ;;  %v1822_v42 = vld [vmem:[%s2556_s1 + $0x1a0] ss:$16 sps:$4 sm:$0xff]   ;;  %v1880_v20 = vld [vmem:[%s2556_s1 + $0x8c] ss:$16 sps:$4 sm:$0xff]  }
  0x20   : > { %v1820_v41 = vld [vmem:[%s2556_s1 + $0x3a4] ss:$16 sps:$4 sm:$0xff]   ;;  %v1823_v43 = vld [vmem:[%s2556_s1 + $0x3a0] ss:$16 sps:$4 sm:$0xff]   ;;  %v1883_v21 = vld [vmem:[%s2556_s1 + $0x28c] ss:$16 sps:$4 sm:$0xff]  }
  0x21   : > { %1076 = vmatpush1.bf16.msra.mxu0 %v1792_v22  ;;  %v1824_v44 = vld [vmem:[%s2556_s1 + $0x184] ss:$16 sps:$4 sm:$0xff]   ;;  %v1828_v46 = vld [vmem:[%s2556_s1 + $0x180] ss:$16 sps:$4 sm:$0xff]   ;;  %v1878_v22 = vld [vmem:[%s2556_s1 + $0x88] ss:$16 sps:$4 sm:$0xff]  }
  0x22   : > { %1149 = vmatpush1.bf16.msra.mxu1 %v1793_v23  ;;  %1077 = vmatprep.subr.bf16.mxu0 %v1794_v24  ;;  %v1826_v45 = vld [vmem:[%s2556_s1 + $0x384] ss:$16 sps:$4 sm:$0xff]   ;;  %v1829_v47 = vld [vmem:[%s2556_s1 + $0x380] ss:$16 sps:$4 sm:$0xff]   ;;  %v1881_v23 = vld [vmem:[%s2556_s1 + $0x288] ss:$16 sps:$4 sm:$0xff]  }
  0x23   : > { %1150 = vmatprep.subr.bf16.mxu1 %v1796_v25  ;;  %v1830_v48 = vld [vmem:[%s2556_s1 + $0x164] ss:$16 sps:$4 sm:$0xff]   ;;  %v1834_v52 = vld [vmem:[%s2556_s1 + $0x160] ss:$16 sps:$4 sm:$0xff]   ;;  %v1886_v24 = vld [vmem:[%s2556_s1 + $0x6c] ss:$16 sps:$4 sm:$0xff]  }
  0x24   : > { %v2170_v49 = vld [vmem:[%s2155_s13 + $0x4] ss:$16 sps:$4 sm:$0xff]   ;;  %v1835_v53 = vld [vmem:[%s2556_s1 + $0x360] ss:$16 sps:$4 sm:$0xff]   ;;  %v1889_v25 = vld [vmem:[%s2556_s1 + $0x26c] ss:$16 sps:$4 sm:$0xff]  }
  0x25   : > { %1078 = vmatpush1.bf16.msra.mxu0 %v1798_v26  ;;  %v1832_v50 = vld [vmem:[%s2556_s1 + $0x364] ss:$16 sps:$4 sm:$0xff]   ;;  %1097 = vmatprep.mubr.bf16.mxu0 %v2170_v49  ;;  %v1840_v56 = vld [vmem:[%s2556_s1 + $0x140] ss:$16 sps:$4 sm:$0xff]   ;;  %v1884_v26 = vld [vmem:[%s2556_s1 + $0x68] ss:$16 sps:$4 sm:$0xff]  }
  0x26   : > { %1151 = vmatpush1.bf16.msra.mxu1 %v1799_v27  ;;  %1079 = vmatprep.subr.bf16.mxu0 %v1800_v28  ;;  %v1836_v54 = vld [vmem:[%s2556_s1 + $0x144] ss:$16 sps:$4 sm:$0xff]   ;;  %v1841_v57 = vld [vmem:[%s2556_s1 + $0x340] ss:$16 sps:$4 sm:$0xff]   ;;  %v1887_v27 = vld [vmem:[%s2556_s1 + $0x268] ss:$16 sps:$4 sm:$0xff]  }
  0x27   : > { %1152 = vmatprep.subr.bf16.mxu1 %v1802_v29  ;;  %v1838_v55 = vld [vmem:[%s2556_s1 + $0x344] ss:$16 sps:$4 sm:$0xff]   ;;  %v1846_v60 = vld [vmem:[%s2556_s1 + $0x120] ss:$16 sps:$4 sm:$0xff]  }
  0x28   : > { %v1842_v58 = vld [vmem:[%s2556_s1 + $0x124] ss:$16 sps:$4 sm:$0xff]   ;;  %v1847_v61 = vld [vmem:[%s2556_s1 + $0x320] ss:$16 sps:$4 sm:$0xff]  }
  0x29   : > { %1080 = vmatpush1.bf16.msra.mxu0 %v1804_v30  ;;  %v1844_v59 = vld [vmem:[%s2556_s1 + $0x324] ss:$16 sps:$4 sm:$0xff]   ;;  %v1852_v0 = vld [vmem:[%s2556_s1 + $0x100] ss:$16 sps:$4 sm:$0xff]   ;;  %v2313_v30 = vld [vmem:[%s2155_s13 + $0x4c] ss:$16 sps:$4 sm:$0xff]  }
  0x2a   : > { %1153 = vmatpush1.bf16.msra.mxu1 %v1805_v31  ;;  %1081 = vmatprep.subr.bf16.mxu0 %v1806_v32  ;;  %v1848_v62 = vld [vmem:[%s2556_s1 + $0x104] ss:$16 sps:$4 sm:$0xff]   ;;  %v1853_v1 = vld [vmem:[%s2556_s1 + $0x300] ss:$16 sps:$4 sm:$0xff]   ;;  %v2316_v31 = vld [vmem:[%s2155_s13 + $0x48] ss:$16 sps:$4 sm:$0xff]  }
  0x2b   : > { %1154 = vmatprep.subr.bf16.mxu1 %v1808_v33  ;;  %v1850_v63 = vld [vmem:[%s2556_s1 + $0x304] ss:$16 sps:$4 sm:$0xff]   ;;  %v2229_v4 = vld [vmem:[%s2155_s13] ss:$16 sps:$4 sm:$0xff]   ;;  %v1892_v32 = vld [vmem:[%s2556_s1 + $0x4c] ss:$16 sps:$4 sm:$0xff]  }
  0x2c   : > { %v2267_v16 = vld [vmem:[%s2155_s13 + $0x24] ss:$16 sps:$4 sm:$0xff]   ;;  %v2270_v17 = vld [vmem:[%s2155_s13 + $0x20] ss:$16 sps:$4 sm:$0xff]   ;;  %v1895_v33 = vld [vmem:[%s2556_s1 + $0x24c] ss:$16 sps:$4 sm:$0xff]  }
  0x2d   : > { %1082 = vmatpush2.bf16.msra.mxu0 %v1810_v34  ;;  %v2307_v28 = vld [vmem:[%s2155_s13 + $0x44] ss:$16 sps:$4 sm:$0xff]   ;;  %v2310_v29 = vld [vmem:[%s2155_s13 + $0x40] ss:$16 sps:$4 sm:$0xff]   ;;  %v1890_v34 = vld [vmem:[%s2556_s1 + $0x48] ss:$16 sps:$4 sm:$0xff]  }
  0x2e   : > { %1155 = vmatpush2.bf16.msra.mxu1 %v1811_v35  ;;  %1083 = vmatprep.subr.bf16.mxu0 %v1812_v36  ;;  %v1893_v35 = vld [vmem:[%s2556_s1 + $0x248] ss:$16 sps:$4 sm:$0xff]   ;;  %v1898_v36 = vld [vmem:[%s2556_s1 + $0x2c] ss:$16 sps:$4 sm:$0xff]  }
  0x2f   : > { %1156 = vmatprep.subr.bf16.mxu1 %v1814_v37  ;;  %v1901_v37 = vld [vmem:[%s2556_s1 + $0x22c] ss:$16 sps:$4 sm:$0xff]  }
  0x31   : > { %1084 = vmatpush2.bf16.msra.mxu0 %v1816_v38  ;;  %v1896_v38 = vld [vmem:[%s2556_s1 + $0x28] ss:$16 sps:$4 sm:$0xff]  }
  0x32   : > { %1157 = vmatpush2.bf16.msra.mxu1 %v1817_v39  ;;  %1085 = vmatprep.subr.bf16.mxu0 %v1818_v40  ;;  %v1899_v39 = vld [vmem:[%s2556_s1 + $0x228] ss:$16 sps:$4 sm:$0xff]   ;;  %v2347_v40 = vld [vmem:[%s2155_s13 + $0x64] ss:$16 sps:$4 sm:$0xff]  }
  0x33   : > { %1158 = vmatprep.subr.bf16.mxu1 %v1820_v41  ;;  %v2350_v41 = vld [vmem:[%s2155_s13 + $0x60] ss:$16 sps:$4 sm:$0xff]  }
  0x35   : > { %1086 = vmatpush2.bf16.msra.mxu0 %v1822_v42  ;;  %v2353_v42 = vld [vmem:[%s2155_s13 + $0x6c] ss:$16 sps:$4 sm:$0xff]  }
  0x36   : > { %1159 = vmatpush2.bf16.msra.mxu1 %v1823_v43  ;;  %1087 = vmatprep.subr.bf16.mxu0 %v1824_v44  ;;  %v2356_v43 = vld [vmem:[%s2155_s13 + $0x68] ss:$16 sps:$4 sm:$0xff]   ;;  %v1904_v44 = vld [vmem:[%s2556_s1 + $0xc] ss:$16 sps:$4 sm:$0xff]  }
  0x37   : > { %1160 = vmatprep.subr.bf16.mxu1 %v1826_v45  ;;  %v1907_v45 = vld [vmem:[%s2556_s1 + $0x20c] ss:$16 sps:$4 sm:$0xff]  }
  0x39   : > { %1088 = vmatpush2.bf16.msra.mxu0 %v1828_v46  ;;  %v1902_v46 = vld [vmem:[%s2556_s1 + $0x8] ss:$16 sps:$4 sm:$0xff]  }
  0x3a   : > { %1161 = vmatpush2.bf16.msra.mxu1 %v1829_v47  ;;  %1089 = vmatprep.subr.bf16.mxu0 %v1830_v48  ;;  %v1905_v47 = vld [vmem:[%s2556_s1 + $0x208] ss:$16 sps:$4 sm:$0xff]   ;;  %v1910_v48 = vld [vmem:[%s2556_s1 + $0x1ec] ss:$16 sps:$4 sm:$0xff]  }
  0x3b   : > { %1162 = vmatprep.subr.bf16.mxu1 %v1832_v50  ;;  %v1913_v50 = vld [vmem:[%s2556_s1 + $0x3ec] ss:$16 sps:$4 sm:$0xff]  }
  0x3d   : > { %1090 = vmatpush2.bf16.msra.mxu0 %v1834_v52  ;;  %v1908_v52 = vld [vmem:[%s2556_s1 + $0x1e8] ss:$16 sps:$4 sm:$0xff]  }
  0x3e   : > { %1163 = vmatpush2.bf16.msra.mxu1 %v1835_v53  ;;  %1091 = vmatprep.subr.bf16.mxu0 %v1836_v54  ;;  %v1911_v53 = vld [vmem:[%s2556_s1 + $0x3e8] ss:$16 sps:$4 sm:$0xff]   ;;  %v1922_v54 = vld [vmem:[%s2556_s1 + $0x1cc] ss:$16 sps:$4 sm:$0xff]  }
  0x3f   : > { %1164 = vmatprep.subr.bf16.mxu1 %v1838_v55  ;;  %v1923_v55 = vld [vmem:[%s2556_s1 + $0x3c8] ss:$16 sps:$4 sm:$0xff]  }
  0x41   : > { %1092 = vmatpush2.bf16.msra.mxu0 %v1840_v56  ;;  %v1928_v56 = vld [vmem:[%s2556_s1 + $0x1ac] ss:$16 sps:$4 sm:$0xff]  }
  0x42   : > { %1165 = vmatpush2.bf16.msra.mxu1 %v1841_v57  ;;  %1093 = vmatprep.subr.bf16.mxu0 %v1842_v58  ;;  %v1931_v57 = vld [vmem:[%s2556_s1 + $0x3ac] ss:$16 sps:$4 sm:$0xff]   ;;  %v1926_v58 = vld [vmem:[%s2556_s1 + $0x1a8] ss:$16 sps:$4 sm:$0xff]  }
  0x43   : > { %1166 = vmatprep.subr.bf16.mxu1 %v1844_v59  ;;  %v1929_v59 = vld [vmem:[%s2556_s1 + $0x3a8] ss:$16 sps:$4 sm:$0xff]  }
  0x45   : > { %1094 = vmatpush2.bf16.msra.mxu0 %v1846_v60  ;;  %v1940_v60 = vld [vmem:[%s2556_s1 + $0x18c] ss:$16 sps:$4 sm:$0xff]  }
  0x46   : > { %1167 = vmatpush2.bf16.msra.mxu1 %v1847_v61  ;;  %1095 = vmatprep.subr.bf16.mxu0 %v1848_v62  ;;  %v1943_v61 = vld [vmem:[%s2556_s1 + $0x38c] ss:$16 sps:$4 sm:$0xff]   ;;  %v1938_v62 = vld [vmem:[%s2556_s1 + $0x188] ss:$16 sps:$4 sm:$0xff]  }
  0x47   : > { %1168 = vmatprep.subr.bf16.mxu1 %v1850_v63  ;;  %v1941_v63 = vld [vmem:[%s2556_s1 + $0x388] ss:$16 sps:$4 sm:$0xff]  }
  0x49   : > { %1096 = vmatpush2.bf16.msra.mxu0 %v1852_v0  ;;  %v1946_v0 = vld [vmem:[%s2556_s1 + $0x16c] ss:$16 sps:$4 sm:$0xff]  }
  0x4a   : > { %1169 = vmatpush2.bf16.msra.mxu1 %v1853_v1  ;;  %1211 = vmatprep.subr.bf16.mxu0 %v1862_v2  ;;  %v1949_v1 = vld [vmem:[%s2556_s1 + $0x36c] ss:$16 sps:$4 sm:$0xff]   ;;  %v1944_v2 = vld [vmem:[%s2556_s1 + $0x168] ss:$16 sps:$4 sm:$0xff]  }
  0x4b   : > { %1284 = vmatprep.subr.bf16.mxu1 %v1865_v3  ;;  %v1947_v3 = vld [vmem:[%s2556_s1 + $0x368] ss:$16 sps:$4 sm:$0xff]  }
  0x4c   : > { %1098 = vmatmul.mubr.bf16.vlgmr.msra.gmra.mxu0 %v2229_v4 }
  0x4d   : > { %1171 = vmatmul.mubr.bf16.vlgmr.msra.gmra.mxu1 %v2232_v5  ;;  %1212 = vmatpush1.bf16.msra.mxu0 %v1860_v6  ;;  %v1958_v6 = vld [vmem:[%s2556_s1 + $0x14c] ss:$16 sps:$4 sm:$0xff]  }
  0x4e   : > { %1285 = vmatpush1.bf16.msra.mxu1 %v1863_v7  ;;  %1213 = vmatprep.subr.bf16.mxu0 %v1868_v8  ;;  %v1961_v7 = vld [vmem:[%s2556_s1 + $0x34c] ss:$16 sps:$4 sm:$0xff]   ;;  %v1956_v8 = vld [vmem:[%s2556_s1 + $0x148] ss:$16 sps:$4 sm:$0xff]  }
  0x4f   : > { %1286 = vmatprep.subr.bf16.mxu1 %v1871_v9  ;;  %1107 = vmatprep.mubr.bf16.mxu0 %v2267_v16  ;;  %v1959_v9 = vld [vmem:[%s2556_s1 + $0x348] ss:$16 sps:$4 sm:$0xff]  }
  0x50   : > { %1180 = vmatprep.mubr.bf16.mxu1 %v2273_v18 }
  0x51   : > { %1214 = vmatpush1.bf16.msra.mxu0 %v1866_v10  ;;  %v1964_v10 = vld [vmem:[%s2556_s1 + $0x12c] ss:$16 sps:$4 sm:$0xff]  }
  0x52   : > { %1287 = vmatpush1.bf16.msra.mxu1 %v1869_v11  ;;  %1215 = vmatprep.subr.bf16.mxu0 %v1874_v12  ;;  %v1967_v11 = vld [vmem:[%s2556_s1 + $0x32c] ss:$16 sps:$4 sm:$0xff]   ;;  %v1962_v12 = vld [vmem:[%s2556_s1 + $0x128] ss:$16 sps:$4 sm:$0xff]  }
  0x53   : > { %1288 = vmatprep.subr.bf16.mxu1 %v1877_v13  ;;  %v1965_v13 = vld [vmem:[%s2556_s1 + $0x328] ss:$16 sps:$4 sm:$0xff]  }
  0x54   : > { %1108 = vmatmul.mubr.bf16.gmra.mxu0 %v2270_v17 }
  0x55   : > { %1181 = vmatmul.mubr.bf16.gmra.mxu1 %v2276_v19  ;;  %1216 = vmatpush1.bf16.msra.mxu0 %v1872_v14  ;;  %v1970_v14 = vld [vmem:[%s2556_s1 + $0x10c] ss:$16 sps:$4 sm:$0xff]  }
  0x56   : > { %1289 = vmatpush1.bf16.msra.mxu1 %v1875_v15  ;;  %1217 = vmatprep.subr.bf16.mxu0 %v1880_v20  ;;  %v1973_v15 = vld [vmem:[%s2556_s1 + $0x30c] ss:$16 sps:$4 sm:$0xff]   ;;  %v1968_v20 = vld [vmem:[%s2556_s1 + $0x108] ss:$16 sps:$4 sm:$0xff]  }
  0x57   : > { %1290 = vmatprep.subr.bf16.mxu1 %v1883_v21  ;;  %1117 = vmatprep.mubr.bf16.mxu0 %v2307_v28  ;;  %v1971_v21 = vld [vmem:[%s2556_s1 + $0x308] ss:$16 sps:$4 sm:$0xff]  }
  0x58   : > { %1190 = vmatprep.mubr.bf16.mxu1 %v2313_v30 }
  0x59   : > { %1218 = vmatpush1.bf16.msra.mxu0 %v1878_v22 }
  0x5a   : > { %1291 = vmatpush1.bf16.msra.mxu1 %v1881_v23  ;;  %1219 = vmatprep.subr.bf16.mxu0 %v1886_v24 }
  0x5b   : > { %1292 = vmatprep.subr.bf16.mxu1 %v1889_v25 }
  0x5c   : > { %1118 = vmatmul.mubr.bf16.gmra.mxu0 %v2310_v29 }
  0x5d   : > { %1191 = vmatmul.mubr.bf16.gmra.mxu1 %v2316_v31  ;;  %1220 = vmatpush1.bf16.msra.mxu0 %v1884_v26 }
  0x5e   : > { %1293 = vmatpush1.bf16.msra.mxu1 %v1887_v27  ;;  %1221 = vmatprep.subr.bf16.mxu0 %v1892_v32 }
  0x5f   : > { %1294 = vmatprep.subr.bf16.mxu1 %v1895_v33  ;;  %1127 = vmatprep.mubr.bf16.mxu0 %v2347_v40 }
  0x60   : > { %1200 = vmatprep.mubr.bf16.mxu1 %v2353_v42 }
  0x61   : > { %1222 = vmatpush1.bf16.msra.mxu0 %v1890_v34 }
  0x62   : > { %1295 = vmatpush1.bf16.msra.mxu1 %v1893_v35  ;;  %1223 = vmatprep.subr.bf16.mxu0 %v1898_v36 }
  0x63   : > { %1296 = vmatprep.subr.bf16.mxu1 %v1901_v37 }
  0x64   : > { %1128 = vmatmul.mubr.bf16.gmra.mxu0 %v2350_v41 }
  0x65   : > { %1201 = vmatmul.mubr.bf16.gmra.mxu1 %v2356_v43  ;;  %1224 = vmatpush1.bf16.msra.mxu0 %v1896_v38 }
  0x66   : > { %1297 = vmatpush1.bf16.msra.mxu1 %v1899_v39  ;;  %1225 = vmatprep.subr.bf16.mxu0 %v1904_v44 }
  0x67   : > { %1298 = vmatprep.subr.bf16.mxu1 %v1907_v45  ;;  %1243 = vmatprep.mubr.bf16.mxu0 %v2170_v49  ;;  %v1925_v49 = vld [vmem:[%s2556_s1 + $0x3cc] ss:$16 sps:$4 sm:$0xff]  }
  0x68   : > { %1316 = vmatprep.mubr.bf16.mxu1 %v2176_v51  ;;  %v1920_v51 = vld [vmem:[%s2556_s1 + $0x1c8] ss:$16 sps:$4 sm:$0xff]  }
  0x69   : > { %1226 = vmatpush1.bf16.msra.mxu0 %v1902_v46 }
  0x6a   : > { %1299 = vmatpush1.bf16.msra.mxu1 %v1905_v47  ;;  %1227 = vmatprep.subr.bf16.mxu0 %v1910_v48 }
  0x6b   : > { %1300 = vmatprep.subr.bf16.mxu1 %v1913_v50 }
  0x6d   : > { %1228 = vmatpush2.bf16.msra.mxu0 %v1908_v52 }
  0x6e   : > { %1301 = vmatpush2.bf16.msra.mxu1 %v1911_v53  ;;  %1229 = vmatprep.subr.bf16.mxu0 %v1922_v54 }
  0x6f   : > { %1302 = vmatprep.subr.bf16.mxu1 %v1925_v49 }
  0x71   : > { %1230 = vmatpush2.bf16.msra.mxu0 %v1920_v51 }
  0x72   : > { %1303 = vmatpush2.bf16.msra.mxu1 %v1923_v55  ;;  %1231 = vmatprep.subr.bf16.mxu0 %v1928_v56 }
  0x73   : > { %1304 = vmatprep.subr.bf16.mxu1 %v1931_v57 }
  0x75   : > { %1232 = vmatpush2.bf16.msra.mxu0 %v1926_v58 }
  0x76   : > { %1305 = vmatpush2.bf16.msra.mxu1 %v1929_v59  ;;  %1233 = vmatprep.subr.bf16.mxu0 %v1940_v60 }
  0x77   : > { %1306 = vmatprep.subr.bf16.mxu1 %v1943_v61 }
  0x79   : > { %1234 = vmatpush2.bf16.msra.mxu0 %v1938_v62 }
  0x7a   : > { %1307 = vmatpush2.bf16.msra.mxu1 %v1941_v63  ;;  %1235 = vmatprep.subr.bf16.mxu0 %v1946_v0 }
  0x7b   : > { %1308 = vmatprep.subr.bf16.mxu1 %v1949_v1 }
  0x7d   : > { %1236 = vmatpush2.bf16.msra.mxu0 %v1944_v2 }
  0x7e   : > { %1309 = vmatpush2.bf16.msra.mxu1 %v1947_v3  ;;  %1237 = vmatprep.subr.bf16.mxu0 %v1958_v6 }
  0x7f   : > { %1310 = vmatprep.subr.bf16.mxu1 %v1961_v7 }
  0x81   : > { %1238 = vmatpush2.bf16.msra.mxu0 %v1956_v8 }
  0x82   : > { %1311 = vmatpush2.bf16.msra.mxu1 %v1959_v9  ;;  %1239 = vmatprep.subr.bf16.mxu0 %v1964_v10 }
  0x83   : > { %1312 = vmatprep.subr.bf16.mxu1 %v1967_v11 }
  0x85   : > { %1240 = vmatpush2.bf16.msra.mxu0 %v1962_v12 }
  0x86   : > { %1313 = vmatpush2.bf16.msra.mxu1 %v1965_v13  ;;  %1241 = vmatprep.subr.bf16.mxu0 %v1970_v14 }
  0x87   : > { %1314 = vmatprep.subr.bf16.mxu1 %v1973_v15 }
  0x89   : > { %1242 = vmatpush2.bf16.msra.mxu0 %v1968_v20 }
  0x8a   : > { %1315 = vmatpush2.bf16.msra.mxu1 %v1971_v21 }
  0x8c   : > { %1244 = vmatmul.mubr.bf16.vlgmr.msra.gmra.mxu0 %v2229_v4  ;;  %v325_v4 = vlaneseq }
  0x8d   : > { %1317 = vmatmul.mubr.bf16.vlgmr.msra.gmra.mxu1 %v2232_v5  ;;  %1253 = vmatprep.mubr.bf16.mxu0 %v2267_v16 }
  0x8e   : > { %1326 = vmatprep.mubr.bf16.mxu1 %v2273_v18  ;;  %v326_v5 = vshrl.u32 %v325_v4, 7 }
  0x90   : > { %v335_v16 = vsub.s32 2, %v326_v5  ;;  %v327_v23 = vsub.s32 0, %v326_v5  ;;  %v331_v24 = vsub.s32 1, %v326_v5 }
  0x94   : > { %1254 = vmatmul.mubr.bf16.gmra.mxu0 %v2270_v17  ;;  %v323_v17 = vld [vmem:[%s2557_s2] sm:$0xf] }
  0x95   : > { %1327 = vmatmul.mubr.bf16.gmra.mxu1 %v2276_v19  ;;  %1263 = vmatprep.mubr.bf16.mxu0 %v2307_v28  ;;  %v2489_v18 = vrot.slane %v323_v17, %v335_v16  ;;  %v339_v19 = vsub.s32 3, %v326_v5  ;;  %v2493_v25 = vrot.slane %v323_v17, %v327_v23  ;;  %v2495_v26 = vrot.slane %v323_v17, %v331_v24 }
  0x96   : > { %1336 = vmatprep.mubr.bf16.mxu1 %v2313_v30 }
  0x97   : > { %v2491_v22 = vrot.slane %v323_v17, %v339_v19 }
  0x9c   : > { %1264 = vmatmul.mubr.bf16.gmra.mxu0 %v2310_v29 }
  0x9d   : > { %1337 = vmatmul.mubr.bf16.gmra.mxu1 %v2316_v31  ;;  %1273 = vmatprep.mubr.bf16.mxu0 %v2347_v40 }
  0x9e   : > { %1346 = vmatprep.mubr.bf16.mxu1 %v2353_v42 }
  0xa4   : > { %1274 = vmatmul.mubr.bf16.gmra.mxu0 %v2350_v41 }
  0xa5   : > { %1347 = vmatmul.mubr.bf16.gmra.mxu1 %v2356_v43 }
 0x10c   : > { %v1099_v27 = vpop.f32.mrf.mxu0 }
 0x10d   : > { %v1172_v28 = vpop.f32.mrf.mxu1  ;;  %v1100_v29 = vadd.f32 %v1099_v27, %v2493_v25 }
 0x10e   : > { %v1101_v30 = vpop.f32.mrf.mxu0 }
 0x10f   : > { %v1174_v31 = vpop.f32.mrf.mxu1  ;;  %v1173_v32 = vadd.f32 %v1172_v28, %v1100_v29  ;;  %v1102_v33 = vadd.f32 %v1101_v30, %v2495_v26 }
 0x110   : > { %v1103_v34 = vpop.f32.mrf.mxu0 }
 0x111   : > { %v1176_v35 = vpop.f32.mrf.mxu1  ;;  %v1357_v36 = vmax.f32 %v1173_v32, 0.0  ;;  %v1175_v37 = vadd.f32 %v1174_v31, %v1102_v33  ;;  %v1104_v38 = vadd.f32 %v1103_v34, %v2493_v25 }
 0x112   : > { %v1105_v39 = vpop.f32.mrf.mxu0 }
 0x113   : > { %v1178_v40 = vpop.f32.mrf.mxu1  ;;  %v1358_v41 = vmax.f32 %v1175_v37, 0.0  ;;  %v1177_v42 = vadd.f32 %v1176_v35, %v1104_v38  ;;  %v1106_v43 = vadd.f32 %v1105_v39, %v2495_v26 }
 0x114   : > { %v1109_v44 = vpop.f32.mrf.mxu0 }
 0x115   : > { %v1182_v45 = vpop.f32.mrf.mxu1  ;;  %v1734_v46 = vpack.c.bf16 %v1358_v41, %v1357_v36  ;;  %v1179_v47 = vadd.f32 %v1178_v40, %v1106_v43  ;;  %v1110_v48 = vadd.f32 %v1109_v44, %v2493_v25  ;;  %v1361_v53 = vmax.f32 %v1177_v42, 0.0 }
 0x116   : > { %v1111_v50 = vpop.f32.mrf.mxu0 }
 0x117   : > { %v1184_v52 = vpop.f32.mrf.mxu1  ;;  %1485 = vst [vmem:[%s2506_s14] sm:$0xff] %v1734_v46  ;;  %v1362_v54 = vmax.f32 %v1179_v47, 0.0  ;;  %v1112_v49 = vadd.f32 %v1111_v50, %v2495_v26  ;;  %v1183_v51 = vadd.f32 %v1182_v45, %v1110_v48 }
 0x118   : > { %v1113_v55 = vpop.f32.mrf.mxu0 }
 0x119   : > { %v1186_v56 = vpop.f32.mrf.mxu1  ;;  %v1736_v57 = vpack.c.bf16 %v1362_v54, %v1361_v53  ;;  %v1365_v58 = vmax.f32 %v1183_v51, 0.0  ;;  %v1114_v59 = vadd.f32 %v1113_v55, %v2493_v25  ;;  %v1185_v60 = vadd.f32 %v1184_v52, %v1112_v49 }
 0x11a   : > { %v1115_v61 = vpop.f32.mrf.mxu0 }
 0x11b   : > { %v1188_v62 = vpop.f32.mrf.mxu1  ;;  %1487 = vst [vmem:[%s2506_s14 + $0x10] sm:$0xff] %v1736_v57  ;;  %v1366_v63 = vmax.f32 %v1185_v60, 0.0  ;;  %v1116_v0 = vadd.f32 %v1115_v61, %v2495_v26  ;;  %v1187_v1 = vadd.f32 %v1186_v56, %v1114_v59 }
 0x11c   : > { %v1119_v2 = vpop.f32.mrf.mxu0 }
 0x11d   : > { %v1192_v3 = vpop.f32.mrf.mxu1  ;;  %v1738_v6 = vpack.c.bf16 %v1366_v63, %v1365_v58  ;;  %v1369_v7 = vmax.f32 %v1187_v1, 0.0  ;;  %v1120_v8 = vadd.f32 %v1119_v2, %v2493_v25  ;;  %v1189_v9 = vadd.f32 %v1188_v62, %v1116_v0 }
 0x11e   : > { %v1121_v10 = vpop.f32.mrf.mxu0 }
 0x11f   : > { %v1194_v11 = vpop.f32.mrf.mxu1  ;;  %1489 = vst [vmem:[%s2506_s14 + $0x20] sm:$0xff] %v1738_v6  ;;  %v1370_v12 = vmax.f32 %v1189_v9, 0.0  ;;  %v1122_v13 = vadd.f32 %v1121_v10, %v2495_v26  ;;  %v1193_v14 = vadd.f32 %v1192_v3, %v1120_v8 }
 0x120   : > { %v1123_v15 = vpop.f32.mrf.mxu0 }
 0x121   : > { %v1196_v20 = vpop.f32.mrf.mxu1  ;;  %v1740_v21 = vpack.c.bf16 %v1370_v12, %v1369_v7  ;;  %v1373_v4 = vmax.f32 %v1193_v14, 0.0  ;;  %v1124_v5 = vadd.f32 %v1123_v15, %v2493_v25  ;;  %v1195_v16 = vadd.f32 %v1194_v11, %v1122_v13 }
 0x122   : > { %v1125_v17 = vpop.f32.mrf.mxu0 }
 0x123   : > { %v1198_v19 = vpop.f32.mrf.mxu1  ;;  %1491 = vst [vmem:[%s2506_s14 + $0x30] sm:$0xff] %v1740_v21  ;;  %v1374_v23 = vmax.f32 %v1195_v16, 0.0  ;;  %v1126_v24 = vadd.f32 %v1125_v17, %v2495_v26  ;;  %v1197_v27 = vadd.f32 %v1196_v20, %v1124_v5 }
 0x124   : > { %v1129_v28 = vpop.f32.mrf.mxu0 }
 0x125   : > { %v1202_v29 = vpop.f32.mrf.mxu1  ;;  %v1742_v30 = vpack.c.bf16 %v1374_v23, %v1373_v4  ;;  %v1377_v31 = vmax.f32 %v1197_v27, 0.0  ;;  %v1130_v32 = vadd.f32 %v1129_v28, %v2493_v25  ;;  %v1199_v33 = vadd.f32 %v1198_v19, %v1126_v24 }
 0x126   : > { %v1131_v34 = vpop.f32.mrf.mxu0 }
 0x127   : > { %v1204_v35 = vpop.f32.mrf.mxu1  ;;  %1493 = vst [vmem:[%s2506_s14 + $0x40] sm:$0xff] %v1742_v30  ;;  %v1378_v36 = vmax.f32 %v1199_v33, 0.0  ;;  %v1132_v37 = vadd.f32 %v1131_v34, %v2495_v26  ;;  %v1203_v38 = vadd.f32 %v1202_v29, %v1130_v32 }
 0x128   : > { %v1133_v39 = vpop.f32.mrf.mxu0 }
 0x129   : > { %v1206_v40 = vpop.f32.mrf.mxu1  ;;  %v1744_v41 = vpack.c.bf16 %v1378_v36, %v1377_v31  ;;  %v1381_v42 = vmax.f32 %v1203_v38, 0.0  ;;  %v1134_v43 = vadd.f32 %v1133_v39, %v2493_v25  ;;  %v1205_v44 = vadd.f32 %v1204_v35, %v1132_v37 }
 0x12a   : > { %v1135_v45 = vpop.f32.mrf.mxu0 }
 0x12b   : > { %v1208_v46 = vpop.f32.mrf.mxu1  ;;  %1495 = vst [vmem:[%s2506_s14 + $0x50] sm:$0xff] %v1744_v41  ;;  %v1382_v47 = vmax.f32 %v1205_v44, 0.0  ;;  %v1136_v48 = vadd.f32 %v1135_v45, %v2495_v26  ;;  %v1207_v50 = vadd.f32 %v1206_v40, %v1134_v43 }
 0x12d   : > { %v1746_v52 = vpack.c.bf16 %v1382_v47, %v1381_v42  ;;  %v1385_v53 = vmax.f32 %v1207_v50, 0.0  ;;  %v1209_v54 = vadd.f32 %v1208_v46, %v1136_v48 }
 0x12f   : > { %1497 = vst [vmem:[%s2506_s14 + $0x60] sm:$0xff] %v1746_v52  ;;  %v1386_v49 = vmax.f32 %v1209_v54, 0.0 }
 0x131   : > { %v1748_v51 = vpack.c.bf16 %v1386_v49, %v1385_v53 }
 0x133   : > { %1499 = vst [vmem:[%s2506_s14 + $0x70] sm:$0xff] %v1748_v51 }
 0x14c   : > { %v1245_v55 = vpop.f32.mrf.mxu0 }
 0x14d   : > { %v1318_v56 = vpop.f32.mrf.mxu1  ;;  %v1246_v57 = vadd.f32 %v1245_v55, %v2489_v18 }
 0x14e   : > { %v1247_v25 = vpop.f32.mrf.mxu0 }
 0x14f   : > { %v1320_v58 = vpop.f32.mrf.mxu1  ;;  %v1319_v59 = vadd.f32 %v1318_v56, %v1246_v57  ;;  %v1248_v60 = vadd.f32 %v1247_v25, %v2491_v22 }
 0x150   : > { %v1249_v61 = vpop.f32.mrf.mxu0 }
 0x151   : > { %v1322_v62 = vpop.f32.mrf.mxu1  ;;  %v1321_v26 = vadd.f32 %v1320_v58, %v1248_v60  ;;  %v1250_v63 = vadd.f32 %v1249_v61, %v2489_v18  ;;  %v1359_v2 = vmax.f32 %v1319_v59, 0.0 }
 0x152   : > { %v1251_v0 = vpop.f32.mrf.mxu0 }
 0x153   : > { %v1324_v1 = vpop.f32.mrf.mxu1  ;;  %v1360_v3 = vmax.f32 %v1321_v26, 0.0  ;;  %v1323_v6 = vadd.f32 %v1322_v62, %v1250_v63  ;;  %v1252_v7 = vadd.f32 %v1251_v0, %v2491_v22 }
 0x154   : > { %v1255_v8 = vpop.f32.mrf.mxu0 }
 0x155   : > { %v1328_v9 = vpop.f32.mrf.mxu1  ;;  %v1735_v10 = vpack.c.bf16 %v1360_v3, %v1359_v2  ;;  %v1325_v11 = vadd.f32 %v1324_v1, %v1252_v7  ;;  %v1256_v12 = vadd.f32 %v1255_v8, %v2489_v18  ;;  %v1363_v15 = vmax.f32 %v1323_v6, 0.0 }
 0x156   : > { %v1257_v13 = vpop.f32.mrf.mxu0 }
 0x157   : > { %v1330_v14 = vpop.f32.mrf.mxu1  ;;  %1486 = vst [vmem:[%s2506_s14 + $0x8] sm:$0xff] %v1735_v10  ;;  %v1364_v20 = vmax.f32 %v1325_v11, 0.0  ;;  %v1329_v21 = vadd.f32 %v1328_v9, %v1256_v12  ;;  %v1258_v4 = vadd.f32 %v1257_v13, %v2491_v22 }
 0x158   : > { %v1259_v5 = vpop.f32.mrf.mxu0 }
 0x159   : > { %v1332_v16 = vpop.f32.mrf.mxu1  ;;  %v1737_v17 = vpack.c.bf16 %v1364_v20, %v1363_v15  ;;  %v1331_v19 = vadd.f32 %v1330_v14, %v1258_v4  ;;  %v1260_v23 = vadd.f32 %v1259_v5, %v2489_v18  ;;  %v1367_v28 = vmax.f32 %v1329_v21, 0.0 }
 0x15a   : > { %v1261_v24 = vpop.f32.mrf.mxu0 }
 0x15b   : > { %v1334_v27 = vpop.f32.mrf.mxu1  ;;  %1488 = vst [vmem:[%s2506_s14 + $0x18] sm:$0xff] %v1737_v17  ;;  %v1368_v29 = vmax.f32 %v1331_v19, 0.0  ;;  %v1333_v30 = vadd.f32 %v1332_v16, %v1260_v23  ;;  %v1262_v31 = vadd.f32 %v1261_v24, %v2491_v22 }
 0x15c   : > { %v1265_v32 = vpop.f32.mrf.mxu0 }
 0x15d   : > { %v1338_v33 = vpop.f32.mrf.mxu1  ;;  %v1739_v34 = vpack.c.bf16 %v1368_v29, %v1367_v28  ;;  %v1335_v35 = vadd.f32 %v1334_v27, %v1262_v31  ;;  %v1266_v36 = vadd.f32 %v1265_v32, %v2489_v18  ;;  %v1371_v39 = vmax.f32 %v1333_v30, 0.0 }
 0x15e   : > { %v1267_v37 = vpop.f32.mrf.mxu0 }
 0x15f   : > { %v1340_v38 = vpop.f32.mrf.mxu1  ;;  %1490 = vst [vmem:[%s2506_s14 + $0x28] sm:$0xff] %v1739_v34  ;;  %v1372_v40 = vmax.f32 %v1335_v35, 0.0  ;;  %v1339_v41 = vadd.f32 %v1338_v33, %v1266_v36  ;;  %v1268_v42 = vadd.f32 %v1267_v37, %v2491_v22 }
 0x160   : > { %v1269_v43 = vpop.f32.mrf.mxu0 }
 0x161   : > { %v1342_v44 = vpop.f32.mrf.mxu1  ;;  %v1741_v45 = vpack.c.bf16 %v1372_v40, %v1371_v39  ;;  %v1341_v46 = vadd.f32 %v1340_v38, %v1268_v42  ;;  %v1270_v47 = vadd.f32 %v1269_v43, %v2489_v18  ;;  %v1375_v52 = vmax.f32 %v1339_v41, 0.0 }
 0x162   : > { %v1271_v48 = vpop.f32.mrf.mxu0 }
 0x163   : > { %v1344_v50 = vpop.f32.mrf.mxu1  ;;  %1492 = vst [vmem:[%s2506_s14 + $0x38] sm:$0xff] %v1741_v45  ;;  %v1376_v53 = vmax.f32 %v1341_v46, 0.0  ;;  %v1343_v54 = vadd.f32 %v1342_v44, %v1270_v47  ;;  %v1272_v49 = vadd.f32 %v1271_v48, %v2491_v22 }
 0x164   : > { %v1275_v51 = vpop.f32.mrf.mxu0 }
 0x165   : > { %v1348_v55 = vpop.f32.mrf.mxu1  ;;  %v1743_v56 = vpack.c.bf16 %v1376_v53, %v1375_v52  ;;  %v1345_v57 = vadd.f32 %v1344_v50, %v1272_v49  ;;  %v1276_v25 = vadd.f32 %v1275_v51, %v2489_v18  ;;  %v1379_v60 = vmax.f32 %v1343_v54, 0.0 }
 0x166   : > { %v1277_v58 = vpop.f32.mrf.mxu0 }
 0x167   : > { %v1350_v59 = vpop.f32.mrf.mxu1  ;;  %1494 = vst [vmem:[%s2506_s14 + $0x48] sm:$0xff] %v1743_v56  ;;  %v1380_v61 = vmax.f32 %v1345_v57, 0.0  ;;  %v1349_v62 = vadd.f32 %v1348_v55, %v1276_v25  ;;  %v1278_v26 = vadd.f32 %v1277_v58, %v2491_v22 }
 0x168   : > { %v1279_v63 = vpop.f32.mrf.mxu0 }
 0x169   : > { %v1352_v0 = vpop.f32.mrf.mxu1  ;;  %v1745_v1 = vpack.c.bf16 %v1380_v61, %v1379_v60  ;;  %v1351_v2 = vadd.f32 %v1350_v59, %v1278_v26  ;;  %v1280_v3 = vadd.f32 %v1279_v63, %v2489_v18  ;;  %v1383_v7 = vmax.f32 %v1349_v62, 0.0 }
 0x16a   : > { %v1281_v6 = vpop.f32.mrf.mxu0 }
 0x16b   : > { %1496 = vst [vmem:[%s2506_s14 + $0x58] sm:$0xff] %v1745_v1  ;;  %v1384_v8 = vmax.f32 %v1351_v2, 0.0  ;;  %v1353_v9 = vadd.f32 %v1352_v0, %v1280_v3  ;;  %v1282_v10 = vadd.f32 %v1281_v6, %v2491_v22  ;;  %v1354_v11 = vpop.f32.mrf.mxu1 }
 0x16d   : > { %v1747_v12 = vpack.c.bf16 %v1384_v8, %v1383_v7  ;;  %v1355_v13 = vadd.f32 %v1354_v11, %v1282_v10  ;;  %v1387_v14 = vmax.f32 %v1353_v9, 0.0 }
 0x16f   : > { %1498 = vst [vmem:[%s2506_s14 + $0x68] sm:$0xff] %v1747_v12  ;;  %v1388_v15 = vmax.f32 %v1355_v13, 0.0 }
 0x171   : > { %v1749_v20 = vpack.c.bf16 %v1388_v15, %v1387_v14 }
 0x173   : > { %1500 = vst [vmem:[%s2506_s14 + $0x78] sm:$0xff] %v1749_v20 }
 0x174 PF: > { %s13_s12 = sadd.s32 1, %s1980_s12  }
 0x175   : > { %p10_p4 = scmp.ge.s32.totalorder %s13_s12, 4  }
 0x177   :  { %12 = sbr.rel (!%p10_p4) target bundleno = 1 (0x1), region = 62 }

</bundles_post_ra>
